<compile_context>
chip_gen: v7x
topology: tpu7x:2x2x1
jax: 0.10.0
libtpu: 0.0.40
codegen_flags: <defaults>
</compile_context>

<pallas_src>
import jax
import jax.numpy as jnp
from jax.experimental import pallas as pl
from jax.experimental.pallas import tpu as pltpu

# ----------------------------- small config ---------------------------------
BATCH = 2
IMG_C = 3
IMG_HW = 32          # (original: 224)
PATCH = 8            # (original: 16)
GRID = IMG_HW // PATCH
NUM_PATCHES = GRID * GRID            # 16   (original: 196)
EMBED_DIM = 64                       # (original: 768)
TOKEN_MLP_DIM = 32                   # (original: 384)
CHANNEL_MLP_DIM = 128                # (original: 3072)
DEPTH = 2                            # (original: 12)
FEAT_DIM = NUM_PATCHES * EMBED_DIM   # 1024 (original: 150528)
CLS_HIDDEN = 128                     # (original: 512)
HEAD_HIDDEN = 2 * CLS_HIDDEN         # concat of two head-1 hidden blocks
NUM_CLASSES = 18
MASK_CLASSES = NUM_CLASSES // 6      # 3
GENDER_CLASSES = NUM_CLASSES // 9    # 2
AGE_CLASSES = NUM_CLASSES // 6       # 3
OUT_PAD = 128                        # lane-dense padded logits width
LN_EPS = 1e-6
PATCH_FEATS = IMG_C * PATCH * PATCH  # 192
NUM_BACKBONES = 2


# ------------------------------ kernel helpers -------------------------------
def _ln(x, g, b):
    """Row-wise LayerNorm over the last (lane) axis; g/b are (1, C) f32."""
    mean = jnp.mean(x, axis=-1, keepdims=True)
    xc = x - mean
    var = jnp.mean(xc * xc, axis=-1, keepdims=True)
    return xc * jax.lax.rsqrt(var + LN_EPS) * g + b


def _gelu(x):
    # TODO(synk): PyTorch nn.GELU default is the exact erf GELU; the tanh
    # approximation is used for robust Mosaic lowering.
    return 0.5 * x * (1.0 + jnp.tanh(0.7978845608028654 * (x + 0.044715 * x * x * x)))


_W_NAMES = ("stem_w", "stem_b",
            "ln1_g", "ln1_b", "tok_w1t", "tok_b1", "tok_w2t", "tok_b2",
            "ln2_g", "ln2_b", "ch_w1", "ch_b1", "ch_w2", "ch_b2",
            "norm_g", "norm_b",
            "head_w1", "head_b1", "head_w2", "head_b2")
NUM_W = len(_W_NAMES)


def _forward_one(nb, xp, r, flat_ref):
    """One backbone + its classifier head(s), fully VMEM-resident.

    xp: (B*S, PATCH_FEATS) bf16 patches.  r: dict of weight refs (leading
    backbone dim of size 1 or 2, indexed by `nb`).  Returns (B, OUT_PAD) f32
    padded logits.
    """
    f32 = jnp.float32
    bf16 = jnp.bfloat16

    # Patch embedding (== Conv2d(p, stride=p) on flattened patches).
    x = jnp.dot(xp, r["stem_w"][nb], preferred_element_type=f32) + r["stem_b"][nb]

    for d in range(DEPTH):  # small static depth -> unrolled
        # --- token mixing: LN over channels, MLP along the patch axis -------
        y = _ln(x, r["ln1_g"][nb, d], r["ln1_b"][nb, d]).astype(bf16)
        parts = []
        for b in range(BATCH):  # per-batch left-matmuls (no kron zero padding)
            yb = y[b * NUM_PATCHES:(b + 1) * NUM_PATCHES, :]          # (S, D)
            hb = _gelu(jnp.dot(r["tok_w1t"][nb, d], yb,
                               preferred_element_type=f32) + r["tok_b1"][nb, d])
            parts.append(jnp.dot(r["tok_w2t"][nb, d], hb.astype(bf16),
                                 preferred_element_type=f32) + r["tok_b2"][nb, d])
        x = x + jnp.concatenate(parts, axis=0)

        # --- channel mixing: LN over channels, MLP along the channel axis ---
        y = _ln(x, r["ln2_g"][nb, d], r["ln2_b"][nb, d]).astype(bf16)
        h = _gelu(jnp.dot(y, r["ch_w1"][nb, d],
                          preferred_element_type=f32) + r["ch_b1"][nb, d])
        x = x + (jnp.dot(h.astype(bf16), r["ch_w2"][nb, d],
                         preferred_element_type=f32) + r["ch_b2"][nb, d])

    x = _ln(x, r["norm_g"][nb], r["norm_b"][nb])                      # (B*S, D) f32

    # Flatten (B*S, D) -> (B, S*D) through a VMEM scratch (row b of the
    # scratch is that sample's m_features.view(B, -1) vector); features never
    # leave VMEM / go to HBM.
    for b in range(BATCH):
        for s in range(NUM_PATCHES):
            row = b * NUM_PATCHES + s
            flat_ref[b:b + 1, s * EMBED_DIM:(s + 1) * EMBED_DIM] = x[row:row + 1, :]
    feat = flat_ref[...].astype(bf16)                                 # (B, FEAT)

    # Classifier head(s): Linear -> LeakyReLU(0.1) -> (Dropout=identity) -> Linear
    h1 = jnp.dot(feat, r["head_w1"][nb], preferred_element_type=f32) + r["head_b1"][nb]
    h1 = jnp.where(h1 >= 0.0, h1, 0.1 * h1)
    logits = jnp.dot(h1.astype(bf16), r["head_w2"][nb],
                     preferred_element_type=f32) + r["head_b2"][nb]
    return logits                                                     # (B, OUT_PAD)


def _mixer_grid_kernel(*args):
    """grid=(2,) variant: one backbone (+ its heads) per grid step / core."""
    xp_ref = args[0]
    r = dict(zip(_W_NAMES, args[1:1 + NUM_W]))
    logits_ref = args[1 + NUM_W]
    flat_ref = args[2 + NUM_W]
    logits = _forward_one(0, xp_ref[...], r, flat_ref)
    logits_ref[...] = logits.astype(logits_ref.dtype)


def _mixer_flat_kernel(*args):
    """no-grid variant: both backbones unrolled in one pipeline step."""
    xp_ref = args[0]
    r = dict(zip(_W_NAMES, args[1:1 + NUM_W]))
    logits_ref = args[1 + NUM_W]
    flat_ref = args[2 + NUM_W]
    xp = xp_ref[...]
    for nb in range(NUM_BACKBONES):
        logits = _forward_one(nb, xp, r, flat_ref)
        logits_ref[nb] = logits.astype(logits_ref.dtype)


# ------------------------------ pallas wrapper --------------------------------
def _multi_core_chip():
    """True on chips where a 'parallel' grid axis shards across TensorCores."""
    try:
        kind = jax.devices()[0].device_kind.lower()
    except Exception:
        return False
    return any(tag in kind for tag in ("v4", "v5p", "v7", "7x"))


def fused_mixer_forward(xp, pk):
    """xp: (B*S, C*p*p) bf16 patches -> (2, B, OUT_PAD) f32 padded logits."""
    w_args = [pk[n] for n in _W_NAMES]
    out_shape = jax.ShapeDtypeStruct((NUM_BACKBONES, BATCH, OUT_PAD), jnp.float32)
    scratch = [pltpu.VMEM((BATCH, FEAT_DIM), jnp.float32)]

    if _multi_core_chip():
        # grid=(2,) "parallel": one backbone per TensorCore.
        def stacked_spec(shape):
            rest = tuple(shape[1:])
            nz = len(rest)
            return pl.BlockSpec((1,) + rest, lambda nb, _nz=nz: (nb,) + (0,) * _nz)

        in_specs = ([pl.BlockSpec(tuple(xp.shape), lambda nb: (0, 0))]
                    + [stacked_spec(a.shape) for a in w_args])
        out_spec = pl.BlockSpec((None, BATCH, OUT_PAD), lambda nb: (nb, 0, 0))
        return pl.pallas_call(
            _mixer_grid_kernel,
            out_shape=out_shape,
            grid=(NUM_BACKBONES,),
            in_specs=in_specs,
            out_specs=out_spec,
            scratch_shapes=scratch,
            compiler_params=pltpu.CompilerParams(
                dimension_semantics=("parallel",)),
        )(xp, *w_args)

    # Single-TensorCore chips (v5e / v6e): one pipeline step, no grid.
    def full_spec(shape):
        nd = len(shape)
        return pl.BlockSpec(tuple(shape), lambda _nd=nd: (0,) * _nd)

    in_specs = [full_spec(xp.shape)] + [full_spec(a.shape) for a in w_args]
    out_spec = full_spec((NUM_BACKBONES, BATCH, OUT_PAD))
    return pl.pallas_call(
        _mixer_flat_kernel,
        out_shape=out_shape,
        in_specs=in_specs,
        out_specs=out_spec,
        scratch_shapes=scratch,
    )(xp, *w_args)


# --------------------------- parameter construction --------------------------
def _linear_init(key, fan_in, fan_out, std_scale=1.0):
    std = std_scale / jnp.sqrt(jnp.float32(fan_in))
    w = jax.random.normal(key, (fan_in, fan_out), jnp.float32) * std
    b = jnp.zeros((fan_out,), jnp.float32)
    return w, b


def make_backbone_params(key):
    keys = jax.random.split(key, 2 + 4 * DEPTH)
    p = {}
    p["stem_w"], p["stem_b"] = _linear_init(keys[0], PATCH_FEATS, EMBED_DIM)
    blocks = []
    for d in range(DEPTH):
        k0, k1, k2, k3 = keys[2 + 4 * d:2 + 4 * (d + 1)]
        blk = {}
        blk["ln1_g"] = jnp.ones((EMBED_DIM,), jnp.float32)
        blk["ln1_b"] = jnp.zeros((EMBED_DIM,), jnp.float32)
        blk["tok_w1"], blk["tok_b1"] = _linear_init(k0, NUM_PATCHES, TOKEN_MLP_DIM)
        blk["tok_w2"], blk["tok_b2"] = _linear_init(k1, TOKEN_MLP_DIM, NUM_PATCHES)
        blk["ln2_g"] = jnp.ones((EMBED_DIM,), jnp.float32)
        blk["ln2_b"] = jnp.zeros((EMBED_DIM,), jnp.float32)
        blk["ch_w1"], blk["ch_b1"] = _linear_init(k2, EMBED_DIM, CHANNEL_MLP_DIM)
        blk["ch_w2"], blk["ch_b2"] = _linear_init(k3, CHANNEL_MLP_DIM, EMBED_DIM)
        blocks.append(blk)
    p["blocks"] = blocks
    p["norm_g"] = jnp.ones((EMBED_DIM,), jnp.float32)
    p["norm_b"] = jnp.zeros((EMBED_DIM,), jnp.float32)
    return p


def make_classifier_params(key, num_out):
    k0, k1 = jax.random.split(key)
    # He-normal-ish init (kaiming_normal fan_out, leaky_relu) -> synthetic
    w1, b1 = _linear_init(k0, FEAT_DIM, CLS_HIDDEN, std_scale=jnp.sqrt(2.0 / 1.01))
    w2, b2 = _linear_init(k1, CLS_HIDDEN, num_out, std_scale=jnp.sqrt(2.0 / 1.01))
    return {"w1": w1, "b1": b1, "w2": w2, "b2": b2}


def make_mixer_params(key):
    kb1, kb2, km, kg, ka = jax.random.split(key, 5)
    return {
        "backbone1": make_backbone_params(kb1),
        "backbone2": make_backbone_params(kb2),
        "mask": make_classifier_params(km, MASK_CLASSES),
        "gender": make_classifier_params(kg, GENDER_CLASSES),
        "age": make_classifier_params(ka, AGE_CLASSES),
    }


def pack_mixer_params(params):
    """One-time repack of canonical params into kernel-ready stacked arrays.

    Matmul weights are cast to bfloat16; LN params and biases stay float32.
    """
    b1p, b2p = params["backbone1"], params["backbone2"]
    bf = jnp.bfloat16

    def stack2(fn):
        return jnp.stack([fn(b1p), fn(b2p)], axis=0)

    def stack_blocks(fn):
        return jnp.stack(
            [jnp.stack([fn(blk) for blk in bp["blocks"]], axis=0)
             for bp in (b1p, b2p)], axis=0)

    # Head-1: per-backbone column-concat (backbone0 = mask [+ zero pad],
    # backbone1 = gender || age), so one (FEAT, 256) matmul per backbone.
    zeros_w1 = jnp.zeros((FEAT_DIM, CLS_HIDDEN), jnp.float32)
    zeros_b1 = jnp.zeros((CLS_HIDDEN,), jnp.float32)
    head_w1 = jnp.stack([
        jnp.concatenate([params["mask"]["w1"], zeros_w1], axis=1),
        jnp.concatenate([params["gender"]["w1"], params["age"]["w1"]], axis=1)],
        axis=0)                                                   # (2, FEAT, 256)
    head_b1 = jnp.stack([
        jnp.concatenate([params["mask"]["b1"], zeros_b1]),
        jnp.concatenate([params["gender"]["b1"], params["age"]["b1"]])],
        axis=0)[:, None, :]                                       # (2, 1, 256)

    # Head-2: block-diagonal, lane-padded to OUT_PAD so there is ONE lane-dense
    # logits store per backbone.
    w2_0 = jnp.zeros((HEAD_HIDDEN, OUT_PAD), jnp.float32)
    w2_0 = w2_0.at[0:CLS_HIDDEN, 0:MASK_CLASSES].set(params["mask"]["w2"])
    w2_1 = jnp.zeros((HEAD_HIDDEN, OUT_PAD), jnp.float32)
    w2_1 = w2_1.at[0:CLS_HIDDEN, 0:GENDER_CLASSES].set(params["gender"]["w2"])
    w2_1 = w2_1.at[CLS_HIDDEN:HEAD_HIDDEN,
                   GENDER_CLASSES:GENDER_CLASSES + AGE_CLASSES].set(params["age"]["w2"])
    head_w2 = jnp.stack([w2_0, w2_1], axis=0)                     # (2, 256, 128)
    b2_0 = jnp.zeros((OUT_PAD,), jnp.float32).at[0:MASK_CLASSES].set(params["mask"]["b2"])
    b2_1 = (jnp.zeros((OUT_PAD,), jnp.float32)
            .at[0:GENDER_CLASSES].set(params["gender"]["b2"])
            .at[GENDER_CLASSES:GENDER_CLASSES + AGE_CLASSES].set(params["age"]["b2"]))
    head_b2 = jnp.stack([b2_0, b2_1], axis=0)[:, None, :]         # (2, 1, 128)

    packed = {
        "stem_w": stack2(lambda p: p["stem_w"]).astype(bf),               # (2,192,64)
        "stem_b": stack2(lambda p: p["stem_b"][None, :]),                 # (2,1,64)
        "ln1_g": stack_blocks(lambda k: k["ln1_g"][None, :]),             # (2,DEPTH,1,64)
        "ln1_b": stack_blocks(lambda k: k["ln1_b"][None, :]),
        # Token-mixing weights stored transposed: mixing over the patch axis is
        # a per-batch left matmul on the (S, D) slice (no kron zero padding,
        # no transposes in-kernel).
        "tok_w1t": stack_blocks(lambda k: k["tok_w1"].T).astype(bf),      # (2,DEPTH,T,S)
        "tok_b1": stack_blocks(lambda k: k["tok_b1"][:, None]),           # (2,DEPTH,T,1)
        "tok_w2t": stack_blocks(lambda k: k["tok_w2"].T).astype(bf),      # (2,DEPTH,S,T)
        "tok_b2": stack_blocks(lambda k: k["tok_b2"][:, None]),           # (2,DEPTH,S,1)
        "ln2_g": stack_blocks(lambda k: k["ln2_g"][None, :]),
        "ln2_b": stack_blocks(lambda k: k["ln2_b"][None, :]),
        "ch_w1": stack_blocks(lambda k: k["ch_w1"]).astype(bf),           # (2,DEPTH,64,128)
        "ch_b1": stack_blocks(lambda k: k["ch_b1"][None, :]),
        "ch_w2": stack_blocks(lambda k: k["ch_w2"]).astype(bf),           # (2,DEPTH,128,64)
        "ch_b2": stack_blocks(lambda k: k["ch_b2"][None, :]),
        "norm_g": stack2(lambda p: p["norm_g"][None, :]),                 # (2,1,64)
        "norm_b": stack2(lambda p: p["norm_b"][None, :]),
        "head_w1": head_w1.astype(bf),                                    # (2,1024,256)
        "head_b1": head_b1,                                               # (2,1,256)
        "head_w2": head_w2.astype(bf),                                    # (2,256,128)
        "head_b2": head_b2,                                               # (2,1,128)
    }
    return packed


# --------------------------------- forward -----------------------------------
def mixer_forward(x_nchw, pk):
    B, C, H, W = x_nchw.shape
    assert B == BATCH, "kernel is specialized to BATCH"
    p = PATCH
    Gh, Gw = H // p, W // p
    S = Gh * Gw

    # TODO(synk): patch extraction stays as one fused XLA reshape/transpose
    # (a 6-D transpose has no clean in-kernel Mosaic lowering); rows are
    # b-major (b*S + s), columns are the flattened (c, i, j) conv kernel.
    xp = (x_nchw.reshape(B, C, Gh, p, Gw, p)
                .transpose(0, 2, 4, 1, 3, 5)
                .reshape(B * S, C * p * p)).astype(jnp.bfloat16)

    logits = fused_mixer_forward(xp, pk)              # (2, B, OUT_PAD)
    mask_out = logits[0, :, :MASK_CLASSES]
    gender_out = logits[1, :, :GENDER_CLASSES]
    age_out = logits[1, :, GENDER_CLASSES:GENDER_CLASSES + AGE_CLASSES]
    return mask_out, gender_out, age_out


# ----------------------------------- main ------------------------------------
if __name__ == "__main__":
    key = jax.random.PRNGKey(0)
    kx, kp = jax.random.split(key)

    x = jax.random.normal(kx, (BATCH, IMG_C, IMG_HW, IMG_HW), jnp.float32)
    params = make_mixer_params(kp)
    packed = pack_mixer_params(params)   # one-time repack, outside the jit

    fwd = jax.jit(mixer_forward)
    mask_out, gender_out, age_out = fwd(x, packed)
    jax.block_until_ready((mask_out, gender_out, age_out))

    assert mask_out.shape == (BATCH, MASK_CLASSES)
    assert gender_out.shape == (BATCH, GENDER_CLASSES)
    assert age_out.shape == (BATCH, AGE_CLASSES)
    print("KERNEL_OK")
</pallas_src>

<mosaic_0001>
module attributes {stable_mosaic.version = 11 : i64} {
  func.func @_mixer_flat_kernel(%arg0: memref<32x192xbf16, #tpu.memory_space<vmem>>, %arg1: memref<2x192x64xbf16, #tpu.memory_space<vmem>>, %arg2: memref<2x1x64xf32, #tpu.memory_space<vmem>>, %arg3: memref<2x2x1x64xf32, #tpu.memory_space<vmem>>, %arg4: memref<2x2x1x64xf32, #tpu.memory_space<vmem>>, %arg5: memref<2x2x32x16xbf16, #tpu.memory_space<vmem>>, %arg6: memref<2x2x32x1xf32, #tpu.memory_space<vmem>>, %arg7: memref<2x2x16x32xbf16, #tpu.memory_space<vmem>>, %arg8: memref<2x2x16x1xf32, #tpu.memory_space<vmem>>, %arg9: memref<2x2x1x64xf32, #tpu.memory_space<vmem>>, %arg10: memref<2x2x1x64xf32, #tpu.memory_space<vmem>>, %arg11: memref<2x2x64x128xbf16, #tpu.memory_space<vmem>>, %arg12: memref<2x2x1x128xf32, #tpu.memory_space<vmem>>, %arg13: memref<2x2x128x64xbf16, #tpu.memory_space<vmem>>, %arg14: memref<2x2x1x64xf32, #tpu.memory_space<vmem>>, %arg15: memref<2x1x64xf32, #tpu.memory_space<vmem>>, %arg16: memref<2x1x64xf32, #tpu.memory_space<vmem>>, %arg17: memref<2x1024x256xbf16, #tpu.memory_space<vmem>>, %arg18: memref<2x1x256xf32, #tpu.memory_space<vmem>>, %arg19: memref<2x256x128xbf16, #tpu.memory_space<vmem>>, %arg20: memref<2x1x128xf32, #tpu.memory_space<vmem>>, %arg21: memref<2x2x128xf32, #tpu.memory_space<vmem>>, %arg22: memref<2x1024xf32, #tpu.memory_space<vmem>>) attributes {dimension_semantics = [], scalar_prefetch = 0 : i64, scratch_operands = 1 : i64, tpu.core_type = #tpu.core_type<tc>} {
    %c0 = arith.constant 0 : index
    %c0_0 = arith.constant 0 : index
    %0 = vector.load %arg0[%c0, %c0_0] : memref<32x192xbf16, #tpu.memory_space<vmem>>, vector<32x192xbf16>
    %c0_1 = arith.constant 0 : index
    %c0_2 = arith.constant 0 : index
    %c0_3 = arith.constant 0 : index
    %1 = vector.load %arg1[%c0_1, %c0_2, %c0_3] : memref<2x192x64xbf16, #tpu.memory_space<vmem>>, vector<1x192x64xbf16>
    %2 = vector.shape_cast %1 : vector<1x192x64xbf16> to vector<192x64xbf16>
    %cst = arith.constant dense<0.000000e+00> : vector<32x64xf32>
    %3 = tpu.matmul %0, %2, %cst {dimension_numbers = #tpu.dot_dimension_numbers<[1], [0], [0], [1], [0, 0, 1, 1], [], []>} : vector<32x192xbf16>, vector<192x64xbf16>, vector<32x64xf32> -> vector<32x64xf32>
    %c0_4 = arith.constant 0 : index
    %c0_5 = arith.constant 0 : index
    %c0_6 = arith.constant 0 : index
    %4 = vector.load %arg2[%c0_4, %c0_5, %c0_6] : memref<2x1x64xf32, #tpu.memory_space<vmem>>, vector<1x1x64xf32>
    %5 = vector.shape_cast %4 : vector<1x1x64xf32> to vector<1x64xf32>
    %6 = vector.broadcast %5 : vector<1x64xf32> to vector<32x64xf32>
    %7 = arith.addf %3, %6 : vector<32x64xf32>
    %c0_7 = arith.constant 0 : index
    %c0_8 = arith.constant 0 : index
    %c0_9 = arith.constant 0 : index
    %c0_10 = arith.constant 0 : index
    %8 = vector.load %arg3[%c0_7, %c0_8, %c0_9, %c0_10] : memref<2x2x1x64xf32, #tpu.memory_space<vmem>>, vector<1x1x1x64xf32>
    %9 = vector.shape_cast %8 : vector<1x1x1x64xf32> to vector<1x64xf32>
    %c0_11 = arith.constant 0 : index
    %c0_12 = arith.constant 0 : index
    %c0_13 = arith.constant 0 : index
    %c0_14 = arith.constant 0 : index
    %10 = vector.load %arg4[%c0_11, %c0_12, %c0_13, %c0_14] : memref<2x2x1x64xf32, #tpu.memory_space<vmem>>, vector<1x1x1x64xf32>
    %11 = vector.shape_cast %10 : vector<1x1x1x64xf32> to vector<1x64xf32>
    %cst_15 = arith.constant dense<0.000000e+00> : vector<32xf32>
    %12 = vector.multi_reduction <add>, %7, %cst_15 [1] : vector<32x64xf32> to vector<32xf32>
    %13 = vector.shape_cast %12 : vector<32xf32> to vector<32x1xf32>
    %cst_16 = arith.constant 6.400000e+01 : f32
    %14 = vector.broadcast %cst_16 : f32 to vector<32x1xf32>
    %15 = arith.divf %13, %14 : vector<32x1xf32>
    %16 = vector.broadcast %15 : vector<32x1xf32> to vector<32x64xf32>
    %17 = arith.subf %7, %16 : vector<32x64xf32>
    %18 = arith.mulf %17, %17 : vector<32x64xf32>
    %cst_17 = arith.constant dense<0.000000e+00> : vector<32xf32>
    %19 = vector.multi_reduction <add>, %18, %cst_17 [1] : vector<32x64xf32> to vector<32xf32>
    %20 = vector.shape_cast %19 : vector<32xf32> to vector<32x1xf32>
    %cst_18 = arith.constant 6.400000e+01 : f32
    %21 = vector.broadcast %cst_18 : f32 to vector<32x1xf32>
    %22 = arith.divf %20, %21 : vector<32x1xf32>
    %cst_19 = arith.constant 9.99999997E-7 : f32
    %23 = vector.broadcast %cst_19 : f32 to vector<32x1xf32>
    %24 = arith.addf %22, %23 : vector<32x1xf32>
    %25 = math.rsqrt %24 : vector<32x1xf32>
    %26 = vector.broadcast %25 : vector<32x1xf32> to vector<32x64xf32>
    %27 = arith.mulf %17, %26 : vector<32x64xf32>
    %28 = vector.broadcast %9 : vector<1x64xf32> to vector<32x64xf32>
    %29 = arith.mulf %27, %28 : vector<32x64xf32>
    %30 = vector.broadcast %11 : vector<1x64xf32> to vector<32x64xf32>
    %31 = arith.addf %29, %30 : vector<32x64xf32>
    %32 = arith.truncf %31 : vector<32x64xf32> to vector<32x64xbf16>
    %33 = vector.extract_strided_slice %32 {offsets = [0, 0], sizes = [16, 64], strides = [1, 1]} : vector<32x64xbf16> to vector<16x64xbf16>
    %c0_20 = arith.constant 0 : index
    %c0_21 = arith.constant 0 : index
    %c0_22 = arith.constant 0 : index
    %c0_23 = arith.constant 0 : index
    %34 = vector.load %arg5[%c0_20, %c0_21, %c0_22, %c0_23] : memref<2x2x32x16xbf16, #tpu.memory_space<vmem>>, vector<1x1x32x16xbf16>
    %35 = vector.shape_cast %34 : vector<1x1x32x16xbf16> to vector<32x16xbf16>
    %cst_24 = arith.constant dense<0.000000e+00> : vector<32x64xf32>
    %36 = tpu.matmul %35, %33, %cst_24 {dimension_numbers = #tpu.dot_dimension_numbers<[1], [0], [0], [1], [0, 0, 1, 1], [], []>} : vector<32x16xbf16>, vector<16x64xbf16>, vector<32x64xf32> -> vector<32x64xf32>
    %c0_25 = arith.constant 0 : index
    %c0_26 = arith.constant 0 : index
    %c0_27 = arith.constant 0 : index
    %c0_28 = arith.constant 0 : index
    %37 = vector.load %arg6[%c0_25, %c0_26, %c0_27, %c0_28] : memref<2x2x32x1xf32, #tpu.memory_space<vmem>>, vector<1x1x32x1xf32>
    %38 = vector.shape_cast %37 : vector<1x1x32x1xf32> to vector<32x1xf32>
    %39 = vector.broadcast %38 : vector<32x1xf32> to vector<32x64xf32>
    %40 = arith.addf %36, %39 : vector<32x64xf32>
    %cst_29 = arith.constant 5.000000e-01 : f32
    %41 = vector.broadcast %cst_29 : f32 to vector<32x64xf32>
    %42 = arith.mulf %41, %40 : vector<32x64xf32>
    %cst_30 = arith.constant 4.471500e-02 : f32
    %43 = vector.broadcast %cst_30 : f32 to vector<32x64xf32>
    %44 = arith.mulf %43, %40 : vector<32x64xf32>
    %45 = arith.mulf %44, %40 : vector<32x64xf32>
    %46 = arith.mulf %45, %40 : vector<32x64xf32>
    %47 = arith.addf %40, %46 : vector<32x64xf32>
    %cst_31 = arith.constant 0.797884583 : f32
    %48 = vector.broadcast %cst_31 : f32 to vector<32x64xf32>
    %49 = arith.mulf %48, %47 : vector<32x64xf32>
    %50 = math.tanh %49 : vector<32x64xf32>
    %cst_32 = arith.constant 1.000000e+00 : f32
    %51 = vector.broadcast %cst_32 : f32 to vector<32x64xf32>
    %52 = arith.addf %51, %50 : vector<32x64xf32>
    %53 = arith.mulf %42, %52 : vector<32x64xf32>
    %c0_33 = arith.constant 0 : index
    %c0_34 = arith.constant 0 : index
    %c0_35 = arith.constant 0 : index
    %c0_36 = arith.constant 0 : index
    %54 = vector.load %arg7[%c0_33, %c0_34, %c0_35, %c0_36] : memref<2x2x16x32xbf16, #tpu.memory_space<vmem>>, vector<1x1x16x32xbf16>
    %55 = vector.shape_cast %54 : vector<1x1x16x32xbf16> to vector<16x32xbf16>
    %56 = arith.truncf %53 : vector<32x64xf32> to vector<32x64xbf16>
    %cst_37 = arith.constant dense<0.000000e+00> : vector<16x64xf32>
    %57 = tpu.matmul %55, %56, %cst_37 {dimension_numbers = #tpu.dot_dimension_numbers<[1], [0], [0], [1], [0, 0, 1, 1], [], []>} : vector<16x32xbf16>, vector<32x64xbf16>, vector<16x64xf32> -> vector<16x64xf32>
    %c0_38 = arith.constant 0 : index
    %c0_39 = arith.constant 0 : index
    %c0_40 = arith.constant 0 : index
    %c0_41 = arith.constant 0 : index
    %58 = vector.load %arg8[%c0_38, %c0_39, %c0_40, %c0_41] : memref<2x2x16x1xf32, #tpu.memory_space<vmem>>, vector<1x1x16x1xf32>
    %59 = vector.shape_cast %58 : vector<1x1x16x1xf32> to vector<16x1xf32>
    %60 = vector.broadcast %59 : vector<16x1xf32> to vector<16x64xf32>
    %61 = arith.addf %57, %60 : vector<16x64xf32>
    %62 = vector.extract_strided_slice %32 {offsets = [16, 0], sizes = [16, 64], strides = [1, 1]} : vector<32x64xbf16> to vector<16x64xbf16>
    %c0_42 = arith.constant 0 : index
    %c0_43 = arith.constant 0 : index
    %c0_44 = arith.constant 0 : index
    %c0_45 = arith.constant 0 : index
    %63 = vector.load %arg5[%c0_42, %c0_43, %c0_44, %c0_45] : memref<2x2x32x16xbf16, #tpu.memory_space<vmem>>, vector<1x1x32x16xbf16>
    %64 = vector.shape_cast %63 : vector<1x1x32x16xbf16> to vector<32x16xbf16>
    %cst_46 = arith.constant dense<0.000000e+00> : vector<32x64xf32>
    %65 = tpu.matmul %64, %62, %cst_46 {dimension_numbers = #tpu.dot_dimension_numbers<[1], [0], [0], [1], [0, 0, 1, 1], [], []>} : vector<32x16xbf16>, vector<16x64xbf16>, vector<32x64xf32> -> vector<32x64xf32>
    %c0_47 = arith.constant 0 : index
    %c0_48 = arith.constant 0 : index
    %c0_49 = arith.constant 0 : index
    %c0_50 = arith.constant 0 : index
    %66 = vector.load %arg6[%c0_47, %c0_48, %c0_49, %c0_50] : memref<2x2x32x1xf32, #tpu.memory_space<vmem>>, vector<1x1x32x1xf32>
    %67 = vector.shape_cast %66 : vector<1x1x32x1xf32> to vector<32x1xf32>
    %68 = vector.broadcast %67 : vector<32x1xf32> to vector<32x64xf32>
    %69 = arith.addf %65, %68 : vector<32x64xf32>
    %cst_51 = arith.constant 5.000000e-01 : f32
    %70 = vector.broadcast %cst_51 : f32 to vector<32x64xf32>
    %71 = arith.mulf %70, %69 : vector<32x64xf32>
    %cst_52 = arith.constant 4.471500e-02 : f32
    %72 = vector.broadcast %cst_52 : f32 to vector<32x64xf32>
    %73 = arith.mulf %72, %69 : vector<32x64xf32>
    %74 = arith.mulf %73, %69 : vector<32x64xf32>
    %75 = arith.mulf %74, %69 : vector<32x64xf32>
    %76 = arith.addf %69, %75 : vector<32x64xf32>
    %cst_53 = arith.constant 0.797884583 : f32
    %77 = vector.broadcast %cst_53 : f32 to vector<32x64xf32>
    %78 = arith.mulf %77, %76 : vector<32x64xf32>
    %79 = math.tanh %78 : vector<32x64xf32>
    %cst_54 = arith.constant 1.000000e+00 : f32
    %80 = vector.broadcast %cst_54 : f32 to vector<32x64xf32>
    %81 = arith.addf %80, %79 : vector<32x64xf32>
    %82 = arith.mulf %71, %81 : vector<32x64xf32>
    %c0_55 = arith.constant 0 : index
    %c0_56 = arith.constant 0 : index
    %c0_57 = arith.constant 0 : index
    %c0_58 = arith.constant 0 : index
    %83 = vector.load %arg7[%c0_55, %c0_56, %c0_57, %c0_58] : memref<2x2x16x32xbf16, #tpu.memory_space<vmem>>, vector<1x1x16x32xbf16>
    %84 = vector.shape_cast %83 : vector<1x1x16x32xbf16> to vector<16x32xbf16>
    %85 = arith.truncf %82 : vector<32x64xf32> to vector<32x64xbf16>
    %cst_59 = arith.constant dense<0.000000e+00> : vector<16x64xf32>
    %86 = tpu.matmul %84, %85, %cst_59 {dimension_numbers = #tpu.dot_dimension_numbers<[1], [0], [0], [1], [0, 0, 1, 1], [], []>} : vector<16x32xbf16>, vector<32x64xbf16>, vector<16x64xf32> -> vector<16x64xf32>
    %c0_60 = arith.constant 0 : index
    %c0_61 = arith.constant 0 : index
    %c0_62 = arith.constant 0 : index
    %c0_63 = arith.constant 0 : index
    %87 = vector.load %arg8[%c0_60, %c0_61, %c0_62, %c0_63] : memref<2x2x16x1xf32, #tpu.memory_space<vmem>>, vector<1x1x16x1xf32>
    %88 = vector.shape_cast %87 : vector<1x1x16x1xf32> to vector<16x1xf32>
    %89 = vector.broadcast %88 : vector<16x1xf32> to vector<16x64xf32>
    %90 = arith.addf %86, %89 : vector<16x64xf32>
    %91 = tpu.concatenate %61, %90 in 0 : vector<16x64xf32>, vector<16x64xf32> -> vector<32x64xf32>
    %92 = arith.addf %7, %91 : vector<32x64xf32>
    %c0_64 = arith.constant 0 : index
    %c0_65 = arith.constant 0 : index
    %c0_66 = arith.constant 0 : index
    %c0_67 = arith.constant 0 : index
    %93 = vector.load %arg9[%c0_64, %c0_65, %c0_66, %c0_67] : memref<2x2x1x64xf32, #tpu.memory_space<vmem>>, vector<1x1x1x64xf32>
    %94 = vector.shape_cast %93 : vector<1x1x1x64xf32> to vector<1x64xf32>
    %c0_68 = arith.constant 0 : index
    %c0_69 = arith.constant 0 : index
    %c0_70 = arith.constant 0 : index
    %c0_71 = arith.constant 0 : index
    %95 = vector.load %arg10[%c0_68, %c0_69, %c0_70, %c0_71] : memref<2x2x1x64xf32, #tpu.memory_space<vmem>>, vector<1x1x1x64xf32>
    %96 = vector.shape_cast %95 : vector<1x1x1x64xf32> to vector<1x64xf32>
    %cst_72 = arith.constant dense<0.000000e+00> : vector<32xf32>
    %97 = vector.multi_reduction <add>, %92, %cst_72 [1] : vector<32x64xf32> to vector<32xf32>
    %98 = vector.shape_cast %97 : vector<32xf32> to vector<32x1xf32>
    %cst_73 = arith.constant 6.400000e+01 : f32
    %99 = vector.broadcast %cst_73 : f32 to vector<32x1xf32>
    %100 = arith.divf %98, %99 : vector<32x1xf32>
    %101 = vector.broadcast %100 : vector<32x1xf32> to vector<32x64xf32>
    %102 = arith.subf %92, %101 : vector<32x64xf32>
    %103 = arith.mulf %102, %102 : vector<32x64xf32>
    %cst_74 = arith.constant dense<0.000000e+00> : vector<32xf32>
    %104 = vector.multi_reduction <add>, %103, %cst_74 [1] : vector<32x64xf32> to vector<32xf32>
    %105 = vector.shape_cast %104 : vector<32xf32> to vector<32x1xf32>
    %cst_75 = arith.constant 6.400000e+01 : f32
    %106 = vector.broadcast %cst_75 : f32 to vector<32x1xf32>
    %107 = arith.divf %105, %106 : vector<32x1xf32>
    %cst_76 = arith.constant 9.99999997E-7 : f32
    %108 = vector.broadcast %cst_76 : f32 to vector<32x1xf32>
    %109 = arith.addf %107, %108 : vector<32x1xf32>
    %110 = math.rsqrt %109 : vector<32x1xf32>
    %111 = vector.broadcast %110 : vector<32x1xf32> to vector<32x64xf32>
    %112 = arith.mulf %102, %111 : vector<32x64xf32>
    %113 = vector.broadcast %94 : vector<1x64xf32> to vector<32x64xf32>
    %114 = arith.mulf %112, %113 : vector<32x64xf32>
    %115 = vector.broadcast %96 : vector<1x64xf32> to vector<32x64xf32>
    %116 = arith.addf %114, %115 : vector<32x64xf32>
    %117 = arith.truncf %116 : vector<32x64xf32> to vector<32x64xbf16>
    %c0_77 = arith.constant 0 : index
    %c0_78 = arith.constant 0 : index
    %c0_79 = arith.constant 0 : index
    %c0_80 = arith.constant 0 : index
    %118 = vector.load %arg11[%c0_77, %c0_78, %c0_79, %c0_80] : memref<2x2x64x128xbf16, #tpu.memory_space<vmem>>, vector<1x1x64x128xbf16>
    %119 = vector.shape_cast %118 : vector<1x1x64x128xbf16> to vector<64x128xbf16>
    %cst_81 = arith.constant dense<0.000000e+00> : vector<32x128xf32>
    %120 = tpu.matmul %117, %119, %cst_81 {dimension_numbers = #tpu.dot_dimension_numbers<[1], [0], [0], [1], [0, 0, 1, 1], [], []>} : vector<32x64xbf16>, vector<64x128xbf16>, vector<32x128xf32> -> vector<32x128xf32>
    %c0_82 = arith.constant 0 : index
    %c0_83 = arith.constant 0 : index
    %c0_84 = arith.constant 0 : index
    %c0_85 = arith.constant 0 : index
    %121 = vector.load %arg12[%c0_82, %c0_83, %c0_84, %c0_85] : memref<2x2x1x128xf32, #tpu.memory_space<vmem>>, vector<1x1x1x128xf32>
    %122 = vector.shape_cast %121 : vector<1x1x1x128xf32> to vector<1x128xf32>
    %123 = vector.broadcast %122 : vector<1x128xf32> to vector<32x128xf32>
    %124 = arith.addf %120, %123 : vector<32x128xf32>
    %cst_86 = arith.constant 5.000000e-01 : f32
    %125 = vector.broadcast %cst_86 : f32 to vector<32x128xf32>
    %126 = arith.mulf %125, %124 : vector<32x128xf32>
    %cst_87 = arith.constant 4.471500e-02 : f32
    %127 = vector.broadcast %cst_87 : f32 to vector<32x128xf32>
    %128 = arith.mulf %127, %124 : vector<32x128xf32>
    %129 = arith.mulf %128, %124 : vector<32x128xf32>
    %130 = arith.mulf %129, %124 : vector<32x128xf32>
    %131 = arith.addf %124, %130 : vector<32x128xf32>
    %cst_88 = arith.constant 0.797884583 : f32
    %132 = vector.broadcast %cst_88 : f32 to vector<32x128xf32>
    %133 = arith.mulf %132, %131 : vector<32x128xf32>
    %134 = math.tanh %133 : vector<32x128xf32>
    %cst_89 = arith.constant 1.000000e+00 : f32
    %135 = vector.broadcast %cst_89 : f32 to vector<32x128xf32>
    %136 = arith.addf %135, %134 : vector<32x128xf32>
    %137 = arith.mulf %126, %136 : vector<32x128xf32>
    %138 = arith.truncf %137 : vector<32x128xf32> to vector<32x128xbf16>
    %c0_90 = arith.constant 0 : index
    %c0_91 = arith.constant 0 : index
    %c0_92 = arith.constant 0 : index
    %c0_93 = arith.constant 0 : index
    %139 = vector.load %arg13[%c0_90, %c0_91, %c0_92, %c0_93] : memref<2x2x128x64xbf16, #tpu.memory_space<vmem>>, vector<1x1x128x64xbf16>
    %140 = vector.shape_cast %139 : vector<1x1x128x64xbf16> to vector<128x64xbf16>
    %cst_94 = arith.constant dense<0.000000e+00> : vector<32x64xf32>
    %141 = tpu.matmul %138, %140, %cst_94 {dimension_numbers = #tpu.dot_dimension_numbers<[1], [0], [0], [1], [0, 0, 1, 1], [], []>} : vector<32x128xbf16>, vector<128x64xbf16>, vector<32x64xf32> -> vector<32x64xf32>
    %c0_95 = arith.constant 0 : index
    %c0_96 = arith.constant 0 : index
    %c0_97 = arith.constant 0 : index
    %c0_98 = arith.constant 0 : index
    %142 = vector.load %arg14[%c0_95, %c0_96, %c0_97, %c0_98] : memref<2x2x1x64xf32, #tpu.memory_space<vmem>>, vector<1x1x1x64xf32>
    %143 = vector.shape_cast %142 : vector<1x1x1x64xf32> to vector<1x64xf32>
    %144 = vector.broadcast %143 : vector<1x64xf32> to vector<32x64xf32>
    %145 = arith.addf %141, %144 : vector<32x64xf32>
    %146 = arith.addf %92, %145 : vector<32x64xf32>
    %c0_99 = arith.constant 0 : index
    %c1 = arith.constant 1 : index
    %c0_100 = arith.constant 0 : index
    %c0_101 = arith.constant 0 : index
    %147 = vector.load %arg3[%c0_99, %c1, %c0_100, %c0_101] : memref<2x2x1x64xf32, #tpu.memory_space<vmem>>, vector<1x1x1x64xf32>
    %148 = vector.shape_cast %147 : vector<1x1x1x64xf32> to vector<1x64xf32>
    %c0_102 = arith.constant 0 : index
    %c1_103 = arith.constant 1 : index
    %c0_104 = arith.constant 0 : index
    %c0_105 = arith.constant 0 : index
    %149 = vector.load %arg4[%c0_102, %c1_103, %c0_104, %c0_105] : memref<2x2x1x64xf32, #tpu.memory_space<vmem>>, vector<1x1x1x64xf32>
    %150 = vector.shape_cast %149 : vector<1x1x1x64xf32> to vector<1x64xf32>
    %cst_106 = arith.constant dense<0.000000e+00> : vector<32xf32>
    %151 = vector.multi_reduction <add>, %146, %cst_106 [1] : vector<32x64xf32> to vector<32xf32>
    %152 = vector.shape_cast %151 : vector<32xf32> to vector<32x1xf32>
    %cst_107 = arith.constant 6.400000e+01 : f32
    %153 = vector.broadcast %cst_107 : f32 to vector<32x1xf32>
    %154 = arith.divf %152, %153 : vector<32x1xf32>
    %155 = vector.broadcast %154 : vector<32x1xf32> to vector<32x64xf32>
    %156 = arith.subf %146, %155 : vector<32x64xf32>
    %157 = arith.mulf %156, %156 : vector<32x64xf32>
    %cst_108 = arith.constant dense<0.000000e+00> : vector<32xf32>
    %158 = vector.multi_reduction <add>, %157, %cst_108 [1] : vector<32x64xf32> to vector<32xf32>
    %159 = vector.shape_cast %158 : vector<32xf32> to vector<32x1xf32>
    %cst_109 = arith.constant 6.400000e+01 : f32
    %160 = vector.broadcast %cst_109 : f32 to vector<32x1xf32>
    %161 = arith.divf %159, %160 : vector<32x1xf32>
    %cst_110 = arith.constant 9.99999997E-7 : f32
    %162 = vector.broadcast %cst_110 : f32 to vector<32x1xf32>
    %163 = arith.addf %161, %162 : vector<32x1xf32>
    %164 = math.rsqrt %163 : vector<32x1xf32>
    %165 = vector.broadcast %164 : vector<32x1xf32> to vector<32x64xf32>
    %166 = arith.mulf %156, %165 : vector<32x64xf32>
    %167 = vector.broadcast %148 : vector<1x64xf32> to vector<32x64xf32>
    %168 = arith.mulf %166, %167 : vector<32x64xf32>
    %169 = vector.broadcast %150 : vector<1x64xf32> to vector<32x64xf32>
    %170 = arith.addf %168, %169 : vector<32x64xf32>
    %171 = arith.truncf %170 : vector<32x64xf32> to vector<32x64xbf16>
    %172 = vector.extract_strided_slice %171 {offsets = [0, 0], sizes = [16, 64], strides = [1, 1]} : vector<32x64xbf16> to vector<16x64xbf16>
    %c0_111 = arith.constant 0 : index
    %c1_112 = arith.constant 1 : index
    %c0_113 = arith.constant 0 : index
    %c0_114 = arith.constant 0 : index
    %173 = vector.load %arg5[%c0_111, %c1_112, %c0_113, %c0_114] : memref<2x2x32x16xbf16, #tpu.memory_space<vmem>>, vector<1x1x32x16xbf16>
    %174 = vector.shape_cast %173 : vector<1x1x32x16xbf16> to vector<32x16xbf16>
    %cst_115 = arith.constant dense<0.000000e+00> : vector<32x64xf32>
    %175 = tpu.matmul %174, %172, %cst_115 {dimension_numbers = #tpu.dot_dimension_numbers<[1], [0], [0], [1], [0, 0, 1, 1], [], []>} : vector<32x16xbf16>, vector<16x64xbf16>, vector<32x64xf32> -> vector<32x64xf32>
    %c0_116 = arith.constant 0 : index
    %c1_117 = arith.constant 1 : index
    %c0_118 = arith.constant 0 : index
    %c0_119 = arith.constant 0 : index
    %176 = vector.load %arg6[%c0_116, %c1_117, %c0_118, %c0_119] : memref<2x2x32x1xf32, #tpu.memory_space<vmem>>, vector<1x1x32x1xf32>
    %177 = vector.shape_cast %176 : vector<1x1x32x1xf32> to vector<32x1xf32>
    %178 = vector.broadcast %177 : vector<32x1xf32> to vector<32x64xf32>
    %179 = arith.addf %175, %178 : vector<32x64xf32>
    %cst_120 = arith.constant 5.000000e-01 : f32
    %180 = vector.broadcast %cst_120 : f32 to vector<32x64xf32>
    %181 = arith.mulf %180, %179 : vector<32x64xf32>
    %cst_121 = arith.constant 4.471500e-02 : f32
    %182 = vector.broadcast %cst_121 : f32 to vector<32x64xf32>
    %183 = arith.mulf %182, %179 : vector<32x64xf32>
    %184 = arith.mulf %183, %179 : vector<32x64xf32>
    %185 = arith.mulf %184, %179 : vector<32x64xf32>
    %186 = arith.addf %179, %185 : vector<32x64xf32>
    %cst_122 = arith.constant 0.797884583 : f32
    %187 = vector.broadcast %cst_122 : f32 to vector<32x64xf32>
    %188 = arith.mulf %187, %186 : vector<32x64xf32>
    %189 = math.tanh %188 : vector<32x64xf32>
    %cst_123 = arith.constant 1.000000e+00 : f32
    %190 = vector.broadcast %cst_123 : f32 to vector<32x64xf32>
    %191 = arith.addf %190, %189 : vector<32x64xf32>
    %192 = arith.mulf %181, %191 : vector<32x64xf32>
    %c0_124 = arith.constant 0 : index
    %c1_125 = arith.constant 1 : index
    %c0_126 = arith.constant 0 : index
    %c0_127 = arith.constant 0 : index
    %193 = vector.load %arg7[%c0_124, %c1_125, %c0_126, %c0_127] : memref<2x2x16x32xbf16, #tpu.memory_space<vmem>>, vector<1x1x16x32xbf16>
    %194 = vector.shape_cast %193 : vector<1x1x16x32xbf16> to vector<16x32xbf16>
    %195 = arith.truncf %192 : vector<32x64xf32> to vector<32x64xbf16>
    %cst_128 = arith.constant dense<0.000000e+00> : vector<16x64xf32>
    %196 = tpu.matmul %194, %195, %cst_128 {dimension_numbers = #tpu.dot_dimension_numbers<[1], [0], [0], [1], [0, 0, 1, 1], [], []>} : vector<16x32xbf16>, vector<32x64xbf16>, vector<16x64xf32> -> vector<16x64xf32>
    %c0_129 = arith.constant 0 : index
    %c1_130 = arith.constant 1 : index
    %c0_131 = arith.constant 0 : index
    %c0_132 = arith.constant 0 : index
    %197 = vector.load %arg8[%c0_129, %c1_130, %c0_131, %c0_132] : memref<2x2x16x1xf32, #tpu.memory_space<vmem>>, vector<1x1x16x1xf32>
    %198 = vector.shape_cast %197 : vector<1x1x16x1xf32> to vector<16x1xf32>
    %199 = vector.broadcast %198 : vector<16x1xf32> to vector<16x64xf32>
    %200 = arith.addf %196, %199 : vector<16x64xf32>
    %201 = vector.extract_strided_slice %171 {offsets = [16, 0], sizes = [16, 64], strides = [1, 1]} : vector<32x64xbf16> to vector<16x64xbf16>
    %c0_133 = arith.constant 0 : index
    %c1_134 = arith.constant 1 : index
    %c0_135 = arith.constant 0 : index
    %c0_136 = arith.constant 0 : index
    %202 = vector.load %arg5[%c0_133, %c1_134, %c0_135, %c0_136] : memref<2x2x32x16xbf16, #tpu.memory_space<vmem>>, vector<1x1x32x16xbf16>
    %203 = vector.shape_cast %202 : vector<1x1x32x16xbf16> to vector<32x16xbf16>
    %cst_137 = arith.constant dense<0.000000e+00> : vector<32x64xf32>
    %204 = tpu.matmul %203, %201, %cst_137 {dimension_numbers = #tpu.dot_dimension_numbers<[1], [0], [0], [1], [0, 0, 1, 1], [], []>} : vector<32x16xbf16>, vector<16x64xbf16>, vector<32x64xf32> -> vector<32x64xf32>
    %c0_138 = arith.constant 0 : index
    %c1_139 = arith.constant 1 : index
    %c0_140 = arith.constant 0 : index
    %c0_141 = arith.constant 0 : index
    %205 = vector.load %arg6[%c0_138, %c1_139, %c0_140, %c0_141] : memref<2x2x32x1xf32, #tpu.memory_space<vmem>>, vector<1x1x32x1xf32>
    %206 = vector.shape_cast %205 : vector<1x1x32x1xf32> to vector<32x1xf32>
    %207 = vector.broadcast %206 : vector<32x1xf32> to vector<32x64xf32>
    %208 = arith.addf %204, %207 : vector<32x64xf32>
    %cst_142 = arith.constant 5.000000e-01 : f32
    %209 = vector.broadcast %cst_142 : f32 to vector<32x64xf32>
    %210 = arith.mulf %209, %208 : vector<32x64xf32>
    %cst_143 = arith.constant 4.471500e-02 : f32
    %211 = vector.broadcast %cst_143 : f32 to vector<32x64xf32>
    %212 = arith.mulf %211, %208 : vector<32x64xf32>
    %213 = arith.mulf %212, %208 : vector<32x64xf32>
    %214 = arith.mulf %213, %208 : vector<32x64xf32>
    %215 = arith.addf %208, %214 : vector<32x64xf32>
    %cst_144 = arith.constant 0.797884583 : f32
    %216 = vector.broadcast %cst_144 : f32 to vector<32x64xf32>
    %217 = arith.mulf %216, %215 : vector<32x64xf32>
    %218 = math.tanh %217 : vector<32x64xf32>
    %cst_145 = arith.constant 1.000000e+00 : f32
    %219 = vector.broadcast %cst_145 : f32 to vector<32x64xf32>
    %220 = arith.addf %219, %218 : vector<32x64xf32>
    %221 = arith.mulf %210, %220 : vector<32x64xf32>
    %c0_146 = arith.constant 0 : index
    %c1_147 = arith.constant 1 : index
    %c0_148 = arith.constant 0 : index
    %c0_149 = arith.constant 0 : index
    %222 = vector.load %arg7[%c0_146, %c1_147, %c0_148, %c0_149] : memref<2x2x16x32xbf16, #tpu.memory_space<vmem>>, vector<1x1x16x32xbf16>
    %223 = vector.shape_cast %222 : vector<1x1x16x32xbf16> to vector<16x32xbf16>
    %224 = arith.truncf %221 : vector<32x64xf32> to vector<32x64xbf16>
    %cst_150 = arith.constant dense<0.000000e+00> : vector<16x64xf32>
    %225 = tpu.matmul %223, %224, %cst_150 {dimension_numbers = #tpu.dot_dimension_numbers<[1], [0], [0], [1], [0, 0, 1, 1], [], []>} : vector<16x32xbf16>, vector<32x64xbf16>, vector<16x64xf32> -> vector<16x64xf32>
    %c0_151 = arith.constant 0 : index
    %c1_152 = arith.constant 1 : index
    %c0_153 = arith.constant 0 : index
    %c0_154 = arith.constant 0 : index
    %226 = vector.load %arg8[%c0_151, %c1_152, %c0_153, %c0_154] : memref<2x2x16x1xf32, #tpu.memory_space<vmem>>, vector<1x1x16x1xf32>
    %227 = vector.shape_cast %226 : vector<1x1x16x1xf32> to vector<16x1xf32>
    %228 = vector.broadcast %227 : vector<16x1xf32> to vector<16x64xf32>
    %229 = arith.addf %225, %228 : vector<16x64xf32>
    %230 = tpu.concatenate %200, %229 in 0 : vector<16x64xf32>, vector<16x64xf32> -> vector<32x64xf32>
    %231 = arith.addf %146, %230 : vector<32x64xf32>
    %c0_155 = arith.constant 0 : index
    %c1_156 = arith.constant 1 : index
    %c0_157 = arith.constant 0 : index
    %c0_158 = arith.constant 0 : index
    %232 = vector.load %arg9[%c0_155, %c1_156, %c0_157, %c0_158] : memref<2x2x1x64xf32, #tpu.memory_space<vmem>>, vector<1x1x1x64xf32>
    %233 = vector.shape_cast %232 : vector<1x1x1x64xf32> to vector<1x64xf32>
    %c0_159 = arith.constant 0 : index
    %c1_160 = arith.constant 1 : index
    %c0_161 = arith.constant 0 : index
    %c0_162 = arith.constant 0 : index
    %234 = vector.load %arg10[%c0_159, %c1_160, %c0_161, %c0_162] : memref<2x2x1x64xf32, #tpu.memory_space<vmem>>, vector<1x1x1x64xf32>
    %235 = vector.shape_cast %234 : vector<1x1x1x64xf32> to vector<1x64xf32>
    %cst_163 = arith.constant dense<0.000000e+00> : vector<32xf32>
    %236 = vector.multi_reduction <add>, %231, %cst_163 [1] : vector<32x64xf32> to vector<32xf32>
    %237 = vector.shape_cast %236 : vector<32xf32> to vector<32x1xf32>
    %cst_164 = arith.constant 6.400000e+01 : f32
    %238 = vector.broadcast %cst_164 : f32 to vector<32x1xf32>
    %239 = arith.divf %237, %238 : vector<32x1xf32>
    %240 = vector.broadcast %239 : vector<32x1xf32> to vector<32x64xf32>
    %241 = arith.subf %231, %240 : vector<32x64xf32>
    %242 = arith.mulf %241, %241 : vector<32x64xf32>
    %cst_165 = arith.constant dense<0.000000e+00> : vector<32xf32>
    %243 = vector.multi_reduction <add>, %242, %cst_165 [1] : vector<32x64xf32> to vector<32xf32>
    %244 = vector.shape_cast %243 : vector<32xf32> to vector<32x1xf32>
    %cst_166 = arith.constant 6.400000e+01 : f32
    %245 = vector.broadcast %cst_166 : f32 to vector<32x1xf32>
    %246 = arith.divf %244, %245 : vector<32x1xf32>
    %cst_167 = arith.constant 9.99999997E-7 : f32
    %247 = vector.broadcast %cst_167 : f32 to vector<32x1xf32>
    %248 = arith.addf %246, %247 : vector<32x1xf32>
    %249 = math.rsqrt %248 : vector<32x1xf32>
    %250 = vector.broadcast %249 : vector<32x1xf32> to vector<32x64xf32>
    %251 = arith.mulf %241, %250 : vector<32x64xf32>
    %252 = vector.broadcast %233 : vector<1x64xf32> to vector<32x64xf32>
    %253 = arith.mulf %251, %252 : vector<32x64xf32>
    %254 = vector.broadcast %235 : vector<1x64xf32> to vector<32x64xf32>
    %255 = arith.addf %253, %254 : vector<32x64xf32>
    %256 = arith.truncf %255 : vector<32x64xf32> to vector<32x64xbf16>
    %c0_168 = arith.constant 0 : index
    %c1_169 = arith.constant 1 : index
    %c0_170 = arith.constant 0 : index
    %c0_171 = arith.constant 0 : index
    %257 = vector.load %arg11[%c0_168, %c1_169, %c0_170, %c0_171] : memref<2x2x64x128xbf16, #tpu.memory_space<vmem>>, vector<1x1x64x128xbf16>
    %258 = vector.shape_cast %257 : vector<1x1x64x128xbf16> to vector<64x128xbf16>
    %cst_172 = arith.constant dense<0.000000e+00> : vector<32x128xf32>
    %259 = tpu.matmul %256, %258, %cst_172 {dimension_numbers = #tpu.dot_dimension_numbers<[1], [0], [0], [1], [0, 0, 1, 1], [], []>} : vector<32x64xbf16>, vector<64x128xbf16>, vector<32x128xf32> -> vector<32x128xf32>
    %c0_173 = arith.constant 0 : index
    %c1_174 = arith.constant 1 : index
    %c0_175 = arith.constant 0 : index
    %c0_176 = arith.constant 0 : index
    %260 = vector.load %arg12[%c0_173, %c1_174, %c0_175, %c0_176] : memref<2x2x1x128xf32, #tpu.memory_space<vmem>>, vector<1x1x1x128xf32>
    %261 = vector.shape_cast %260 : vector<1x1x1x128xf32> to vector<1x128xf32>
    %262 = vector.broadcast %261 : vector<1x128xf32> to vector<32x128xf32>
    %263 = arith.addf %259, %262 : vector<32x128xf32>
    %cst_177 = arith.constant 5.000000e-01 : f32
    %264 = vector.broadcast %cst_177 : f32 to vector<32x128xf32>
    %265 = arith.mulf %264, %263 : vector<32x128xf32>
    %cst_178 = arith.constant 4.471500e-02 : f32
    %266 = vector.broadcast %cst_178 : f32 to vector<32x128xf32>
    %267 = arith.mulf %266, %263 : vector<32x128xf32>
    %268 = arith.mulf %267, %263 : vector<32x128xf32>
    %269 = arith.mulf %268, %263 : vector<32x128xf32>
    %270 = arith.addf %263, %269 : vector<32x128xf32>
    %cst_179 = arith.constant 0.797884583 : f32
    %271 = vector.broadcast %cst_179 : f32 to vector<32x128xf32>
    %272 = arith.mulf %271, %270 : vector<32x128xf32>
    %273 = math.tanh %272 : vector<32x128xf32>
    %cst_180 = arith.constant 1.000000e+00 : f32
    %274 = vector.broadcast %cst_180 : f32 to vector<32x128xf32>
    %275 = arith.addf %274, %273 : vector<32x128xf32>
    %276 = arith.mulf %265, %275 : vector<32x128xf32>
    %277 = arith.truncf %276 : vector<32x128xf32> to vector<32x128xbf16>
    %c0_181 = arith.constant 0 : index
    %c1_182 = arith.constant 1 : index
    %c0_183 = arith.constant 0 : index
    %c0_184 = arith.constant 0 : index
    %278 = vector.load %arg13[%c0_181, %c1_182, %c0_183, %c0_184] : memref<2x2x128x64xbf16, #tpu.memory_space<vmem>>, vector<1x1x128x64xbf16>
    %279 = vector.shape_cast %278 : vector<1x1x128x64xbf16> to vector<128x64xbf16>
    %cst_185 = arith.constant dense<0.000000e+00> : vector<32x64xf32>
    %280 = tpu.matmul %277, %279, %cst_185 {dimension_numbers = #tpu.dot_dimension_numbers<[1], [0], [0], [1], [0, 0, 1, 1], [], []>} : vector<32x128xbf16>, vector<128x64xbf16>, vector<32x64xf32> -> vector<32x64xf32>
    %c0_186 = arith.constant 0 : index
    %c1_187 = arith.constant 1 : index
    %c0_188 = arith.constant 0 : index
    %c0_189 = arith.constant 0 : index
    %281 = vector.load %arg14[%c0_186, %c1_187, %c0_188, %c0_189] : memref<2x2x1x64xf32, #tpu.memory_space<vmem>>, vector<1x1x1x64xf32>
    %282 = vector.shape_cast %281 : vector<1x1x1x64xf32> to vector<1x64xf32>
    %283 = vector.broadcast %282 : vector<1x64xf32> to vector<32x64xf32>
    %284 = arith.addf %280, %283 : vector<32x64xf32>
    %285 = arith.addf %231, %284 : vector<32x64xf32>
    %c0_190 = arith.constant 0 : index
    %c0_191 = arith.constant 0 : index
    %c0_192 = arith.constant 0 : index
    %286 = vector.load %arg15[%c0_190, %c0_191, %c0_192] : memref<2x1x64xf32, #tpu.memory_space<vmem>>, vector<1x1x64xf32>
    %287 = vector.shape_cast %286 : vector<1x1x64xf32> to vector<1x64xf32>
    %c0_193 = arith.constant 0 : index
    %c0_194 = arith.constant 0 : index
    %c0_195 = arith.constant 0 : index
    %288 = vector.load %arg16[%c0_193, %c0_194, %c0_195] : memref<2x1x64xf32, #tpu.memory_space<vmem>>, vector<1x1x64xf32>
    %289 = vector.shape_cast %288 : vector<1x1x64xf32> to vector<1x64xf32>
    %cst_196 = arith.constant dense<0.000000e+00> : vector<32xf32>
    %290 = vector.multi_reduction <add>, %285, %cst_196 [1] : vector<32x64xf32> to vector<32xf32>
    %291 = vector.shape_cast %290 : vector<32xf32> to vector<32x1xf32>
    %cst_197 = arith.constant 6.400000e+01 : f32
    %292 = vector.broadcast %cst_197 : f32 to vector<32x1xf32>
    %293 = arith.divf %291, %292 : vector<32x1xf32>
    %294 = vector.broadcast %293 : vector<32x1xf32> to vector<32x64xf32>
    %295 = arith.subf %285, %294 : vector<32x64xf32>
    %296 = arith.mulf %295, %295 : vector<32x64xf32>
    %cst_198 = arith.constant dense<0.000000e+00> : vector<32xf32>
    %297 = vector.multi_reduction <add>, %296, %cst_198 [1] : vector<32x64xf32> to vector<32xf32>
    %298 = vector.shape_cast %297 : vector<32xf32> to vector<32x1xf32>
    %cst_199 = arith.constant 6.400000e+01 : f32
    %299 = vector.broadcast %cst_199 : f32 to vector<32x1xf32>
    %300 = arith.divf %298, %299 : vector<32x1xf32>
    %cst_200 = arith.constant 9.99999997E-7 : f32
    %301 = vector.broadcast %cst_200 : f32 to vector<32x1xf32>
    %302 = arith.addf %300, %301 : vector<32x1xf32>
    %303 = math.rsqrt %302 : vector<32x1xf32>
    %304 = vector.broadcast %303 : vector<32x1xf32> to vector<32x64xf32>
    %305 = arith.mulf %295, %304 : vector<32x64xf32>
    %306 = vector.broadcast %287 : vector<1x64xf32> to vector<32x64xf32>
    %307 = arith.mulf %305, %306 : vector<32x64xf32>
    %308 = vector.broadcast %289 : vector<1x64xf32> to vector<32x64xf32>
    %309 = arith.addf %307, %308 : vector<32x64xf32>
    %310 = vector.extract_strided_slice %309 {offsets = [0, 0], sizes = [1, 64], strides = [1, 1]} : vector<32x64xf32> to vector<1x64xf32>
    %c0_201 = arith.constant 0 : index
    %c0_202 = arith.constant 0 : index
    %311 = vector.load %arg22[%c0_201, %c0_202] : memref<2x1024xf32, #tpu.memory_space<vmem>>, vector<1x64xf32>
    tpu.vector_store %arg22[%c0_201, %c0_202], %310 {strides = array<i32>} : memref<2x1024xf32, #tpu.memory_space<vmem>>, vector<1x64xf32>,
    %312 = vector.extract_strided_slice %309 {offsets = [1, 0], sizes = [1, 64], strides = [1, 1]} : vector<32x64xf32> to vector<1x64xf32>
    %c0_203 = arith.constant 0 : index
    %c64 = arith.constant 64 : index
    %313 = vector.load %arg22[%c0_203, %c64] : memref<2x1024xf32, #tpu.memory_space<vmem>>, vector<1x64xf32>
    tpu.vector_store %arg22[%c0_203, %c64], %312 {strides = array<i32>} : memref<2x1024xf32, #tpu.memory_space<vmem>>, vector<1x64xf32>,
    %314 = vector.extract_strided_slice %309 {offsets = [2, 0], sizes = [1, 64], strides = [1, 1]} : vector<32x64xf32> to vector<1x64xf32>
    %c0_204 = arith.constant 0 : index
    %c128 = arith.constant 128 : index
    %315 = vector.load %arg22[%c0_204, %c128] : memref<2x1024xf32, #tpu.memory_space<vmem>>, vector<1x64xf32>
    tpu.vector_store %arg22[%c0_204, %c128], %314 {strides = array<i32>} : memref<2x1024xf32, #tpu.memory_space<vmem>>, vector<1x64xf32>,
    %316 = vector.extract_strided_slice %309 {offsets = [3, 0], sizes = [1, 64], strides = [1, 1]} : vector<32x64xf32> to vector<1x64xf32>
    %c0_205 = arith.constant 0 : index
    %c192 = arith.constant 192 : index
    %317 = vector.load %arg22[%c0_205, %c192] : memref<2x1024xf32, #tpu.memory_space<vmem>>, vector<1x64xf32>
    tpu.vector_store %arg22[%c0_205, %c192], %316 {strides = array<i32>} : memref<2x1024xf32, #tpu.memory_space<vmem>>, vector<1x64xf32>,
    %318 = vector.extract_strided_slice %309 {offsets = [4, 0], sizes = [1, 64], strides = [1, 1]} : vector<32x64xf32> to vector<1x64xf32>
    %c0_206 = arith.constant 0 : index
    %c256 = arith.constant 256 : index
    %319 = vector.load %arg22[%c0_206, %c256] : memref<2x1024xf32, #tpu.memory_space<vmem>>, vector<1x64xf32>
    tpu.vector_store %arg22[%c0_206, %c256], %318 {strides = array<i32>} : memref<2x1024xf32, #tpu.memory_space<vmem>>, vector<1x64xf32>,
    %320 = vector.extract_strided_slice %309 {offsets = [5, 0], sizes = [1, 64], strides = [1, 1]} : vector<32x64xf32> to vector<1x64xf32>
    %c0_207 = arith.constant 0 : index
    %c320 = arith.constant 320 : index
    %321 = vector.load %arg22[%c0_207, %c320] : memref<2x1024xf32, #tpu.memory_space<vmem>>, vector<1x64xf32>
    tpu.vector_store %arg22[%c0_207, %c320], %320 {strides = array<i32>} : memref<2x1024xf32, #tpu.memory_space<vmem>>, vector<1x64xf32>,
    %322 = vector.extract_strided_slice %309 {offsets = [6, 0], sizes = [1, 64], strides = [1, 1]} : vector<32x64xf32> to vector<1x64xf32>
    %c0_208 = arith.constant 0 : index
    %c384 = arith.constant 384 : index
    %323 = vector.load %arg22[%c0_208, %c384] : memref<2x1024xf32, #tpu.memory_space<vmem>>, vector<1x64xf32>
    tpu.vector_store %arg22[%c0_208, %c384], %322 {strides = array<i32>} : memref<2x1024xf32, #tpu.memory_space<vmem>>, vector<1x64xf32>,
    %324 = vector.extract_strided_slice %309 {offsets = [7, 0], sizes = [1, 64], strides = [1, 1]} : vector<32x64xf32> to vector<1x64xf32>
    %c0_209 = arith.constant 0 : index
    %c448 = arith.constant 448 : index
    %325 = vector.load %arg22[%c0_209, %c448] : memref<2x1024xf32, #tpu.memory_space<vmem>>, vector<1x64xf32>
    tpu.vector_store %arg22[%c0_209, %c448], %324 {strides = array<i32>} : memref<2x1024xf32, #tpu.memory_space<vmem>>, vector<1x64xf32>,
    %326 = vector.extract_strided_slice %309 {offsets = [8, 0], sizes = [1, 64], strides = [1, 1]} : vector<32x64xf32> to vector<1x64xf32>
    %c0_210 = arith.constant 0 : index
    %c512 = arith.constant 512 : index
    %327 = vector.load %arg22[%c0_210, %c512] : memref<2x1024xf32, #tpu.memory_space<vmem>>, vector<1x64xf32>
    tpu.vector_store %arg22[%c0_210, %c512], %326 {strides = array<i32>} : memref<2x1024xf32, #tpu.memory_space<vmem>>, vector<1x64xf32>,
    %328 = vector.extract_strided_slice %309 {offsets = [9, 0], sizes = [1, 64], strides = [1, 1]} : vector<32x64xf32> to vector<1x64xf32>
    %c0_211 = arith.constant 0 : index
    %c576 = arith.constant 576 : index
    %329 = vector.load %arg22[%c0_211, %c576] : memref<2x1024xf32, #tpu.memory_space<vmem>>, vector<1x64xf32>
    tpu.vector_store %arg22[%c0_211, %c576], %328 {strides = array<i32>} : memref<2x1024xf32, #tpu.memory_space<vmem>>, vector<1x64xf32>,
    %330 = vector.extract_strided_slice %309 {offsets = [10, 0], sizes = [1, 64], strides = [1, 1]} : vector<32x64xf32> to vector<1x64xf32>
    %c0_212 = arith.constant 0 : index
    %c640 = arith.constant 640 : index
    %331 = vector.load %arg22[%c0_212, %c640] : memref<2x1024xf32, #tpu.memory_space<vmem>>, vector<1x64xf32>
    tpu.vector_store %arg22[%c0_212, %c640], %330 {strides = array<i32>} : memref<2x1024xf32, #tpu.memory_space<vmem>>, vector<1x64xf32>,
    %332 = vector.extract_strided_slice %309 {offsets = [11, 0], sizes = [1, 64], strides = [1, 1]} : vector<32x64xf32> to vector<1x64xf32>
    %c0_213 = arith.constant 0 : index
    %c704 = arith.constant 704 : index
    %333 = vector.load %arg22[%c0_213, %c704] : memref<2x1024xf32, #tpu.memory_space<vmem>>, vector<1x64xf32>
    tpu.vector_store %arg22[%c0_213, %c704], %332 {strides = array<i32>} : memref<2x1024xf32, #tpu.memory_space<vmem>>, vector<1x64xf32>,
    %334 = vector.extract_strided_slice %309 {offsets = [12, 0], sizes = [1, 64], strides = [1, 1]} : vector<32x64xf32> to vector<1x64xf32>
    %c0_214 = arith.constant 0 : index
    %c768 = arith.constant 768 : index
    %335 = vector.load %arg22[%c0_214, %c768] : memref<2x1024xf32, #tpu.memory_space<vmem>>, vector<1x64xf32>
    tpu.vector_store %arg22[%c0_214, %c768], %334 {strides = array<i32>} : memref<2x1024xf32, #tpu.memory_space<vmem>>, vector<1x64xf32>,
    %336 = vector.extract_strided_slice %309 {offsets = [13, 0], sizes = [1, 64], strides = [1, 1]} : vector<32x64xf32> to vector<1x64xf32>
    %c0_215 = arith.constant 0 : index
    %c832 = arith.constant 832 : index
    %337 = vector.load %arg22[%c0_215, %c832] : memref<2x1024xf32, #tpu.memory_space<vmem>>, vector<1x64xf32>
    tpu.vector_store %arg22[%c0_215, %c832], %336 {strides = array<i32>} : memref<2x1024xf32, #tpu.memory_space<vmem>>, vector<1x64xf32>,
    %338 = vector.extract_strided_slice %309 {offsets = [14, 0], sizes = [1, 64], strides = [1, 1]} : vector<32x64xf32> to vector<1x64xf32>
    %c0_216 = arith.constant 0 : index
    %c896 = arith.constant 896 : index
    %339 = vector.load %arg22[%c0_216, %c896] : memref<2x1024xf32, #tpu.memory_space<vmem>>, vector<1x64xf32>
    tpu.vector_store %arg22[%c0_216, %c896], %338 {strides = array<i32>} : memref<2x1024xf32, #tpu.memory_space<vmem>>, vector<1x64xf32>,
    %340 = vector.extract_strided_slice %309 {offsets = [15, 0], sizes = [1, 64], strides = [1, 1]} : vector<32x64xf32> to vector<1x64xf32>
    %c0_217 = arith.constant 0 : index
    %c960 = arith.constant 960 : index
    %341 = vector.load %arg22[%c0_217, %c960] : memref<2x1024xf32, #tpu.memory_space<vmem>>, vector<1x64xf32>
    tpu.vector_store %arg22[%c0_217, %c960], %340 {strides = array<i32>} : memref<2x1024xf32, #tpu.memory_space<vmem>>, vector<1x64xf32>,
    %342 = vector.extract_strided_slice %309 {offsets = [16, 0], sizes = [1, 64], strides = [1, 1]} : vector<32x64xf32> to vector<1x64xf32>
    %c1_218 = arith.constant 1 : index
    %c0_219 = arith.constant 0 : index
    %343 = vector.load %arg22[%c1_218, %c0_219] : memref<2x1024xf32, #tpu.memory_space<vmem>>, vector<1x64xf32>
    tpu.vector_store %arg22[%c1_218, %c0_219], %342 {strides = array<i32>} : memref<2x1024xf32, #tpu.memory_space<vmem>>, vector<1x64xf32>,
    %344 = vector.extract_strided_slice %309 {offsets = [17, 0], sizes = [1, 64], strides = [1, 1]} : vector<32x64xf32> to vector<1x64xf32>
    %c1_220 = arith.constant 1 : index
    %c64_221 = arith.constant 64 : index
    %345 = vector.load %arg22[%c1_220, %c64_221] : memref<2x1024xf32, #tpu.memory_space<vmem>>, vector<1x64xf32>
    tpu.vector_store %arg22[%c1_220, %c64_221], %344 {strides = array<i32>} : memref<2x1024xf32, #tpu.memory_space<vmem>>, vector<1x64xf32>,
    %346 = vector.extract_strided_slice %309 {offsets = [18, 0], sizes = [1, 64], strides = [1, 1]} : vector<32x64xf32> to vector<1x64xf32>
    %c1_222 = arith.constant 1 : index
    %c128_223 = arith.constant 128 : index
    %347 = vector.load %arg22[%c1_222, %c128_223] : memref<2x1024xf32, #tpu.memory_space<vmem>>, vector<1x64xf32>
    tpu.vector_store %arg22[%c1_222, %c128_223], %346 {strides = array<i32>} : memref<2x1024xf32, #tpu.memory_space<vmem>>, vector<1x64xf32>,
    %348 = vector.extract_strided_slice %309 {offsets = [19, 0], sizes = [1, 64], strides = [1, 1]} : vector<32x64xf32> to vector<1x64xf32>
    %c1_224 = arith.constant 1 : index
    %c192_225 = arith.constant 192 : index
    %349 = vector.load %arg22[%c1_224, %c192_225] : memref<2x1024xf32, #tpu.memory_space<vmem>>, vector<1x64xf32>
    tpu.vector_store %arg22[%c1_224, %c192_225], %348 {strides = array<i32>} : memref<2x1024xf32, #tpu.memory_space<vmem>>, vector<1x64xf32>,
    %350 = vector.extract_strided_slice %309 {offsets = [20, 0], sizes = [1, 64], strides = [1, 1]} : vector<32x64xf32> to vector<1x64xf32>
    %c1_226 = arith.constant 1 : index
    %c256_227 = arith.constant 256 : index
    %351 = vector.load %arg22[%c1_226, %c256_227] : memref<2x1024xf32, #tpu.memory_space<vmem>>, vector<1x64xf32>
    tpu.vector_store %arg22[%c1_226, %c256_227], %350 {strides = array<i32>} : memref<2x1024xf32, #tpu.memory_space<vmem>>, vector<1x64xf32>,
    %352 = vector.extract_strided_slice %309 {offsets = [21, 0], sizes = [1, 64], strides = [1, 1]} : vector<32x64xf32> to vector<1x64xf32>
    %c1_228 = arith.constant 1 : index
    %c320_229 = arith.constant 320 : index
    %353 = vector.load %arg22[%c1_228, %c320_229] : memref<2x1024xf32, #tpu.memory_space<vmem>>, vector<1x64xf32>
    tpu.vector_store %arg22[%c1_228, %c320_229], %352 {strides = array<i32>} : memref<2x1024xf32, #tpu.memory_space<vmem>>, vector<1x64xf32>,
    %354 = vector.extract_strided_slice %309 {offsets = [22, 0], sizes = [1, 64], strides = [1, 1]} : vector<32x64xf32> to vector<1x64xf32>
    %c1_230 = arith.constant 1 : index
    %c384_231 = arith.constant 384 : index
    %355 = vector.load %arg22[%c1_230, %c384_231] : memref<2x1024xf32, #tpu.memory_space<vmem>>, vector<1x64xf32>
    tpu.vector_store %arg22[%c1_230, %c384_231], %354 {strides = array<i32>} : memref<2x1024xf32, #tpu.memory_space<vmem>>, vector<1x64xf32>,
    %356 = vector.extract_strided_slice %309 {offsets = [23, 0], sizes = [1, 64], strides = [1, 1]} : vector<32x64xf32> to vector<1x64xf32>
    %c1_232 = arith.constant 1 : index
    %c448_233 = arith.constant 448 : index
    %357 = vector.load %arg22[%c1_232, %c448_233] : memref<2x1024xf32, #tpu.memory_space<vmem>>, vector<1x64xf32>
    tpu.vector_store %arg22[%c1_232, %c448_233], %356 {strides = array<i32>} : memref<2x1024xf32, #tpu.memory_space<vmem>>, vector<1x64xf32>,
    %358 = vector.extract_strided_slice %309 {offsets = [24, 0], sizes = [1, 64], strides = [1, 1]} : vector<32x64xf32> to vector<1x64xf32>
    %c1_234 = arith.constant 1 : index
    %c512_235 = arith.constant 512 : index
    %359 = vector.load %arg22[%c1_234, %c512_235] : memref<2x1024xf32, #tpu.memory_space<vmem>>, vector<1x64xf32>
    tpu.vector_store %arg22[%c1_234, %c512_235], %358 {strides = array<i32>} : memref<2x1024xf32, #tpu.memory_space<vmem>>, vector<1x64xf32>,
    %360 = vector.extract_strided_slice %309 {offsets = [25, 0], sizes = [1, 64], strides = [1, 1]} : vector<32x64xf32> to vector<1x64xf32>
    %c1_236 = arith.constant 1 : index
    %c576_237 = arith.constant 576 : index
    %361 = vector.load %arg22[%c1_236, %c576_237] : memref<2x1024xf32, #tpu.memory_space<vmem>>, vector<1x64xf32>
    tpu.vector_store %arg22[%c1_236, %c576_237], %360 {strides = array<i32>} : memref<2x1024xf32, #tpu.memory_space<vmem>>, vector<1x64xf32>,
    %362 = vector.extract_strided_slice %309 {offsets = [26, 0], sizes = [1, 64], strides = [1, 1]} : vector<32x64xf32> to vector<1x64xf32>
    %c1_238 = arith.constant 1 : index
    %c640_239 = arith.constant 640 : index
    %363 = vector.load %arg22[%c1_238, %c640_239] : memref<2x1024xf32, #tpu.memory_space<vmem>>, vector<1x64xf32>
    tpu.vector_store %arg22[%c1_238, %c640_239], %362 {strides = array<i32>} : memref<2x1024xf32, #tpu.memory_space<vmem>>, vector<1x64xf32>,
    %364 = vector.extract_strided_slice %309 {offsets = [27, 0], sizes = [1, 64], strides = [1, 1]} : vector<32x64xf32> to vector<1x64xf32>
    %c1_240 = arith.constant 1 : index
    %c704_241 = arith.constant 704 : index
    %365 = vector.load %arg22[%c1_240, %c704_241] : memref<2x1024xf32, #tpu.memory_space<vmem>>, vector<1x64xf32>
    tpu.vector_store %arg22[%c1_240, %c704_241], %364 {strides = array<i32>} : memref<2x1024xf32, #tpu.memory_space<vmem>>, vector<1x64xf32>,
    %366 = vector.extract_strided_slice %309 {offsets = [28, 0], sizes = [1, 64], strides = [1, 1]} : vector<32x64xf32> to vector<1x64xf32>
    %c1_242 = arith.constant 1 : index
    %c768_243 = arith.constant 768 : index
    %367 = vector.load %arg22[%c1_242, %c768_243] : memref<2x1024xf32, #tpu.memory_space<vmem>>, vector<1x64xf32>
    tpu.vector_store %arg22[%c1_242, %c768_243], %366 {strides = array<i32>} : memref<2x1024xf32, #tpu.memory_space<vmem>>, vector<1x64xf32>,
    %368 = vector.extract_strided_slice %309 {offsets = [29, 0], sizes = [1, 64], strides = [1, 1]} : vector<32x64xf32> to vector<1x64xf32>
    %c1_244 = arith.constant 1 : index
    %c832_245 = arith.constant 832 : index
    %369 = vector.load %arg22[%c1_244, %c832_245] : memref<2x1024xf32, #tpu.memory_space<vmem>>, vector<1x64xf32>
    tpu.vector_store %arg22[%c1_244, %c832_245], %368 {strides = array<i32>} : memref<2x1024xf32, #tpu.memory_space<vmem>>, vector<1x64xf32>,
    %370 = vector.extract_strided_slice %309 {offsets = [30, 0], sizes = [1, 64], strides = [1, 1]} : vector<32x64xf32> to vector<1x64xf32>
    %c1_246 = arith.constant 1 : index
    %c896_247 = arith.constant 896 : index
    %371 = vector.load %arg22[%c1_246, %c896_247] : memref<2x1024xf32, #tpu.memory_space<vmem>>, vector<1x64xf32>
    tpu.vector_store %arg22[%c1_246, %c896_247], %370 {strides = array<i32>} : memref<2x1024xf32, #tpu.memory_space<vmem>>, vector<1x64xf32>,
    %372 = vector.extract_strided_slice %309 {offsets = [31, 0], sizes = [1, 64], strides = [1, 1]} : vector<32x64xf32> to vector<1x64xf32>
    %c1_248 = arith.constant 1 : index
    %c960_249 = arith.constant 960 : index
    %373 = vector.load %arg22[%c1_248, %c960_249] : memref<2x1024xf32, #tpu.memory_space<vmem>>, vector<1x64xf32>
    tpu.vector_store %arg22[%c1_248, %c960_249], %372 {strides = array<i32>} : memref<2x1024xf32, #tpu.memory_space<vmem>>, vector<1x64xf32>,
    %c0_250 = arith.constant 0 : index
    %c0_251 = arith.constant 0 : index
    %374 = vector.load %arg22[%c0_250, %c0_251] : memref<2x1024xf32, #tpu.memory_space<vmem>>, vector<2x1024xf32>
    %375 = arith.truncf %374 : vector<2x1024xf32> to vector<2x1024xbf16>
    %c0_252 = arith.constant 0 : index
    %c0_253 = arith.constant 0 : index
    %c0_254 = arith.constant 0 : index
    %376 = vector.load %arg17[%c0_252, %c0_253, %c0_254] : memref<2x1024x256xbf16, #tpu.memory_space<vmem>>, vector<1x1024x256xbf16>
    %377 = vector.shape_cast %376 : vector<1x1024x256xbf16> to vector<1024x256xbf16>
    %cst_255 = arith.constant dense<0.000000e+00> : vector<2x256xf32>
    %378 = tpu.matmul %375, %377, %cst_255 {dimension_numbers = #tpu.dot_dimension_numbers<[1], [0], [0], [1], [0, 0, 1, 1], [], []>} : vector<2x1024xbf16>, vector<1024x256xbf16>, vector<2x256xf32> -> vector<2x256xf32>
    %c0_256 = arith.constant 0 : index
    %c0_257 = arith.constant 0 : index
    %c0_258 = arith.constant 0 : index
    %379 = vector.load %arg18[%c0_256, %c0_257, %c0_258] : memref<2x1x256xf32, #tpu.memory_space<vmem>>, vector<1x1x256xf32>
    %380 = vector.shape_cast %379 : vector<1x1x256xf32> to vector<1x256xf32>
    %381 = vector.broadcast %380 : vector<1x256xf32> to vector<2x256xf32>
    %382 = arith.addf %378, %381 : vector<2x256xf32>
    %cst_259 = arith.constant 0.000000e+00 : f32
    %383 = vector.broadcast %cst_259 : f32 to vector<2x256xf32>
    %384 = arith.cmpf oge, %382, %383 : vector<2x256xf32>
    %cst_260 = arith.constant 1.000000e-01 : f32
    %385 = vector.broadcast %cst_260 : f32 to vector<2x256xf32>
    %386 = arith.mulf %385, %382 : vector<2x256xf32>
    %387 = arith.select %384, %382, %386 : vector<2x256xi1>, vector<2x256xf32>
    %388 = arith.truncf %387 : vector<2x256xf32> to vector<2x256xbf16>
    %c0_261 = arith.constant 0 : index
    %c0_262 = arith.constant 0 : index
    %c0_263 = arith.constant 0 : index
    %389 = vector.load %arg19[%c0_261, %c0_262, %c0_263] : memref<2x256x128xbf16, #tpu.memory_space<vmem>>, vector<1x256x128xbf16>
    %390 = vector.shape_cast %389 : vector<1x256x128xbf16> to vector<256x128xbf16>
    %cst_264 = arith.constant dense<0.000000e+00> : vector<2x128xf32>
    %391 = tpu.matmul %388, %390, %cst_264 {dimension_numbers = #tpu.dot_dimension_numbers<[1], [0], [0], [1], [0, 0, 1, 1], [], []>} : vector<2x256xbf16>, vector<256x128xbf16>, vector<2x128xf32> -> vector<2x128xf32>
    %c0_265 = arith.constant 0 : index
    %c0_266 = arith.constant 0 : index
    %c0_267 = arith.constant 0 : index
    %392 = vector.load %arg20[%c0_265, %c0_266, %c0_267] : memref<2x1x128xf32, #tpu.memory_space<vmem>>, vector<1x1x128xf32>
    %393 = vector.shape_cast %392 : vector<1x1x128xf32> to vector<1x128xf32>
    %394 = vector.broadcast %393 : vector<1x128xf32> to vector<2x128xf32>
    %395 = arith.addf %391, %394 : vector<2x128xf32>
    %c0_268 = arith.constant 0 : index
    %c0_269 = arith.constant 0 : index
    %c0_270 = arith.constant 0 : index
    %396 = vector.load %arg21[%c0_268, %c0_269, %c0_270] : memref<2x2x128xf32, #tpu.memory_space<vmem>>, vector<1x2x128xf32>
    %397 = vector.shape_cast %396 : vector<1x2x128xf32> to vector<2x128xf32>
    %398 = vector.shape_cast %395 : vector<2x128xf32> to vector<1x2x128xf32>
    tpu.vector_store %arg21[%c0_268, %c0_269, %c0_270], %398 {strides = array<i32>} : memref<2x2x128xf32, #tpu.memory_space<vmem>>, vector<1x2x128xf32>,
    %c1_271 = arith.constant 1 : index
    %c0_272 = arith.constant 0 : index
    %c0_273 = arith.constant 0 : index
    %399 = vector.load %arg1[%c1_271, %c0_272, %c0_273] : memref<2x192x64xbf16, #tpu.memory_space<vmem>>, vector<1x192x64xbf16>
    %400 = vector.shape_cast %399 : vector<1x192x64xbf16> to vector<192x64xbf16>
    %cst_274 = arith.constant dense<0.000000e+00> : vector<32x64xf32>
    %401 = tpu.matmul %0, %400, %cst_274 {dimension_numbers = #tpu.dot_dimension_numbers<[1], [0], [0], [1], [0, 0, 1, 1], [], []>} : vector<32x192xbf16>, vector<192x64xbf16>, vector<32x64xf32> -> vector<32x64xf32>
    %c1_275 = arith.constant 1 : index
    %c0_276 = arith.constant 0 : index
    %c0_277 = arith.constant 0 : index
    %402 = vector.load %arg2[%c1_275, %c0_276, %c0_277] : memref<2x1x64xf32, #tpu.memory_space<vmem>>, vector<1x1x64xf32>
    %403 = vector.shape_cast %402 : vector<1x1x64xf32> to vector<1x64xf32>
    %404 = vector.broadcast %403 : vector<1x64xf32> to vector<32x64xf32>
    %405 = arith.addf %401, %404 : vector<32x64xf32>
    %c1_278 = arith.constant 1 : index
    %c0_279 = arith.constant 0 : index
    %c0_280 = arith.constant 0 : index
    %c0_281 = arith.constant 0 : index
    %406 = vector.load %arg3[%c1_278, %c0_279, %c0_280, %c0_281] : memref<2x2x1x64xf32, #tpu.memory_space<vmem>>, vector<1x1x1x64xf32>
    %407 = vector.shape_cast %406 : vector<1x1x1x64xf32> to vector<1x64xf32>
    %c1_282 = arith.constant 1 : index
    %c0_283 = arith.constant 0 : index
    %c0_284 = arith.constant 0 : index
    %c0_285 = arith.constant 0 : index
    %408 = vector.load %arg4[%c1_282, %c0_283, %c0_284, %c0_285] : memref<2x2x1x64xf32, #tpu.memory_space<vmem>>, vector<1x1x1x64xf32>
    %409 = vector.shape_cast %408 : vector<1x1x1x64xf32> to vector<1x64xf32>
    %cst_286 = arith.constant dense<0.000000e+00> : vector<32xf32>
    %410 = vector.multi_reduction <add>, %405, %cst_286 [1] : vector<32x64xf32> to vector<32xf32>
    %411 = vector.shape_cast %410 : vector<32xf32> to vector<32x1xf32>
    %cst_287 = arith.constant 6.400000e+01 : f32
    %412 = vector.broadcast %cst_287 : f32 to vector<32x1xf32>
    %413 = arith.divf %411, %412 : vector<32x1xf32>
    %414 = vector.broadcast %413 : vector<32x1xf32> to vector<32x64xf32>
    %415 = arith.subf %405, %414 : vector<32x64xf32>
    %416 = arith.mulf %415, %415 : vector<32x64xf32>
    %cst_288 = arith.constant dense<0.000000e+00> : vector<32xf32>
    %417 = vector.multi_reduction <add>, %416, %cst_288 [1] : vector<32x64xf32> to vector<32xf32>
    %418 = vector.shape_cast %417 : vector<32xf32> to vector<32x1xf32>
    %cst_289 = arith.constant 6.400000e+01 : f32
    %419 = vector.broadcast %cst_289 : f32 to vector<32x1xf32>
    %420 = arith.divf %418, %419 : vector<32x1xf32>
    %cst_290 = arith.constant 9.99999997E-7 : f32
    %421 = vector.broadcast %cst_290 : f32 to vector<32x1xf32>
    %422 = arith.addf %420, %421 : vector<32x1xf32>
    %423 = math.rsqrt %422 : vector<32x1xf32>
    %424 = vector.broadcast %423 : vector<32x1xf32> to vector<32x64xf32>
    %425 = arith.mulf %415, %424 : vector<32x64xf32>
    %426 = vector.broadcast %407 : vector<1x64xf32> to vector<32x64xf32>
    %427 = arith.mulf %425, %426 : vector<32x64xf32>
    %428 = vector.broadcast %409 : vector<1x64xf32> to vector<32x64xf32>
    %429 = arith.addf %427, %428 : vector<32x64xf32>
    %430 = arith.truncf %429 : vector<32x64xf32> to vector<32x64xbf16>
    %431 = vector.extract_strided_slice %430 {offsets = [0, 0], sizes = [16, 64], strides = [1, 1]} : vector<32x64xbf16> to vector<16x64xbf16>
    %c1_291 = arith.constant 1 : index
    %c0_292 = arith.constant 0 : index
    %c0_293 = arith.constant 0 : index
    %c0_294 = arith.constant 0 : index
    %432 = vector.load %arg5[%c1_291, %c0_292, %c0_293, %c0_294] : memref<2x2x32x16xbf16, #tpu.memory_space<vmem>>, vector<1x1x32x16xbf16>
    %433 = vector.shape_cast %432 : vector<1x1x32x16xbf16> to vector<32x16xbf16>
    %cst_295 = arith.constant dense<0.000000e+00> : vector<32x64xf32>
    %434 = tpu.matmul %433, %431, %cst_295 {dimension_numbers = #tpu.dot_dimension_numbers<[1], [0], [0], [1], [0, 0, 1, 1], [], []>} : vector<32x16xbf16>, vector<16x64xbf16>, vector<32x64xf32> -> vector<32x64xf32>
    %c1_296 = arith.constant 1 : index
    %c0_297 = arith.constant 0 : index
    %c0_298 = arith.constant 0 : index
    %c0_299 = arith.constant 0 : index
    %435 = vector.load %arg6[%c1_296, %c0_297, %c0_298, %c0_299] : memref<2x2x32x1xf32, #tpu.memory_space<vmem>>, vector<1x1x32x1xf32>
    %436 = vector.shape_cast %435 : vector<1x1x32x1xf32> to vector<32x1xf32>
    %437 = vector.broadcast %436 : vector<32x1xf32> to vector<32x64xf32>
    %438 = arith.addf %434, %437 : vector<32x64xf32>
    %cst_300 = arith.constant 5.000000e-01 : f32
    %439 = vector.broadcast %cst_300 : f32 to vector<32x64xf32>
    %440 = arith.mulf %439, %438 : vector<32x64xf32>
    %cst_301 = arith.constant 4.471500e-02 : f32
    %441 = vector.broadcast %cst_301 : f32 to vector<32x64xf32>
    %442 = arith.mulf %441, %438 : vector<32x64xf32>
    %443 = arith.mulf %442, %438 : vector<32x64xf32>
    %444 = arith.mulf %443, %438 : vector<32x64xf32>
    %445 = arith.addf %438, %444 : vector<32x64xf32>
    %cst_302 = arith.constant 0.797884583 : f32
    %446 = vector.broadcast %cst_302 : f32 to vector<32x64xf32>
    %447 = arith.mulf %446, %445 : vector<32x64xf32>
    %448 = math.tanh %447 : vector<32x64xf32>
    %cst_303 = arith.constant 1.000000e+00 : f32
    %449 = vector.broadcast %cst_303 : f32 to vector<32x64xf32>
    %450 = arith.addf %449, %448 : vector<32x64xf32>
    %451 = arith.mulf %440, %450 : vector<32x64xf32>
    %c1_304 = arith.constant 1 : index
    %c0_305 = arith.constant 0 : index
    %c0_306 = arith.constant 0 : index
    %c0_307 = arith.constant 0 : index
    %452 = vector.load %arg7[%c1_304, %c0_305, %c0_306, %c0_307] : memref<2x2x16x32xbf16, #tpu.memory_space<vmem>>, vector<1x1x16x32xbf16>
    %453 = vector.shape_cast %452 : vector<1x1x16x32xbf16> to vector<16x32xbf16>
    %454 = arith.truncf %451 : vector<32x64xf32> to vector<32x64xbf16>
    %cst_308 = arith.constant dense<0.000000e+00> : vector<16x64xf32>
    %455 = tpu.matmul %453, %454, %cst_308 {dimension_numbers = #tpu.dot_dimension_numbers<[1], [0], [0], [1], [0, 0, 1, 1], [], []>} : vector<16x32xbf16>, vector<32x64xbf16>, vector<16x64xf32> -> vector<16x64xf32>
    %c1_309 = arith.constant 1 : index
    %c0_310 = arith.constant 0 : index
    %c0_311 = arith.constant 0 : index
    %c0_312 = arith.constant 0 : index
    %456 = vector.load %arg8[%c1_309, %c0_310, %c0_311, %c0_312] : memref<2x2x16x1xf32, #tpu.memory_space<vmem>>, vector<1x1x16x1xf32>
    %457 = vector.shape_cast %456 : vector<1x1x16x1xf32> to vector<16x1xf32>
    %458 = vector.broadcast %457 : vector<16x1xf32> to vector<16x64xf32>
    %459 = arith.addf %455, %458 : vector<16x64xf32>
    %460 = vector.extract_strided_slice %430 {offsets = [16, 0], sizes = [16, 64], strides = [1, 1]} : vector<32x64xbf16> to vector<16x64xbf16>
    %c1_313 = arith.constant 1 : index
    %c0_314 = arith.constant 0 : index
    %c0_315 = arith.constant 0 : index
    %c0_316 = arith.constant 0 : index
    %461 = vector.load %arg5[%c1_313, %c0_314, %c0_315, %c0_316] : memref<2x2x32x16xbf16, #tpu.memory_space<vmem>>, vector<1x1x32x16xbf16>
    %462 = vector.shape_cast %461 : vector<1x1x32x16xbf16> to vector<32x16xbf16>
    %cst_317 = arith.constant dense<0.000000e+00> : vector<32x64xf32>
    %463 = tpu.matmul %462, %460, %cst_317 {dimension_numbers = #tpu.dot_dimension_numbers<[1], [0], [0], [1], [0, 0, 1, 1], [], []>} : vector<32x16xbf16>, vector<16x64xbf16>, vector<32x64xf32> -> vector<32x64xf32>
    %c1_318 = arith.constant 1 : index
    %c0_319 = arith.constant 0 : index
    %c0_320 = arith.constant 0 : index
    %c0_321 = arith.constant 0 : index
    %464 = vector.load %arg6[%c1_318, %c0_319, %c0_320, %c0_321] : memref<2x2x32x1xf32, #tpu.memory_space<vmem>>, vector<1x1x32x1xf32>
    %465 = vector.shape_cast %464 : vector<1x1x32x1xf32> to vector<32x1xf32>
    %466 = vector.broadcast %465 : vector<32x1xf32> to vector<32x64xf32>
    %467 = arith.addf %463, %466 : vector<32x64xf32>
    %cst_322 = arith.constant 5.000000e-01 : f32
    %468 = vector.broadcast %cst_322 : f32 to vector<32x64xf32>
    %469 = arith.mulf %468, %467 : vector<32x64xf32>
    %cst_323 = arith.constant 4.471500e-02 : f32
    %470 = vector.broadcast %cst_323 : f32 to vector<32x64xf32>
    %471 = arith.mulf %470, %467 : vector<32x64xf32>
    %472 = arith.mulf %471, %467 : vector<32x64xf32>
    %473 = arith.mulf %472, %467 : vector<32x64xf32>
    %474 = arith.addf %467, %473 : vector<32x64xf32>
    %cst_324 = arith.constant 0.797884583 : f32
    %475 = vector.broadcast %cst_324 : f32 to vector<32x64xf32>
    %476 = arith.mulf %475, %474 : vector<32x64xf32>
    %477 = math.tanh %476 : vector<32x64xf32>
    %cst_325 = arith.constant 1.000000e+00 : f32
    %478 = vector.broadcast %cst_325 : f32 to vector<32x64xf32>
    %479 = arith.addf %478, %477 : vector<32x64xf32>
    %480 = arith.mulf %469, %479 : vector<32x64xf32>
    %c1_326 = arith.constant 1 : index
    %c0_327 = arith.constant 0 : index
    %c0_328 = arith.constant 0 : index
    %c0_329 = arith.constant 0 : index
    %481 = vector.load %arg7[%c1_326, %c0_327, %c0_328, %c0_329] : memref<2x2x16x32xbf16, #tpu.memory_space<vmem>>, vector<1x1x16x32xbf16>
    %482 = vector.shape_cast %481 : vector<1x1x16x32xbf16> to vector<16x32xbf16>
    %483 = arith.truncf %480 : vector<32x64xf32> to vector<32x64xbf16>
    %cst_330 = arith.constant dense<0.000000e+00> : vector<16x64xf32>
    %484 = tpu.matmul %482, %483, %cst_330 {dimension_numbers = #tpu.dot_dimension_numbers<[1], [0], [0], [1], [0, 0, 1, 1], [], []>} : vector<16x32xbf16>, vector<32x64xbf16>, vector<16x64xf32> -> vector<16x64xf32>
    %c1_331 = arith.constant 1 : index
    %c0_332 = arith.constant 0 : index
    %c0_333 = arith.constant 0 : index
    %c0_334 = arith.constant 0 : index
    %485 = vector.load %arg8[%c1_331, %c0_332, %c0_333, %c0_334] : memref<2x2x16x1xf32, #tpu.memory_space<vmem>>, vector<1x1x16x1xf32>
    %486 = vector.shape_cast %485 : vector<1x1x16x1xf32> to vector<16x1xf32>
    %487 = vector.broadcast %486 : vector<16x1xf32> to vector<16x64xf32>
    %488 = arith.addf %484, %487 : vector<16x64xf32>
    %489 = tpu.concatenate %459, %488 in 0 : vector<16x64xf32>, vector<16x64xf32> -> vector<32x64xf32>
    %490 = arith.addf %405, %489 : vector<32x64xf32>
    %c1_335 = arith.constant 1 : index
    %c0_336 = arith.constant 0 : index
    %c0_337 = arith.constant 0 : index
    %c0_338 = arith.constant 0 : index
    %491 = vector.load %arg9[%c1_335, %c0_336, %c0_337, %c0_338] : memref<2x2x1x64xf32, #tpu.memory_space<vmem>>, vector<1x1x1x64xf32>
    %492 = vector.shape_cast %491 : vector<1x1x1x64xf32> to vector<1x64xf32>
    %c1_339 = arith.constant 1 : index
    %c0_340 = arith.constant 0 : index
    %c0_341 = arith.constant 0 : index
    %c0_342 = arith.constant 0 : index
    %493 = vector.load %arg10[%c1_339, %c0_340, %c0_341, %c0_342] : memref<2x2x1x64xf32, #tpu.memory_space<vmem>>, vector<1x1x1x64xf32>
    %494 = vector.shape_cast %493 : vector<1x1x1x64xf32> to vector<1x64xf32>
    %cst_343 = arith.constant dense<0.000000e+00> : vector<32xf32>
    %495 = vector.multi_reduction <add>, %490, %cst_343 [1] : vector<32x64xf32> to vector<32xf32>
    %496 = vector.shape_cast %495 : vector<32xf32> to vector<32x1xf32>
    %cst_344 = arith.constant 6.400000e+01 : f32
    %497 = vector.broadcast %cst_344 : f32 to vector<32x1xf32>
    %498 = arith.divf %496, %497 : vector<32x1xf32>
    %499 = vector.broadcast %498 : vector<32x1xf32> to vector<32x64xf32>
    %500 = arith.subf %490, %499 : vector<32x64xf32>
    %501 = arith.mulf %500, %500 : vector<32x64xf32>
    %cst_345 = arith.constant dense<0.000000e+00> : vector<32xf32>
    %502 = vector.multi_reduction <add>, %501, %cst_345 [1] : vector<32x64xf32> to vector<32xf32>
    %503 = vector.shape_cast %502 : vector<32xf32> to vector<32x1xf32>
    %cst_346 = arith.constant 6.400000e+01 : f32
    %504 = vector.broadcast %cst_346 : f32 to vector<32x1xf32>
    %505 = arith.divf %503, %504 : vector<32x1xf32>
    %cst_347 = arith.constant 9.99999997E-7 : f32
    %506 = vector.broadcast %cst_347 : f32 to vector<32x1xf32>
    %507 = arith.addf %505, %506 : vector<32x1xf32>
    %508 = math.rsqrt %507 : vector<32x1xf32>
    %509 = vector.broadcast %508 : vector<32x1xf32> to vector<32x64xf32>
    %510 = arith.mulf %500, %509 : vector<32x64xf32>
    %511 = vector.broadcast %492 : vector<1x64xf32> to vector<32x64xf32>
    %512 = arith.mulf %510, %511 : vector<32x64xf32>
    %513 = vector.broadcast %494 : vector<1x64xf32> to vector<32x64xf32>
    %514 = arith.addf %512, %513 : vector<32x64xf32>
    %515 = arith.truncf %514 : vector<32x64xf32> to vector<32x64xbf16>
    %c1_348 = arith.constant 1 : index
    %c0_349 = arith.constant 0 : index
    %c0_350 = arith.constant 0 : index
    %c0_351 = arith.constant 0 : index
    %516 = vector.load %arg11[%c1_348, %c0_349, %c0_350, %c0_351] : memref<2x2x64x128xbf16, #tpu.memory_space<vmem>>, vector<1x1x64x128xbf16>
    %517 = vector.shape_cast %516 : vector<1x1x64x128xbf16> to vector<64x128xbf16>
    %cst_352 = arith.constant dense<0.000000e+00> : vector<32x128xf32>
    %518 = tpu.matmul %515, %517, %cst_352 {dimension_numbers = #tpu.dot_dimension_numbers<[1], [0], [0], [1], [0, 0, 1, 1], [], []>} : vector<32x64xbf16>, vector<64x128xbf16>, vector<32x128xf32> -> vector<32x128xf32>
    %c1_353 = arith.constant 1 : index
    %c0_354 = arith.constant 0 : index
    %c0_355 = arith.constant 0 : index
    %c0_356 = arith.constant 0 : index
    %519 = vector.load %arg12[%c1_353, %c0_354, %c0_355, %c0_356] : memref<2x2x1x128xf32, #tpu.memory_space<vmem>>, vector<1x1x1x128xf32>
    %520 = vector.shape_cast %519 : vector<1x1x1x128xf32> to vector<1x128xf32>
    %521 = vector.broadcast %520 : vector<1x128xf32> to vector<32x128xf32>
    %522 = arith.addf %518, %521 : vector<32x128xf32>
    %cst_357 = arith.constant 5.000000e-01 : f32
    %523 = vector.broadcast %cst_357 : f32 to vector<32x128xf32>
    %524 = arith.mulf %523, %522 : vector<32x128xf32>
    %cst_358 = arith.constant 4.471500e-02 : f32
    %525 = vector.broadcast %cst_358 : f32 to vector<32x128xf32>
    %526 = arith.mulf %525, %522 : vector<32x128xf32>
    %527 = arith.mulf %526, %522 : vector<32x128xf32>
    %528 = arith.mulf %527, %522 : vector<32x128xf32>
    %529 = arith.addf %522, %528 : vector<32x128xf32>
    %cst_359 = arith.constant 0.797884583 : f32
    %530 = vector.broadcast %cst_359 : f32 to vector<32x128xf32>
    %531 = arith.mulf %530, %529 : vector<32x128xf32>
    %532 = math.tanh %531 : vector<32x128xf32>
    %cst_360 = arith.constant 1.000000e+00 : f32
    %533 = vector.broadcast %cst_360 : f32 to vector<32x128xf32>
    %534 = arith.addf %533, %532 : vector<32x128xf32>
    %535 = arith.mulf %524, %534 : vector<32x128xf32>
    %536 = arith.truncf %535 : vector<32x128xf32> to vector<32x128xbf16>
    %c1_361 = arith.constant 1 : index
    %c0_362 = arith.constant 0 : index
    %c0_363 = arith.constant 0 : index
    %c0_364 = arith.constant 0 : index
    %537 = vector.load %arg13[%c1_361, %c0_362, %c0_363, %c0_364] : memref<2x2x128x64xbf16, #tpu.memory_space<vmem>>, vector<1x1x128x64xbf16>
    %538 = vector.shape_cast %537 : vector<1x1x128x64xbf16> to vector<128x64xbf16>
    %cst_365 = arith.constant dense<0.000000e+00> : vector<32x64xf32>
    %539 = tpu.matmul %536, %538, %cst_365 {dimension_numbers = #tpu.dot_dimension_numbers<[1], [0], [0], [1], [0, 0, 1, 1], [], []>} : vector<32x128xbf16>, vector<128x64xbf16>, vector<32x64xf32> -> vector<32x64xf32>
    %c1_366 = arith.constant 1 : index
    %c0_367 = arith.constant 0 : index
    %c0_368 = arith.constant 0 : index
    %c0_369 = arith.constant 0 : index
    %540 = vector.load %arg14[%c1_366, %c0_367, %c0_368, %c0_369] : memref<2x2x1x64xf32, #tpu.memory_space<vmem>>, vector<1x1x1x64xf32>
    %541 = vector.shape_cast %540 : vector<1x1x1x64xf32> to vector<1x64xf32>
    %542 = vector.broadcast %541 : vector<1x64xf32> to vector<32x64xf32>
    %543 = arith.addf %539, %542 : vector<32x64xf32>
    %544 = arith.addf %490, %543 : vector<32x64xf32>
    %c1_370 = arith.constant 1 : index
    %c1_371 = arith.constant 1 : index
    %c0_372 = arith.constant 0 : index
    %c0_373 = arith.constant 0 : index
    %545 = vector.load %arg3[%c1_370, %c1_371, %c0_372, %c0_373] : memref<2x2x1x64xf32, #tpu.memory_space<vmem>>, vector<1x1x1x64xf32>
    %546 = vector.shape_cast %545 : vector<1x1x1x64xf32> to vector<1x64xf32>
    %c1_374 = arith.constant 1 : index
    %c1_375 = arith.constant 1 : index
    %c0_376 = arith.constant 0 : index
    %c0_377 = arith.constant 0 : index
    %547 = vector.load %arg4[%c1_374, %c1_375, %c0_376, %c0_377] : memref<2x2x1x64xf32, #tpu.memory_space<vmem>>, vector<1x1x1x64xf32>
    %548 = vector.shape_cast %547 : vector<1x1x1x64xf32> to vector<1x64xf32>
    %cst_378 = arith.constant dense<0.000000e+00> : vector<32xf32>
    %549 = vector.multi_reduction <add>, %544, %cst_378 [1] : vector<32x64xf32> to vector<32xf32>
    %550 = vector.shape_cast %549 : vector<32xf32> to vector<32x1xf32>
    %cst_379 = arith.constant 6.400000e+01 : f32
    %551 = vector.broadcast %cst_379 : f32 to vector<32x1xf32>
    %552 = arith.divf %550, %551 : vector<32x1xf32>
    %553 = vector.broadcast %552 : vector<32x1xf32> to vector<32x64xf32>
    %554 = arith.subf %544, %553 : vector<32x64xf32>
    %555 = arith.mulf %554, %554 : vector<32x64xf32>
    %cst_380 = arith.constant dense<0.000000e+00> : vector<32xf32>
    %556 = vector.multi_reduction <add>, %555, %cst_380 [1] : vector<32x64xf32> to vector<32xf32>
    %557 = vector.shape_cast %556 : vector<32xf32> to vector<32x1xf32>
    %cst_381 = arith.constant 6.400000e+01 : f32
    %558 = vector.broadcast %cst_381 : f32 to vector<32x1xf32>
    %559 = arith.divf %557, %558 : vector<32x1xf32>
    %cst_382 = arith.constant 9.99999997E-7 : f32
    %560 = vector.broadcast %cst_382 : f32 to vector<32x1xf32>
    %561 = arith.addf %559, %560 : vector<32x1xf32>
    %562 = math.rsqrt %561 : vector<32x1xf32>
    %563 = vector.broadcast %562 : vector<32x1xf32> to vector<32x64xf32>
    %564 = arith.mulf %554, %563 : vector<32x64xf32>
    %565 = vector.broadcast %546 : vector<1x64xf32> to vector<32x64xf32>
    %566 = arith.mulf %564, %565 : vector<32x64xf32>
    %567 = vector.broadcast %548 : vector<1x64xf32> to vector<32x64xf32>
    %568 = arith.addf %566, %567 : vector<32x64xf32>
    %569 = arith.truncf %568 : vector<32x64xf32> to vector<32x64xbf16>
    %570 = vector.extract_strided_slice %569 {offsets = [0, 0], sizes = [16, 64], strides = [1, 1]} : vector<32x64xbf16> to vector<16x64xbf16>
    %c1_383 = arith.constant 1 : index
    %c1_384 = arith.constant 1 : index
    %c0_385 = arith.constant 0 : index
    %c0_386 = arith.constant 0 : index
    %571 = vector.load %arg5[%c1_383, %c1_384, %c0_385, %c0_386] : memref<2x2x32x16xbf16, #tpu.memory_space<vmem>>, vector<1x1x32x16xbf16>
    %572 = vector.shape_cast %571 : vector<1x1x32x16xbf16> to vector<32x16xbf16>
    %cst_387 = arith.constant dense<0.000000e+00> : vector<32x64xf32>
    %573 = tpu.matmul %572, %570, %cst_387 {dimension_numbers = #tpu.dot_dimension_numbers<[1], [0], [0], [1], [0, 0, 1, 1], [], []>} : vector<32x16xbf16>, vector<16x64xbf16>, vector<32x64xf32> -> vector<32x64xf32>
    %c1_388 = arith.constant 1 : index
    %c1_389 = arith.constant 1 : index
    %c0_390 = arith.constant 0 : index
    %c0_391 = arith.constant 0 : index
    %574 = vector.load %arg6[%c1_388, %c1_389, %c0_390, %c0_391] : memref<2x2x32x1xf32, #tpu.memory_space<vmem>>, vector<1x1x32x1xf32>
    %575 = vector.shape_cast %574 : vector<1x1x32x1xf32> to vector<32x1xf32>
    %576 = vector.broadcast %575 : vector<32x1xf32> to vector<32x64xf32>
    %577 = arith.addf %573, %576 : vector<32x64xf32>
    %cst_392 = arith.constant 5.000000e-01 : f32
    %578 = vector.broadcast %cst_392 : f32 to vector<32x64xf32>
    %579 = arith.mulf %578, %577 : vector<32x64xf32>
    %cst_393 = arith.constant 4.471500e-02 : f32
    %580 = vector.broadcast %cst_393 : f32 to vector<32x64xf32>
    %581 = arith.mulf %580, %577 : vector<32x64xf32>
    %582 = arith.mulf %581, %577 : vector<32x64xf32>
    %583 = arith.mulf %582, %577 : vector<32x64xf32>
    %584 = arith.addf %577, %583 : vector<32x64xf32>
    %cst_394 = arith.constant 0.797884583 : f32
    %585 = vector.broadcast %cst_394 : f32 to vector<32x64xf32>
    %586 = arith.mulf %585, %584 : vector<32x64xf32>
    %587 = math.tanh %586 : vector<32x64xf32>
    %cst_395 = arith.constant 1.000000e+00 : f32
    %588 = vector.broadcast %cst_395 : f32 to vector<32x64xf32>
    %589 = arith.addf %588, %587 : vector<32x64xf32>
    %590 = arith.mulf %579, %589 : vector<32x64xf32>
    %c1_396 = arith.constant 1 : index
    %c1_397 = arith.constant 1 : index
    %c0_398 = arith.constant 0 : index
    %c0_399 = arith.constant 0 : index
    %591 = vector.load %arg7[%c1_396, %c1_397, %c0_398, %c0_399] : memref<2x2x16x32xbf16, #tpu.memory_space<vmem>>, vector<1x1x16x32xbf16>
    %592 = vector.shape_cast %591 : vector<1x1x16x32xbf16> to vector<16x32xbf16>
    %593 = arith.truncf %590 : vector<32x64xf32> to vector<32x64xbf16>
    %cst_400 = arith.constant dense<0.000000e+00> : vector<16x64xf32>
    %594 = tpu.matmul %592, %593, %cst_400 {dimension_numbers = #tpu.dot_dimension_numbers<[1], [0], [0], [1], [0, 0, 1, 1], [], []>} : vector<16x32xbf16>, vector<32x64xbf16>, vector<16x64xf32> -> vector<16x64xf32>
    %c1_401 = arith.constant 1 : index
    %c1_402 = arith.constant 1 : index
    %c0_403 = arith.constant 0 : index
    %c0_404 = arith.constant 0 : index
    %595 = vector.load %arg8[%c1_401, %c1_402, %c0_403, %c0_404] : memref<2x2x16x1xf32, #tpu.memory_space<vmem>>, vector<1x1x16x1xf32>
    %596 = vector.shape_cast %595 : vector<1x1x16x1xf32> to vector<16x1xf32>
    %597 = vector.broadcast %596 : vector<16x1xf32> to vector<16x64xf32>
    %598 = arith.addf %594, %597 : vector<16x64xf32>
    %599 = vector.extract_strided_slice %569 {offsets = [16, 0], sizes = [16, 64], strides = [1, 1]} : vector<32x64xbf16> to vector<16x64xbf16>
    %c1_405 = arith.constant 1 : index
    %c1_406 = arith.constant 1 : index
    %c0_407 = arith.constant 0 : index
    %c0_408 = arith.constant 0 : index
    %600 = vector.load %arg5[%c1_405, %c1_406, %c0_407, %c0_408] : memref<2x2x32x16xbf16, #tpu.memory_space<vmem>>, vector<1x1x32x16xbf16>
    %601 = vector.shape_cast %600 : vector<1x1x32x16xbf16> to vector<32x16xbf16>
    %cst_409 = arith.constant dense<0.000000e+00> : vector<32x64xf32>
    %602 = tpu.matmul %601, %599, %cst_409 {dimension_numbers = #tpu.dot_dimension_numbers<[1], [0], [0], [1], [0, 0, 1, 1], [], []>} : vector<32x16xbf16>, vector<16x64xbf16>, vector<32x64xf32> -> vector<32x64xf32>
    %c1_410 = arith.constant 1 : index
    %c1_411 = arith.constant 1 : index
    %c0_412 = arith.constant 0 : index
    %c0_413 = arith.constant 0 : index
    %603 = vector.load %arg6[%c1_410, %c1_411, %c0_412, %c0_413] : memref<2x2x32x1xf32, #tpu.memory_space<vmem>>, vector<1x1x32x1xf32>
    %604 = vector.shape_cast %603 : vector<1x1x32x1xf32> to vector<32x1xf32>
    %605 = vector.broadcast %604 : vector<32x1xf32> to vector<32x64xf32>
    %606 = arith.addf %602, %605 : vector<32x64xf32>
    %cst_414 = arith.constant 5.000000e-01 : f32
    %607 = vector.broadcast %cst_414 : f32 to vector<32x64xf32>
    %608 = arith.mulf %607, %606 : vector<32x64xf32>
    %cst_415 = arith.constant 4.471500e-02 : f32
    %609 = vector.broadcast %cst_415 : f32 to vector<32x64xf32>
    %610 = arith.mulf %609, %606 : vector<32x64xf32>
    %611 = arith.mulf %610, %606 : vector<32x64xf32>
    %612 = arith.mulf %611, %606 : vector<32x64xf32>
    %613 = arith.addf %606, %612 : vector<32x64xf32>
    %cst_416 = arith.constant 0.797884583 : f32
    %614 = vector.broadcast %cst_416 : f32 to vector<32x64xf32>
    %615 = arith.mulf %614, %613 : vector<32x64xf32>
    %616 = math.tanh %615 : vector<32x64xf32>
    %cst_417 = arith.constant 1.000000e+00 : f32
    %617 = vector.broadcast %cst_417 : f32 to vector<32x64xf32>
    %618 = arith.addf %617, %616 : vector<32x64xf32>
    %619 = arith.mulf %608, %618 : vector<32x64xf32>
    %c1_418 = arith.constant 1 : index
    %c1_419 = arith.constant 1 : index
    %c0_420 = arith.constant 0 : index
    %c0_421 = arith.constant 0 : index
    %620 = vector.load %arg7[%c1_418, %c1_419, %c0_420, %c0_421] : memref<2x2x16x32xbf16, #tpu.memory_space<vmem>>, vector<1x1x16x32xbf16>
    %621 = vector.shape_cast %620 : vector<1x1x16x32xbf16> to vector<16x32xbf16>
    %622 = arith.truncf %619 : vector<32x64xf32> to vector<32x64xbf16>
    %cst_422 = arith.constant dense<0.000000e+00> : vector<16x64xf32>
    %623 = tpu.matmul %621, %622, %cst_422 {dimension_numbers = #tpu.dot_dimension_numbers<[1], [0], [0], [1], [0, 0, 1, 1], [], []>} : vector<16x32xbf16>, vector<32x64xbf16>, vector<16x64xf32> -> vector<16x64xf32>
    %c1_423 = arith.constant 1 : index
    %c1_424 = arith.constant 1 : index
    %c0_425 = arith.constant 0 : index
    %c0_426 = arith.constant 0 : index
    %624 = vector.load %arg8[%c1_423, %c1_424, %c0_425, %c0_426] : memref<2x2x16x1xf32, #tpu.memory_space<vmem>>, vector<1x1x16x1xf32>
    %625 = vector.shape_cast %624 : vector<1x1x16x1xf32> to vector<16x1xf32>
    %626 = vector.broadcast %625 : vector<16x1xf32> to vector<16x64xf32>
    %627 = arith.addf %623, %626 : vector<16x64xf32>
    %628 = tpu.concatenate %598, %627 in 0 : vector<16x64xf32>, vector<16x64xf32> -> vector<32x64xf32>
    %629 = arith.addf %544, %628 : vector<32x64xf32>
    %c1_427 = arith.constant 1 : index
    %c1_428 = arith.constant 1 : index
    %c0_429 = arith.constant 0 : index
    %c0_430 = arith.constant 0 : index
    %630 = vector.load %arg9[%c1_427, %c1_428, %c0_429, %c0_430] : memref<2x2x1x64xf32, #tpu.memory_space<vmem>>, vector<1x1x1x64xf32>
    %631 = vector.shape_cast %630 : vector<1x1x1x64xf32> to vector<1x64xf32>
    %c1_431 = arith.constant 1 : index
    %c1_432 = arith.constant 1 : index
    %c0_433 = arith.constant 0 : index
    %c0_434 = arith.constant 0 : index
    %632 = vector.load %arg10[%c1_431, %c1_432, %c0_433, %c0_434] : memref<2x2x1x64xf32, #tpu.memory_space<vmem>>, vector<1x1x1x64xf32>
    %633 = vector.shape_cast %632 : vector<1x1x1x64xf32> to vector<1x64xf32>
    %cst_435 = arith.constant dense<0.000000e+00> : vector<32xf32>
    %634 = vector.multi_reduction <add>, %629, %cst_435 [1] : vector<32x64xf32> to vector<32xf32>
    %635 = vector.shape_cast %634 : vector<32xf32> to vector<32x1xf32>
    %cst_436 = arith.constant 6.400000e+01 : f32
    %636 = vector.broadcast %cst_436 : f32 to vector<32x1xf32>
    %637 = arith.divf %635, %636 : vector<32x1xf32>
    %638 = vector.broadcast %637 : vector<32x1xf32> to vector<32x64xf32>
    %639 = arith.subf %629, %638 : vector<32x64xf32>
    %640 = arith.mulf %639, %639 : vector<32x64xf32>
    %cst_437 = arith.constant dense<0.000000e+00> : vector<32xf32>
    %641 = vector.multi_reduction <add>, %640, %cst_437 [1] : vector<32x64xf32> to vector<32xf32>
    %642 = vector.shape_cast %641 : vector<32xf32> to vector<32x1xf32>
    %cst_438 = arith.constant 6.400000e+01 : f32
    %643 = vector.broadcast %cst_438 : f32 to vector<32x1xf32>
    %644 = arith.divf %642, %643 : vector<32x1xf32>
    %cst_439 = arith.constant 9.99999997E-7 : f32
    %645 = vector.broadcast %cst_439 : f32 to vector<32x1xf32>
    %646 = arith.addf %644, %645 : vector<32x1xf32>
    %647 = math.rsqrt %646 : vector<32x1xf32>
    %648 = vector.broadcast %647 : vector<32x1xf32> to vector<32x64xf32>
    %649 = arith.mulf %639, %648 : vector<32x64xf32>
    %650 = vector.broadcast %631 : vector<1x64xf32> to vector<32x64xf32>
    %651 = arith.mulf %649, %650 : vector<32x64xf32>
    %652 = vector.broadcast %633 : vector<1x64xf32> to vector<32x64xf32>
    %653 = arith.addf %651, %652 : vector<32x64xf32>
    %654 = arith.truncf %653 : vector<32x64xf32> to vector<32x64xbf16>
    %c1_440 = arith.constant 1 : index
    %c1_441 = arith.constant 1 : index
    %c0_442 = arith.constant 0 : index
    %c0_443 = arith.constant 0 : index
    %655 = vector.load %arg11[%c1_440, %c1_441, %c0_442, %c0_443] : memref<2x2x64x128xbf16, #tpu.memory_space<vmem>>, vector<1x1x64x128xbf16>
    %656 = vector.shape_cast %655 : vector<1x1x64x128xbf16> to vector<64x128xbf16>
    %cst_444 = arith.constant dense<0.000000e+00> : vector<32x128xf32>
    %657 = tpu.matmul %654, %656, %cst_444 {dimension_numbers = #tpu.dot_dimension_numbers<[1], [0], [0], [1], [0, 0, 1, 1], [], []>} : vector<32x64xbf16>, vector<64x128xbf16>, vector<32x128xf32> -> vector<32x128xf32>
    %c1_445 = arith.constant 1 : index
    %c1_446 = arith.constant 1 : index
    %c0_447 = arith.constant 0 : index
    %c0_448 = arith.constant 0 : index
    %658 = vector.load %arg12[%c1_445, %c1_446, %c0_447, %c0_448] : memref<2x2x1x128xf32, #tpu.memory_space<vmem>>, vector<1x1x1x128xf32>
    %659 = vector.shape_cast %658 : vector<1x1x1x128xf32> to vector<1x128xf32>
    %660 = vector.broadcast %659 : vector<1x128xf32> to vector<32x128xf32>
    %661 = arith.addf %657, %660 : vector<32x128xf32>
    %cst_449 = arith.constant 5.000000e-01 : f32
    %662 = vector.broadcast %cst_449 : f32 to vector<32x128xf32>
    %663 = arith.mulf %662, %661 : vector<32x128xf32>
    %cst_450 = arith.constant 4.471500e-02 : f32
    %664 = vector.broadcast %cst_450 : f32 to vector<32x128xf32>
    %665 = arith.mulf %664, %661 : vector<32x128xf32>
    %666 = arith.mulf %665, %661 : vector<32x128xf32>
    %667 = arith.mulf %666, %661 : vector<32x128xf32>
    %668 = arith.addf %661, %667 : vector<32x128xf32>
    %cst_451 = arith.constant 0.797884583 : f32
    %669 = vector.broadcast %cst_451 : f32 to vector<32x128xf32>
    %670 = arith.mulf %669, %668 : vector<32x128xf32>
    %671 = math.tanh %670 : vector<32x128xf32>
    %cst_452 = arith.constant 1.000000e+00 : f32
    %672 = vector.broadcast %cst_452 : f32 to vector<32x128xf32>
    %673 = arith.addf %672, %671 : vector<32x128xf32>
    %674 = arith.mulf %663, %673 : vector<32x128xf32>
    %675 = arith.truncf %674 : vector<32x128xf32> to vector<32x128xbf16>
    %c1_453 = arith.constant 1 : index
    %c1_454 = arith.constant 1 : index
    %c0_455 = arith.constant 0 : index
    %c0_456 = arith.constant 0 : index
    %676 = vector.load %arg13[%c1_453, %c1_454, %c0_455, %c0_456] : memref<2x2x128x64xbf16, #tpu.memory_space<vmem>>, vector<1x1x128x64xbf16>
    %677 = vector.shape_cast %676 : vector<1x1x128x64xbf16> to vector<128x64xbf16>
    %cst_457 = arith.constant dense<0.000000e+00> : vector<32x64xf32>
    %678 = tpu.matmul %675, %677, %cst_457 {dimension_numbers = #tpu.dot_dimension_numbers<[1], [0], [0], [1], [0, 0, 1, 1], [], []>} : vector<32x128xbf16>, vector<128x64xbf16>, vector<32x64xf32> -> vector<32x64xf32>
    %c1_458 = arith.constant 1 : index
    %c1_459 = arith.constant 1 : index
    %c0_460 = arith.constant 0 : index
    %c0_461 = arith.constant 0 : index
    %679 = vector.load %arg14[%c1_458, %c1_459, %c0_460, %c0_461] : memref<2x2x1x64xf32, #tpu.memory_space<vmem>>, vector<1x1x1x64xf32>
    %680 = vector.shape_cast %679 : vector<1x1x1x64xf32> to vector<1x64xf32>
    %681 = vector.broadcast %680 : vector<1x64xf32> to vector<32x64xf32>
    %682 = arith.addf %678, %681 : vector<32x64xf32>
    %683 = arith.addf %629, %682 : vector<32x64xf32>
    %c1_462 = arith.constant 1 : index
    %c0_463 = arith.constant 0 : index
    %c0_464 = arith.constant 0 : index
    %684 = vector.load %arg15[%c1_462, %c0_463, %c0_464] : memref<2x1x64xf32, #tpu.memory_space<vmem>>, vector<1x1x64xf32>
    %685 = vector.shape_cast %684 : vector<1x1x64xf32> to vector<1x64xf32>
    %c1_465 = arith.constant 1 : index
    %c0_466 = arith.constant 0 : index
    %c0_467 = arith.constant 0 : index
    %686 = vector.load %arg16[%c1_465, %c0_466, %c0_467] : memref<2x1x64xf32, #tpu.memory_space<vmem>>, vector<1x1x64xf32>
    %687 = vector.shape_cast %686 : vector<1x1x64xf32> to vector<1x64xf32>
    %cst_468 = arith.constant dense<0.000000e+00> : vector<32xf32>
    %688 = vector.multi_reduction <add>, %683, %cst_468 [1] : vector<32x64xf32> to vector<32xf32>
    %689 = vector.shape_cast %688 : vector<32xf32> to vector<32x1xf32>
    %cst_469 = arith.constant 6.400000e+01 : f32
    %690 = vector.broadcast %cst_469 : f32 to vector<32x1xf32>
    %691 = arith.divf %689, %690 : vector<32x1xf32>
    %692 = vector.broadcast %691 : vector<32x1xf32> to vector<32x64xf32>
    %693 = arith.subf %683, %692 : vector<32x64xf32>
    %694 = arith.mulf %693, %693 : vector<32x64xf32>
    %cst_470 = arith.constant dense<0.000000e+00> : vector<32xf32>
    %695 = vector.multi_reduction <add>, %694, %cst_470 [1] : vector<32x64xf32> to vector<32xf32>
    %696 = vector.shape_cast %695 : vector<32xf32> to vector<32x1xf32>
    %cst_471 = arith.constant 6.400000e+01 : f32
    %697 = vector.broadcast %cst_471 : f32 to vector<32x1xf32>
    %698 = arith.divf %696, %697 : vector<32x1xf32>
    %cst_472 = arith.constant 9.99999997E-7 : f32
    %699 = vector.broadcast %cst_472 : f32 to vector<32x1xf32>
    %700 = arith.addf %698, %699 : vector<32x1xf32>
    %701 = math.rsqrt %700 : vector<32x1xf32>
    %702 = vector.broadcast %701 : vector<32x1xf32> to vector<32x64xf32>
    %703 = arith.mulf %693, %702 : vector<32x64xf32>
    %704 = vector.broadcast %685 : vector<1x64xf32> to vector<32x64xf32>
    %705 = arith.mulf %703, %704 : vector<32x64xf32>
    %706 = vector.broadcast %687 : vector<1x64xf32> to vector<32x64xf32>
    %707 = arith.addf %705, %706 : vector<32x64xf32>
    %708 = vector.extract_strided_slice %707 {offsets = [0, 0], sizes = [1, 64], strides = [1, 1]} : vector<32x64xf32> to vector<1x64xf32>
    %c0_473 = arith.constant 0 : index
    %c0_474 = arith.constant 0 : index
    %709 = vector.load %arg22[%c0_473, %c0_474] : memref<2x1024xf32, #tpu.memory_space<vmem>>, vector<1x64xf32>
    tpu.vector_store %arg22[%c0_473, %c0_474], %708 {strides = array<i32>} : memref<2x1024xf32, #tpu.memory_space<vmem>>, vector<1x64xf32>,
    %710 = vector.extract_strided_slice %707 {offsets = [1, 0], sizes = [1, 64], strides = [1, 1]} : vector<32x64xf32> to vector<1x64xf32>
    %c0_475 = arith.constant 0 : index
    %c64_476 = arith.constant 64 : index
    %711 = vector.load %arg22[%c0_475, %c64_476] : memref<2x1024xf32, #tpu.memory_space<vmem>>, vector<1x64xf32>
    tpu.vector_store %arg22[%c0_475, %c64_476], %710 {strides = array<i32>} : memref<2x1024xf32, #tpu.memory_space<vmem>>, vector<1x64xf32>,
    %712 = vector.extract_strided_slice %707 {offsets = [2, 0], sizes = [1, 64], strides = [1, 1]} : vector<32x64xf32> to vector<1x64xf32>
    %c0_477 = arith.constant 0 : index
    %c128_478 = arith.constant 128 : index
    %713 = vector.load %arg22[%c0_477, %c128_478] : memref<2x1024xf32, #tpu.memory_space<vmem>>, vector<1x64xf32>
    tpu.vector_store %arg22[%c0_477, %c128_478], %712 {strides = array<i32>} : memref<2x1024xf32, #tpu.memory_space<vmem>>, vector<1x64xf32>,
    %714 = vector.extract_strided_slice %707 {offsets = [3, 0], sizes = [1, 64], strides = [1, 1]} : vector<32x64xf32> to vector<1x64xf32>
    %c0_479 = arith.constant 0 : index
    %c192_480 = arith.constant 192 : index
    %715 = vector.load %arg22[%c0_479, %c192_480] : memref<2x1024xf32, #tpu.memory_space<vmem>>, vector<1x64xf32>
    tpu.vector_store %arg22[%c0_479, %c192_480], %714 {strides = array<i32>} : memref<2x1024xf32, #tpu.memory_space<vmem>>, vector<1x64xf32>,
    %716 = vector.extract_strided_slice %707 {offsets = [4, 0], sizes = [1, 64], strides = [1, 1]} : vector<32x64xf32> to vector<1x64xf32>
    %c0_481 = arith.constant 0 : index
    %c256_482 = arith.constant 256 : index
    %717 = vector.load %arg22[%c0_481, %c256_482] : memref<2x1024xf32, #tpu.memory_space<vmem>>, vector<1x64xf32>
    tpu.vector_store %arg22[%c0_481, %c256_482], %716 {strides = array<i32>} : memref<2x1024xf32, #tpu.memory_space<vmem>>, vector<1x64xf32>,
    %718 = vector.extract_strided_slice %707 {offsets = [5, 0], sizes = [1, 64], strides = [1, 1]} : vector<32x64xf32> to vector<1x64xf32>
    %c0_483 = arith.constant 0 : index
    %c320_484 = arith.constant 320 : index
    %719 = vector.load %arg22[%c0_483, %c320_484] : memref<2x1024xf32, #tpu.memory_space<vmem>>, vector<1x64xf32>
    tpu.vector_store %arg22[%c0_483, %c320_484], %718 {strides = array<i32>} : memref<2x1024xf32, #tpu.memory_space<vmem>>, vector<1x64xf32>,
    %720 = vector.extract_strided_slice %707 {offsets = [6, 0], sizes = [1, 64], strides = [1, 1]} : vector<32x64xf32> to vector<1x64xf32>
    %c0_485 = arith.constant 0 : index
    %c384_486 = arith.constant 384 : index
    %721 = vector.load %arg22[%c0_485, %c384_486] : memref<2x1024xf32, #tpu.memory_space<vmem>>, vector<1x64xf32>
    tpu.vector_store %arg22[%c0_485, %c384_486], %720 {strides = array<i32>} : memref<2x1024xf32, #tpu.memory_space<vmem>>, vector<1x64xf32>,
    %722 = vector.extract_strided_slice %707 {offsets = [7, 0], sizes = [1, 64], strides = [1, 1]} : vector<32x64xf32> to vector<1x64xf32>
    %c0_487 = arith.constant 0 : index
    %c448_488 = arith.constant 448 : index
    %723 = vector.load %arg22[%c0_487, %c448_488] : memref<2x1024xf32, #tpu.memory_space<vmem>>, vector<1x64xf32>
    tpu.vector_store %arg22[%c0_487, %c448_488], %722 {strides = array<i32>} : memref<2x1024xf32, #tpu.memory_space<vmem>>, vector<1x64xf32>,
    %724 = vector.extract_strided_slice %707 {offsets = [8, 0], sizes = [1, 64], strides = [1, 1]} : vector<32x64xf32> to vector<1x64xf32>
    %c0_489 = arith.constant 0 : index
    %c512_490 = arith.constant 512 : index
    %725 = vector.load %arg22[%c0_489, %c512_490] : memref<2x1024xf32, #tpu.memory_space<vmem>>, vector<1x64xf32>
    tpu.vector_store %arg22[%c0_489, %c512_490], %724 {strides = array<i32>} : memref<2x1024xf32, #tpu.memory_space<vmem>>, vector<1x64xf32>,
    %726 = vector.extract_strided_slice %707 {offsets = [9, 0], sizes = [1, 64], strides = [1, 1]} : vector<32x64xf32> to vector<1x64xf32>
    %c0_491 = arith.constant 0 : index
    %c576_492 = arith.constant 576 : index
    %727 = vector.load %arg22[%c0_491, %c576_492] : memref<2x1024xf32, #tpu.memory_space<vmem>>, vector<1x64xf32>
    tpu.vector_store %arg22[%c0_491, %c576_492], %726 {strides = array<i32>} : memref<2x1024xf32, #tpu.memory_space<vmem>>, vector<1x64xf32>,
    %728 = vector.extract_strided_slice %707 {offsets = [10, 0], sizes = [1, 64], strides = [1, 1]} : vector<32x64xf32> to vector<1x64xf32>
    %c0_493 = arith.constant 0 : index
    %c640_494 = arith.constant 640 : index
    %729 = vector.load %arg22[%c0_493, %c640_494] : memref<2x1024xf32, #tpu.memory_space<vmem>>, vector<1x64xf32>
    tpu.vector_store %arg22[%c0_493, %c640_494], %728 {strides = array<i32>} : memref<2x1024xf32, #tpu.memory_space<vmem>>, vector<1x64xf32>,
    %730 = vector.extract_strided_slice %707 {offsets = [11, 0], sizes = [1, 64], strides = [1, 1]} : vector<32x64xf32> to vector<1x64xf32>
    %c0_495 = arith.constant 0 : index
    %c704_496 = arith.constant 704 : index
    %731 = vector.load %arg22[%c0_495, %c704_496] : memref<2x1024xf32, #tpu.memory_space<vmem>>, vector<1x64xf32>
    tpu.vector_store %arg22[%c0_495, %c704_496], %730 {strides = array<i32>} : memref<2x1024xf32, #tpu.memory_space<vmem>>, vector<1x64xf32>,
    %732 = vector.extract_strided_slice %707 {offsets = [12, 0], sizes = [1, 64], strides = [1, 1]} : vector<32x64xf32> to vector<1x64xf32>
    %c0_497 = arith.constant 0 : index
    %c768_498 = arith.constant 768 : index
    %733 = vector.load %arg22[%c0_497, %c768_498] : memref<2x1024xf32, #tpu.memory_space<vmem>>, vector<1x64xf32>
    tpu.vector_store %arg22[%c0_497, %c768_498], %732 {strides = array<i32>} : memref<2x1024xf32, #tpu.memory_space<vmem>>, vector<1x64xf32>,
    %734 = vector.extract_strided_slice %707 {offsets = [13, 0], sizes = [1, 64], strides = [1, 1]} : vector<32x64xf32> to vector<1x64xf32>
    %c0_499 = arith.constant 0 : index
    %c832_500 = arith.constant 832 : index
    %735 = vector.load %arg22[%c0_499, %c832_500] : memref<2x1024xf32, #tpu.memory_space<vmem>>, vector<1x64xf32>
    tpu.vector_store %arg22[%c0_499, %c832_500], %734 {strides = array<i32>} : memref<2x1024xf32, #tpu.memory_space<vmem>>, vector<1x64xf32>,
    %736 = vector.extract_strided_slice %707 {offsets = [14, 0], sizes = [1, 64], strides = [1, 1]} : vector<32x64xf32> to vector<1x64xf32>
    %c0_501 = arith.constant 0 : index
    %c896_502 = arith.constant 896 : index
    %737 = vector.load %arg22[%c0_501, %c896_502] : memref<2x1024xf32, #tpu.memory_space<vmem>>, vector<1x64xf32>
    tpu.vector_store %arg22[%c0_501, %c896_502], %736 {strides = array<i32>} : memref<2x1024xf32, #tpu.memory_space<vmem>>, vector<1x64xf32>,
    %738 = vector.extract_strided_slice %707 {offsets = [15, 0], sizes = [1, 64], strides = [1, 1]} : vector<32x64xf32> to vector<1x64xf32>
    %c0_503 = arith.constant 0 : index
    %c960_504 = arith.constant 960 : index
    %739 = vector.load %arg22[%c0_503, %c960_504] : memref<2x1024xf32, #tpu.memory_space<vmem>>, vector<1x64xf32>
    tpu.vector_store %arg22[%c0_503, %c960_504], %738 {strides = array<i32>} : memref<2x1024xf32, #tpu.memory_space<vmem>>, vector<1x64xf32>,
    %740 = vector.extract_strided_slice %707 {offsets = [16, 0], sizes = [1, 64], strides = [1, 1]} : vector<32x64xf32> to vector<1x64xf32>
    %c1_505 = arith.constant 1 : index
    %c0_506 = arith.constant 0 : index
    %741 = vector.load %arg22[%c1_505, %c0_506] : memref<2x1024xf32, #tpu.memory_space<vmem>>, vector<1x64xf32>
    tpu.vector_store %arg22[%c1_505, %c0_506], %740 {strides = array<i32>} : memref<2x1024xf32, #tpu.memory_space<vmem>>, vector<1x64xf32>,
    %742 = vector.extract_strided_slice %707 {offsets = [17, 0], sizes = [1, 64], strides = [1, 1]} : vector<32x64xf32> to vector<1x64xf32>
    %c1_507 = arith.constant 1 : index
    %c64_508 = arith.constant 64 : index
    %743 = vector.load %arg22[%c1_507, %c64_508] : memref<2x1024xf32, #tpu.memory_space<vmem>>, vector<1x64xf32>
    tpu.vector_store %arg22[%c1_507, %c64_508], %742 {strides = array<i32>} : memref<2x1024xf32, #tpu.memory_space<vmem>>, vector<1x64xf32>,
    %744 = vector.extract_strided_slice %707 {offsets = [18, 0], sizes = [1, 64], strides = [1, 1]} : vector<32x64xf32> to vector<1x64xf32>
    %c1_509 = arith.constant 1 : index
    %c128_510 = arith.constant 128 : index
    %745 = vector.load %arg22[%c1_509, %c128_510] : memref<2x1024xf32, #tpu.memory_space<vmem>>, vector<1x64xf32>
    tpu.vector_store %arg22[%c1_509, %c128_510], %744 {strides = array<i32>} : memref<2x1024xf32, #tpu.memory_space<vmem>>, vector<1x64xf32>,
    %746 = vector.extract_strided_slice %707 {offsets = [19, 0], sizes = [1, 64], strides = [1, 1]} : vector<32x64xf32> to vector<1x64xf32>
    %c1_511 = arith.constant 1 : index
    %c192_512 = arith.constant 192 : index
    %747 = vector.load %arg22[%c1_511, %c192_512] : memref<2x1024xf32, #tpu.memory_space<vmem>>, vector<1x64xf32>
    tpu.vector_store %arg22[%c1_511, %c192_512], %746 {strides = array<i32>} : memref<2x1024xf32, #tpu.memory_space<vmem>>, vector<1x64xf32>,
    %748 = vector.extract_strided_slice %707 {offsets = [20, 0], sizes = [1, 64], strides = [1, 1]} : vector<32x64xf32> to vector<1x64xf32>
    %c1_513 = arith.constant 1 : index
    %c256_514 = arith.constant 256 : index
    %749 = vector.load %arg22[%c1_513, %c256_514] : memref<2x1024xf32, #tpu.memory_space<vmem>>, vector<1x64xf32>
    tpu.vector_store %arg22[%c1_513, %c256_514], %748 {strides = array<i32>} : memref<2x1024xf32, #tpu.memory_space<vmem>>, vector<1x64xf32>,
    %750 = vector.extract_strided_slice %707 {offsets = [21, 0], sizes = [1, 64], strides = [1, 1]} : vector<32x64xf32> to vector<1x64xf32>
    %c1_515 = arith.constant 1 : index
    %c320_516 = arith.constant 320 : index
    %751 = vector.load %arg22[%c1_515, %c320_516] : memref<2x1024xf32, #tpu.memory_space<vmem>>, vector<1x64xf32>
    tpu.vector_store %arg22[%c1_515, %c320_516], %750 {strides = array<i32>} : memref<2x1024xf32, #tpu.memory_space<vmem>>, vector<1x64xf32>,
    %752 = vector.extract_strided_slice %707 {offsets = [22, 0], sizes = [1, 64], strides = [1, 1]} : vector<32x64xf32> to vector<1x64xf32>
    %c1_517 = arith.constant 1 : index
    %c384_518 = arith.constant 384 : index
    %753 = vector.load %arg22[%c1_517, %c384_518] : memref<2x1024xf32, #tpu.memory_space<vmem>>, vector<1x64xf32>
    tpu.vector_store %arg22[%c1_517, %c384_518], %752 {strides = array<i32>} : memref<2x1024xf32, #tpu.memory_space<vmem>>, vector<1x64xf32>,
    %754 = vector.extract_strided_slice %707 {offsets = [23, 0], sizes = [1, 64], strides = [1, 1]} : vector<32x64xf32> to vector<1x64xf32>
    %c1_519 = arith.constant 1 : index
    %c448_520 = arith.constant 448 : index
    %755 = vector.load %arg22[%c1_519, %c448_520] : memref<2x1024xf32, #tpu.memory_space<vmem>>, vector<1x64xf32>
    tpu.vector_store %arg22[%c1_519, %c448_520], %754 {strides = array<i32>} : memref<2x1024xf32, #tpu.memory_space<vmem>>, vector<1x64xf32>,
    %756 = vector.extract_strided_slice %707 {offsets = [24, 0], sizes = [1, 64], strides = [1, 1]} : vector<32x64xf32> to vector<1x64xf32>
    %c1_521 = arith.constant 1 : index
    %c512_522 = arith.constant 512 : index
    %757 = vector.load %arg22[%c1_521, %c512_522] : memref<2x1024xf32, #tpu.memory_space<vmem>>, vector<1x64xf32>
    tpu.vector_store %arg22[%c1_521, %c512_522], %756 {strides = array<i32>} : memref<2x1024xf32, #tpu.memory_space<vmem>>, vector<1x64xf32>,
    %758 = vector.extract_strided_slice %707 {offsets = [25, 0], sizes = [1, 64], strides = [1, 1]} : vector<32x64xf32> to vector<1x64xf32>
    %c1_523 = arith.constant 1 : index
    %c576_524 = arith.constant 576 : index
    %759 = vector.load %arg22[%c1_523, %c576_524] : memref<2x1024xf32, #tpu.memory_space<vmem>>, vector<1x64xf32>
    tpu.vector_store %arg22[%c1_523, %c576_524], %758 {strides = array<i32>} : memref<2x1024xf32, #tpu.memory_space<vmem>>, vector<1x64xf32>,
    %760 = vector.extract_strided_slice %707 {offsets = [26, 0], sizes = [1, 64], strides = [1, 1]} : vector<32x64xf32> to vector<1x64xf32>
    %c1_525 = arith.constant 1 : index
    %c640_526 = arith.constant 640 : index
    %761 = vector.load %arg22[%c1_525, %c640_526] : memref<2x1024xf32, #tpu.memory_space<vmem>>, vector<1x64xf32>
    tpu.vector_store %arg22[%c1_525, %c640_526], %760 {strides = array<i32>} : memref<2x1024xf32, #tpu.memory_space<vmem>>, vector<1x64xf32>,
    %762 = vector.extract_strided_slice %707 {offsets = [27, 0], sizes = [1, 64], strides = [1, 1]} : vector<32x64xf32> to vector<1x64xf32>
    %c1_527 = arith.constant 1 : index
    %c704_528 = arith.constant 704 : index
    %763 = vector.load %arg22[%c1_527, %c704_528] : memref<2x1024xf32, #tpu.memory_space<vmem>>, vector<1x64xf32>
    tpu.vector_store %arg22[%c1_527, %c704_528], %762 {strides = array<i32>} : memref<2x1024xf32, #tpu.memory_space<vmem>>, vector<1x64xf32>,
    %764 = vector.extract_strided_slice %707 {offsets = [28, 0], sizes = [1, 64], strides = [1, 1]} : vector<32x64xf32> to vector<1x64xf32>
    %c1_529 = arith.constant 1 : index
    %c768_530 = arith.constant 768 : index
    %765 = vector.load %arg22[%c1_529, %c768_530] : memref<2x1024xf32, #tpu.memory_space<vmem>>, vector<1x64xf32>
    tpu.vector_store %arg22[%c1_529, %c768_530], %764 {strides = array<i32>} : memref<2x1024xf32, #tpu.memory_space<vmem>>, vector<1x64xf32>,
    %766 = vector.extract_strided_slice %707 {offsets = [29, 0], sizes = [1, 64], strides = [1, 1]} : vector<32x64xf32> to vector<1x64xf32>
    %c1_531 = arith.constant 1 : index
    %c832_532 = arith.constant 832 : index
    %767 = vector.load %arg22[%c1_531, %c832_532] : memref<2x1024xf32, #tpu.memory_space<vmem>>, vector<1x64xf32>
    tpu.vector_store %arg22[%c1_531, %c832_532], %766 {strides = array<i32>} : memref<2x1024xf32, #tpu.memory_space<vmem>>, vector<1x64xf32>,
    %768 = vector.extract_strided_slice %707 {offsets = [30, 0], sizes = [1, 64], strides = [1, 1]} : vector<32x64xf32> to vector<1x64xf32>
    %c1_533 = arith.constant 1 : index
    %c896_534 = arith.constant 896 : index
    %769 = vector.load %arg22[%c1_533, %c896_534] : memref<2x1024xf32, #tpu.memory_space<vmem>>, vector<1x64xf32>
    tpu.vector_store %arg22[%c1_533, %c896_534], %768 {strides = array<i32>} : memref<2x1024xf32, #tpu.memory_space<vmem>>, vector<1x64xf32>,
    %770 = vector.extract_strided_slice %707 {offsets = [31, 0], sizes = [1, 64], strides = [1, 1]} : vector<32x64xf32> to vector<1x64xf32>
    %c1_535 = arith.constant 1 : index
    %c960_536 = arith.constant 960 : index
    %771 = vector.load %arg22[%c1_535, %c960_536] : memref<2x1024xf32, #tpu.memory_space<vmem>>, vector<1x64xf32>
    tpu.vector_store %arg22[%c1_535, %c960_536], %770 {strides = array<i32>} : memref<2x1024xf32, #tpu.memory_space<vmem>>, vector<1x64xf32>,
    %c0_537 = arith.constant 0 : index
    %c0_538 = arith.constant 0 : index
    %772 = vector.load %arg22[%c0_537, %c0_538] : memref<2x1024xf32, #tpu.memory_space<vmem>>, vector<2x1024xf32>
    %773 = arith.truncf %772 : vector<2x1024xf32> to vector<2x1024xbf16>
    %c1_539 = arith.constant 1 : index
    %c0_540 = arith.constant 0 : index
    %c0_541 = arith.constant 0 : index
    %774 = vector.load %arg17[%c1_539, %c0_540, %c0_541] : memref<2x1024x256xbf16, #tpu.memory_space<vmem>>, vector<1x1024x256xbf16>
    %775 = vector.shape_cast %774 : vector<1x1024x256xbf16> to vector<1024x256xbf16>
    %cst_542 = arith.constant dense<0.000000e+00> : vector<2x256xf32>
    %776 = tpu.matmul %773, %775, %cst_542 {dimension_numbers = #tpu.dot_dimension_numbers<[1], [0], [0], [1], [0, 0, 1, 1], [], []>} : vector<2x1024xbf16>, vector<1024x256xbf16>, vector<2x256xf32> -> vector<2x256xf32>
    %c1_543 = arith.constant 1 : index
    %c0_544 = arith.constant 0 : index
    %c0_545 = arith.constant 0 : index
    %777 = vector.load %arg18[%c1_543, %c0_544, %c0_545] : memref<2x1x256xf32, #tpu.memory_space<vmem>>, vector<1x1x256xf32>
    %778 = vector.shape_cast %777 : vector<1x1x256xf32> to vector<1x256xf32>
    %779 = vector.broadcast %778 : vector<1x256xf32> to vector<2x256xf32>
    %780 = arith.addf %776, %779 : vector<2x256xf32>
    %cst_546 = arith.constant 0.000000e+00 : f32
    %781 = vector.broadcast %cst_546 : f32 to vector<2x256xf32>
    %782 = arith.cmpf oge, %780, %781 : vector<2x256xf32>
    %cst_547 = arith.constant 1.000000e-01 : f32
    %783 = vector.broadcast %cst_547 : f32 to vector<2x256xf32>
    %784 = arith.mulf %783, %780 : vector<2x256xf32>
    %785 = arith.select %782, %780, %784 : vector<2x256xi1>, vector<2x256xf32>
    %786 = arith.truncf %785 : vector<2x256xf32> to vector<2x256xbf16>
    %c1_548 = arith.constant 1 : index
    %c0_549 = arith.constant 0 : index
    %c0_550 = arith.constant 0 : index
    %787 = vector.load %arg19[%c1_548, %c0_549, %c0_550] : memref<2x256x128xbf16, #tpu.memory_space<vmem>>, vector<1x256x128xbf16>
    %788 = vector.shape_cast %787 : vector<1x256x128xbf16> to vector<256x128xbf16>
    %cst_551 = arith.constant dense<0.000000e+00> : vector<2x128xf32>
    %789 = tpu.matmul %786, %788, %cst_551 {dimension_numbers = #tpu.dot_dimension_numbers<[1], [0], [0], [1], [0, 0, 1, 1], [], []>} : vector<2x256xbf16>, vector<256x128xbf16>, vector<2x128xf32> -> vector<2x128xf32>
    %c1_552 = arith.constant 1 : index
    %c0_553 = arith.constant 0 : index
    %c0_554 = arith.constant 0 : index
    %790 = vector.load %arg20[%c1_552, %c0_553, %c0_554] : memref<2x1x128xf32, #tpu.memory_space<vmem>>, vector<1x1x128xf32>
    %791 = vector.shape_cast %790 : vector<1x1x128xf32> to vector<1x128xf32>
    %792 = vector.broadcast %791 : vector<1x128xf32> to vector<2x128xf32>
    %793 = arith.addf %789, %792 : vector<2x128xf32>
    %c1_555 = arith.constant 1 : index
    %c0_556 = arith.constant 0 : index
    %c0_557 = arith.constant 0 : index
    %794 = vector.load %arg21[%c1_555, %c0_556, %c0_557] : memref<2x2x128xf32, #tpu.memory_space<vmem>>, vector<1x2x128xf32>
    %795 = vector.shape_cast %794 : vector<1x2x128xf32> to vector<2x128xf32>
    %796 = vector.shape_cast %793 : vector<2x128xf32> to vector<1x2x128xf32>
    tpu.vector_store %arg21[%c1_555, %c0_556, %c0_557], %796 {strides = array<i32>} : memref<2x2x128xf32, #tpu.memory_space<vmem>>, vector<1x2x128xf32>,
    return
  }
}

</mosaic_0001>

<bundles_post_ra>
// kernel: mixer_forward.1
= control target key start
LH: loop header
LB: loop body
LE: loop exit
PB: predicated region body
PF: predicated region fallthrough
CT: control target
= control target key end

     0   :  { %v8206_v0 = vmov 0   ;;  %vm194_vm0 = vcmask 523264   ;;  %vm365_vm1 = vcmask 130048   ;;  %vm8208_vm2 = vmmov 0   ;;  %s8210_s29 = smov 64   ;;  %s10441_s1 = inlined_call_operand.vmem [shape: bf16[2,192,64], index: 1, kind: input, shape index: {}]   ;;  %s10442_s0 = inlined_call_operand.vmem [shape: bf16[32,192], index: 0, kind: input, shape index: {}]   ;;  %s10443_s2 = inlined_call_operand.vmem [shape: f32[2,1,64], index: 2, kind: input, shape index: {}]   ;;  %s10444_s6 = inlined_call_operand.vmem [shape: f32[2,2,32,1], index: 6, kind: input, shape index: {}]   ;;  %s10445_s5 = inlined_call_operand.vmem [shape: bf16[2,2,32,16], index: 5, kind: input, shape index: {}]   ;;  %s10446_s8 = inlined_call_operand.vmem [shape: f32[2,2,16,1], index: 8, kind: input, shape index: {}]   ;;  %s10447_s3 = inlined_call_operand.vmem [shape: f32[2,2,1,64], index: 3, kind: input, shape index: {}]   ;;  %s10448_s4 = inlined_call_operand.vmem [shape: f32[2,2,1,64], index: 4, kind: input, shape index: {}]   ;;  %s10449_s7 = inlined_call_operand.vmem [shape: bf16[2,2,16,32], index: 7, kind: input, shape index: {}]   ;;  %s10450_s9 = inlined_call_operand.vmem [shape: f32[2,2,1,64], index: 9, kind: input, shape index: {}]   ;;  %s10451_s10 = inlined_call_operand.vmem [shape: f32[2,2,1,64], index: 10, kind: input, shape index: {}]   ;;  %s10452_s11 = inlined_call_operand.vmem [shape: bf16[2,2,64,128], index: 11, kind: input, shape index: {}]   ;;  %s10453_s13 = inlined_call_operand.vmem [shape: bf16[2,2,128,64], index: 13, kind: input, shape index: {}]   ;;  %s10454_s12 = inlined_call_operand.vmem [shape: f32[2,2,1,128], index: 12, kind: input, shape index: {}]   ;;  %s10455_s14 = inlined_call_operand.vmem [shape: f32[2,2,1,64], index: 14, kind: input, shape index: {}]   ;;  %s10456_s17 = inlined_call_operand.vmem [shape: bf16[2,1024,256], index: 17, kind: input, shape index: {}]   ;;  %s10457_s15 = inlined_call_operand.vmem [shape: f32[2,1,64], index: 15, kind: input, shape index: {}]   ;;  %s10458_s16 = inlined_call_operand.vmem [shape: f32[2,1,64], index: 16, kind: input, shape index: {}]   ;;  %s10459_s19 = inlined_call_operand.vmem [shape: bf16[2,256,128], index: 19, kind: input, shape index: {}]   ;;  %s10460_s18 = inlined_call_operand.vmem [shape: f32[2,1,256], index: 18, kind: input, shape index: {}]   ;;  %s10461_s20 = inlined_call_operand.vmem [shape: f32[2,1,128], index: 20, kind: input, shape index: {}]   ;;  %s10462_s21 = inlined_call_operand.vmem [shape: f32[2,2,128], index: 21, kind: output, shape index: {}]  }
   0x1   :  { %10471 = sst [smem:[#allocation3_spill]] %s10441_s1  ;;  %201 = vmatprep.subr.bf16.mxu1 %v8206_v0  ;;  %7516 = vset.pattern.permute.xlu1 %v8206_v0  ;;  %vm478_vm3 = vcmask 261120   ;;  %vm1807_vm4 = vcmask 516096   ;;  %vm1822_vm5 = vcmask 1040896  }
   0x2   :  { %10472 = sst [smem:[#allocation4_spill]] %s10442_s0  ;;  %s10478_s26 = sld [smem:[#allocation3_spill]]  ;;  %7515 = vset.pattern.permute.xlu0 %v8206_v0 }
   0x3   :  { %10473 = sst [smem:[#allocation5_spill]] %s10443_s2  ;;  %s10479_s22 = sld [smem:[#allocation4_spill]] }
   0x4   :  { %10474 = sst [smem:[#allocation6_spill]] %s10444_s6  ;;  %s10480_s30 = sld [smem:[#allocation5_spill]] }
   0x5   :  { %10475 = sst [smem:[#allocation7_spill]] %s10445_s5  ;;  %s10481_s0 = sld [smem:[#allocation6_spill]] }
   0x6   :  { %10476 = sst [smem:[#allocation8_spill]] %s10446_s8  ;;  %s10482_s5 = sld [smem:[#allocation7_spill]] }
   0x7   :  { %10477 = sst [smem:[#allocation9_spill]] %s10455_s14  ;;  %s10483_s24 = sld [smem:[#allocation8_spill]] }
   0x8   :  { %v7517_v1 = vld [vmem:[%s10478_s26] sm:$0xff]   ;;  %v7518_v2 = vld [vmem:[%s10478_s26 + $0x8] sm:$0xff]   ;;  %v7519_v3 = vld [vmem:[%s10478_s26 + $0x10] sm:$0xff]   ;;  %s10484_s27 = sld [smem:[#allocation5_spill]] }
   0x9   :  { %202 = vmatpush1.bf16.msra.mxu1 %v7517_v1  ;;  %v7520_v4 = vld [vmem:[%s10478_s26 + $0x18] sm:$0xff]   ;;  %v7531_v5 = vld [vmem:[%s10479_s22 + $0x4] ss:$8 sps:$4 sm:$0xff]   ;;  %v7523_v8 = vld [vmem:[%s10478_s26 + $0x30] sm:$0xff]  }
   0xa   :  { %203 = vmatprep.subr.bf16.mxu1 %v8206_v0  ;;  %v7521_v6 = vld [vmem:[%s10478_s26 + $0x20] sm:$0xff]   ;;  %6313 = vmatprep.mubr.msk.bf16.mxu1 %vm194_vm0, %v7531_v5  ;;  %v7522_v7 = vld [vmem:[%s10478_s26 + $0x28] sm:$0xff]   ;;  %v7524_v9 = vld [vmem:[%s10478_s26 + $0x38] sm:$0xff]  }
   0xb   :  { %v7525_v10 = vld [vmem:[%s10478_s26 + $0x40] sm:$0xff]   ;;  %v7526_v11 = vld [vmem:[%s10478_s26 + $0x48] sm:$0xff]   ;;  %v7527_v12 = vld [vmem:[%s10478_s26 + $0x50] sm:$0xff]  }
   0xc   :  { %v7528_v13 = vld [vmem:[%s10478_s26 + $0x58] sm:$0xff]   ;;  %v7529_v14 = vld [vmem:[%s10479_s22] ss:$8 sps:$4 sm:$0xff]   ;;  %v333_v46 = vld [vmem:[%s10481_s0 + $0x10] sm:$0xff] }
   0xd   :  { %204 = vmatpush1.bf16.msra.mxu1 %v7518_v2  ;;  %v7532_v15 = vld [vmem:[%s10479_s22 + $0x14] ss:$8 sps:$4 sm:$0xff]   ;;  %v7534_v16 = vld [vmem:[%s10479_s22 + $0x10] ss:$8 sps:$4 sm:$0xff]   ;;  %v6296_v17 = vld [vmem:[%s10480_s30] ss:$0 sm:$0xff] }
   0xe   :  { %205 = vmatprep.subr.bf16.mxu1 %v8206_v0  ;;  %v331_v33 = vld [vmem:[%s10481_s0] sm:$0xff]  ;;  %v332_v45 = vld [vmem:[%s10481_s0 + $0x8] sm:$0xff]  ;;  %v334_v47 = vld [vmem:[%s10481_s0 + $0x18] sm:$0xff] }
   0xf   :  { %v8423_v48 = vld [vmem:[%s10482_s5] sm:$0xff]  }
  0x10   :  { %v461_v54 = vld [vmem:[%s10483_s24] sm:$0xff] }
  0x11   :  { %206 = vmatpush1.bf16.msra.mxu1 %v7519_v3  ;;  %v8445_v5 = vld [vmem:[%s10447_s3] ss:$0 sm:$0xff] }
  0x12   :  { %207 = vmatprep.subr.bf16.mxu1 %v8206_v0 }
  0x15   :  { %208 = vmatpush1.bf16.msra.mxu1 %v7520_v4 }
  0x16   :  { %209 = vmatprep.subr.bf16.mxu1 %v8206_v0 }
  0x19   :  { %210 = vmatpush1.bf16.msra.mxu1 %v7521_v6 }
  0x1a   :  { %211 = vmatprep.subr.bf16.mxu1 %v8206_v0 }
  0x1d   :  { %212 = vmatpush1.bf16.msra.mxu1 %v7522_v7 }
  0x1e   :  { %213 = vmatprep.subr.bf16.mxu1 %v8206_v0 }
  0x21   :  { %214 = vmatpush1.bf16.msra.mxu1 %v7523_v8 }
  0x22   :  { %215 = vmatprep.subr.bf16.mxu1 %v8206_v0 }
  0x25   :  { %216 = vmatpush1.bf16.msra.mxu1 %v7524_v9  ;;  %v8451_v9 = vld [vmem:[%s10448_s4] ss:$0 sm:$0xff] }
  0x26   :  { %217 = vmatprep.subr.bf16.mxu1 %v8206_v0 }
  0x29   :  { %218 = vmatpush1.bf16.msra.mxu1 %v7525_v10 }
  0x2a   :  { %219 = vmatprep.subr.bf16.mxu1 %v8206_v0 }
  0x2d   :  { %220 = vmatpush1.bf16.msra.mxu1 %v7526_v11 }
  0x2e   :  { %221 = vmatprep.subr.bf16.mxu1 %v8206_v0 }
  0x31   :  { %222 = vmatpush1.bf16.msra.mxu1 %v7527_v12 }
  0x32   :  { %223 = vmatprep.subr.bf16.mxu1 %v8206_v0 }
  0x35   :  { %224 = vmatpush1.bf16.msra.mxu1 %v7528_v13 }
  0x38   :  { %234 = vmatmul.mubr.bf16.vlgmr.msra.gmra.mrb[0].mxu1 %v7529_v14  ;;  %v8459_v14 = vld [vmem:[%s10482_s5 + $0x8] sm:$0xff]  }
  0x39   :  { %6314 = vmatprep.mubr.msk.bf16.mxu1 %vm194_vm0, %v7532_v15  ;;  %v462_v15 = vld [vmem:[%s10483_s24 + $0x8] sm:$0xff] }
  0x40   :  { %242 = vmatmul.mubr.bf16.gmra.mrb[4].mxu1 %v7534_v16  ;;  %v8207_v16 = vmov 0.0  }
  0x41   :  { %7246 = vmatprep.mubr.msk.bf16.mxu1 %vm365_vm1, %v8423_v48 }
 0x10b   :  { %v235_v18 = vpop.f32.mrb[0].mxu1 }
 0x10c   :  { %v8388_v19 = vadd.f32 %v6296_v17, %v235_v18  ;;  %v237_v20 = vpop.f32.mrb[1].mxu1 }
 0x10d   :  { %v238_v21 = vpop.f32.mrb[2].mxu1 }
 0x10e   :  { %v8390_v22 = vadd.f32 %v6296_v17, %v238_v21  ;;  %v240_v23 = vpop.f32.mrb[3].mxu1  ;;  %v252_v24 = vsel %vm194_vm0, %v8388_v19, 0.0 }
 0x10f   :  { %253 = vadd.xlane.f32.xlu0 %v252_v24 }
 0x110   :  { %v255_v25 = vsel %vm194_vm0, %v8390_v22, 0.0 }
 0x113   :  { %256 = vadd.xlane.f32.xlu0 %v255_v25  ;;  %v243_v26 = vpop.f32.mrb[4].mxu1 }
 0x114   :  { %v8396_v27 = vadd.f32 %v6296_v17, %v243_v26  ;;  %v245_v28 = vpop.f32.mrb[5].mxu1 }
 0x115   :  { %v246_v30 = vpop.f32.mrb[6].mxu1 }
 0x116   :  { %v258_v29 = vsel %vm194_vm0, %v8396_v27, 0.0  ;;  %v8400_v31 = vadd.f32 %v6296_v17, %v246_v30  ;;  %v248_v32 = vpop.f32.mrb[7].mxu1 }
 0x117   :  { %259 = vadd.xlane.f32.xlu0 %v258_v29 }
 0x118   :  { %v261_v44 = vsel %vm194_vm0, %v8400_v31, 0.0 }
 0x12d   :  { %337 = vperm.xlu0 %7515, %v331_v33  }
 0x19c   :  { %v254_v34 = vpop.xlane.xlu0 %253 }
 0x19d   :  { %v265_v35 = vmul.f32 0.015625, %v254_v34 }
 0x19f   :  { %v269_v36 = vsub.f32 %v8388_v19, %v265_v35 }
 0x1a0   :  { %v257_v37 = vpop.xlane.xlu0 %256 }
 0x1a1   :  { %v266_v38 = vmul.f32 0.015625, %v257_v37  ;;  %v273_v39 = vmul.f32 %v269_v36, %v269_v36 }
 0x1a3   :  { %v270_v40 = vsub.f32 %v8390_v22, %v266_v38  ;;  %v277_v41 = vsel %vm194_vm0, %v273_v39, 0.0 }
 0x1a4   :  { %278 = vadd.xlane.f32.xlu1 %v277_v41  ;;  %v260_v49 = vpop.xlane.xlu0 %259 }
 0x1a5   :  { %v274_v42 = vmul.f32 %v270_v40, %v270_v40  ;;  %v267_v50 = vmul.f32 0.015625, %v260_v49 }
 0x1a7   :  { %v280_v43 = vsel %vm194_vm0, %v274_v42, 0.0  ;;  %v8428_v51 = vsub.f32 %v8396_v27, %v267_v50 }
 0x1a8   :  { %281 = vadd.xlane.f32.xlu1 %v280_v43 }
 0x1a9   :  { %v275_v52 = vmul.f32 %v8428_v51, %v8428_v51 }
 0x1ab   :  { %v283_v53 = vsel %vm194_vm0, %v275_v52, 0.0 }
 0x1ac   :  { %262 = vadd.xlane.f32.xlu1 %v261_v44  ;;  %v8473_v20 = vpop.permute.xlu0 %337 }
 0x1bd   :  { %342 = vperm.xlu1 %7516, %v332_v45  }
 0x1c1   :  { %347 = vperm.xlu1 %7516, %v333_v46  }
 0x1c5   :  { %352 = vperm.xlu1 %7516, %v334_v47  }
 0x1e9   :  { %284 = vadd.xlane.f32.xlu1 %v283_v53 }
 0x1fa   :  { %465 = vperm.xlu1 %7516, %v461_v54  }
 0x231   :  { %v279_v55 = vpop.xlane.xlu1 %278 }
 0x232   :  { %v289_v56 = vmul.f32 0.015625, %v279_v55 }
 0x234   :  { %v293_v57 = vadd.f32 1e-06, %v289_v56 }
 0x235   :  { %v282_v58 = vpop.xlane.xlu1 %281 }
 0x236   :  { %8026 = vrsqrt.f32 %v293_v57  ;;  %v290_v59 = vmul.f32 0.015625, %v282_v58 }
 0x238   :  { %v294_v60 = vadd.f32 1e-06, %v290_v59 }
 0x239   :  { %v263_v61 = vpop.xlane.xlu1 %262 }
 0x23a   :  { %8028 = vrsqrt.f32 %v294_v60  ;;  %v268_v62 = vmul.f32 0.015625, %v263_v61 }
 0x23c   :  { %v8437_v63 = vsub.f32 %v8400_v31, %v268_v62 }
 0x23d   :  { %v8469_v17 = vpop.permute.xlu1 %342 }
 0x23e   :  { %v276_v1 = vmul.f32 %v8437_v63, %v8437_v63 }
 0x240   :  { %v8027_v2 = vpop.eup %8026  ;;  %v286_v3 = vsel %vm194_vm0, %v276_v1, 0.0 }
 0x241   :  { %287 = vadd.xlane.f32.xlu0 %v286_v3  ;;  %v301_v4 = vmul.f32 %v8027_v2, %v269_v36  ;;  %v8471_v18 = vpop.permute.xlu1 %347 }
 0x243   :  { %v311_v8 = vmul.f32 %v8445_v5, %v301_v4 }
 0x244   :  { %v8029_v6 = vpop.eup %8028 }
 0x245   :  { %v302_v7 = vmul.f32 %v8029_v6, %v270_v40  ;;  %v321_v11 = vadd.f32 %v8451_v9, %v311_v8  ;;  %v8475_v21 = vpop.permute.xlu1 %352 }
 0x247   :  { %v312_v10 = vmul.f32 %v8445_v5, %v302_v7 }
 0x249   :  { %v322_v12 = vadd.f32 %v8451_v9, %v312_v10 }
 0x24b   :  { %v325_v13 = vpack.c.bf16 %v322_v12, %v321_v11 }
 0x24d   :  { %7244 = vmatprep.subr.bf16.mxu1 %v325_v13 }
 0x24e   :  { %7245 = vmatpush3.bf16.msra.mxu1 %v325_v13 }
 0x24f   :  { %7250 = vmatprep.subr.bf16.mxu1 %v8207_v16 }
 0x251   :  { %7247 = vmatmul.mubr.msk.bf16.vlgmr.msra.gmra.mrb[8].mxu1 %vm365_vm1, %v8459_v14 }
 0x252   :  { %7254 = vmatprep.mubr.msk.bf16.mxu1 %vm8208_vm2, %v8207_v16 }
 0x257   :  { %470 = vperm.xlu0 %7515, %v462_v15  }
 0x276   :  { %v285_v25 = vpop.xlane.xlu1 %284 }
 0x277   :  { %v291_v36 = vmul.f32 0.015625, %v285_v25 }
 0x279   :  { %v295_v46 = vadd.f32 1e-06, %v291_v36 }
 0x2ce   :  { %v288_v23 = vpop.xlane.xlu0 %287 }
 0x2cf   :  { %v292_v32 = vmul.f32 0.015625, %v288_v23 }
 0x2d1   :  { %v296_v43 = vadd.f32 1e-06, %v292_v32 }
 0x2d3   :  { %8030 = vrsqrt.f32 %v296_v43 }
 0x2d4   :  { %8032 = vrsqrt.f32 %v295_v46 }
 0x2dd   :  { %v8031_v61 = vpop.eup %8030 }
 0x2de   :  { %v8033_v62 = vpop.eup %8032  ;;  %v304_v4 = vmul.f32 %v8031_v61, %v8437_v63 }
 0x2df   :  { %v303_v13 = vmul.f32 %v8033_v62, %v8428_v51 }
 0x2e1   :  { %v313_v63 = vmul.f32 %v8445_v5, %v303_v13 }
 0x2e3   :  { %v323_v51 = vadd.f32 %v8451_v9, %v313_v63 }
 0x324   :  { %v7248_v24 = vpop.f32.mrb[8].mxu1 }
 0x325   :  { %v415_v26 = vadd.f32 %v7248_v24, %v8471_v18  ;;  %v406_v28 = vpop.f32.mrb[9].mxu1 }
 0x326   :  { %v407_v29 = vadd.f32 %v406_v28, %v8473_v20  ;;  %v7249_v30 = vpop.f32.mrb[10].mxu1 }
 0x327   :  { %v427_v33 = vmul.f32 0.044715, %v415_v26  ;;  %v418_v34 = vadd.f32 %v7249_v30, %v8475_v21  ;;  %v409_v35 = vpop.f32.mrb[11].mxu1  ;;  %v423_v10 = vmul.f32 0.5, %v415_v26  ;;  %v314_v30 = vmul.f32 %v8445_v5, %v304_v4  ;;  %v8502_v5 = vpop.permute.xlu1 %465 }
 0x328   :  { %v425_v37 = vmul.f32 0.044715, %v407_v29  ;;  %v410_v38 = vadd.f32 %v409_v35, %v8469_v17  ;;  %v421_v15 = vmul.f32 0.5, %v407_v29 }
 0x329   :  { %v431_v39 = vmul.f32 %v427_v33, %v415_v26  ;;  %v428_v40 = vmul.f32 0.044715, %v418_v34  ;;  %v424_v11 = vmul.f32 0.5, %v418_v34 }
 0x32a   :  { %v429_v41 = vmul.f32 %v425_v37, %v407_v29  ;;  %v426_v42 = vmul.f32 0.044715, %v410_v38  ;;  %v422_v23 = vmul.f32 0.5, %v410_v38  ;;  %v324_v37 = vadd.f32 %v8451_v9, %v314_v30 }
 0x32b   :  { %v435_v44 = vmul.f32 %v431_v39, %v415_v26  ;;  %v432_v45 = vmul.f32 %v428_v40, %v418_v34  ;;  %v8505_v39 = vpop.permute.xlu0 %470 }
 0x32c   :  { %v433_v47 = vmul.f32 %v429_v41, %v407_v29  ;;  %v430_v49 = vmul.f32 %v426_v42, %v410_v38 }
 0x32d   :  { %v439_v50 = vadd.f32 %v435_v44, %v415_v26  ;;  %v436_v52 = vmul.f32 %v432_v45, %v418_v34  ;;  %v326_v26 = vpack.c.bf16 %v324_v37, %v323_v51 }
 0x32e   :  { %v437_v53 = vadd.f32 %v433_v47, %v407_v29  ;;  %v434_v54 = vmul.f32 %v430_v49, %v410_v38  ;;  %v8491_v29 = vld [vmem:[%s10449_s7] sm:$0xff]  }
 0x32f   :  { %v443_v55 = vmul.f32 0.7978846, %v439_v50  ;;  %v440_v56 = vadd.f32 %v436_v52, %v418_v34 }
 0x330   :  { %v441_v57 = vmul.f32 0.7978846, %v437_v53  ;;  %v438_v58 = vadd.f32 %v434_v54, %v410_v38 }
 0x331   :  { %8034 = vtanh.f32 %v443_v55  ;;  %v444_v59 = vmul.f32 0.7978846, %v440_v56 }
 0x332   :  { %8036 = vtanh.f32 %v441_v57  ;;  %v442_v60 = vmul.f32 0.7978846, %v438_v58 }
 0x333   :  { %8038 = vtanh.f32 %v444_v59 }
 0x334   :  { %8040 = vtanh.f32 %v442_v60 }
 0x33b   :  { %v8035_v1 = vpop.eup %8034 }
 0x33c   :  { %v8037_v2 = vpop.eup %8036  ;;  %v451_v3 = vadd.f32 1.0, %v8035_v1 }
 0x33d   :  { %v8039_v6 = vpop.eup %8038  ;;  %v449_v7 = vadd.f32 1.0, %v8037_v2 }
 0x33e   :  { %v8041_v8 = vpop.eup %8040  ;;  %v452_v12 = vadd.f32 1.0, %v8039_v6  ;;  %v455_v25 = vmul.f32 %v451_v3, %v423_v10 }
 0x33f   :  { %v450_v24 = vadd.f32 1.0, %v8041_v8  ;;  %v453_v32 = vmul.f32 %v449_v7, %v421_v15 }
 0x340   :  { %v456_v28 = vmul.f32 %v452_v12, %v424_v11 }
 0x341   :  { %v454_v33 = vmul.f32 %v450_v24, %v422_v23 }
 0x342   :  { %v460_v35 = vpack.c.bf16 %v456_v28, %v455_v25 }
 0x343   :  { %v459_v36 = vpack.c.bf16 %v454_v33, %v453_v32 }
 0x345   :  { %7251 = vmatpush3.bf16.msra.mxu1 %v459_v36 }
 0x346   :  { %7252 = vmatprep.subr.bf16.mxu1 %v8207_v16 }
 0x349   :  { %7253 = vmatpush3.bf16.msra.mxu1 %v460_v35 }
 0x34a   :  { %7258 = vmatprep.subr.bf16.mxu1 %v326_v26 }
 0x34c   :  { %7255 = vmatmul.mubr.msk.bf16.vlgmr.msra.gmra.mrb[12].mxu1 %vm478_vm3, %v8491_v29 }
 0x34d   :  { %7259 = vmatpush3.bf16.msra.mxu1 %v326_v26  ;;  %7260 = vmatprep.mubr.msk.bf16.mxu1 %vm365_vm1, %v8423_v48 }
 0x34e   :  { %7264 = vmatprep.subr.bf16.mxu1 %v8207_v16 }
 0x354   :  { %7261 = vmatmul.mubr.msk.bf16.vlgmr.msra.gmra.mrb[16].mxu1 %vm365_vm1, %v8459_v14 }
 0x355   :  { %7268 = vmatprep.mubr.msk.bf16.mxu1 %vm8208_vm2, %v8207_v16 }
 0x41f   :  { %v516_v9 = vpop.f32.mrb[12].mxu1 }
 0x420   :  { %v517_v34 = vadd.f32 %v516_v9, %v8502_v5  ;;  %v7256_v38 = vpop.f32.mrb[13].mxu1 }
 0x421   :  { %v519_v40 = vpop.f32.mrb[14].mxu1 }
 0x422   :  { %v8508_v41 = vadd.f32 %v517_v34, %v8388_v19  ;;  %v520_v48 = vadd.f32 %v519_v40, %v8505_v39  ;;  %v7257_v42 = vpop.f32.mrb[15].mxu1 }
 0x424   :  { %v8512_v14 = vadd.f32 %v520_v48, %v8390_v22  ;;  %v657_v43 = vsel %vm194_vm0, %v8508_v41, 0.0 }
 0x425   :  { %658 = vadd.xlane.f32.xlu1 %v657_v43 }
 0x426   :  { %v660_v44 = vsel %vm194_vm0, %v8512_v14, 0.0 }
 0x427   :  { %v7262_v45 = vpop.f32.mrb[16].mxu1  ;;  %661 = vadd.xlane.f32.xlu0 %v660_v44 }
 0x428   :  { %v566_v46 = vadd.f32 %v7262_v45, %v8471_v18  ;;  %v557_v47 = vpop.f32.mrb[17].mxu1 }
 0x429   :  { %v558_v19 = vadd.f32 %v557_v47, %v8473_v20  ;;  %v7263_v49 = vpop.f32.mrb[18].mxu1 }
 0x42a   :  { %v578_v50 = vmul.f32 0.044715, %v566_v46  ;;  %v569_v52 = vadd.f32 %v7263_v49, %v8475_v21  ;;  %v560_v22 = vpop.f32.mrb[19].mxu1  ;;  %v574_v23 = vmul.f32 0.5, %v566_v46 }
 0x42b   :  { %v576_v53 = vmul.f32 0.044715, %v558_v19  ;;  %v561_v54 = vadd.f32 %v560_v22, %v8469_v17  ;;  %v572_v28 = vmul.f32 0.5, %v558_v19 }
 0x42c   :  { %v582_v55 = vmul.f32 %v578_v50, %v566_v46  ;;  %v579_v56 = vmul.f32 0.044715, %v569_v52  ;;  %v575_v24 = vmul.f32 0.5, %v569_v52 }
 0x42d   :  { %v580_v57 = vmul.f32 %v576_v53, %v558_v19  ;;  %v577_v58 = vmul.f32 0.044715, %v561_v54  ;;  %v573_v30 = vmul.f32 0.5, %v561_v54 }
 0x42e   :  { %v586_v59 = vmul.f32 %v582_v55, %v566_v46  ;;  %v583_v60 = vmul.f32 %v579_v56, %v569_v52 }
 0x42f   :  { %v584_v61 = vmul.f32 %v580_v57, %v558_v19  ;;  %v581_v62 = vmul.f32 %v577_v58, %v561_v54 }
 0x430   :  { %v590_v18 = vadd.f32 %v586_v59, %v566_v46  ;;  %v587_v1 = vmul.f32 %v583_v60, %v569_v52 }
 0x431   :  { %v588_v2 = vadd.f32 %v584_v61, %v558_v19  ;;  %v585_v20 = vmul.f32 %v581_v62, %v561_v54 }
 0x432   :  { %v594_v3 = vmul.f32 0.7978846, %v590_v18  ;;  %v591_v4 = vadd.f32 %v587_v1, %v569_v52 }
 0x433   :  { %v592_v6 = vmul.f32 0.7978846, %v588_v2  ;;  %v589_v21 = vadd.f32 %v585_v20, %v561_v54 }
 0x434   :  { %8042 = vtanh.f32 %v594_v3  ;;  %v595_v7 = vmul.f32 0.7978846, %v591_v4 }
 0x435   :  { %8044 = vtanh.f32 %v592_v6  ;;  %v593_v17 = vmul.f32 0.7978846, %v589_v21  ;;  %v6326_v6 = vld [vmem:[%s10450_s9] ss:$0 sm:$0xff] }
 0x436   :  { %8046 = vtanh.f32 %v595_v7 }
 0x437   :  { %8048 = vtanh.f32 %v593_v17 }
 0x43e   :  { %v8043_v8 = vpop.eup %8042 }
 0x43f   :  { %v8045_v10 = vpop.eup %8044  ;;  %v602_v11 = vadd.f32 1.0, %v8043_v8  ;;  %v6327_v8 = vld [vmem:[%s10451_s10] ss:$0 sm:$0xff] }
 0x440   :  { %v8047_v12 = vpop.eup %8046  ;;  %v600_v13 = vadd.f32 1.0, %v8045_v10 }
 0x441   :  { %v8049_v15 = vpop.eup %8048  ;;  %v603_v25 = vadd.f32 1.0, %v8047_v12  ;;  %v606_v33 = vmul.f32 %v602_v11, %v574_v23  ;;  %v7538_v11 = vld [vmem:[%s10452_s11] sm:$0xff]  }
 0x442   :  { %v601_v32 = vadd.f32 1.0, %v8049_v15  ;;  %v604_v63 = vmul.f32 %v600_v13, %v572_v28  ;;  %v7539_v15 = vld [vmem:[%s10452_s11 + $0x8] sm:$0xff]   ;;  %7272 = vmatprep.subr.bf16.mxu0 %v7538_v11 }
 0x443   :  { %v607_v35 = vmul.f32 %v603_v25, %v575_v24  ;;  %7273 = vmatpush3.bf16.msra.mxu0 %v7538_v11  ;;  %v7540_v24 = vld [vmem:[%s10452_s11 + $0x10] sm:$0xff]   ;;  %v7541_v25 = vld [vmem:[%s10452_s11 + $0x18] sm:$0xff]  }
 0x444   :  { %v605_v36 = vmul.f32 %v601_v32, %v573_v30  ;;  %7274 = vmatprep.subr.bf16.mxu0 %v7539_v15 }
 0x445   :  { %v609_v37 = vpack.c.bf16 %v607_v35, %v606_v33 }
 0x446   :  { %v608_v51 = vpack.c.bf16 %v605_v36, %v604_v63 }
 0x447   :  { %7275 = vmatpush3.bf16.msra.mxu0 %v7539_v15 }
 0x448   :  { %7265 = vmatpush3.bf16.msra.mxu1 %v608_v51  ;;  %7276 = vmatprep.subr.bf16.mxu0 %v7540_v24 }
 0x449   :  { %7266 = vmatprep.subr.bf16.mxu1 %v8207_v16 }
 0x44b   :  { %7277 = vmatpush3.bf16.msra.mxu0 %v7540_v24 }
 0x44c   :  { %7267 = vmatpush3.bf16.msra.mxu1 %v609_v37  ;;  %7278 = vmatprep.subr.bf16.mxu0 %v7541_v25 }
 0x44f   :  { %7269 = vmatmul.mubr.msk.bf16.vlgmr.msra.gmra.mrb[20].mxu1 %vm478_vm3, %v8491_v29  ;;  %7279 = vmatpush3.bf16.msra.mxu0 %v7541_v25 }
 0x4b2   :  { %v659_v26 = vpop.xlane.xlu1 %658 }
 0x4b3   :  { %v669_v34 = vmul.f32 0.015625, %v659_v26 }
 0x4b4   :  { %v662_v48 = vpop.xlane.xlu0 %661 }
 0x4b5   :  { %v673_v46 = vsub.f32 %v8508_v41, %v669_v34  ;;  %v670_v47 = vmul.f32 0.015625, %v662_v48 }
 0x522   :  { %v644_v9 = vpop.f32.mrb[20].mxu1 }
 0x523   :  { %v645_v38 = vadd.f32 %v644_v9, %v8502_v5  ;;  %v7270_v40 = vpop.f32.mrb[21].mxu1  ;;  %v674_v5 = vsub.f32 %v8512_v14, %v670_v47  ;;  %v7546_v47 = vld [vmem:[%s10453_s13 + $0x20] sm:$0xff]  }
 0x524   :  { %v647_v42 = vpop.f32.mrb[22].mxu1 }
 0x525   :  { %v8527_v43 = vadd.f32 %v645_v38, %v8396_v27  ;;  %v648_v44 = vadd.f32 %v647_v42, %v8505_v39  ;;  %v7271_v45 = vpop.f32.mrb[23].mxu1  ;;  %v677_v27 = vmul.f32 %v673_v46, %v673_v46  ;;  %v678_v50 = vmul.f32 %v674_v5, %v674_v5  ;;  %v7542_v42 = vld [vmem:[%s10453_s13] sm:$0xff]  }
 0x526   :  { %7284 = vmatprep.subr.bf16.mxu1 %v7542_v42  ;;  %v7544_v45 = vld [vmem:[%s10453_s13 + $0x10] sm:$0xff]  }
 0x527   :  { %v8532_v19 = vadd.f32 %v648_v44, %v8400_v31  ;;  %v663_v29 = vsel %vm194_vm0, %v8527_v43, 0.0  ;;  %v681_v39 = vsel %vm194_vm0, %v677_v27, 0.0  ;;  %v684_v52 = vsel %vm194_vm0, %v678_v50, 0.0  ;;  %7285 = vmatpush3.bf16.msra.mxu1 %v7542_v42  ;;  %v7543_v44 = vld [vmem:[%s10453_s13 + $0x8] sm:$0xff]   ;;  %v6328_v27 = vld [vmem:[%s10454_s12] ss:$0 sm:$0xff] }
 0x528   :  { %664 = vadd.xlane.f32.xlu1 %v663_v29  ;;  %7286 = vmatprep.subr.bf16.mxu1 %v7543_v44  ;;  %v7547_v29 = vld [vmem:[%s10453_s13 + $0x28] sm:$0xff]  }
 0x529   :  { %v666_v49 = vsel %vm194_vm0, %v8532_v19, 0.0 }
 0x52b   :  { %7287 = vmatpush3.bf16.msra.mxu1 %v7543_v44 }
 0x52c   :  { %667 = vadd.xlane.f32.xlu1 %v666_v49  ;;  %7288 = vmatprep.subr.bf16.mxu1 %v7544_v45  ;;  %v7549_v49 = vld [vmem:[%s10453_s13 + $0x38] sm:$0xff]  }
 0x52f   :  { %7289 = vmatpush3.bf16.msra.mxu1 %v7544_v45 }
 0x530   :  { %682 = vadd.xlane.f32.xlu1 %v681_v39 }
 0x534   :  { %685 = vadd.xlane.f32.xlu1 %v684_v52 }
 0x5b5   :  { %v665_v31 = vpop.xlane.xlu1 %664 }
 0x5b6   :  { %v671_v22 = vmul.f32 0.015625, %v665_v31 }
 0x5b8   :  { %v675_v53 = vsub.f32 %v8527_v43, %v671_v22 }
 0x5b9   :  { %v668_v54 = vpop.xlane.xlu1 %667 }
 0x5ba   :  { %v672_v55 = vmul.f32 0.015625, %v668_v54  ;;  %v679_v56 = vmul.f32 %v675_v53, %v675_v53 }
 0x5bc   :  { %v676_v57 = vsub.f32 %v8532_v19, %v672_v55  ;;  %v687_v58 = vsel %vm194_vm0, %v679_v56, 0.0 }
 0x5bd   :  { %v683_v59 = vpop.xlane.xlu1 %682  ;;  %688 = vadd.xlane.f32.xlu0 %v687_v58 }
 0x5be   :  { %v693_v60 = vmul.f32 0.015625, %v683_v59  ;;  %v680_v61 = vmul.f32 %v676_v57, %v676_v57 }
 0x5c0   :  { %v697_v62 = vadd.f32 1e-06, %v693_v60  ;;  %v690_v18 = vsel %vm194_vm0, %v680_v61, 0.0 }
 0x5c1   :  { %691 = vadd.xlane.f32.xlu1 %v690_v18  ;;  %v686_v1 = vpop.xlane.xlu1 %685 }
 0x5c2   :  { %8050 = vrsqrt.f32 %v697_v62  ;;  %v694_v2 = vmul.f32 0.015625, %v686_v1 }
 0x5c4   :  { %v698_v20 = vadd.f32 1e-06, %v694_v2 }
 0x5c6   :  { %8052 = vrsqrt.f32 %v698_v20 }
 0x5cc   :  { %v8051_v3 = vpop.eup %8050 }
 0x5cd   :  { %v705_v4 = vmul.f32 %v8051_v3, %v673_v46  ;;  %v7545_v46 = vld [vmem:[%s10453_s13 + $0x18] sm:$0xff]  }
 0x5ce   :  { %7290 = vmatprep.subr.bf16.mxu1 %v7545_v46 }
 0x5cf   :  { %v715_v17 = vmul.f32 %v6326_v6, %v705_v4  ;;  %7291 = vmatpush3.bf16.msra.mxu1 %v7545_v46 }
 0x5d0   :  { %v8053_v21 = vpop.eup %8052  ;;  %7292 = vmatprep.subr.bf16.mxu1 %v7546_v47 }
 0x5d1   :  { %v706_v7 = vmul.f32 %v8053_v21, %v674_v5  ;;  %v725_v12 = vadd.f32 %v6327_v8, %v715_v17  ;;  %v7548_v5 = vld [vmem:[%s10453_s13 + $0x30] sm:$0xff]  }
 0x5d3   :  { %v716_v10 = vmul.f32 %v6326_v6, %v706_v7  ;;  %7293 = vmatpush3.bf16.msra.mxu1 %v7546_v47 }
 0x5d4   :  { %7294 = vmatprep.subr.bf16.mxu1 %v7547_v29 }
 0x5d5   :  { %v726_v13 = vadd.f32 %v6327_v8, %v716_v10 }
 0x5d7   :  { %v729_v23 = vpack.c.bf16 %v726_v13, %v725_v12  ;;  %7295 = vmatpush3.bf16.msra.mxu1 %v7547_v29 }
 0x5d8   :  { %7296 = vmatprep.subr.bf16.mxu1 %v7548_v5 }
 0x5d9   :  { %7280 = vmatprep.mubr.msk.bf16.mxu0 %vm194_vm0, %v729_v23 }
 0x5db   :  { %7297 = vmatpush3.bf16.msra.mxu1 %v7548_v5 }
 0x5dc   :  { %7298 = vmatprep.subr.bf16.mxu1 %v7549_v49 }
 0x5df   :  { %7299 = vmatpush3.bf16.msra.mxu1 %v7549_v49 }
 0x5e0   :  { %7324 = vmatprep.subr.bf16.mxu1 %v8207_v16 }
 0x64a   :  { %v689_v28 = vpop.xlane.xlu0 %688 }
 0x64b   :  { %v695_v30 = vmul.f32 0.015625, %v689_v28 }
 0x64d   :  { %v699_v32 = vadd.f32 1e-06, %v695_v30 }
 0x64e   :  { %v692_v33 = vpop.xlane.xlu1 %691 }
 0x64f   :  { %8054 = vrsqrt.f32 %v699_v32  ;;  %v696_v35 = vmul.f32 0.015625, %v692_v33 }
 0x651   :  { %v700_v63 = vadd.f32 1e-06, %v696_v35 }
 0x653   :  { %8056 = vrsqrt.f32 %v700_v63 }
 0x659   :  { %v8055_v36 = vpop.eup %8054 }
 0x65a   :  { %v707_v37 = vmul.f32 %v8055_v36, %v675_v53 }
 0x65c   :  { %v717_v9 = vmul.f32 %v6326_v6, %v707_v37 }
 0x65d   :  { %v8057_v51 = vpop.eup %8056 }
 0x65e   :  { %v708_v26 = vmul.f32 %v8057_v51, %v676_v57  ;;  %v727_v38 = vadd.f32 %v6327_v8, %v717_v9 }
 0x660   :  { %v718_v34 = vmul.f32 %v6326_v6, %v708_v26 }
 0x662   :  { %v728_v40 = vadd.f32 %v6327_v8, %v718_v34 }
 0x664   :  { %v730_v48 = vpack.c.bf16 %v728_v40, %v727_v38  ;;  %v6335_v38 = vld [vmem:[%s10455_s14] ss:$0 sm:$0xff] }
 0x666   :  { %7281 = vmatmul.mubr.msk.bf16.vlgmr.msra.gmra.mrb[0].mxu0 %vm194_vm0, %v730_v48 }
 0x739   :  { %v7282_v39 = vpop.f32.mrb[0].mxu0 }
 0x73a   :  { %v819_v50 = vadd.f32 %v7282_v39, %v6328_v27  ;;  %v810_v52 = vpop.f32.mrb[1].mxu0 }
 0x73b   :  { %v811_v31 = vadd.f32 %v6328_v27, %v810_v52  ;;  %v7283_v22 = vpop.f32.mrb[2].mxu0 }
 0x73c   :  { %v831_v53 = vmul.f32 0.044715, %v819_v50  ;;  %v822_v54 = vadd.f32 %v7283_v22, %v6328_v27  ;;  %v813_v55 = vpop.f32.mrb[3].mxu0  ;;  %v827_v28 = vmul.f32 0.5, %v819_v50 }
 0x73d   :  { %v829_v56 = vmul.f32 0.044715, %v811_v31  ;;  %v814_v57 = vadd.f32 %v6328_v27, %v813_v55  ;;  %v825_v33 = vmul.f32 0.5, %v811_v31 }
 0x73e   :  { %v835_v58 = vmul.f32 %v831_v53, %v819_v50  ;;  %v832_v59 = vmul.f32 0.044715, %v822_v54  ;;  %v828_v30 = vmul.f32 0.5, %v822_v54 }
 0x73f   :  { %v833_v60 = vmul.f32 %v829_v56, %v811_v31  ;;  %v830_v61 = vmul.f32 0.044715, %v814_v57  ;;  %v826_v35 = vmul.f32 0.5, %v814_v57 }
 0x740   :  { %v839_v62 = vmul.f32 %v835_v58, %v819_v50  ;;  %v836_v18 = vmul.f32 %v832_v59, %v822_v54 }
 0x741   :  { %v837_v1 = vmul.f32 %v833_v60, %v811_v31  ;;  %v834_v2 = vmul.f32 %v830_v61, %v814_v57  ;;  %v6354_v61 = vld [vmem:[%s10481_s0 + $0x30] sm:$0xff] }
 0x742   :  { %v843_v20 = vadd.f32 %v839_v62, %v819_v50  ;;  %v840_v3 = vmul.f32 %v836_v18, %v822_v54  ;;  %v6355_v62 = vld [vmem:[%s10481_s0 + $0x38] sm:$0xff]  ;;  %v8637_v18 = vld [vmem:[%s10482_s5 + $0x10] sm:$0xff]  }
 0x743   :  { %v838_v4 = vmul.f32 %v834_v2, %v814_v57  ;;  %v841_v6 = vadd.f32 %v837_v1, %v811_v31  ;;  %7306 = vmatprep.mubr.msk.bf16.mxu0 %vm365_vm1, %v8637_v18 }
 0x744   :  { %v847_v21 = vmul.f32 0.7978846, %v843_v20  ;;  %v844_v7 = vadd.f32 %v840_v3, %v822_v54 }
 0x745   :  { %v842_v17 = vadd.f32 %v838_v4, %v814_v57  ;;  %v845_v8 = vmul.f32 0.7978846, %v841_v6 }
 0x746   :  { %8058 = vtanh.f32 %v847_v21  ;;  %v848_v10 = vmul.f32 0.7978846, %v844_v7 }
 0x747   :  { %v846_v11 = vmul.f32 0.7978846, %v842_v17  ;;  %8060 = vtanh.f32 %v845_v8 }
 0x748   :  { %8062 = vtanh.f32 %v848_v10 }
 0x749   :  { %8064 = vtanh.f32 %v846_v11 }
 0x750   :  { %v8059_v12 = vpop.eup %8058 }
 0x751   :  { %v8061_v13 = vpop.eup %8060  ;;  %v855_v15 = vadd.f32 1.0, %v8059_v12 }
 0x752   :  { %v8063_v23 = vpop.eup %8062  ;;  %v853_v24 = vadd.f32 1.0, %v8061_v13 }
 0x753   :  { %v8065_v25 = vpop.eup %8064  ;;  %v856_v32 = vadd.f32 1.0, %v8063_v23  ;;  %v859_v36 = vmul.f32 %v855_v15, %v827_v28 }
 0x754   :  { %v854_v63 = vadd.f32 1.0, %v8065_v25  ;;  %v857_v51 = vmul.f32 %v853_v24, %v825_v33  ;;  %v8656_v25 = vld [vmem:[%s10447_s3 + $0x1] ss:$0 sm:$0xff] }
 0x755   :  { %v860_v37 = vmul.f32 %v856_v32, %v828_v30 }
 0x756   :  { %v858_v26 = vmul.f32 %v854_v63, %v826_v35  ;;  %v8662_v35 = vld [vmem:[%s10448_s4 + $0x1] ss:$0 sm:$0xff] }
 0x757   :  { %v862_v9 = vpack.c.bf16 %v860_v37, %v859_v36 }
 0x758   :  { %v861_v34 = vpack.c.bf16 %v858_v26, %v857_v51  ;;  %v6363_v26 = vld [vmem:[%s10483_s24 + $0x18] sm:$0xff] }
 0x75a   :  { %7300 = vmatprep.mubr.bf16.mxu1 %v861_v34  ;;  %v6362_v34 = vld [vmem:[%s10483_s24 + $0x10] sm:$0xff] }
 0x75b   :  { %7301 = vmatmul.mubr.bf16.vlgmr.msra.gmra.mrb[24].mxu1 %v862_v9  ;;  %v8673_v9 = vld [vmem:[%s10482_s5 + $0x18] sm:$0xff]  }
 0x75c   :  { %7328 = vmatprep.mubr.msk.bf16.mxu1 %vm8208_vm2, %v8207_v16 }
 0x82e   :  { %v7302_v40 = vpop.f32.mrb[24].mxu1 }
 0x82f   :  { %v977_v48 = vadd.f32 %v7302_v40, %v6335_v38  ;;  %v968_v42 = vpop.f32.mrb[25].mxu1 }
 0x830   :  { %v969_v44 = vadd.f32 %v6335_v38, %v968_v42  ;;  %v7303_v45 = vpop.f32.mrb[26].mxu1 }
 0x831   :  { %v980_v46 = vadd.f32 %v7303_v45, %v6335_v38  ;;  %v971_v47 = vpop.f32.mrb[27].mxu1 }
 0x832   :  { %v8599_v29 = vadd.f32 %v969_v44, %v8508_v41  ;;  %v972_v5 = vadd.f32 %v6335_v38, %v971_v47 }
 0x833   :  { %v8615_v57 = vadd.f32 %v980_v46, %v8532_v19  ;;  %v6352_v19 = vld [vmem:[%s10481_s0 + $0x20] sm:$0xff] }
 0x834   :  { %v8602_v49 = vadd.f32 %v972_v5, %v8512_v14  ;;  %v991_v27 = vsel %vm194_vm0, %v8599_v29, 0.0  ;;  %v8611_v14 = vadd.f32 %v977_v48, %v8527_v43  ;;  %v6353_v43 = vld [vmem:[%s10481_s0 + $0x28] sm:$0xff] }
 0x835   :  { %992 = vadd.xlane.f32.xlu0 %v991_v27  ;;  %v1000_v60 = vsel %vm194_vm0, %v8615_v57, 0.0 }
 0x836   :  { %v994_v39 = vsel %vm194_vm0, %v8602_v49, 0.0  ;;  %v997_v59 = vsel %vm194_vm0, %v8611_v14, 0.0 }
 0x837   :  { %995 = vadd.xlane.f32.xlu1 %v994_v39 }
 0x8c2   :  { %v993_v50 = vpop.xlane.xlu0 %992 }
 0x8c3   :  { %v1003_v52 = vmul.f32 0.015625, %v993_v50 }
 0x8c4   :  { %v996_v31 = vpop.xlane.xlu1 %995 }
 0x8c5   :  { %v1007_v22 = vsub.f32 %v8599_v29, %v1003_v52  ;;  %v1004_v53 = vmul.f32 0.015625, %v996_v31 }
 0x8c7   :  { %v1008_v41 = vsub.f32 %v8602_v49, %v1004_v53  ;;  %v1011_v54 = vmul.f32 %v1007_v22, %v1007_v22 }
 0x8c9   :  { %v1015_v55 = vsel %vm194_vm0, %v1011_v54, 0.0  ;;  %v1012_v56 = vmul.f32 %v1008_v41, %v1008_v41 }
 0x8ca   :  { %1016 = vadd.xlane.f32.xlu0 %v1015_v55 }
 0x8cb   :  { %v1018_v58 = vsel %vm194_vm0, %v1012_v56, 0.0 }
 0x8cc   :  { %1019 = vadd.xlane.f32.xlu1 %v1018_v58 }
 0x8ce   :  { %998 = vadd.xlane.f32.xlu0 %v997_v59 }
 0x8d0   :  { %1001 = vadd.xlane.f32.xlu1 %v1000_v60 }
 0x8e1   :  { %1082 = vperm.xlu1 %7516, %v6353_v43  }
 0x8e4   :  { %1077 = vperm.xlu0 %7515, %v6352_v19  }
 0x8e5   :  { %1087 = vperm.xlu1 %7516, %v6354_v61  }
 0x8e8   :  { %1092 = vperm.xlu0 %7515, %v6355_v62  }
 0x957   :  { %v1017_v1 = vpop.xlane.xlu0 %1016 }
 0x958   :  { %v1027_v2 = vmul.f32 0.015625, %v1017_v1 }
 0x959   :  { %v1020_v20 = vpop.xlane.xlu1 %1019 }
 0x95a   :  { %v1031_v3 = vadd.f32 1e-06, %v1027_v2  ;;  %v1028_v4 = vmul.f32 0.015625, %v1020_v20 }
 0x95b   :  { %v999_v6 = vpop.xlane.xlu0 %998 }
 0x95c   :  { %8066 = vrsqrt.f32 %v1031_v3  ;;  %v1032_v21 = vadd.f32 1e-06, %v1028_v4  ;;  %v1005_v7 = vmul.f32 0.015625, %v999_v6 }
 0x95d   :  { %v1002_v17 = vpop.xlane.xlu1 %1001 }
 0x95e   :  { %8068 = vrsqrt.f32 %v1032_v21  ;;  %v8642_v8 = vsub.f32 %v8611_v14, %v1005_v7  ;;  %v1006_v10 = vmul.f32 0.015625, %v1002_v17 }
 0x960   :  { %v8645_v11 = vsub.f32 %v8615_v57, %v1006_v10  ;;  %v1013_v12 = vmul.f32 %v8642_v8, %v8642_v8 }
 0x961   :  { %v8685_v40 = vpop.permute.xlu1 %1082 }
 0x962   :  { %v1021_v13 = vsel %vm194_vm0, %v1013_v12, 0.0  ;;  %v1014_v15 = vmul.f32 %v8645_v11, %v8645_v11 }
 0x963   :  { %1022 = vadd.xlane.f32.xlu1 %v1021_v13  ;;  %v8683_v38 = vpop.permute.xlu0 %1077 }
 0x964   :  { %v1024_v23 = vsel %vm194_vm0, %v1014_v15, 0.0 }
 0x965   :  { %1025 = vadd.xlane.f32.xlu0 %v1024_v23  ;;  %v8689_v42 = vpop.permute.xlu1 %1087 }
 0x966   :  { %v8067_v24 = vpop.eup %8066 }
 0x967   :  { %v1039_v28 = vmul.f32 %v8067_v24, %v1007_v22  ;;  %v8687_v48 = vpop.permute.xlu0 %1092 }
 0x968   :  { %v8069_v30 = vpop.eup %8068 }
 0x969   :  { %v1040_v32 = vmul.f32 %v8069_v30, %v1008_v41  ;;  %v1049_v33 = vmul.f32 %v8656_v25, %v1039_v28 }
 0x96b   :  { %v1050_v63 = vmul.f32 %v8656_v25, %v1040_v32  ;;  %v1059_v36 = vadd.f32 %v8662_v35, %v1049_v33 }
 0x96d   :  { %v1060_v37 = vadd.f32 %v8662_v35, %v1050_v63 }
 0x96f   :  { %v1063_v51 = vpack.c.bf16 %v1060_v37, %v1059_v36 }
 0x971   :  { %7304 = vmatprep.subr.bf16.mxu0 %v1063_v51 }
 0x972   :  { %7305 = vmatpush3.bf16.msra.mxu0 %v1063_v51 }
 0x973   :  { %7310 = vmatprep.subr.bf16.mxu0 %v8207_v16 }
 0x974   :  { %1211 = vperm.xlu1 %7516, %v6363_v26  }
 0x975   :  { %7307 = vmatmul.mubr.msk.bf16.vlgmr.msra.gmra.mrb[4].mxu0 %vm365_vm1, %v8673_v9 }
 0x976   :  { %7314 = vmatprep.mubr.msk.bf16.mxu0 %vm8208_vm2, %v8207_v16 }
 0x97b   :  { %1206 = vperm.xlu0 %7515, %v6362_v34  }
 0x9f0   :  { %v1023_v46 = vpop.xlane.xlu1 %1022 }
 0x9f1   :  { %v1029_v53 = vmul.f32 0.015625, %v1023_v46 }
 0x9f2   :  { %v1026_v44 = vpop.xlane.xlu0 %1025 }
 0x9f3   :  { %v1030_v50 = vmul.f32 0.015625, %v1026_v44  ;;  %v1033_v61 = vadd.f32 1e-06, %v1029_v53 }
 0x9f5   :  { %v1034_v60 = vadd.f32 1e-06, %v1030_v50 }
 0x9f7   :  { %8070 = vrsqrt.f32 %v1034_v60 }
 0x9f8   :  { %8072 = vrsqrt.f32 %v1033_v61 }
 0xa01   :  { %v8071_v13 = vpop.eup %8070 }
 0xa02   :  { %v8073_v15 = vpop.eup %8072  ;;  %v1042_v30 = vmul.f32 %v8071_v13, %v8645_v11 }
 0xa03   :  { %v1041_v26 = vmul.f32 %v8073_v15, %v8642_v8 }
 0xa05   :  { %v1051_v11 = vmul.f32 %v8656_v25, %v1041_v26 }
 0xa07   :  { %v1061_v8 = vadd.f32 %v8662_v35, %v1051_v11 }
 0xa48   :  { %v7308_v45 = vpop.f32.mrb[4].mxu0 }
 0xa49   :  { %v1154_v47 = vadd.f32 %v7308_v45, %v8689_v42  ;;  %v1145_v5 = vpop.f32.mrb[5].mxu0 }
 0xa4a   :  { %v1146_v27 = vadd.f32 %v1145_v5, %v8683_v38  ;;  %v7309_v39 = vpop.f32.mrb[6].mxu0 }
 0xa4b   :  { %v1166_v52 = vmul.f32 0.044715, %v1154_v47  ;;  %v1157_v31 = vadd.f32 %v7309_v39, %v8687_v48  ;;  %v1148_v22 = vpop.f32.mrb[7].mxu0  ;;  %v1162_v36 = vmul.f32 0.5, %v1154_v47  ;;  %v1052_v39 = vmul.f32 %v8656_v25, %v1042_v30  ;;  %v8713_v25 = vpop.permute.xlu0 %1206 }
 0xa4c   :  { %v1164_v41 = vmul.f32 0.044715, %v1146_v27  ;;  %v1149_v54 = vadd.f32 %v1148_v22, %v8685_v40  ;;  %v1160_v34 = vmul.f32 0.5, %v1146_v27 }
 0xa4d   :  { %v1170_v55 = vmul.f32 %v1166_v52, %v1154_v47  ;;  %v1167_v56 = vmul.f32 0.044715, %v1157_v31  ;;  %v1163_v37 = vmul.f32 0.5, %v1157_v31 }
 0xa4e   :  { %v1168_v58 = vmul.f32 %v1164_v41, %v1146_v27  ;;  %v1165_v59 = vmul.f32 0.044715, %v1149_v54  ;;  %v1161_v44 = vmul.f32 0.5, %v1149_v54  ;;  %v1062_v41 = vadd.f32 %v8662_v35, %v1052_v39 }
 0xa4f   :  { %v1174_v43 = vmul.f32 %v1170_v55, %v1154_v47  ;;  %v1171_v19 = vmul.f32 %v1167_v56, %v1157_v31  ;;  %v8716_v55 = vpop.permute.xlu1 %1211 }
 0xa50   :  { %v1172_v62 = vmul.f32 %v1168_v58, %v1146_v27  ;;  %v1169_v1 = vmul.f32 %v1165_v59, %v1149_v54 }
 0xa51   :  { %v1178_v2 = vadd.f32 %v1174_v43, %v1154_v47  ;;  %v1175_v20 = vmul.f32 %v1171_v19, %v1157_v31  ;;  %v1064_v47 = vpack.c.bf16 %v1062_v41, %v1061_v8 }
 0xa52   :  { %v1176_v3 = vadd.f32 %v1172_v62, %v1146_v27  ;;  %v1173_v4 = vmul.f32 %v1169_v1, %v1149_v54  ;;  %v8705_v27 = vld [vmem:[%s10449_s7 + $0x8] sm:$0xff]  }
 0xa53   :  { %v1182_v6 = vmul.f32 0.7978846, %v1178_v2  ;;  %v1179_v21 = vadd.f32 %v1175_v20, %v1157_v31 }
 0xa54   :  { %v1180_v7 = vmul.f32 0.7978846, %v1176_v3  ;;  %v1177_v17 = vadd.f32 %v1173_v4, %v1149_v54 }
 0xa55   :  { %8074 = vtanh.f32 %v1182_v6  ;;  %v1183_v10 = vmul.f32 0.7978846, %v1179_v21 }
 0xa56   :  { %8076 = vtanh.f32 %v1180_v7  ;;  %v1181_v12 = vmul.f32 0.7978846, %v1177_v17 }
 0xa57   :  { %8078 = vtanh.f32 %v1183_v10 }
 0xa58   :  { %8080 = vtanh.f32 %v1181_v12 }
 0xa5f   :  { %v8075_v23 = vpop.eup %8074 }
 0xa60   :  { %v8077_v24 = vpop.eup %8076  ;;  %v1190_v28 = vadd.f32 1.0, %v8075_v23 }
 0xa61   :  { %v8079_v32 = vpop.eup %8078  ;;  %v1188_v33 = vadd.f32 1.0, %v8077_v24 }
 0xa62   :  { %v8081_v63 = vpop.eup %8080  ;;  %v1191_v51 = vadd.f32 1.0, %v8079_v32  ;;  %v1194_v46 = vmul.f32 %v1190_v28, %v1162_v36 }
 0xa63   :  { %v1189_v45 = vadd.f32 1.0, %v8081_v63  ;;  %v1192_v50 = vmul.f32 %v1188_v33, %v1160_v34 }
 0xa64   :  { %v1195_v5 = vmul.f32 %v1191_v51, %v1163_v37 }
 0xa65   :  { %v1193_v52 = vmul.f32 %v1189_v45, %v1161_v44 }
 0xa66   :  { %v1200_v22 = vpack.c.bf16 %v1195_v5, %v1194_v46 }
 0xa67   :  { %v1199_v53 = vpack.c.bf16 %v1193_v52, %v1192_v50 }
 0xa69   :  { %7311 = vmatpush3.bf16.msra.mxu0 %v1199_v53 }
 0xa6a   :  { %7312 = vmatprep.subr.bf16.mxu0 %v8207_v16 }
 0xa6d   :  { %7313 = vmatpush3.bf16.msra.mxu0 %v1200_v22 }
 0xa6e   :  { %7318 = vmatprep.subr.bf16.mxu0 %v1064_v47 }
 0xa70   :  { %7315 = vmatmul.mubr.msk.bf16.vlgmr.msra.gmra.mrb[8].mxu0 %vm478_vm3, %v8705_v27 }
 0xa71   :  { %7319 = vmatpush3.bf16.msra.mxu0 %v1064_v47  ;;  %7320 = vmatprep.mubr.msk.bf16.mxu0 %vm365_vm1, %v8637_v18 }
 0xa78   :  { %7321 = vmatmul.mubr.msk.bf16.vlgmr.msra.gmra.mrb[12].mxu0 %vm365_vm1, %v8673_v9 }
 0xb43   :  { %v1256_v35 = vpop.f32.mrb[8].mxu0 }
 0xb44   :  { %v1257_v31 = vadd.f32 %v1256_v35, %v8713_v25  ;;  %v7316_v54 = vpop.f32.mrb[9].mxu0 }
 0xb45   :  { %v1259_v56 = vpop.f32.mrb[10].mxu0 }
 0xb46   :  { %v8719_v58 = vadd.f32 %v1257_v31, %v8599_v29  ;;  %v1260_v59 = vadd.f32 %v1259_v56, %v8716_v55  ;;  %v7317_v60 = vpop.f32.mrb[11].mxu0 }
 0xb48   :  { %v8723_v18 = vadd.f32 %v1260_v59, %v8602_v49  ;;  %v1399_v9 = vsel %vm194_vm0, %v8719_v58, 0.0 }
 0xb49   :  { %1400 = vadd.xlane.f32.xlu1 %v1399_v9 }
 0xb4a   :  { %v1402_v43 = vsel %vm194_vm0, %v8723_v18, 0.0 }
 0xb4b   :  { %1403 = vadd.xlane.f32.xlu0 %v1402_v43  ;;  %v7322_v19 = vpop.f32.mrb[12].mxu0 }
 0xb4c   :  { %v1306_v61 = vadd.f32 %v7322_v19, %v8689_v42  ;;  %v1297_v62 = vpop.f32.mrb[13].mxu0 }
 0xb4d   :  { %v1298_v29 = vadd.f32 %v1297_v62, %v8683_v38  ;;  %v7323_v1 = vpop.f32.mrb[14].mxu0 }
 0xb4e   :  { %v1318_v2 = vmul.f32 0.044715, %v1306_v61  ;;  %v1309_v20 = vadd.f32 %v7323_v1, %v8687_v48  ;;  %v1300_v49 = vpop.f32.mrb[15].mxu0  ;;  %v1314_v44 = vmul.f32 0.5, %v1306_v61 }
 0xb4f   :  { %v1316_v3 = vmul.f32 0.044715, %v1298_v29  ;;  %v1301_v4 = vadd.f32 %v1300_v49, %v8685_v40  ;;  %v1312_v5 = vmul.f32 0.5, %v1298_v29 }
 0xb50   :  { %v1322_v6 = vmul.f32 %v1318_v2, %v1306_v61  ;;  %v1319_v21 = vmul.f32 0.044715, %v1309_v20  ;;  %v1315_v45 = vmul.f32 0.5, %v1309_v20 }
 0xb51   :  { %v1320_v7 = vmul.f32 %v1316_v3, %v1298_v29  ;;  %v1317_v17 = vmul.f32 0.044715, %v1301_v4  ;;  %v1313_v39 = vmul.f32 0.5, %v1301_v4 }
 0xb52   :  { %v1326_v10 = vmul.f32 %v1322_v6, %v1306_v61  ;;  %v1323_v12 = vmul.f32 %v1319_v21, %v1309_v20 }
 0xb53   :  { %v1324_v13 = vmul.f32 %v1320_v7, %v1298_v29  ;;  %v1321_v15 = vmul.f32 %v1317_v17, %v1301_v4 }
 0xb54   :  { %v1330_v42 = vadd.f32 %v1326_v10, %v1306_v61  ;;  %v1327_v23 = vmul.f32 %v1323_v12, %v1309_v20 }
 0xb55   :  { %v1328_v24 = vadd.f32 %v1324_v13, %v1298_v29  ;;  %v1325_v38 = vmul.f32 %v1321_v15, %v1301_v4 }
 0xb56   :  { %v1334_v28 = vmul.f32 0.7978846, %v1330_v42  ;;  %v1331_v30 = vadd.f32 %v1327_v23, %v1309_v20 }
 0xb57   :  { %v1332_v32 = vmul.f32 0.7978846, %v1328_v24  ;;  %v1329_v48 = vadd.f32 %v1325_v38, %v1301_v4 }
 0xb58   :  { %8082 = vtanh.f32 %v1334_v28  ;;  %v1335_v33 = vmul.f32 0.7978846, %v1331_v30  ;;  %v6371_v30 = vld [vmem:[%s10450_s9 + $0x1] ss:$0 sm:$0xff] }
 0xb59   :  { %8084 = vtanh.f32 %v1332_v32  ;;  %v1333_v40 = vmul.f32 0.7978846, %v1329_v48 }
 0xb5a   :  { %8086 = vtanh.f32 %v1335_v33 }
 0xb5b   :  { %8088 = vtanh.f32 %v1333_v40 }
 0xb62   :  { %v8083_v63 = vpop.eup %8082 }
 0xb63   :  { %v8085_v36 = vpop.eup %8084  ;;  %v1342_v37 = vadd.f32 1.0, %v8083_v63  ;;  %v6372_v63 = vld [vmem:[%s10451_s10 + $0x1] ss:$0 sm:$0xff] }
 0xb64   :  { %v8087_v51 = vpop.eup %8086  ;;  %v1340_v26 = vadd.f32 1.0, %v8085_v36 }
 0xb65   :  { %v8089_v34 = vpop.eup %8088  ;;  %v1343_v46 = vadd.f32 1.0, %v8087_v51  ;;  %v1346_v52 = vmul.f32 %v1342_v37, %v1314_v44  ;;  %v7554_v44 = vld [vmem:[%s10452_s11 + $0x28] sm:$0xff]  }
 0xb66   :  { %v1341_v50 = vadd.f32 1.0, %v8089_v34  ;;  %v1344_v11 = vmul.f32 %v1340_v26, %v1312_v5  ;;  %v7553_v34 = vld [vmem:[%s10452_s11 + $0x20] sm:$0xff]  }
 0xb67   :  { %v1347_v22 = vmul.f32 %v1343_v46, %v1315_v45  ;;  %7332 = vmatprep.subr.bf16.mxu0 %v7553_v34  ;;  %v7555_v45 = vld [vmem:[%s10452_s11 + $0x30] sm:$0xff]   ;;  %v7556_v46 = vld [vmem:[%s10452_s11 + $0x38] sm:$0xff]  }
 0xb68   :  { %v1345_v53 = vmul.f32 %v1341_v50, %v1313_v39  ;;  %7333 = vmatpush3.bf16.msra.mxu0 %v7553_v34 }
 0xb69   :  { %v1349_v41 = vpack.c.bf16 %v1347_v22, %v1346_v52  ;;  %7334 = vmatprep.subr.bf16.mxu0 %v7554_v44 }
 0xb6a   :  { %v1348_v8 = vpack.c.bf16 %v1345_v53, %v1344_v11 }
 0xb6c   :  { %7325 = vmatpush3.bf16.msra.mxu1 %v1348_v8  ;;  %7335 = vmatpush3.bf16.msra.mxu0 %v7554_v44 }
 0xb6d   :  { %7326 = vmatprep.subr.bf16.mxu1 %v8207_v16  ;;  %7336 = vmatprep.subr.bf16.mxu0 %v7555_v45 }
 0xb70   :  { %7327 = vmatpush3.bf16.msra.mxu1 %v1349_v41  ;;  %7337 = vmatpush3.bf16.msra.mxu0 %v7555_v45 }
 0xb71   :  { %7338 = vmatprep.subr.bf16.mxu0 %v7556_v46 }
 0xb73   :  { %7329 = vmatmul.mubr.msk.bf16.vlgmr.msra.gmra.mrb[28].mxu1 %vm478_vm3, %v8705_v27 }
 0xb74   :  { %7339 = vmatpush3.bf16.msra.mxu0 %v7556_v46 }
 0xbd6   :  { %v1401_v47 = vpop.xlane.xlu1 %1400 }
 0xbd7   :  { %v1411_v31 = vmul.f32 0.015625, %v1401_v47 }
 0xbd8   :  { %v1404_v35 = vpop.xlane.xlu0 %1403 }
 0xbd9   :  { %v1412_v54 = vmul.f32 0.015625, %v1404_v35  ;;  %v1415_v59 = vsub.f32 %v8719_v58, %v1411_v31 }
 0xbdb   :  { %v1416_v19 = vsub.f32 %v8723_v18, %v1412_v54  ;;  %v1419_v2 = vmul.f32 %v1415_v59, %v1415_v59 }
 0xbdd   :  { %v1420_v20 = vmul.f32 %v1416_v19, %v1416_v19  ;;  %v1423_v49 = vsel %vm194_vm0, %v1419_v2, 0.0  ;;  %v7564_v2 = vld [vmem:[%s10453_s13 + $0x78] sm:$0xff]  }
 0xc46   :  { %v1384_v56 = vpop.f32.mrb[28].mxu1 }
 0xc47   :  { %v1385_v60 = vadd.f32 %v1384_v56, %v8713_v25  ;;  %v7330_v9 = vpop.f32.mrb[29].mxu1 }
 0xc48   :  { %v1387_v43 = vpop.f32.mrb[30].mxu1  ;;  %v7558_v9 = vld [vmem:[%s10453_s13 + $0x48] sm:$0xff]  }
 0xc49   :  { %v8740_v61 = vadd.f32 %v1385_v60, %v8611_v14  ;;  %v1388_v62 = vadd.f32 %v1387_v43, %v8716_v55  ;;  %v7331_v29 = vpop.f32.mrb[31].mxu1  ;;  %v1426_v14 = vsel %vm194_vm0, %v1420_v20, 0.0  ;;  %v7557_v60 = vld [vmem:[%s10453_s13 + $0x40] sm:$0xff]   ;;  %v7559_v43 = vld [vmem:[%s10453_s13 + $0x50] sm:$0xff]  }
 0xc4a   :  { %7344 = vmatprep.subr.bf16.mxu1 %v7557_v60  ;;  %v7562_v29 = vld [vmem:[%s10453_s13 + $0x68] sm:$0xff]  }
 0xc4b   :  { %v8744_v27 = vadd.f32 %v1388_v62, %v8615_v57  ;;  %v1405_v1 = vsel %vm194_vm0, %v8740_v61, 0.0  ;;  %7345 = vmatpush3.bf16.msra.mxu1 %v7557_v60  ;;  %v7561_v62 = vld [vmem:[%s10453_s13 + $0x60] sm:$0xff]  }
 0xc4c   :  { %1406 = vadd.xlane.f32.xlu0 %v1405_v1  ;;  %7346 = vmatprep.subr.bf16.mxu1 %v7558_v9  ;;  %v7563_v1 = vld [vmem:[%s10453_s13 + $0x70] sm:$0xff]  }
 0xc4d   :  { %v1408_v25 = vsel %vm194_vm0, %v8744_v27, 0.0 }
 0xc4e   :  { %1409 = vadd.xlane.f32.xlu1 %v1408_v25  ;;  %v6382_v25 = vld [vmem:[%s10454_s12 + $0x1] ss:$0 sm:$0xff] }
 0xc4f   :  { %7347 = vmatpush3.bf16.msra.mxu1 %v7558_v9 }
 0xc50   :  { %1424 = vadd.xlane.f32.xlu0 %v1423_v49  ;;  %7348 = vmatprep.subr.bf16.mxu1 %v7559_v43 }
 0xc52   :  { %1427 = vadd.xlane.f32.xlu1 %v1426_v14 }
 0xc53   :  { %7349 = vmatpush3.bf16.msra.mxu1 %v7559_v43 }
 0xcd9   :  { %v1407_v55 = vpop.xlane.xlu0 %1406 }
 0xcda   :  { %v1413_v3 = vmul.f32 0.015625, %v1407_v55 }
 0xcdb   :  { %v1410_v57 = vpop.xlane.xlu1 %1409 }
 0xcdc   :  { %v1417_v4 = vsub.f32 %v8740_v61, %v1413_v3  ;;  %v1414_v6 = vmul.f32 0.015625, %v1410_v57 }
 0xcdd   :  { %v1425_v21 = vpop.xlane.xlu0 %1424 }
 0xcde   :  { %v1418_v7 = vsub.f32 %v8744_v27, %v1414_v6  ;;  %v1435_v17 = vmul.f32 0.015625, %v1425_v21  ;;  %v1421_v10 = vmul.f32 %v1417_v4, %v1417_v4 }
 0xcdf   :  { %v1428_v12 = vpop.xlane.xlu1 %1427 }
 0xce0   :  { %v1439_v13 = vadd.f32 1e-06, %v1435_v17  ;;  %v1436_v15 = vmul.f32 0.015625, %v1428_v12  ;;  %v1429_v42 = vsel %vm194_vm0, %v1421_v10, 0.0  ;;  %v1422_v23 = vmul.f32 %v1418_v7, %v1418_v7 }
 0xce1   :  { %1430 = vadd.xlane.f32.xlu0 %v1429_v42 }
 0xce2   :  { %8090 = vrsqrt.f32 %v1439_v13  ;;  %v1440_v24 = vadd.f32 1e-06, %v1436_v15  ;;  %v1432_v38 = vsel %vm194_vm0, %v1422_v23, 0.0 }
 0xce3   :  { %1433 = vadd.xlane.f32.xlu1 %v1432_v38 }
 0xce4   :  { %8092 = vrsqrt.f32 %v1440_v24 }
 0xcec   :  { %v8091_v28 = vpop.eup %8090 }
 0xced   :  { %v1447_v32 = vmul.f32 %v8091_v28, %v1415_v59 }
 0xcee   :  { %v8093_v48 = vpop.eup %8092 }
 0xcef   :  { %v1448_v33 = vmul.f32 %v8093_v48, %v1416_v19  ;;  %v1457_v40 = vmul.f32 %v6371_v30, %v1447_v32  ;;  %v7560_v19 = vld [vmem:[%s10453_s13 + $0x58] sm:$0xff]  }
 0xcf0   :  { %7350 = vmatprep.subr.bf16.mxu1 %v7560_v19 }
 0xcf1   :  { %v1458_v36 = vmul.f32 %v6371_v30, %v1448_v33  ;;  %v1467_v37 = vadd.f32 %v6372_v63, %v1457_v40  ;;  %7351 = vmatpush3.bf16.msra.mxu1 %v7560_v19 }
 0xcf2   :  { %7352 = vmatprep.subr.bf16.mxu1 %v7561_v62 }
 0xcf3   :  { %v1468_v51 = vadd.f32 %v6372_v63, %v1458_v36 }
 0xcf5   :  { %v1471_v26 = vpack.c.bf16 %v1468_v51, %v1467_v37  ;;  %7353 = vmatpush3.bf16.msra.mxu1 %v7561_v62 }
 0xcf6   :  { %7354 = vmatprep.subr.bf16.mxu1 %v7562_v29 }
 0xcf7   :  { %7340 = vmatprep.mubr.msk.bf16.mxu0 %vm194_vm0, %v1471_v26 }
 0xcf9   :  { %7355 = vmatpush3.bf16.msra.mxu1 %v7562_v29 }
 0xcfa   :  { %7356 = vmatprep.subr.bf16.mxu1 %v7563_v1 }
 0xcfd   :  { %7357 = vmatpush3.bf16.msra.mxu1 %v7563_v1 }
 0xcfe   :  { %7358 = vmatprep.subr.bf16.mxu1 %v7564_v2 }
 0xd01   :  { %7359 = vmatpush3.bf16.msra.mxu1 %v7564_v2 }
 0xd6e   :  { %v1431_v5 = vpop.xlane.xlu0 %1430 }
 0xd6f   :  { %v1437_v39 = vmul.f32 0.015625, %v1431_v5 }
 0xd70   :  { %v1434_v50 = vpop.xlane.xlu1 %1433 }
 0xd71   :  { %v1441_v52 = vadd.f32 1e-06, %v1437_v39  ;;  %v1438_v22 = vmul.f32 0.015625, %v1434_v50 }
 0xd73   :  { %8094 = vrsqrt.f32 %v1441_v52  ;;  %v1442_v11 = vadd.f32 1e-06, %v1438_v22 }
 0xd75   :  { %8096 = vrsqrt.f32 %v1442_v11 }
 0xd7d   :  { %v8095_v53 = vpop.eup %8094 }
 0xd7e   :  { %v1449_v41 = vmul.f32 %v8095_v53, %v1417_v4 }
 0xd7f   :  { %v8097_v8 = vpop.eup %8096 }
 0xd80   :  { %v1459_v47 = vmul.f32 %v6371_v30, %v1449_v41  ;;  %v1450_v35 = vmul.f32 %v8097_v8, %v1418_v7 }
 0xd82   :  { %v1460_v31 = vmul.f32 %v6371_v30, %v1450_v35  ;;  %v1469_v54 = vadd.f32 %v6372_v63, %v1459_v47 }
 0xd84   :  { %v1470_v56 = vadd.f32 %v6372_v63, %v1460_v31 }
 0xd86   :  { %v1472_v59 = vpack.c.bf16 %v1470_v56, %v1469_v54  ;;  %v6406_v54 = vld [vmem:[%s10455_s14 + $0x1] ss:$0 sm:$0xff]  ;;  %s10485_s14 = sld [smem:[#allocation9_spill]] }
 0xd88   :  { %7341 = vmatmul.mubr.msk.bf16.vlgmr.msra.gmra.mrb[16].mxu0 %vm194_vm0, %v1472_v59 }
 0xe5b   :  { %v7342_v20 = vpop.f32.mrb[16].mxu0 }
 0xe5c   :  { %v1563_v49 = vadd.f32 %v7342_v20, %v6382_v25  ;;  %v1554_v14 = vpop.f32.mrb[17].mxu0 }
 0xe5d   :  { %v1555_v55 = vadd.f32 %v6382_v25, %v1554_v14  ;;  %v7343_v3 = vpop.f32.mrb[18].mxu0 }
 0xe5e   :  { %v1575_v57 = vmul.f32 0.044715, %v1563_v49  ;;  %v1566_v4 = vadd.f32 %v7343_v3, %v6382_v25  ;;  %v1557_v6 = vpop.f32.mrb[19].mxu0  ;;  %v1571_v5 = vmul.f32 0.5, %v1563_v49 }
 0xe5f   :  { %v1573_v21 = vmul.f32 0.044715, %v1555_v55  ;;  %v1558_v7 = vadd.f32 %v6382_v25, %v1557_v6  ;;  %v1569_v52 = vmul.f32 0.5, %v1555_v55 }
 0xe60   :  { %v1579_v17 = vmul.f32 %v1575_v57, %v1563_v49  ;;  %v1576_v10 = vmul.f32 0.044715, %v1566_v4  ;;  %v1572_v39 = vmul.f32 0.5, %v1566_v4 }
 0xe61   :  { %v1577_v12 = vmul.f32 %v1573_v21, %v1555_v55  ;;  %v1574_v13 = vmul.f32 0.044715, %v1558_v7  ;;  %v1570_v22 = vmul.f32 0.5, %v1558_v7 }
 0xe62   :  { %v1583_v15 = vmul.f32 %v1579_v17, %v1563_v49  ;;  %v1580_v42 = vmul.f32 %v1576_v10, %v1566_v4 }
 0xe63   :  { %v1581_v23 = vmul.f32 %v1577_v12, %v1555_v55  ;;  %v1578_v24 = vmul.f32 %v1574_v13, %v1558_v7 }
 0xe64   :  { %v1587_v38 = vadd.f32 %v1583_v15, %v1563_v49  ;;  %v1584_v28 = vmul.f32 %v1580_v42, %v1566_v4 }
 0xe65   :  { %v1582_v30 = vmul.f32 %v1578_v24, %v1558_v7  ;;  %v1585_v32 = vadd.f32 %v1581_v23, %v1555_v55 }
 0xe66   :  { %v1591_v48 = vmul.f32 0.7978846, %v1587_v38  ;;  %v1588_v33 = vadd.f32 %v1584_v28, %v1566_v4 }
 0xe67   :  { %v1586_v40 = vadd.f32 %v1582_v30, %v1558_v7  ;;  %v1589_v63 = vmul.f32 0.7978846, %v1585_v32  ;;  %v7565_v32 = vld [vmem:[%s10456_s17] ss:$8 sps:$4 sm:$0xff]  }
 0xe68   :  { %8098 = vtanh.f32 %v1591_v48  ;;  %v1592_v36 = vmul.f32 0.7978846, %v1588_v33  ;;  %v7567_v48 = vld [vmem:[%s10456_s17 + $0x4] ss:$8 sps:$4 sm:$0xff]   ;;  %v7568_v33 = vld [vmem:[%s10456_s17 + $0x100] ss:$8 sps:$4 sm:$0xff]  }
 0xe69   :  { %v1590_v37 = vmul.f32 0.7978846, %v1586_v40  ;;  %8100 = vtanh.f32 %v1589_v63  ;;  %v7570_v40 = vld [vmem:[%s10456_s17 + $0x104] ss:$8 sps:$4 sm:$0xff]   ;;  %2839 = vmatprep.subr.bf16.mxu1 %v7567_v48  ;;  %v7571_v63 = vld [vmem:[%s10456_s17 + $0x10] ss:$8 sps:$4 sm:$0xff]  }
 0xe6a   :  { %8102 = vtanh.f32 %v1592_v36  ;;  %v7573_v36 = vld [vmem:[%s10456_s17 + $0x14] ss:$8 sps:$4 sm:$0xff]   ;;  %2880 = vmatprep.subr.bf16.mxu0 %v7570_v40  ;;  %v6416_v48 = vld [vmem:[%s10458_s16] ss:$0 sm:$0xff] }
 0xe6b   :  { %8104 = vtanh.f32 %v1590_v37  ;;  %v7574_v37 = vld [vmem:[%s10456_s17 + $0x110] ss:$8 sps:$4 sm:$0xff]   ;;  %2881 = vmatpush1.bf16.msra.mxu0 %v7568_v33 }
 0xe72   :  { %v8099_v51 = vpop.eup %8098 }
 0xe73   :  { %v8101_v26 = vpop.eup %8100  ;;  %v1599_v34 = vadd.f32 1.0, %v8099_v51  ;;  %v7576_v51 = vld [vmem:[%s10456_s17 + $0x114] ss:$8 sps:$4 sm:$0xff]  }
 0xe74   :  { %v8103_v44 = vpop.eup %8102  ;;  %v1597_v45 = vadd.f32 1.0, %v8101_v26  ;;  %v7579_v26 = vld [vmem:[%s10456_s17 + $0x24] ss:$8 sps:$4 sm:$0xff]   ;;  %2882 = vmatprep.subr.bf16.mxu0 %v7576_v51 }
 0xe75   :  { %v8105_v46 = vpop.eup %8104  ;;  %v1600_v50 = vadd.f32 1.0, %v8103_v44  ;;  %v1603_v53 = vmul.f32 %v1599_v34, %v1571_v5  ;;  %v7577_v34 = vld [vmem:[%s10456_s17 + $0x20] ss:$8 sps:$4 sm:$0xff]   ;;  %v7582_v44 = vld [vmem:[%s10456_s17 + $0x124] ss:$8 sps:$4 sm:$0xff]   ;;  %2883 = vmatpush1.bf16.msra.mxu0 %v7574_v37 }
 0xe76   :  { %v1598_v11 = vadd.f32 1.0, %v8105_v46  ;;  %v1601_v8 = vmul.f32 %v1597_v45, %v1569_v52  ;;  %v7580_v45 = vld [vmem:[%s10456_s17 + $0x120] ss:$8 sps:$4 sm:$0xff]   ;;  %v7585_v46 = vld [vmem:[%s10456_s17 + $0x34] ss:$8 sps:$4 sm:$0xff]   ;;  %2884 = vmatprep.subr.bf16.mxu0 %v7582_v44 }
 0xe77   :  { %v1604_v41 = vmul.f32 %v1600_v50, %v1572_v39  ;;  %v7588_v5 = vld [vmem:[%s10456_s17 + $0x134] ss:$8 sps:$4 sm:$0xff]   ;;  %v7583_v39 = vld [vmem:[%s10456_s17 + $0x30] ss:$8 sps:$4 sm:$0xff]   ;;  %v7591_v52 = vld [vmem:[%s10456_s17 + $0x44] ss:$8 sps:$4 sm:$0xff]  }
 0xe78   :  { %v1602_v47 = vmul.f32 %v1598_v11, %v1570_v22  ;;  %v7586_v50 = vld [vmem:[%s10456_s17 + $0x130] ss:$8 sps:$4 sm:$0xff]   ;;  %v7594_v22 = vld [vmem:[%s10456_s17 + $0x144] ss:$8 sps:$4 sm:$0xff]   ;;  %v7589_v11 = vld [vmem:[%s10456_s17 + $0x40] ss:$8 sps:$4 sm:$0xff]  }
 0xe79   :  { %v1606_v35 = vpack.c.bf16 %v1604_v41, %v1603_v53  ;;  %2885 = vmatpush1.bf16.msra.mxu0 %v7580_v45  ;;  %v7592_v53 = vld [vmem:[%s10456_s17 + $0x140] ss:$8 sps:$4 sm:$0xff]   ;;  %v7597_v41 = vld [vmem:[%s10456_s17 + $0x54] ss:$8 sps:$4 sm:$0xff]   ;;  %v7627_v37 = vld [vmem:[%s10456_s17 + $0xa4] ss:$8 sps:$4 sm:$0xff]  }
 0xe7a   :  { %v1605_v31 = vpack.c.bf16 %v1602_v47, %v1601_v8  ;;  %2886 = vmatprep.subr.bf16.mxu0 %v7588_v5  ;;  %v7600_v8 = vld [vmem:[%s10456_s17 + $0x154] ss:$8 sps:$4 sm:$0xff]   ;;  %v7595_v47 = vld [vmem:[%s10456_s17 + $0x50] ss:$8 sps:$4 sm:$0xff]  }
 0xe7c   :  { %7360 = vmatprep.mubr.bf16.mxu1 %v1605_v31  ;;  %v7603_v31 = vld [vmem:[%s10456_s17 + $0x64] ss:$8 sps:$4 sm:$0xff]  }
 0xe7d   :  { %7361 = vmatmul.mubr.bf16.vlgmr.msra.gmra.mrb[32].mxu1 %v1606_v35  ;;  %2887 = vmatpush1.bf16.msra.mxu0 %v7586_v50  ;;  %v7598_v35 = vld [vmem:[%s10456_s17 + $0x150] ss:$8 sps:$4 sm:$0xff]  }
 0xe7e   :  { %2840 = vmatpush1.bf16.msra.mxu1 %v7565_v32  ;;  %2888 = vmatprep.subr.bf16.mxu0 %v7594_v22  ;;  %v7633_v22 = vld [vmem:[%s10456_s17 + $0xb4] ss:$8 sps:$4 sm:$0xff]  }
 0xe7f   :  { %2841 = vmatprep.subr.bf16.mxu1 %v7573_v36  ;;  %v7625_v36 = vld [vmem:[%s10456_s17 + $0xa0] ss:$8 sps:$4 sm:$0xff]  }
 0xe81   :  { %2889 = vmatpush1.bf16.msra.mxu0 %v7592_v53 }
 0xe82   :  { %2842 = vmatpush1.bf16.msra.mxu1 %v7571_v63  ;;  %2890 = vmatprep.subr.bf16.mxu0 %v7600_v8 }
 0xe83   :  { %2843 = vmatprep.subr.bf16.mxu1 %v7579_v26 }
 0xe85   :  { %2891 = vmatpush1.bf16.msra.mxu0 %v7598_v35 }
 0xe86   :  { %2844 = vmatpush1.bf16.msra.mxu1 %v7577_v34 }
 0xe87   :  { %2845 = vmatprep.subr.bf16.mxu1 %v7585_v46 }
 0xe8a   :  { %2846 = vmatpush1.bf16.msra.mxu1 %v7583_v39 }
 0xe8b   :  { %2847 = vmatprep.subr.bf16.mxu1 %v7591_v52  ;;  %v7631_v52 = vld [vmem:[%s10456_s17 + $0xb0] ss:$8 sps:$4 sm:$0xff]  }
 0xe8e   :  { %2848 = vmatpush1.bf16.msra.mxu1 %v7589_v11 }
 0xe8f   :  { %2849 = vmatprep.subr.bf16.mxu1 %v7597_v41 }
 0xe92   :  { %2850 = vmatpush1.bf16.msra.mxu1 %v7595_v47 }
 0xe93   :  { %2851 = vmatprep.subr.bf16.mxu1 %v7603_v31 }
 0xf50   :  { %v7362_v56 = vpop.f32.mrb[32].mxu1 }
 0xf51   :  { %v1723_v59 = vadd.f32 %v7362_v56, %v6406_v54  ;;  %v1714_v60 = vpop.f32.mrb[33].mxu1  ;;  %v7606_v56 = vld [vmem:[%s10456_s17 + $0x164] ss:$8 sps:$4 sm:$0xff]  }
 0xf52   :  { %v1715_v9 = vadd.f32 %v6406_v54, %v1714_v60  ;;  %v7363_v43 = vpop.f32.mrb[34].mxu1  ;;  %v7609_v60 = vld [vmem:[%s10456_s17 + $0x74] ss:$8 sps:$4 sm:$0xff]   ;;  %2892 = vmatprep.subr.bf16.mxu0 %v7606_v56 }
 0xf53   :  { %v1726_v19 = vadd.f32 %v7363_v43, %v6406_v54  ;;  %v1717_v62 = vpop.f32.mrb[35].mxu1  ;;  %v1731_v29 = vadd.f32 %v1723_v59, %v8740_v61  ;;  %v7604_v59 = vld [vmem:[%s10456_s17 + $0x160] ss:$8 sps:$4 sm:$0xff]   ;;  %v7607_v43 = vld [vmem:[%s10456_s17 + $0x70] ss:$8 sps:$4 sm:$0xff]  }
 0xf54   :  { %v1718_v1 = vadd.f32 %v6406_v54, %v1717_v62  ;;  %v1729_v2 = vadd.f32 %v1715_v9, %v8719_v58  ;;  %v7601_v54 = vld [vmem:[%s10456_s17 + $0x60] ss:$8 sps:$4 sm:$0xff]   ;;  %v7612_v9 = vld [vmem:[%s10456_s17 + $0x174] ss:$8 sps:$4 sm:$0xff]   ;;  %v7615_v62 = vld [vmem:[%s10456_s17 + $0x84] ss:$8 sps:$4 sm:$0xff]   ;;  %2893 = vmatpush1.bf16.msra.mxu0 %v7604_v59 }
 0xf55   :  { %v1741_v25 = vsel %vm194_vm0, %v1731_v29, 0.0  ;;  %v1732_v20 = vadd.f32 %v1726_v19, %v8744_v27  ;;  %v7610_v19 = vld [vmem:[%s10456_s17 + $0x170] ss:$8 sps:$4 sm:$0xff]   ;;  %2852 = vmatpush1.bf16.msra.mxu1 %v7601_v54  ;;  %2894 = vmatprep.subr.bf16.mxu0 %v7612_v9 }
 0xf56   :  { %1742 = vadd.xlane.f32.xlu1 %v1741_v25  ;;  %v1735_v49 = vsel %vm194_vm0, %v1729_v2, 0.0  ;;  %v1730_v14 = vadd.f32 %v1718_v1, %v8723_v18  ;;  %2853 = vmatprep.subr.bf16.mxu1 %v7609_v60  ;;  %v7613_v1 = vld [vmem:[%s10456_s17 + $0x80] ss:$8 sps:$4 sm:$0xff]  }
 0xf57   :  { %1736 = vadd.xlane.f32.xlu0 %v1735_v49  ;;  %v1744_v55 = vsel %vm194_vm0, %v1732_v20, 0.0 }
 0xf58   :  { %v1738_v3 = vsel %vm194_vm0, %v1730_v14, 0.0  ;;  %2895 = vmatpush1.bf16.msra.mxu0 %v7610_v19 }
 0xf59   :  { %2854 = vmatpush1.bf16.msra.mxu1 %v7607_v43 }
 0xf5a   :  { %1745 = vadd.xlane.f32.xlu1 %v1744_v55  ;;  %2855 = vmatprep.subr.bf16.mxu1 %v7615_v62  ;;  %v7637_v62 = vld [vmem:[%s10456_s17 + $0xc0] ss:$8 sps:$4 sm:$0xff]  }
 0xf5b   :  { %1739 = vadd.xlane.f32.xlu0 %v1738_v3 }
 0xf5d   :  { %2856 = vmatpush1.bf16.msra.mxu1 %v7613_v1 }
 0xfe3   :  { %v1743_v61 = vpop.xlane.xlu1 %1742 }
 0xfe4   :  { %v1749_v57 = vmul.f32 0.015625, %v1743_v61  ;;  %v1737_v4 = vpop.xlane.xlu0 %1736 }
 0xfe5   :  { %v1747_v58 = vmul.f32 0.015625, %v1737_v4 }
 0xfe6   :  { %v8814_v6 = vsub.f32 %v1731_v29, %v1749_v57  ;;  %v7618_v29 = vld [vmem:[%s10456_s17 + $0x184] ss:$8 sps:$4 sm:$0xff]  }
 0xfe7   :  { %v8816_v21 = vsub.f32 %v1729_v2, %v1747_v58  ;;  %v1746_v27 = vpop.xlane.xlu1 %1745  ;;  %v7616_v2 = vld [vmem:[%s10456_s17 + $0x180] ss:$8 sps:$4 sm:$0xff]   ;;  %2896 = vmatprep.subr.bf16.mxu0 %v7618_v29  ;;  %v7639_v29 = vld [vmem:[%s10456_s17 + $0xc4] ss:$8 sps:$4 sm:$0xff]  }
 0xfe8   :  { %v1750_v7 = vmul.f32 0.015625, %v1746_v27  ;;  %v1740_v17 = vpop.xlane.xlu0 %1739  ;;  %v1757_v18 = vmul.f32 %v8814_v6, %v8814_v6  ;;  %2897 = vmatpush1.bf16.msra.mxu0 %v7616_v2 }
 0xfe9   :  { %v1748_v10 = vmul.f32 0.015625, %v1740_v17  ;;  %v1755_v12 = vmul.f32 %v8816_v21, %v8816_v21  ;;  %v8209_v17 = vmov 1983009808  }
 0xfea   :  { %v8822_v13 = vsub.f32 %v1732_v20, %v1750_v7  ;;  %v1765_v15 = vsel %vm194_vm0, %v1757_v18, 0.0  ;;  %v1811_v18 = vunpack.c.l.s4 %v8209_v17 }
 0xfeb   :  { %v8825_v42 = vsub.f32 %v1730_v14, %v1748_v10  ;;  %1766 = vadd.xlane.f32.xlu1 %v1765_v15  ;;  %v1759_v23 = vsel %vm194_vm0, %v1755_v12, 0.0  ;;  %v1813_v10 = vlaneseq  ;;  %v6415_v12 = vld [vmem:[%s10457_s15] ss:$0 sm:$0xff]  ;;  %v7619_v15 = vld [vmem:[%s10456_s17 + $0x90] ss:$8 sps:$4 sm:$0xff]  }
 0xfec   :  { %1760 = vadd.xlane.f32.xlu0 %v1759_v23  ;;  %v1758_v24 = vmul.f32 %v8822_v13, %v8822_v13  ;;  %v7621_v23 = vld [vmem:[%s10456_s17 + $0x94] ss:$8 sps:$4 sm:$0xff]  }
 0xfed   :  { %v1756_v38 = vmul.f32 %v8825_v42, %v8825_v42  ;;  %2857 = vmatprep.subr.bf16.mxu1 %v7621_v23  ;;  %v7646_v23 = vld [vmem:[%s10456_s17 + $0x1d0] ss:$8 sps:$4 sm:$0xff]  }
 0xfee   :  { %v1768_v28 = vsel %vm194_vm0, %v1758_v24, 0.0  ;;  %v1812_v24 = vunpack.c.0.s8 %v1811_v18  ;;  %2858 = vmatpush1.bf16.msra.mxu1 %v7619_v15  ;;  %v7643_v18 = vld [vmem:[%s10456_s17 + $0xd0] ss:$8 sps:$4 sm:$0xff]  }
 0xfef   :  { %1769 = vadd.xlane.f32.xlu1 %v1768_v28  ;;  %v1762_v30 = vsel %vm194_vm0, %v1756_v38, 0.0  ;;  %v8951_v38 = vshrl.u32 %v1813_v10, 7  ;;  %v7622_v28 = vld [vmem:[%s10456_s17 + $0x190] ss:$8 sps:$4 sm:$0xff]   ;;  %2859 = vmatprep.subr.bf16.mxu1 %v7627_v37  ;;  %v7648_v10 = vld [vmem:[%s10456_s17 + $0x1d4] ss:$8 sps:$4 sm:$0xff]  }
 0xff0   :  { %1763 = vadd.xlane.f32.xlu0 %v1762_v30  ;;  %v7624_v30 = vld [vmem:[%s10456_s17 + $0x194] ss:$8 sps:$4 sm:$0xff]  }
 0xff1   :  { %2898 = vmatprep.subr.bf16.mxu0 %v7624_v30  ;;  %v8971_v26 = vsub.s32 %v1812_v24, %v8951_v38  ;;  %v7649_v30 = vld [vmem:[%s10456_s17 + $0xe0] ss:$8 sps:$4 sm:$0xff]   ;;  %v7657_v37 = vld [vmem:[%s10456_s17 + $0xf4] ss:$8 sps:$4 sm:$0xff]  }
 0xff2   :  { %2899 = vmatpush1.bf16.msra.mxu0 %v7622_v28  ;;  %2860 = vmatpush1.bf16.msra.mxu1 %v7625_v36  ;;  %v7655_v36 = vld [vmem:[%s10456_s17 + $0xf0] ss:$8 sps:$4 sm:$0xff]  }
 0xff3   :  { %2861 = vmatprep.subr.bf16.mxu1 %v7633_v22 }
 0xff6   :  { %2862 = vmatpush1.bf16.msra.mxu1 %v7631_v52 }
 0xff7   :  { %2863 = vmatprep.subr.bf16.mxu1 %v7639_v29 }
 0xffa   :  { %2864 = vmatpush1.bf16.msra.mxu1 %v7637_v62 }
0x1078   :  { %v1767_v25 = vpop.xlane.xlu1 %1766 }
0x1079   :  { %v1773_v20 = vmul.f32 0.015625, %v1767_v25  ;;  %v1761_v49 = vpop.xlane.xlu0 %1760 }
0x107a   :  { %v1771_v14 = vmul.f32 0.015625, %v1761_v49 }
0x107b   :  { %v1777_v55 = vadd.f32 1e-06, %v1773_v20 }
0x107c   :  { %v1775_v3 = vadd.f32 1e-06, %v1771_v14  ;;  %v1770_v61 = vpop.xlane.xlu1 %1769  ;;  %v7642_v14 = vld [vmem:[%s10456_s17 + $0x1c4] ss:$8 sps:$4 sm:$0xff]  }
0x107d   :  { %8106 = vrsqrt.f32 %v1777_v55  ;;  %v1774_v57 = vmul.f32 0.015625, %v1770_v61  ;;  %v1764_v4 = vpop.xlane.xlu0 %1763  ;;  %v7640_v61 = vld [vmem:[%s10456_s17 + $0x1c0] ss:$8 sps:$4 sm:$0xff]  }
0x107e   :  { %8108 = vrsqrt.f32 %v1775_v3  ;;  %v1772_v58 = vmul.f32 0.015625, %v1764_v4 }
0x107f   :  { %v1778_v27 = vadd.f32 1e-06, %v1774_v57 }
0x1080   :  { %v1776_v7 = vadd.f32 1e-06, %v1772_v58 }
0x1081   :  { %8110 = vrsqrt.f32 %v1778_v27 }
0x1082   :  { %8112 = vrsqrt.f32 %v1776_v7  ;;  %v7645_v7 = vld [vmem:[%s10456_s17 + $0xd4] ss:$8 sps:$4 sm:$0xff]  }
0x1083   :  { %2865 = vmatprep.subr.bf16.mxu1 %v7645_v7  ;;  %v7672_v7 = vld [vmem:[%s10456_s17 + $0x234] ss:$8 sps:$4 sm:$0xff]  }
0x1084   :  { %2866 = vmatpush1.bf16.msra.mxu1 %v7643_v18  ;;  %v7670_v18 = vld [vmem:[%s10456_s17 + $0x230] ss:$8 sps:$4 sm:$0xff]  }
0x1087   :  { %v8107_v32 = vpop.eup %8106 }
0x1088   :  { %v8109_v33 = vpop.eup %8108  ;;  %v1785_v40 = vmul.f32 %v8107_v32, %v8814_v6  ;;  %v7628_v6 = vld [vmem:[%s10456_s17 + $0x1a0] ss:$8 sps:$4 sm:$0xff]   ;;  %v7651_v32 = vld [vmem:[%s10456_s17 + $0xe4] ss:$8 sps:$4 sm:$0xff]  }
0x1089   :  { %v1783_v63 = vmul.f32 %v8109_v33, %v8816_v21  ;;  %v7630_v21 = vld [vmem:[%s10456_s17 + $0x1a4] ss:$8 sps:$4 sm:$0xff]   ;;  %2867 = vmatprep.subr.bf16.mxu1 %v7651_v32  ;;  %v7679_v32 = vld [vmem:[%s10456_s17 + $0x260] ss:$8 sps:$4 sm:$0xff]  }
0x108a   :  { %v1795_v51 = vmul.f32 %v6415_v12, %v1785_v40  ;;  %2900 = vmatprep.subr.bf16.mxu0 %v7630_v21  ;;  %v7654_v33 = vld [vmem:[%s10456_s17 + $0x1e4] ss:$8 sps:$4 sm:$0xff]   ;;  %2868 = vmatpush1.bf16.msra.mxu1 %v7649_v30 }
0x108b   :  { %v8111_v34 = vpop.eup %8110  ;;  %v1793_v44 = vmul.f32 %v6415_v12, %v1783_v63  ;;  %2901 = vmatpush1.bf16.msra.mxu0 %v7628_v6  ;;  %v7660_v6 = vld [vmem:[%s10456_s17 + $0x1f4] ss:$8 sps:$4 sm:$0xff]   ;;  %2869 = vmatprep.subr.bf16.mxu1 %v7657_v37  ;;  %v7681_v30 = vld [vmem:[%s10456_s17 + $0x264] ss:$8 sps:$4 sm:$0xff]   ;;  %v7688_v37 = vld [vmem:[%s10456_s17 + $0x290] ss:$8 sps:$4 sm:$0xff]  }
0x108c   :  { %v8113_v45 = vpop.eup %8112  ;;  %v1786_v46 = vmul.f32 %v8111_v34, %v8822_v13  ;;  %v1805_v5 = vadd.f32 %v6416_v48, %v1795_v51  ;;  %v7634_v13 = vld [vmem:[%s10456_s17 + $0x1b0] ss:$8 sps:$4 sm:$0xff]  }
0x108d   :  { %v1784_v39 = vmul.f32 %v8113_v45, %v8825_v42  ;;  %v1803_v50 = vadd.f32 %v6416_v48, %v1793_v44  ;;  %v7636_v42 = vld [vmem:[%s10456_s17 + $0x1b4] ss:$8 sps:$4 sm:$0xff]   ;;  %v7658_v51 = vld [vmem:[%s10456_s17 + $0x1f0] ss:$8 sps:$4 sm:$0xff]   ;;  %v7663_v44 = vld [vmem:[%s10456_s17 + $0x204] ss:$8 sps:$4 sm:$0xff]  }
0x108e   :  { %v1915_v11 = vrot.slane %v1805_v5, %v8971_v26  ;;  %v1931_v53 = vcombine.high %v1805_v5, %v1805_v5  ;;  %v1796_v41 = vmul.f32 %v6415_v12, %v1786_v46  ;;  %1907 = vst.msk [vmem:[#allocation2 + $0x1] sm:$0x1] %vm1807_vm4, %v1805_v5  ;;  %2902 = vmatprep.subr.bf16.mxu0 %v7636_v42 }
0x108f   :  { %v1816_v8 = vrot.slane %v1803_v50, %v8971_v26  ;;  %v1833_v47 = vcombine.high %v1803_v50, %v1803_v50  ;;  %v1794_v35 = vmul.f32 %v6415_v12, %v1784_v39  ;;  %1808 = vst.msk [vmem:[#allocation2] sm:$0x1] %vm1807_vm4, %v1803_v50  ;;  %2903 = vmatpush1.bf16.msra.mxu0 %v7634_v13 }
0x1090   :  { %v6425_v31 = vrot.slane %v1915_v11, 9  ;;  %v1922_v54 = vcombine.high %v1915_v11, %v1915_v11  ;;  %v8998_v56 = vrot.slane %v1931_v53, %v8971_v26  ;;  %v1806_v59 = vadd.f32 %v6416_v48, %v1796_v41  ;;  %2904 = vmatprep.subr.bf16.mxu0 %v7642_v14  ;;  %2870 = vmatpush1.bf16.msra.mxu1 %v7655_v36  ;;  %v7661_v14 = vld [vmem:[%s10456_s17 + $0x200] ss:$8 sps:$4 sm:$0xff]   ;;  %v7690_v36 = vld [vmem:[%s10456_s17 + $0x294] ss:$8 sps:$4 sm:$0xff]  }
0x1091   :  { %v6417_v60 = vrot.slane %v1816_v8, 9  ;;  %v1824_v9 = vcombine.high %v1816_v8, %v1816_v8  ;;  %v1840_v43 = vrot.slane %v1833_v47, %v8971_v26  ;;  %v1804_v19 = vadd.f32 %v6416_v48, %v1794_v35  ;;  %v7652_v48 = vld [vmem:[%s10456_s17 + $0x1e0] ss:$8 sps:$4 sm:$0xff]  }
0x1092   :  { %1918 = vrot.lane.b32.xlu1 %v6425_v31, %s8210_s29  ;;  %v9010_v1 = vcombine.high %v8998_v56, %v8998_v56  ;;  %v9013_v2 = vrot.slane %v1806_v59, %v8971_v26  ;;  %1924 = vst.msk [vmem:[#allocation2 + $0x3] sm:$0x1] %vm1807_vm4, %v1922_v54  ;;  %1940 = vst.msk [vmem:[#allocation2 + $0x5] sm:$0x1] %vm1807_vm4, %v8998_v56  ;;  %v6426_v57 = vrot.slane %v1922_v54, 9  ;;  %v6427_v40 = vrot.slane %v8998_v56, 9 }
0x1093   :  { %1956 = vst.msk [vmem:[#allocation2 + $0x9] sm:$0x1] %vm1807_vm4, %v1806_v59  ;;  %1819 = vrot.lane.b32.xlu0 %v6417_v60, %s8210_s29  ;;  %v6418_v25 = vrot.slane %v1824_v9, 9  ;;  %v1849_v20 = vcombine.high %v1840_v43, %v1840_v43  ;;  %v1866_v49 = vrot.slane %v1804_v19, %v8971_v26  ;;  %1826 = vst.msk [vmem:[#allocation2 + $0x2] sm:$0x1] %vm1807_vm4, %v1824_v9  ;;  %2905 = vmatpush1.bf16.msra.mxu0 %v7640_v61 }
0x1094   :  { %1842 = vst.msk [vmem:[#allocation2 + $0x4] sm:$0x1] %vm1807_vm4, %v1840_v43  ;;  %1858 = vst.msk [vmem:[#allocation2 + $0x8] sm:$0x1] %vm1807_vm4, %v1804_v19  ;;  %v1971_v55 = vcombine.high %v9013_v2, %v9013_v2  ;;  %v1882_v3 = vcombine.high %v1804_v19, %v1804_v19  ;;  %v1980_v58 = vcombine.high %v1806_v59, %v1806_v59  ;;  %v6419_v12 = vrot.slane %v1840_v43, 9 }
0x1095   :  { %1949 = vst.msk [vmem:[#allocation2 + $0x7] sm:$0x1] %vm1807_vm4, %v9010_v1  ;;  %v1873_v4 = vcombine.high %v1866_v49, %v1866_v49  ;;  %1851 = vst.msk [vmem:[#allocation2 + $0x6] sm:$0x1] %vm1807_vm4, %v1849_v20  ;;  %v6420_v24 = vrot.slane %v1849_v20, 9  ;;  %2906 = vmatprep.subr.bf16.mxu0 %v7648_v10  ;;  %v6428_v63 = vrot.slane %v9010_v1, 9 }
0x1096   :  { %1829 = vrot.lane.b32.xlu1 %v6418_v25, %s8210_s29  ;;  %v1889_v27 = vrot.slane %v1882_v3, %v8971_v26  ;;  %1973 = vst.msk [vmem:[#allocation2 + $0xb] sm:$0x1] %vm1807_vm4, %v1971_v55  ;;  %v1987_v17 = vrot.slane %v1980_v58, %v8971_v26  ;;  %v6421_v21 = vrot.slane %v1866_v49, 9  ;;  %v6430_v34 = vrot.slane %v1971_v55, 9  ;;  %v7666_v61 = vld [vmem:[%s10456_s17 + $0x214] ss:$8 sps:$4 sm:$0xff]  }
0x1097   :  { %1927 = vrot.lane.b32.xlu0 %v6426_v57, %s8210_s29  ;;  %1875 = vst.msk [vmem:[#allocation2 + $0xa] sm:$0x1] %vm1807_vm4, %v1873_v4  ;;  %2907 = vmatpush1.bf16.msra.mxu0 %v7646_v23  ;;  %v6429_v45 = vrot.slane %v9013_v2, 9  ;;  %v6422_v46 = vrot.slane %v1873_v4, 9  ;;  %v7664_v57 = vld [vmem:[%s10456_s17 + $0x210] ss:$8 sps:$4 sm:$0xff]  }
0x1098   :  { %v1898_v15 = vcombine.high %v1889_v27, %v1889_v27  ;;  %1891 = vst.msk [vmem:[#allocation2 + $0xc] sm:$0x1] %vm1807_vm4, %v1889_v27  ;;  %v1996_v28 = vcombine.high %v1987_v17, %v1987_v17  ;;  %1989 = vst.msk [vmem:[#allocation2 + $0xd] sm:$0x1] %vm1807_vm4, %v1987_v17  ;;  %2908 = vmatprep.subr.bf16.mxu0 %v7654_v33  ;;  %v6423_v5 = vrot.slane %v1889_v27, 9  ;;  %v6431_v50 = vrot.slane %v1987_v17, 9 }
0x1099   :  { %v7669_v4 = vld [vmem:[%s10456_s17 + $0x224] ss:$8 sps:$4 sm:$0xff]   ;;  %v7667_v58 = vld [vmem:[%s10456_s17 + $0x220] ss:$8 sps:$4 sm:$0xff]   ;;  %v7682_v33 = vld [vmem:[%s10456_s17 + $0x270] ss:$8 sps:$4 sm:$0xff]  }
0x109a   :  { %1845 = vrot.lane.b32.xlu1 %v6419_v12, %s8210_s29  ;;  %1900 = vst.msk [vmem:[#allocation2 + $0xe] sm:$0x1] %vm1807_vm4, %v1898_v15  ;;  %1998 = vst.msk [vmem:[#allocation2 + $0xf] sm:$0x1] %vm1807_vm4, %v1996_v28  ;;  %v6424_v39 = vrot.slane %v1898_v15, 9  ;;  %v6432_v52 = vrot.slane %v1996_v28, 9 }
0x109b   :  { %1854 = vrot.lane.b32.xlu0 %v6420_v24, %s8210_s29  ;;  %2909 = vmatpush1.bf16.msra.mxu0 %v7652_v48  ;;  %v7675_v12 = vld [vmem:[%s10456_s17 + $0x244] ss:$8 sps:$4 sm:$0xff]   ;;  %v7673_v23 = vld [vmem:[%s10456_s17 + $0x240] ss:$8 sps:$4 sm:$0xff]   ;;  %v7678_v24 = vld [vmem:[%s10456_s17 + $0x254] ss:$8 sps:$4 sm:$0xff]  }
0x109c   :  { %2910 = vmatprep.subr.bf16.mxu0 %v7660_v6  ;;  %v7676_v28 = vld [vmem:[%s10456_s17 + $0x250] ss:$8 sps:$4 sm:$0xff]   ;;  %v7684_v48 = vld [vmem:[%s10456_s17 + $0x274] ss:$8 sps:$4 sm:$0xff]   ;;  %v7691_v6 = vld [vmem:[%s10456_s17 + $0x2a0] ss:$8 sps:$4 sm:$0xff]  }
0x109e   :  { %1943 = vrot.lane.b32.xlu1 %v6427_v40, %s8210_s29  ;;  %v7687_v40 = vld [vmem:[%s10456_s17 + $0x284] ss:$8 sps:$4 sm:$0xff]  }
0x109f   :  { %1952 = vrot.lane.b32.xlu0 %v6428_v63, %s8210_s29  ;;  %2911 = vmatpush1.bf16.msra.mxu0 %v7658_v51  ;;  %v7685_v63 = vld [vmem:[%s10456_s17 + $0x280] ss:$8 sps:$4 sm:$0xff]   ;;  %v7693_v51 = vld [vmem:[%s10456_s17 + $0x2a4] ss:$8 sps:$4 sm:$0xff]  }
0x10a0   :  { %2921 = vmatprep.subr.bf16.mxu0 %v7663_v44  ;;  %v7699_v44 = vld [vmem:[%s10456_s17 + $0x2c4] ss:$8 sps:$4 sm:$0xff]  }
0x10a2   :  { %1869 = vrot.lane.b32.xlu1 %v6421_v21, %s8210_s29  ;;  %v7696_v21 = vld [vmem:[%s10456_s17 + $0x2b4] ss:$8 sps:$4 sm:$0xff]  }
0x10a3   :  { %1976 = vrot.lane.b32.xlu0 %v6430_v34, %s8210_s29  ;;  %v7694_v34 = vld [vmem:[%s10456_s17 + $0x2b0] ss:$8 sps:$4 sm:$0xff]  }
0x10a6   :  { %1967 = vrot.lane.b32.xlu1 %v6429_v45, %s8210_s29  ;;  %v7697_v45 = vld [vmem:[%s10456_s17 + $0x2c0] ss:$8 sps:$4 sm:$0xff]  }
0x10a7   :  { %1878 = vrot.lane.b32.xlu0 %v6422_v46, %s8210_s29  ;;  %v7702_v46 = vld [vmem:[%s10456_s17 + $0x2d4] ss:$8 sps:$4 sm:$0xff]  }
0x10aa   :  { %1894 = vrot.lane.b32.xlu1 %v6423_v5, %s8210_s29  ;;  %v7700_v5 = vld [vmem:[%s10456_s17 + $0x2d0] ss:$8 sps:$4 sm:$0xff]  }
0x10ab   :  { %1903 = vrot.lane.b32.xlu0 %v6424_v39, %s8210_s29  ;;  %v7705_v39 = vld [vmem:[%s10456_s17 + $0x2e4] ss:$8 sps:$4 sm:$0xff]  }
0x10ae   :  { %1992 = vrot.lane.b32.xlu1 %v6431_v50, %s8210_s29 }
0x10af   :  { %2001 = vrot.lane.b32.xlu0 %v6432_v52, %s8210_s29  ;;  %v7703_v52 = vld [vmem:[%s10456_s17 + $0x2e0] ss:$8 sps:$4 sm:$0xff]  }
0x1104   :  { %v1919_v22 = vpop.permute.xlu1 %1918 }
0x1105   :  { %1921 = vst.msk [vmem:[#allocation2 + $0x1] sm:$0x1] %vm1822_vm5, %v1919_v22  ;;  %v1820_v11 = vpop.permute.xlu0 %1819  ;;  %v7708_v22 = vld [vmem:[%s10456_s17 + $0x2f4] ss:$8 sps:$4 sm:$0xff]  }
0x1106   :  { %1823 = vst.msk [vmem:[#allocation2] sm:$0x1] %vm1822_vm5, %v1820_v11 }
0x1108   :  { %v1830_v53 = vpop.permute.xlu1 %1829 }
0x1109   :  { %1832 = vst.msk [vmem:[#allocation2 + $0x2] sm:$0x1] %vm1822_vm5, %v1830_v53  ;;  %v1928_v41 = vpop.permute.xlu0 %1927  ;;  %v7706_v53 = vld [vmem:[%s10456_s17 + $0x2f0] ss:$8 sps:$4 sm:$0xff]  }
0x110a   :  { %1930 = vst.msk [vmem:[#allocation2 + $0x3] sm:$0x1] %vm1822_vm5, %v1928_v41  ;;  %v7711_v41 = vld [vmem:[%s10456_s17 + $0x304] ss:$8 sps:$4 sm:$0xff]  }
0x110c   :  { %v1846_v13 = vpop.permute.xlu1 %1845 }
0x110d   :  { %1848 = vst.msk [vmem:[#allocation2 + $0x4] sm:$0x1] %vm1822_vm5, %v1846_v13  ;;  %v1855_v42 = vpop.permute.xlu0 %1854 }
0x110e   :  { %1857 = vst.msk [vmem:[#allocation2 + $0x6] sm:$0x1] %vm1822_vm5, %v1855_v42  ;;  %v7709_v42 = vld [vmem:[%s10456_s17 + $0x300] ss:$8 sps:$4 sm:$0xff]  }
0x1110   :  { %v1944_v8 = vpop.permute.xlu1 %1943 }
0x1111   :  { %1946 = vst.msk [vmem:[#allocation2 + $0x5] sm:$0x1] %vm1822_vm5, %v1944_v8  ;;  %v1953_v47 = vpop.permute.xlu0 %1952 }
0x1112   :  { %1955 = vst.msk [vmem:[#allocation2 + $0x7] sm:$0x1] %vm1822_vm5, %v1953_v47  ;;  %v7715_v47 = vld [vmem:[%s10456_s17 + $0x314] ss:$8 sps:$4 sm:$0xff]  }
0x1114   :  { %v1870_v35 = vpop.permute.xlu1 %1869 }
0x1115   :  { %1872 = vst.msk [vmem:[#allocation2 + $0x8] sm:$0x1] %vm1822_vm5, %v1870_v35  ;;  %v1977_v31 = vpop.permute.xlu0 %1976 }
0x1116   :  { %1979 = vst.msk [vmem:[#allocation2 + $0xb] sm:$0x1] %vm1822_vm5, %v1977_v31  ;;  %v7713_v31 = vld [vmem:[%s10456_s17 + $0x310] ss:$8 sps:$4 sm:$0xff]  }
0x1118   :  { %v1968_v54 = vpop.permute.xlu1 %1967 }
0x1119   :  { %v2005_v56 = vld [vmem:[#allocation2] sm:$0xff]  ;;  %1970 = vst.msk [vmem:[#allocation2 + $0x9] sm:$0x1] %vm1822_vm5, %v1968_v54  ;;  %v1879_v59 = vpop.permute.xlu0 %1878 }
0x111a   :  { %1881 = vst.msk [vmem:[#allocation2 + $0xa] sm:$0x1] %vm1822_vm5, %v1879_v59  ;;  %v2016_v60 = vrot.slane %v2005_v56, %v8971_v26  ;;  %v2009_v9 = vcombine.high %v2005_v56, %v2005_v56  ;;  %v7718_v54 = vld [vmem:[%s10456_s17 + $0x324] ss:$8 sps:$4 sm:$0xff]   ;;  %v7716_v56 = vld [vmem:[%s10456_s17 + $0x320] ss:$8 sps:$4 sm:$0xff]  }
0x111b   :  { %v7721_v59 = vld [vmem:[%s10456_s17 + $0x334] ss:$8 sps:$4 sm:$0xff]  }
0x111c   :  { %v1895_v43 = vpop.permute.xlu1 %1894  ;;  %v2024_v19 = vcombine.high %v2016_v60, %v2016_v60  ;;  %v2023_v62 = vrot.slane %v2009_v9, %v8971_v26  ;;  %v2051_v25 = vpack.c.bf16 %v2016_v60, %v2016_v60  ;;  %v7719_v60 = vld [vmem:[%s10456_s17 + $0x330] ss:$8 sps:$4 sm:$0xff]   ;;  %v7724_v9 = vld [vmem:[%s10456_s17 + $0x344] ss:$8 sps:$4 sm:$0xff]  }
0x111d   :  { %1897 = vst.msk [vmem:[#allocation2 + $0xc] sm:$0x1] %vm1822_vm5, %v1895_v43  ;;  %v1904_v29 = vpop.permute.xlu0 %1903  ;;  %v7722_v43 = vld [vmem:[%s10456_s17 + $0x340] ss:$8 sps:$4 sm:$0xff]  }
0x111e   :  { %1906 = vst.msk [vmem:[#allocation2 + $0xe] sm:$0x1] %vm1822_vm5, %v1904_v29  ;;  %v2052_v1 = vpack.c.bf16 %v2024_v19, %v2024_v19  ;;  %v2025_v2 = vcombine.high %v2023_v62, %v2023_v62  ;;  %v2053_v3 = vpack.c.bf16 %v2023_v62, %v2023_v62  ;;  %v7727_v19 = vld [vmem:[%s10456_s17 + $0x354] ss:$8 sps:$4 sm:$0xff]   ;;  %v7725_v62 = vld [vmem:[%s10456_s17 + $0x350] ss:$8 sps:$4 sm:$0xff]  }
0x111f   :  { %v7730_v29 = vld [vmem:[%s10456_s17 + $0x364] ss:$8 sps:$4 sm:$0xff]  }
0x1120   :  { %v1993_v20 = vpop.permute.xlu1 %1992  ;;  %2871 = vmatprep.mubr.bf16.mxu1 %v2052_v1  ;;  %v2054_v49 = vpack.c.bf16 %v2025_v2, %v2025_v2  ;;  %v7728_v1 = vld [vmem:[%s10456_s17 + $0x360] ss:$8 sps:$4 sm:$0xff]   ;;  %v7733_v2 = vld [vmem:[%s10456_s17 + $0x374] ss:$8 sps:$4 sm:$0xff]  }
0x1121   :  { %1995 = vst.msk [vmem:[#allocation2 + $0xd] sm:$0x1] %vm1822_vm5, %v1993_v20  ;;  %2872 = vmatmul.mubr.bf16.vlgmr.msra.gmra.mrb[36].mxu1 %v2051_v25  ;;  %v2002_v55 = vpop.permute.xlu0 %2001  ;;  %v7758_v25 = vld [vmem:[%s10459_s19 + $0x40] sm:$0xff]  }
0x1122   :  { %2004 = vst.msk [vmem:[#allocation2 + $0xf] sm:$0x1] %vm1822_vm5, %v2002_v55  ;;  %2912 = vmatprep.mubr.bf16.mxu0 %v2054_v49  ;;  %v7759_v20 = vld [vmem:[%s10459_s19] sm:$0xff]   ;;  %v7731_v49 = vld [vmem:[%s10456_s17 + $0x370] ss:$8 sps:$4 sm:$0xff]   ;;  %7144 = vmatprep.subr.bf16.mxu1 %v7758_v25  ;;  %v7761_v55 = vld [vmem:[%s10459_s19 + $0x8] sm:$0xff]  }
0x1123   :  { %2913 = vmatmul.mubr.bf16.vlgmr.msra.gmra.mrb[20].mxu0 %v2053_v3  ;;  %7145 = vmatpush3.bf16.msra.mxu1 %v7759_v20  ;;  %v7762_v3 = vld [vmem:[%s10459_s19 + $0x50] sm:$0xff]   ;;  %v7777_v20 = vld [vmem:[%s10478_s26 + $0x78] sm:$0xff]  }
0x1124   :  { %2922 = vmatpush1.bf16.msra.mxu0 %v7661_v14  ;;  %v7760_v14 = vld [vmem:[%s10459_s19 + $0x48] sm:$0xff]   ;;  %v7776_v25 = vld [vmem:[%s10478_s26 + $0x70] sm:$0xff]  }
0x1125   :  { %2923 = vmatprep.subr.bf16.mxu0 %v7666_v61  ;;  %7146 = vmatprep.subr.bf16.mxu1 %v7760_v14  ;;  %v7736_v61 = vld [vmem:[%s10456_s17 + $0x384] ss:$8 sps:$4 sm:$0xff]  }
0x1126   :  { %v7779_v14 = vld [vmem:[%s10478_s26 + $0x88] sm:$0xff]  }
0x1127   :  { %7147 = vmatpush3.bf16.msra.mxu1 %v7761_v55  ;;  %v7780_v55 = vld [vmem:[%s10478_s26 + $0x90] sm:$0xff]  }
0x1128   :  { %2924 = vmatpush1.bf16.msra.mxu0 %v7664_v57  ;;  %v7734_v57 = vld [vmem:[%s10456_s17 + $0x380] ss:$8 sps:$4 sm:$0xff]   ;;  %7148 = vmatprep.subr.bf16.mxu1 %v7762_v3  ;;  %v7781_v3 = vld [vmem:[%s10478_s26 + $0x98] sm:$0xff]  }
0x1129   :  { %v2006_v27 = vld [vmem:[#allocation2 + $0x8] sm:$0xff]  ;;  %2925 = vmatprep.subr.bf16.mxu0 %v7669_v4  ;;  %v7763_v4 = vld [vmem:[%s10459_s19 + $0x10] sm:$0xff]  }
0x112a   :  { %v9136_v17 = vrot.slane %v2006_v27, %v8971_v26  ;;  %v2026_v50 = vcombine.high %v2006_v27, %v2006_v27  ;;  %v7739_v27 = vld [vmem:[%s10456_s17 + $0x394] ss:$8 sps:$4 sm:$0xff]  }
0x112b   :  { %7149 = vmatpush3.bf16.msra.mxu1 %v7763_v4  ;;  %v7784_v4 = vld [vmem:[%s10478_s26 + $0xb0] sm:$0xff]  }
0x112c   :  { %2926 = vmatpush1.bf16.msra.mxu0 %v7667_v58  ;;  %v2041_v10 = vcombine.high %v9136_v17, %v9136_v17  ;;  %v9213_v11 = vrot.slane %v2026_v50, %v8971_v26  ;;  %v2055_v8 = vpack.c.bf16 %v9136_v17, %v9136_v17  ;;  %v7764_v58 = vld [vmem:[%s10459_s19 + $0x58] sm:$0xff]  }
0x112d   :  { %2927 = vmatprep.subr.bf16.mxu0 %v7672_v7  ;;  %v7737_v7 = vld [vmem:[%s10456_s17 + $0x390] ss:$8 sps:$4 sm:$0xff]   ;;  %7150 = vmatprep.subr.bf16.mxu1 %v7764_v58 }
0x112e   :  { %v2056_v15 = vpack.c.bf16 %v2041_v10, %v2041_v10  ;;  %v2042_v13 = vcombine.high %v9213_v11, %v9213_v11  ;;  %v7765_v17 = vld [vmem:[%s10459_s19 + $0x18] sm:$0xff]   ;;  %v7766_v10 = vld [vmem:[%s10459_s19 + $0x60] sm:$0xff]  }
0x112f   :  { %7151 = vmatpush3.bf16.msra.mxu1 %v7765_v17  ;;  %v7773_v50 = vld [vmem:[%s10459_s19 + $0x38] sm:$0xff]  }
0x1130   :  { %2928 = vmatpush1.bf16.msra.mxu0 %v7670_v18  ;;  %2953 = vmatprep.mubr.bf16.mxu0 %v2056_v15  ;;  %v2058_v35 = vpack.c.bf16 %v2042_v13, %v2042_v13  ;;  %v7742_v18 = vld [vmem:[%s10456_s17 + $0x3a4] ss:$8 sps:$4 sm:$0xff]   ;;  %v7740_v15 = vld [vmem:[%s10456_s17 + $0x3a0] ss:$8 sps:$4 sm:$0xff]   ;;  %v7785_v58 = vld [vmem:[%s10478_s26 + $0xb8] sm:$0xff]  }
0x1131   :  { %2929 = vmatprep.subr.bf16.mxu0 %v7675_v12  ;;  %v7767_v12 = vld [vmem:[%s10459_s19 + $0x20] sm:$0xff]   ;;  %7152 = vmatprep.subr.bf16.mxu1 %v7766_v10  ;;  %v8205_v17 = vld [vmem:[%s10479_s22 + $0x10] ss:$8 sps:$4 sm:$0xff]  }
0x1133   :  { %7153 = vmatpush3.bf16.msra.mxu1 %v7767_v12 }
0x1134   :  { %2930 = vmatpush1.bf16.msra.mxu0 %v7673_v23  ;;  %v7768_v23 = vld [vmem:[%s10459_s19 + $0x68] sm:$0xff]  }
0x1135   :  { %2931 = vmatprep.subr.bf16.mxu0 %v7678_v24  ;;  %v7745_v24 = vld [vmem:[%s10456_s17 + $0x3b4] ss:$8 sps:$4 sm:$0xff]   ;;  %7154 = vmatprep.subr.bf16.mxu1 %v7768_v23 }
0x1138   :  { %2932 = vmatpush1.bf16.msra.mxu0 %v7676_v28  ;;  %v7769_v28 = vld [vmem:[%s10459_s19 + $0x28] sm:$0xff]  }
0x1139   :  { %2933 = vmatprep.subr.bf16.mxu0 %v7681_v30  ;;  %v7743_v30 = vld [vmem:[%s10456_s17 + $0x3b0] ss:$8 sps:$4 sm:$0xff]   ;;  %7155 = vmatpush3.bf16.msra.mxu1 %v7769_v28  ;;  %v6603_v28 = vld [vmem:[%s10484_s27 + $0x1] ss:$0 sm:$0xff] }
0x113c   :  { %2934 = vmatpush1.bf16.msra.mxu0 %v7679_v32  ;;  %v7748_v32 = vld [vmem:[%s10456_s17 + $0x3c4] ss:$8 sps:$4 sm:$0xff]  }
0x113d   :  { %2935 = vmatprep.subr.bf16.mxu0 %v7684_v48  ;;  %v7746_v48 = vld [vmem:[%s10456_s17 + $0x3c0] ss:$8 sps:$4 sm:$0xff]  }
0x1140   :  { %2936 = vmatpush1.bf16.msra.mxu0 %v7682_v33  ;;  %v7751_v33 = vld [vmem:[%s10456_s17 + $0x3d4] ss:$8 sps:$4 sm:$0xff]  }
0x1141   :  { %2937 = vmatprep.subr.bf16.mxu0 %v7687_v40  ;;  %v7749_v40 = vld [vmem:[%s10456_s17 + $0x3d0] ss:$8 sps:$4 sm:$0xff]  }
0x1144   :  { %2938 = vmatpush1.bf16.msra.mxu0 %v7685_v63  ;;  %v7754_v63 = vld [vmem:[%s10456_s17 + $0x3e4] ss:$8 sps:$4 sm:$0xff]  }
0x1145   :  { %2939 = vmatprep.subr.bf16.mxu0 %v7690_v36  ;;  %v7752_v36 = vld [vmem:[%s10456_s17 + $0x3e0] ss:$8 sps:$4 sm:$0xff]  }
0x1148   :  { %2940 = vmatpush1.bf16.msra.mxu0 %v7688_v37  ;;  %v7757_v37 = vld [vmem:[%s10456_s17 + $0x3f4] ss:$8 sps:$4 sm:$0xff]  }
0x1149   :  { %2941 = vmatprep.subr.bf16.mxu0 %v7693_v51  ;;  %v7755_v51 = vld [vmem:[%s10456_s17 + $0x3f0] ss:$8 sps:$4 sm:$0xff]  }
0x114c   :  { %2942 = vmatpush1.bf16.msra.mxu0 %v7691_v6  ;;  %v2057_v6 = vpack.c.bf16 %v9213_v11, %v9213_v11  ;;  %v2195_v11 = vsub.s32 1, %v8951_v38 }
0x114d   :  { %2943 = vmatprep.subr.bf16.mxu0 %v7696_v21 }
0x1150   :  { %2944 = vmatpush1.bf16.msra.mxu0 %v7694_v34 }
0x1151   :  { %2945 = vmatprep.subr.bf16.mxu0 %v7699_v44 }
0x1154   :  { %2946 = vmatpush1.bf16.msra.mxu0 %v7697_v45 }
0x1155   :  { %2947 = vmatprep.subr.bf16.mxu0 %v7702_v46  ;;  %v7770_v46 = vld [vmem:[%s10459_s19 + $0x70] sm:$0xff]  }
0x1156   :  { %7156 = vmatprep.subr.bf16.mxu1 %v7770_v46 }
0x1158   :  { %2948 = vmatpush1.bf16.msra.mxu0 %v7700_v5  ;;  %v7771_v5 = vld [vmem:[%s10459_s19 + $0x30] sm:$0xff]  }
0x1159   :  { %2949 = vmatprep.subr.bf16.mxu0 %v7705_v39  ;;  %7157 = vmatpush3.bf16.msra.mxu1 %v7771_v5  ;;  %v7772_v39 = vld [vmem:[%s10459_s19 + $0x78] sm:$0xff]  }
0x115a   :  { %7158 = vmatprep.subr.bf16.mxu1 %v7772_v39 }
0x115c   :  { %2950 = vmatpush1.bf16.msra.mxu0 %v7703_v52  ;;  %v2191_v52 = vsub.s32 0, %v8951_v38  ;;  %v7070_v38 = vld [vmem:[%s10461_s20 + $0x1] ss:$0 sm:$0xff] }
0x115d   :  { %2951 = vmatprep.subr.bf16.mxu0 %v7708_v22  ;;  %7159 = vmatpush3.bf16.msra.mxu1 %v7773_v50  ;;  %v2187_v22 = vld [vmem:[%s10460_s18] sm:$0x3] }
0x115e   :  { %3292 = vmatprep.subr.bf16.mxu1 %v8206_v0 }
0x1160   :  { %2952 = vmatpush1.bf16.msra.mxu0 %v7706_v53  ;;  %v2192_v53 = vrot.slane %v2187_v22, %v2191_v52 }
0x1161   :  { %2962 = vmatprep.subr.bf16.mxu0 %v7711_v41  ;;  %v2196_v41 = vrot.slane %v2187_v22, %v2195_v11 }
0x1163   :  { %2954 = vmatmul.mubr.bf16.vlgmr.msra.gmra.mrb[20].mxu0 %v2055_v8 }
0x1164   :  { %2963 = vmatpush1.bf16.msra.mxu0 %v7709_v42  ;;  %2994 = vmatprep.mubr.bf16.mxu0 %v2058_v35 }
0x1165   :  { %2964 = vmatprep.subr.bf16.mxu0 %v7715_v47 }
0x1168   :  { %2965 = vmatpush1.bf16.msra.mxu0 %v7713_v31 }
0x1169   :  { %2966 = vmatprep.subr.bf16.mxu0 %v7718_v54 }
0x116c   :  { %2967 = vmatpush1.bf16.msra.mxu0 %v7716_v56 }
0x116d   :  { %2968 = vmatprep.subr.bf16.mxu0 %v7721_v59 }
0x1170   :  { %2969 = vmatpush1.bf16.msra.mxu0 %v7719_v60 }
0x1171   :  { %2970 = vmatprep.subr.bf16.mxu0 %v7724_v9 }
0x1174   :  { %2971 = vmatpush1.bf16.msra.mxu0 %v7722_v43 }
0x1175   :  { %2972 = vmatprep.subr.bf16.mxu0 %v7727_v19 }
0x1178   :  { %2973 = vmatpush1.bf16.msra.mxu0 %v7725_v62  ;;  %v7774_v62 = vld [vmem:[%s10478_s26 + $0x60] sm:$0xff]  }
0x1179   :  { %2974 = vmatprep.subr.bf16.mxu0 %v7730_v29 }
0x117c   :  { %2975 = vmatpush1.bf16.msra.mxu0 %v7728_v1  ;;  %v7775_v1 = vld [vmem:[%s10478_s26 + $0x68] sm:$0xff]  }
0x117d   :  { %2976 = vmatprep.subr.bf16.mxu0 %v7733_v2  ;;  %v8202_v2 = vld [vmem:[%s10479_s22 + $0x4] ss:$8 sps:$4 sm:$0xff]  }
0x1180   :  { %2977 = vmatpush1.bf16.msra.mxu0 %v7731_v49  ;;  %v7778_v49 = vld [vmem:[%s10478_s26 + $0x80] sm:$0xff]  }
0x1181   :  { %2978 = vmatprep.subr.bf16.mxu0 %v7736_v61  ;;  %v7782_v61 = vld [vmem:[%s10478_s26 + $0xa0] sm:$0xff]  }
0x1184   :  { %2979 = vmatpush1.bf16.msra.mxu0 %v7734_v57  ;;  %v7783_v57 = vld [vmem:[%s10478_s26 + $0xa8] sm:$0xff]  }
0x1185   :  { %2980 = vmatprep.subr.bf16.mxu0 %v7739_v27  ;;  %v8203_v27 = vld [vmem:[%s10479_s22] ss:$8 sps:$4 sm:$0xff]  }
0x1188   :  { %2981 = vmatpush1.bf16.msra.mxu0 %v7737_v7  ;;  %v8204_v7 = vld [vmem:[%s10479_s22 + $0x14] ss:$8 sps:$4 sm:$0xff]  }
0x1189   :  { %2982 = vmatprep.subr.bf16.mxu0 %v7742_v18 }
0x118c   :  { %2983 = vmatpush1.bf16.msra.mxu0 %v7740_v15 }
0x118d   :  { %2984 = vmatprep.subr.bf16.mxu0 %v7745_v24 }
0x1190   :  { %2985 = vmatpush1.bf16.msra.mxu0 %v7743_v30 }
0x1191   :  { %2986 = vmatprep.subr.bf16.mxu0 %v7748_v32 }
0x1194   :  { %2987 = vmatpush1.bf16.msra.mxu0 %v7746_v48 }
0x1195   :  { %2988 = vmatprep.subr.bf16.mxu0 %v7751_v33 }
0x1198   :  { %2989 = vmatpush1.bf16.msra.mxu0 %v7749_v40 }
0x1199   :  { %2990 = vmatprep.subr.bf16.mxu0 %v7754_v63 }
0x119c   :  { %2991 = vmatpush1.bf16.msra.mxu0 %v7752_v36 }
0x119d   :  { %2992 = vmatprep.subr.bf16.mxu0 %v7757_v37 }
0x11a0   :  { %2993 = vmatpush1.bf16.msra.mxu0 %v7755_v51 }
0x11a3   :  { %2995 = vmatmul.mubr.bf16.vlgmr.msra.gmra.mrb[20].mxu0 %v2057_v6 }
0x11f4   :  { %v2873_v21 = vpop.f32.mrb[36].mxu1 }
0x11f5   :  { %v2875_v34 = vpop.f32.mrb[37].mxu1  ;;  %v2874_v13 = vadd.f32 %v2873_v21, %v2192_v53 }
0x11f6   :  { %v2877_v44 = vpop.f32.mrb[38].mxu1  ;;  %v2876_v42 = vadd.f32 %v2875_v34, %v2196_v41 }
0x11f7   :  { %v2878_v45 = vpop.f32.mrb[39].mxu1 }
0x1276   :  { %v2996_v8 = vpop.f32.mrb[20].mxu0 }
0x1277   :  { %v7485_v47 = vadd.f32 %v2996_v8, %v2874_v13  ;;  %v2998_v35 = vpop.f32.mrb[21].mxu0 }
0x1278   :  { %v7487_v31 = vadd.f32 %v2998_v35, %v2876_v42  ;;  %v3000_v54 = vpop.f32.mrb[22].mxu0 }
0x1279   :  { %vm3003_vm6 = vcmp.ge.f32.partialorder %v7485_v47, 0.0  ;;  %v3005_v56 = vmul.f32 0.1, %v7485_v47  ;;  %v3001_v59 = vpop.f32.mrb[23].mxu0  ;;  %v6626_v54 = vld [vmem:[%s10481_s0 + $0x40] sm:$0xff] }
0x127a   :  { %vm3004_vm7 = vcmp.ge.f32.partialorder %v7487_v31, 0.0  ;;  %v3006_v60 = vmul.f32 0.1, %v7487_v31  ;;  %v6629_v59 = vld [vmem:[%s10481_s0 + $0x58] sm:$0xff] }
0x127b   :  { %v3007_v9 = vsel %vm3003_vm6, %v7485_v47, %v3005_v56  ;;  %v6628_v56 = vld [vmem:[%s10481_s0 + $0x50] sm:$0xff] }
0x127c   :  { %v3008_v43 = vsel %vm3004_vm7, %v7487_v31, %v3006_v60  ;;  %v3009_v29 = vpack.c.bf16 %v3007_v9, %v3007_v9  ;;  %v6627_v31 = vld [vmem:[%s10481_s0 + $0x48] sm:$0xff]  ;;  %v9483_v60 = vld [vmem:[%s10482_s5 + $0x20] sm:$0xff]  }
0x127d   :  { %v3010_v19 = vpack.c.bf16 %v3008_v43, %v3008_v43 }
0x127f   :  { %3178 = vmatprep.mubr.bf16.mxu1 %v3010_v19 }
0x1280   :  { %3179 = vmatmul.mubr.bf16.vlgmr.msra.gmra.mrb[40].mxu1 %v3009_v29 }
0x1281   :  { %3293 = vmatpush1.bf16.msra.mxu1 %v7774_v62  ;;  %6616 = vmatprep.mubr.msk.bf16.mxu1 %vm194_vm0, %v8202_v2 }
0x1282   :  { %3294 = vmatprep.subr.bf16.mxu1 %v8206_v0 }
0x1285   :  { %3295 = vmatpush1.bf16.msra.mxu1 %v7775_v1 }
0x1286   :  { %3296 = vmatprep.subr.bf16.mxu1 %v8206_v0 }
0x1289   :  { %3297 = vmatpush1.bf16.msra.mxu1 %v7776_v25 }
0x128a   :  { %3298 = vmatprep.subr.bf16.mxu1 %v8206_v0 }
0x128d   :  { %3299 = vmatpush1.bf16.msra.mxu1 %v7777_v20 }
0x128e   :  { %3300 = vmatprep.subr.bf16.mxu1 %v8206_v0 }
0x1291   :  { %3301 = vmatpush1.bf16.msra.mxu1 %v7778_v49 }
0x1292   :  { %3302 = vmatprep.subr.bf16.mxu1 %v8206_v0 }
0x1295   :  { %3303 = vmatpush1.bf16.msra.mxu1 %v7779_v14 }
0x1296   :  { %3304 = vmatprep.subr.bf16.mxu1 %v8206_v0 }
0x1299   :  { %3305 = vmatpush1.bf16.msra.mxu1 %v7780_v55 }
0x129a   :  { %3306 = vmatprep.subr.bf16.mxu1 %v8206_v0 }
0x129d   :  { %3307 = vmatpush1.bf16.msra.mxu1 %v7781_v3 }
0x129e   :  { %3308 = vmatprep.subr.bf16.mxu1 %v8206_v0 }
0x12a1   :  { %3309 = vmatpush1.bf16.msra.mxu1 %v7782_v61 }
0x12a2   :  { %3310 = vmatprep.subr.bf16.mxu1 %v8206_v0 }
0x12a5   :  { %3311 = vmatpush1.bf16.msra.mxu1 %v7783_v57 }
0x12a6   :  { %3312 = vmatprep.subr.bf16.mxu1 %v8206_v0 }
0x12a9   :  { %3313 = vmatpush1.bf16.msra.mxu1 %v7784_v4 }
0x12aa   :  { %3314 = vmatprep.subr.bf16.mxu1 %v8206_v0  ;;  %v6561_v0 = vld [vmem:[%s10461_s20] ss:$0 sm:$0xff] }
0x12ad   :  { %3315 = vmatpush1.bf16.msra.mxu1 %v7785_v58 }
0x12b0   :  { %3325 = vmatmul.mubr.bf16.vlgmr.msra.gmra.mrb[44].mxu1 %v8203_v27  ;;  %v9502_v27 = vld [vmem:[%s10447_s3 + $0x2] ss:$0 sm:$0xff] }
0x12b1   :  { %6617 = vmatprep.mubr.msk.bf16.mxu1 %vm194_vm0, %v8204_v7 }
0x12b8   :  { %3333 = vmatmul.mubr.bf16.gmra.mrb[48].mxu1 %v8205_v17 }
0x12b9   :  { %7366 = vmatprep.mubr.msk.bf16.mxu1 %vm365_vm1, %v9483_v60 }
0x1353   :  { %v7160_v18 = vpop.f32.mrb[40].mxu1 }
0x1354   :  { %v7161_v10 = vpop.f32.mrb[41].mxu1 }
0x1355   :  { %v7162_v12 = vadd.f32 %v7161_v10, %v7160_v18  ;;  %v7163_v15 = vpop.f32.mrb[42].mxu1  ;;  %v9508_v10 = vld [vmem:[%s10448_s4 + $0x2] ss:$0 sm:$0xff] }
0x1356   :  { %v7164_v23 = vpop.f32.mrb[43].mxu1 }
0x1357   :  { %v3181_v24 = vadd.f32 %v7162_v12, %v6561_v0 }
0x1359   :  { %3186 = vst [vmem:[%s10462_s21] sm:$0x3] %v3181_v24 }
0x1383   :  { %v3326_v30 = vpop.f32.mrb[44].mxu1 }
0x1384   :  { %v9448_v32 = vadd.f32 %v6603_v28, %v3326_v30  ;;  %v3328_v48 = vpop.f32.mrb[45].mxu1  ;;  %v9519_v30 = vld [vmem:[%s10482_s5 + $0x28] sm:$0xff]  }
0x1385   :  { %v3329_v33 = vpop.f32.mrb[46].mxu1  ;;  %v6636_v48 = vld [vmem:[%s10483_s24 + $0x20] sm:$0xff] }
0x1386   :  { %v9450_v40 = vadd.f32 %v6603_v28, %v3329_v33  ;;  %v3331_v63 = vpop.f32.mrb[47].mxu1  ;;  %v3345_v36 = vsel %vm194_vm0, %v9448_v32, 0.0 }
0x1387   :  { %3346 = vadd.xlane.f32.xlu1 %v3345_v36 }
0x1388   :  { %v3348_v37 = vsel %vm194_vm0, %v9450_v40, 0.0 }
0x1389   :  { %3349 = vadd.xlane.f32.xlu0 %v3348_v37 }
0x138b   :  { %v3334_v51 = vpop.f32.mrb[48].mxu1 }
0x138c   :  { %v9456_v6 = vadd.f32 %v6603_v28, %v3334_v51  ;;  %v3336_v21 = vpop.f32.mrb[49].mxu1 }
0x138d   :  { %v3337_v34 = vpop.f32.mrb[50].mxu1 }
0x138e   :  { %v9458_v44 = vadd.f32 %v6603_v28, %v3337_v34  ;;  %v3339_v45 = vpop.f32.mrb[51].mxu1  ;;  %v3351_v47 = vsel %vm194_vm0, %v9456_v6, 0.0  ;;  %v6637_v28 = vld [vmem:[%s10483_s24 + $0x28] sm:$0xff] }
0x1390   :  { %v3354_v35 = vsel %vm194_vm0, %v9458_v44, 0.0 }
0x1414   :  { %v3347_v46 = vpop.xlane.xlu1 %3346 }
0x1415   :  { %v3357_v5 = vmul.f32 0.015625, %v3347_v46 }
0x1416   :  { %v3350_v39 = vpop.xlane.xlu0 %3349 }
0x1417   :  { %v3361_v50 = vsub.f32 %v9448_v32, %v3357_v5  ;;  %v3358_v22 = vmul.f32 0.015625, %v3350_v39 }
0x1419   :  { %v3362_v53 = vsub.f32 %v9450_v40, %v3358_v22  ;;  %v3365_v41 = vmul.f32 %v3361_v50, %v3361_v50 }
0x141b   :  { %v3369_v13 = vsel %vm194_vm0, %v3365_v41, 0.0  ;;  %v3366_v42 = vmul.f32 %v3362_v53, %v3362_v53 }
0x141c   :  { %3370 = vadd.xlane.f32.xlu0 %v3369_v13 }
0x141d   :  { %v3372_v8 = vsel %vm194_vm0, %v3366_v42, 0.0 }
0x141e   :  { %3373 = vadd.xlane.f32.xlu1 %v3372_v8 }
0x1420   :  { %3352 = vadd.xlane.f32.xlu0 %v3351_v47 }
0x1422   :  { %3355 = vadd.xlane.f32.xlu1 %v3354_v35 }
0x1433   :  { %3436 = vperm.xlu1 %7516, %v6627_v31  }
0x1436   :  { %3431 = vperm.xlu0 %7515, %v6626_v54  }
0x1437   :  { %3441 = vperm.xlu1 %7516, %v6628_v56  }
0x143a   :  { %3446 = vperm.xlu0 %7515, %v6629_v59  }
0x14a9   :  { %v3371_v9 = vpop.xlane.xlu0 %3370 }
0x14aa   :  { %v3381_v43 = vmul.f32 0.015625, %v3371_v9 }
0x14ab   :  { %v3374_v19 = vpop.xlane.xlu1 %3373 }
0x14ac   :  { %v3385_v62 = vadd.f32 1e-06, %v3381_v43  ;;  %v3382_v29 = vmul.f32 0.015625, %v3374_v19 }
0x14ad   :  { %v3353_v1 = vpop.xlane.xlu0 %3352 }
0x14ae   :  { %8114 = vrsqrt.f32 %v3385_v62  ;;  %v3386_v2 = vadd.f32 1e-06, %v3382_v29  ;;  %v3359_v25 = vmul.f32 0.015625, %v3353_v1 }
0x14af   :  { %v3356_v20 = vpop.xlane.xlu1 %3355 }
0x14b0   :  { %8116 = vrsqrt.f32 %v3386_v2  ;;  %v9488_v49 = vsub.f32 %v9456_v6, %v3359_v25  ;;  %v3360_v14 = vmul.f32 0.015625, %v3356_v20 }
0x14b2   :  { %v9491_v55 = vsub.f32 %v9458_v44, %v3360_v14  ;;  %v3367_v3 = vmul.f32 %v9488_v49, %v9488_v49 }
0x14b3   :  { %v9531_v63 = vpop.permute.xlu1 %3436 }
0x14b4   :  { %v3375_v61 = vsel %vm194_vm0, %v3367_v3, 0.0  ;;  %v3368_v57 = vmul.f32 %v9491_v55, %v9491_v55 }
0x14b5   :  { %3376 = vadd.xlane.f32.xlu1 %v3375_v61  ;;  %v9529_v33 = vpop.permute.xlu0 %3431 }
0x14b6   :  { %v3378_v4 = vsel %vm194_vm0, %v3368_v57, 0.0 }
0x14b7   :  { %3379 = vadd.xlane.f32.xlu0 %v3378_v4  ;;  %v9535_v37 = vpop.permute.xlu1 %3441 }
0x14b8   :  { %v8115_v58 = vpop.eup %8114 }
0x14b9   :  { %v3393_v7 = vmul.f32 %v8115_v58, %v3361_v50  ;;  %v9533_v36 = vpop.permute.xlu0 %3446 }
0x14ba   :  { %v8117_v17 = vpop.eup %8116 }
0x14bb   :  { %v3394_v18 = vmul.f32 %v8117_v17, %v3362_v53  ;;  %v3403_v0 = vmul.f32 %v9502_v27, %v3393_v7 }
0x14bd   :  { %v3404_v12 = vmul.f32 %v9502_v27, %v3394_v18  ;;  %v3413_v15 = vadd.f32 %v9508_v10, %v3403_v0 }
0x14bf   :  { %v3414_v23 = vadd.f32 %v9508_v10, %v3404_v12 }
0x14c1   :  { %v3417_v24 = vpack.c.bf16 %v3414_v23, %v3413_v15 }
0x14c3   :  { %7364 = vmatprep.subr.bf16.mxu1 %v3417_v24 }
0x14c4   :  { %7365 = vmatpush3.bf16.msra.mxu1 %v3417_v24 }
0x14c5   :  { %7370 = vmatprep.subr.bf16.mxu1 %v8207_v16 }
0x14c6   :  { %3565 = vperm.xlu1 %7516, %v6637_v28  }
0x14c7   :  { %7367 = vmatmul.mubr.msk.bf16.vlgmr.msra.gmra.mrb[52].mxu1 %vm365_vm1, %v9519_v30 }
0x14c8   :  { %7374 = vmatprep.mubr.msk.bf16.mxu1 %vm8208_vm2, %v8207_v16 }
0x14cd   :  { %3560 = vperm.xlu0 %7515, %v6636_v48  }
0x1542   :  { %v3377_v34 = vpop.xlane.xlu1 %3376 }
0x1543   :  { %v3383_v13 = vmul.f32 0.015625, %v3377_v34 }
0x1544   :  { %v3380_v51 = vpop.xlane.xlu0 %3379 }
0x1545   :  { %v3384_v50 = vmul.f32 0.015625, %v3380_v51  ;;  %v3387_v43 = vadd.f32 1e-06, %v3383_v13 }
0x1547   :  { %v3388_v56 = vadd.f32 1e-06, %v3384_v50 }
0x1549   :  { %8118 = vrsqrt.f32 %v3388_v56 }
0x154a   :  { %8120 = vrsqrt.f32 %v3387_v43 }
0x1553   :  { %v8119_v58 = vpop.eup %8118 }
0x1554   :  { %v8121_v7 = vpop.eup %8120  ;;  %v3396_v12 = vmul.f32 %v8119_v58, %v9491_v55 }
0x159a   :  { %v7368_v21 = vpop.f32.mrb[52].mxu1 }
0x159b   :  { %v3508_v45 = vadd.f32 %v7368_v21, %v9535_v37  ;;  %v3499_v46 = vpop.f32.mrb[53].mxu1  ;;  %v3395_v21 = vmul.f32 %v8121_v7, %v9488_v49 }
0x159c   :  { %v3500_v5 = vadd.f32 %v3499_v46, %v9529_v33  ;;  %v7369_v39 = vpop.f32.mrb[54].mxu1 }
0x159d   :  { %v3520_v22 = vmul.f32 0.044715, %v3508_v45  ;;  %v3511_v53 = vadd.f32 %v7369_v39, %v9533_v36  ;;  %v3502_v41 = vpop.f32.mrb[55].mxu1  ;;  %v3516_v28 = vmul.f32 0.5, %v3508_v45  ;;  %v3405_v55 = vmul.f32 %v9502_v27, %v3395_v21 }
0x159e   :  { %v3518_v42 = vmul.f32 0.044715, %v3500_v5  ;;  %v3503_v8 = vadd.f32 %v3502_v41, %v9531_v63  ;;  %v3514_v34 = vmul.f32 0.5, %v3500_v5  ;;  %v3406_v41 = vmul.f32 %v9502_v27, %v3396_v12  ;;  %v9562_v27 = vpop.permute.xlu0 %3560 }
0x159f   :  { %v3524_v47 = vmul.f32 %v3520_v22, %v3508_v45  ;;  %v3521_v35 = vmul.f32 0.044715, %v3511_v53  ;;  %v3517_v48 = vmul.f32 0.5, %v3511_v53  ;;  %v3415_v49 = vadd.f32 %v9508_v10, %v3405_v55 }
0x15a0   :  { %v3522_v31 = vmul.f32 %v3518_v42, %v3500_v5  ;;  %v3519_v54 = vmul.f32 0.044715, %v3503_v8  ;;  %v3515_v46 = vmul.f32 0.5, %v3503_v8 }
0x15a1   :  { %v3528_v59 = vmul.f32 %v3524_v47, %v3508_v45  ;;  %v3525_v9 = vmul.f32 %v3521_v35, %v3511_v53 }
0x15a2   :  { %v3526_v19 = vmul.f32 %v3522_v31, %v3500_v5  ;;  %v3523_v62 = vmul.f32 %v3519_v54, %v3503_v8  ;;  %v3416_v31 = vadd.f32 %v9508_v10, %v3406_v41  ;;  %v9565_v54 = vpop.permute.xlu1 %3565 }
0x15a3   :  { %v3532_v29 = vadd.f32 %v3528_v59, %v3508_v45  ;;  %v3529_v1 = vmul.f32 %v3525_v9, %v3511_v53 }
0x15a4   :  { %v3530_v2 = vadd.f32 %v3526_v19, %v3500_v5  ;;  %v3527_v25 = vmul.f32 %v3523_v62, %v3503_v8  ;;  %v3418_v45 = vpack.c.bf16 %v3416_v31, %v3415_v49  ;;  %v9551_v5 = vld [vmem:[%s10449_s7 + $0x10] sm:$0xff]  }
0x15a5   :  { %v3536_v20 = vmul.f32 0.7978846, %v3532_v29  ;;  %v3533_v14 = vadd.f32 %v3529_v1, %v3511_v53 }
0x15a6   :  { %v3534_v3 = vmul.f32 0.7978846, %v3530_v2  ;;  %v3531_v61 = vadd.f32 %v3527_v25, %v3503_v8 }
0x15a7   :  { %8122 = vtanh.f32 %v3536_v20  ;;  %v3537_v57 = vmul.f32 0.7978846, %v3533_v14 }
0x15a8   :  { %8124 = vtanh.f32 %v3534_v3  ;;  %v3535_v4 = vmul.f32 0.7978846, %v3531_v61 }
0x15a9   :  { %8126 = vtanh.f32 %v3537_v57 }
0x15aa   :  { %8128 = vtanh.f32 %v3535_v4 }
0x15b1   :  { %v8123_v17 = vpop.eup %8122 }
0x15b2   :  { %v8125_v18 = vpop.eup %8124  ;;  %v3544_v0 = vadd.f32 1.0, %v8123_v17 }
0x15b3   :  { %v8127_v15 = vpop.eup %8126  ;;  %v3542_v23 = vadd.f32 1.0, %v8125_v18 }
0x15b4   :  { %v8129_v24 = vpop.eup %8128  ;;  %v3545_v51 = vadd.f32 1.0, %v8127_v15  ;;  %v3548_v50 = vmul.f32 %v3544_v0, %v3516_v28 }
0x15b5   :  { %v3543_v39 = vadd.f32 1.0, %v8129_v24  ;;  %v3546_v13 = vmul.f32 %v3542_v23, %v3514_v34 }
0x15b6   :  { %v3549_v22 = vmul.f32 %v3545_v51, %v3517_v48 }
0x15b7   :  { %v3547_v42 = vmul.f32 %v3543_v39, %v3515_v46 }
0x15b8   :  { %v3554_v47 = vpack.c.bf16 %v3549_v22, %v3548_v50 }
0x15b9   :  { %v3553_v35 = vpack.c.bf16 %v3547_v42, %v3546_v13 }
0x15bb   :  { %7371 = vmatpush3.bf16.msra.mxu1 %v3553_v35 }
0x15bc   :  { %7372 = vmatprep.subr.bf16.mxu1 %v8207_v16 }
0x15bf   :  { %7373 = vmatpush3.bf16.msra.mxu1 %v3554_v47 }
0x15c0   :  { %7378 = vmatprep.subr.bf16.mxu1 %v3418_v45 }
0x15c2   :  { %7375 = vmatmul.mubr.msk.bf16.vlgmr.msra.gmra.mrb[56].mxu1 %vm478_vm3, %v9551_v5 }
0x15c3   :  { %7379 = vmatpush3.bf16.msra.mxu1 %v3418_v45  ;;  %7380 = vmatprep.mubr.msk.bf16.mxu1 %vm365_vm1, %v9483_v60 }
0x15c4   :  { %7384 = vmatprep.subr.bf16.mxu1 %v8207_v16 }
0x15ca   :  { %7381 = vmatmul.mubr.msk.bf16.vlgmr.msra.gmra.mrb[60].mxu1 %vm365_vm1, %v9519_v30 }
0x15cb   :  { %7388 = vmatprep.mubr.msk.bf16.mxu1 %vm8208_vm2, %v8207_v16 }
0x1695   :  { %v3610_v10 = vpop.f32.mrb[56].mxu1 }
0x1696   :  { %v3611_v53 = vadd.f32 %v3610_v10, %v9562_v27  ;;  %v7376_v8 = vpop.f32.mrb[57].mxu1 }
0x1697   :  { %v3613_v56 = vpop.f32.mrb[58].mxu1 }
0x1698   :  { %v9568_v59 = vadd.f32 %v3611_v53, %v9448_v32  ;;  %v3614_v60 = vadd.f32 %v3613_v56, %v9565_v54  ;;  %v7377_v9 = vpop.f32.mrb[59].mxu1 }
0x169a   :  { %v9572_v30 = vadd.f32 %v3614_v60, %v9450_v40  ;;  %v3753_v43 = vsel %vm194_vm0, %v9568_v59, 0.0 }
0x169b   :  { %3754 = vadd.xlane.f32.xlu1 %v3753_v43 }
0x169c   :  { %v3756_v19 = vsel %vm194_vm0, %v9572_v30, 0.0 }
0x169d   :  { %v7382_v62 = vpop.f32.mrb[60].mxu1  ;;  %3757 = vadd.xlane.f32.xlu0 %v3756_v19 }
0x169e   :  { %v3660_v29 = vadd.f32 %v7382_v62, %v9535_v37  ;;  %v3651_v1 = vpop.f32.mrb[61].mxu1 }
0x169f   :  { %v3652_v32 = vadd.f32 %v3651_v1, %v9529_v33  ;;  %v7383_v2 = vpop.f32.mrb[62].mxu1 }
0x16a0   :  { %v3672_v25 = vmul.f32 0.044715, %v3660_v29  ;;  %v3663_v20 = vadd.f32 %v7383_v2, %v9533_v36  ;;  %v3654_v40 = vpop.f32.mrb[63].mxu1  ;;  %v3668_v22 = vmul.f32 0.5, %v3660_v29 }
0x16a1   :  { %v3670_v14 = vmul.f32 0.044715, %v3652_v32  ;;  %v3655_v3 = vadd.f32 %v3654_v40, %v9531_v63  ;;  %v3666_v42 = vmul.f32 0.5, %v3652_v32 }
0x16a2   :  { %v3676_v61 = vmul.f32 %v3672_v25, %v3660_v29  ;;  %v3673_v57 = vmul.f32 0.044715, %v3663_v20  ;;  %v3669_v41 = vmul.f32 0.5, %v3663_v20 }
0x16a3   :  { %v3674_v4 = vmul.f32 %v3670_v14, %v3652_v32  ;;  %v3671_v58 = vmul.f32 0.044715, %v3655_v3  ;;  %v3667_v47 = vmul.f32 0.5, %v3655_v3 }
0x16a4   :  { %v3680_v7 = vmul.f32 %v3676_v61, %v3660_v29  ;;  %v3677_v17 = vmul.f32 %v3673_v57, %v3663_v20 }
0x16a5   :  { %v3678_v18 = vmul.f32 %v3674_v4, %v3652_v32  ;;  %v3675_v0 = vmul.f32 %v3671_v58, %v3655_v3 }
0x16a6   :  { %v3684_v37 = vadd.f32 %v3680_v7, %v3660_v29  ;;  %v3681_v12 = vmul.f32 %v3677_v17, %v3663_v20 }
0x16a7   :  { %v3682_v15 = vadd.f32 %v3678_v18, %v3652_v32  ;;  %v3679_v33 = vmul.f32 %v3675_v0, %v3655_v3 }
0x16a8   :  { %v3688_v23 = vmul.f32 0.7978846, %v3684_v37  ;;  %v3685_v24 = vadd.f32 %v3681_v12, %v3663_v20 }
0x16a9   :  { %v3686_v28 = vmul.f32 0.7978846, %v3682_v15  ;;  %v3683_v36 = vadd.f32 %v3679_v33, %v3655_v3 }
0x16aa   :  { %8130 = vtanh.f32 %v3688_v23  ;;  %v3689_v48 = vmul.f32 0.7978846, %v3685_v24 }
0x16ab   :  { %8132 = vtanh.f32 %v3686_v28  ;;  %v3687_v63 = vmul.f32 0.7978846, %v3683_v36 }
0x16ac   :  { %8134 = vtanh.f32 %v3689_v48  ;;  %v6645_v48 = vld [vmem:[%s10450_s9 + $0x2] ss:$0 sm:$0xff] }
0x16ad   :  { %8136 = vtanh.f32 %v3687_v63 }
0x16b4   :  { %v8131_v51 = vpop.eup %8130 }
0x16b5   :  { %v8133_v21 = vpop.eup %8132  ;;  %v3696_v34 = vadd.f32 1.0, %v8131_v51 }
0x16b6   :  { %v8135_v46 = vpop.eup %8134  ;;  %v3694_v39 = vadd.f32 1.0, %v8133_v21 }
0x16b7   :  { %v8137_v50 = vpop.eup %8136  ;;  %v3697_v13 = vadd.f32 1.0, %v8135_v46  ;;  %v3700_v35 = vmul.f32 %v3696_v34, %v3668_v22  ;;  %v6646_v46 = vld [vmem:[%s10451_s10 + $0x2] ss:$0 sm:$0xff] }
0x16b8   :  { %v3695_v55 = vadd.f32 1.0, %v8137_v50  ;;  %v3698_v49 = vmul.f32 %v3694_v39, %v3666_v42  ;;  %v7790_v42 = vld [vmem:[%s10452_s11 + $0x48] sm:$0xff]  }
0x16b9   :  { %v3701_v31 = vmul.f32 %v3697_v13, %v3669_v41  ;;  %v7789_v13 = vld [vmem:[%s10452_s11 + $0x40] sm:$0xff]  }
0x16ba   :  { %v3699_v45 = vmul.f32 %v3695_v55, %v3667_v47  ;;  %v7791_v47 = vld [vmem:[%s10452_s11 + $0x50] sm:$0xff]   ;;  %v7792_v55 = vld [vmem:[%s10452_s11 + $0x58] sm:$0xff]  }
0x16bb   :  { %v3703_v10 = vpack.c.bf16 %v3701_v31, %v3700_v35 }
0x16bc   :  { %v3702_v53 = vpack.c.bf16 %v3699_v45, %v3698_v49 }
0x16be   :  { %7385 = vmatpush3.bf16.msra.mxu1 %v3702_v53 }
0x16bf   :  { %7386 = vmatprep.subr.bf16.mxu1 %v8207_v16 }
0x16c2   :  { %7387 = vmatpush3.bf16.msra.mxu1 %v3703_v10 }
0x16c3   :  { %7392 = vmatprep.subr.bf16.mxu1 %v7789_v13 }
0x16c5   :  { %7389 = vmatmul.mubr.msk.bf16.vlgmr.msra.gmra.mrb[64].mxu1 %vm478_vm3, %v9551_v5 }
0x16c6   :  { %7393 = vmatpush3.bf16.msra.mxu1 %v7789_v13 }
0x16c7   :  { %7394 = vmatprep.subr.bf16.mxu1 %v7790_v42 }
0x16ca   :  { %7395 = vmatpush3.bf16.msra.mxu1 %v7790_v42 }
0x16cb   :  { %7396 = vmatprep.subr.bf16.mxu1 %v7791_v47 }
0x16ce   :  { %7397 = vmatpush3.bf16.msra.mxu1 %v7791_v47 }
0x16cf   :  { %7398 = vmatprep.subr.bf16.mxu1 %v7792_v55 }
0x16d2   :  { %7399 = vmatpush3.bf16.msra.mxu1 %v7792_v55 }
0x1728   :  { %v3755_v8 = vpop.xlane.xlu1 %3754 }
0x1729   :  { %v3765_v60 = vmul.f32 0.015625, %v3755_v8 }
0x172a   :  { %v3758_v56 = vpop.xlane.xlu0 %3757 }
0x172b   :  { %v3766_v9 = vmul.f32 0.015625, %v3758_v56  ;;  %v3769_v19 = vsub.f32 %v9568_v59, %v3765_v60 }
0x172d   :  { %v3770_v32 = vsub.f32 %v9572_v30, %v3766_v9  ;;  %v3773_v14 = vmul.f32 %v3769_v19, %v3769_v19 }
0x172f   :  { %v3774_v3 = vmul.f32 %v3770_v32, %v3770_v32  ;;  %v3777_v61 = vsel %vm194_vm0, %v3773_v14, 0.0  ;;  %v7797_v14 = vld [vmem:[%s10453_s13 + $0xa0] sm:$0xff]  }
0x1798   :  { %v3738_v43 = vpop.f32.mrb[64].mxu1 }
0x1799   :  { %v3739_v62 = vadd.f32 %v3738_v43, %v9562_v27  ;;  %v7390_v29 = vpop.f32.mrb[65].mxu1 }
0x179a   :  { %v3741_v1 = vpop.f32.mrb[66].mxu1 }
0x179b   :  { %v9589_v2 = vadd.f32 %v3739_v62, %v9456_v6  ;;  %v3742_v25 = vadd.f32 %v3741_v1, %v9565_v54  ;;  %v7391_v20 = vpop.f32.mrb[67].mxu1  ;;  %v3780_v6 = vsel %vm194_vm0, %v3774_v3, 0.0  ;;  %v7799_v3 = vld [vmem:[%s10453_s13 + $0xb0] sm:$0xff]  }
0x179c   :  { %v7795_v20 = vld [vmem:[%s10453_s13 + $0x90] sm:$0xff]  }
0x179d   :  { %v9593_v5 = vadd.f32 %v3742_v25, %v9458_v44  ;;  %v3759_v40 = vsel %vm194_vm0, %v9589_v2, 0.0  ;;  %v7794_v25 = vld [vmem:[%s10453_s13 + $0x88] sm:$0xff]  }
0x179e   :  { %3760 = vadd.xlane.f32.xlu0 %v3759_v40  ;;  %v7796_v40 = vld [vmem:[%s10453_s13 + $0x98] sm:$0xff]  }
0x179f   :  { %v3762_v27 = vsel %vm194_vm0, %v9593_v5, 0.0 }
0x17a0   :  { %3763 = vadd.xlane.f32.xlu1 %v3762_v27  ;;  %v7798_v27 = vld [vmem:[%s10453_s13 + $0xa8] sm:$0xff]  }
0x17a2   :  { %3778 = vadd.xlane.f32.xlu0 %v3777_v61  ;;  %v7800_v61 = vld [vmem:[%s10453_s13 + $0xb8] sm:$0xff]  }
0x17a4   :  { %3781 = vadd.xlane.f32.xlu1 %v3780_v6  ;;  %v6656_v6 = vld [vmem:[%s10454_s12 + $0x2] ss:$0 sm:$0xff] }
0x182b   :  { %v3761_v54 = vpop.xlane.xlu0 %3760 }
0x182c   :  { %v3767_v57 = vmul.f32 0.015625, %v3761_v54 }
0x182d   :  { %v3764_v44 = vpop.xlane.xlu1 %3763 }
0x182e   :  { %v3771_v4 = vsub.f32 %v9589_v2, %v3767_v57  ;;  %v3768_v58 = vmul.f32 0.015625, %v3764_v44 }
0x182f   :  { %v3779_v7 = vpop.xlane.xlu0 %3778 }
0x1830   :  { %v3772_v17 = vsub.f32 %v9593_v5, %v3768_v58  ;;  %v3789_v18 = vmul.f32 0.015625, %v3779_v7  ;;  %v3775_v0 = vmul.f32 %v3771_v4, %v3771_v4 }
0x1831   :  { %v3782_v37 = vpop.xlane.xlu1 %3781 }
0x1832   :  { %v3793_v12 = vadd.f32 1e-06, %v3789_v18  ;;  %v3790_v15 = vmul.f32 0.015625, %v3782_v37  ;;  %v3783_v33 = vsel %vm194_vm0, %v3775_v0, 0.0  ;;  %v3776_v23 = vmul.f32 %v3772_v17, %v3772_v17 }
0x1833   :  { %3784 = vadd.xlane.f32.xlu0 %v3783_v33 }
0x1834   :  { %8138 = vrsqrt.f32 %v3793_v12  ;;  %v3794_v24 = vadd.f32 1e-06, %v3790_v15  ;;  %v3786_v28 = vsel %vm194_vm0, %v3776_v23, 0.0 }
0x1835   :  { %3787 = vadd.xlane.f32.xlu1 %v3786_v28 }
0x1836   :  { %8140 = vrsqrt.f32 %v3794_v24 }
0x183e   :  { %v8139_v36 = vpop.eup %8138 }
0x183f   :  { %v3801_v63 = vmul.f32 %v8139_v36, %v3769_v19 }
0x1840   :  { %v8141_v51 = vpop.eup %8140 }
0x1841   :  { %v3802_v21 = vmul.f32 %v8141_v51, %v3770_v32  ;;  %v3811_v34 = vmul.f32 %v6645_v48, %v3801_v63  ;;  %v7793_v32 = vld [vmem:[%s10453_s13 + $0x80] sm:$0xff]  }
0x1842   :  { %7404 = vmatprep.subr.bf16.mxu1 %v7793_v32 }
0x1843   :  { %v3812_v39 = vmul.f32 %v6645_v48, %v3802_v21  ;;  %v3821_v50 = vadd.f32 %v6646_v46, %v3811_v34 }
0x1845   :  { %v3822_v22 = vadd.f32 %v6646_v46, %v3812_v39 }
0x1847   :  { %v3825_v41 = vpack.c.bf16 %v3822_v22, %v3821_v50 }
0x1849   :  { %7400 = vmatprep.mubr.msk.bf16.mxu1 %vm194_vm0, %v3825_v41 }
0x18c0   :  { %v3785_v35 = vpop.xlane.xlu0 %3784 }
0x18c1   :  { %v3791_v31 = vmul.f32 0.015625, %v3785_v35 }
0x18c2   :  { %v3788_v49 = vpop.xlane.xlu1 %3787 }
0x18c3   :  { %v3795_v45 = vadd.f32 1e-06, %v3791_v31  ;;  %v3792_v10 = vmul.f32 0.015625, %v3788_v49 }
0x18c5   :  { %8142 = vrsqrt.f32 %v3795_v45  ;;  %v3796_v53 = vadd.f32 1e-06, %v3792_v10 }
0x18c7   :  { %8144 = vrsqrt.f32 %v3796_v53 }
0x18cf   :  { %v8143_v8 = vpop.eup %8142 }
0x18d0   :  { %v3803_v56 = vmul.f32 %v8143_v8, %v3771_v4 }
0x18d1   :  { %v8145_v60 = vpop.eup %8144 }
0x18d2   :  { %v3813_v9 = vmul.f32 %v6645_v48, %v3803_v56  ;;  %v3804_v43 = vmul.f32 %v8145_v60, %v3772_v17 }
0x18d4   :  { %v3814_v19 = vmul.f32 %v6645_v48, %v3804_v43  ;;  %v3823_v62 = vadd.f32 %v6646_v46, %v3813_v9 }
0x18d6   :  { %v3824_v29 = vadd.f32 %v6646_v46, %v3814_v19 }
0x18d8   :  { %v3826_v1 = vpack.c.bf16 %v3824_v29, %v3823_v62 }
0x18da   :  { %7401 = vmatmul.mubr.msk.bf16.vlgmr.msra.gmra.mrb[68].mxu1 %vm194_vm0, %v3826_v1 }
0x18db   :  { %7405 = vmatpush3.bf16.msra.mxu1 %v7793_v32  ;;  %v6680_v32 = vld [vmem:[%s10485_s14 + $0x2] ss:$0 sm:$0xff] }
0x18dc   :  { %7406 = vmatprep.subr.bf16.mxu1 %v7794_v25 }
0x18df   :  { %7407 = vmatpush3.bf16.msra.mxu1 %v7794_v25 }
0x18e0   :  { %7408 = vmatprep.subr.bf16.mxu1 %v7795_v20 }
0x18e3   :  { %7409 = vmatpush3.bf16.msra.mxu1 %v7795_v20 }
0x18e4   :  { %7410 = vmatprep.subr.bf16.mxu1 %v7796_v40 }
0x18e7   :  { %7411 = vmatpush3.bf16.msra.mxu1 %v7796_v40 }
0x18e8   :  { %7412 = vmatprep.subr.bf16.mxu1 %v7797_v14 }
0x18eb   :  { %7413 = vmatpush3.bf16.msra.mxu1 %v7797_v14 }
0x18ec   :  { %7414 = vmatprep.subr.bf16.mxu1 %v7798_v27 }
0x18ef   :  { %7415 = vmatpush3.bf16.msra.mxu1 %v7798_v27 }
0x18f0   :  { %7416 = vmatprep.subr.bf16.mxu1 %v7799_v3 }
0x18f3   :  { %7417 = vmatpush3.bf16.msra.mxu1 %v7799_v3 }
0x18f4   :  { %7418 = vmatprep.subr.bf16.mxu1 %v7800_v61 }
0x18f7   :  { %7419 = vmatpush3.bf16.msra.mxu1 %v7800_v61 }
0x19ad   :  { %v7402_v54 = vpop.f32.mrb[68].mxu1 }
0x19ae   :  { %v3917_v57 = vadd.f32 %v7402_v54, %v6656_v6  ;;  %v3908_v44 = vpop.f32.mrb[69].mxu1 }
0x19af   :  { %v3909_v4 = vadd.f32 %v6656_v6, %v3908_v44  ;;  %v7403_v58 = vpop.f32.mrb[70].mxu1 }
0x19b0   :  { %v3929_v7 = vmul.f32 0.044715, %v3917_v57  ;;  %v3920_v17 = vadd.f32 %v7403_v58, %v6656_v6  ;;  %v3911_v18 = vpop.f32.mrb[71].mxu1  ;;  %v3925_v45 = vmul.f32 0.5, %v3917_v57 }
0x19b1   :  { %v3927_v0 = vmul.f32 0.044715, %v3909_v4  ;;  %v3912_v37 = vadd.f32 %v6656_v6, %v3911_v18  ;;  %v3923_v8 = vmul.f32 0.5, %v3909_v4 }
0x19b2   :  { %v3933_v12 = vmul.f32 %v3929_v7, %v3917_v57  ;;  %v3930_v15 = vmul.f32 0.044715, %v3920_v17  ;;  %v3926_v10 = vmul.f32 0.5, %v3920_v17 }
0x19b3   :  { %v3931_v33 = vmul.f32 %v3927_v0, %v3909_v4  ;;  %v3928_v23 = vmul.f32 0.044715, %v3912_v37  ;;  %v3924_v56 = vmul.f32 0.5, %v3912_v37 }
0x19b4   :  { %v3937_v24 = vmul.f32 %v3933_v12, %v3917_v57  ;;  %v3934_v28 = vmul.f32 %v3930_v15, %v3920_v17 }
0x19b5   :  { %v3935_v36 = vmul.f32 %v3931_v33, %v3909_v4  ;;  %v3932_v48 = vmul.f32 %v3928_v23, %v3912_v37 }
0x19b6   :  { %v3941_v63 = vadd.f32 %v3937_v24, %v3917_v57  ;;  %v3938_v51 = vmul.f32 %v3934_v28, %v3920_v17 }
0x19b7   :  { %v3936_v21 = vmul.f32 %v3932_v48, %v3912_v37  ;;  %v3939_v34 = vadd.f32 %v3935_v36, %v3909_v4  ;;  %v6699_v36 = vld [vmem:[%s10481_s0 + $0x70] sm:$0xff]  ;;  %v6700_v48 = vld [vmem:[%s10481_s0 + $0x78] sm:$0xff] }
0x19b8   :  { %v3945_v46 = vmul.f32 0.7978846, %v3941_v63  ;;  %v3942_v39 = vadd.f32 %v3938_v51, %v3920_v17  ;;  %v9694_v63 = vld [vmem:[%s10482_s5 + $0x30] sm:$0xff]  }
0x19b9   :  { %v3940_v50 = vadd.f32 %v3936_v21, %v3912_v37  ;;  %v3943_v22 = vmul.f32 0.7978846, %v3939_v34 }
0x19ba   :  { %8146 = vtanh.f32 %v3945_v46  ;;  %v3946_v41 = vmul.f32 0.7978846, %v3942_v39 }
0x19bb   :  { %v3944_v13 = vmul.f32 0.7978846, %v3940_v50  ;;  %8148 = vtanh.f32 %v3943_v22 }
0x19bc   :  { %8150 = vtanh.f32 %v3946_v41 }
0x19bd   :  { %8152 = vtanh.f32 %v3944_v13 }
0x19c4   :  { %v8147_v42 = vpop.eup %8146 }
0x19c5   :  { %v8149_v47 = vpop.eup %8148  ;;  %v3953_v55 = vadd.f32 1.0, %v8147_v42 }
0x19c6   :  { %v8151_v35 = vpop.eup %8150  ;;  %v3951_v31 = vadd.f32 1.0, %v8149_v47 }
0x19c7   :  { %v8153_v49 = vpop.eup %8152  ;;  %v3954_v53 = vadd.f32 1.0, %v8151_v35  ;;  %v3957_v9 = vmul.f32 %v3953_v55, %v3925_v45 }
0x19c8   :  { %v3952_v60 = vadd.f32 1.0, %v8153_v49  ;;  %v3955_v19 = vmul.f32 %v3951_v31, %v3923_v8 }
0x19c9   :  { %v3958_v43 = vmul.f32 %v3954_v53, %v3926_v10  ;;  %v9713_v53 = vld [vmem:[%s10447_s3 + $0x3] ss:$0 sm:$0xff] }
0x19ca   :  { %v3956_v62 = vmul.f32 %v3952_v60, %v3924_v56 }
0x19cb   :  { %v3960_v29 = vpack.c.bf16 %v3958_v43, %v3957_v9  ;;  %v9719_v43 = vld [vmem:[%s10448_s4 + $0x3] ss:$0 sm:$0xff] }
0x19cc   :  { %v3959_v1 = vpack.c.bf16 %v3956_v62, %v3955_v19 }
0x19ce   :  { %7420 = vmatprep.mubr.bf16.mxu1 %v3959_v1 }
0x19cf   :  { %7421 = vmatmul.mubr.bf16.vlgmr.msra.gmra.mrb[72].mxu1 %v3960_v29 }
0x19d0   :  { %7426 = vmatprep.mubr.msk.bf16.mxu1 %vm365_vm1, %v9694_v63 }
0x1aa2   :  { %v7422_v25 = vpop.f32.mrb[72].mxu1 }
0x1aa3   :  { %v4077_v20 = vadd.f32 %v7422_v25, %v6680_v32  ;;  %v4068_v40 = vpop.f32.mrb[73].mxu1  ;;  %v9730_v25 = vld [vmem:[%s10482_s5 + $0x38] sm:$0xff]  }
0x1aa4   :  { %v4069_v14 = vadd.f32 %v6680_v32, %v4068_v40  ;;  %v7423_v27 = vpop.f32.mrb[74].mxu1 }
0x1aa5   :  { %v4080_v3 = vadd.f32 %v7423_v27, %v6680_v32  ;;  %v4071_v61 = vpop.f32.mrb[75].mxu1 }
0x1aa6   :  { %v9656_v6 = vadd.f32 %v4069_v14, %v9568_v59  ;;  %v4072_v54 = vadd.f32 %v6680_v32, %v4071_v61  ;;  %v6708_v32 = vld [vmem:[%s10483_s24 + $0x38] sm:$0xff] }
0x1aa7   :  { %v9672_v33 = vadd.f32 %v4080_v3, %v9593_v5  ;;  %v6697_v5 = vld [vmem:[%s10481_s0 + $0x60] sm:$0xff] }
0x1aa8   :  { %v9659_v57 = vadd.f32 %v4072_v54, %v9572_v30  ;;  %v4091_v44 = vsel %vm194_vm0, %v9656_v6, 0.0  ;;  %v9668_v30 = vadd.f32 %v4077_v20, %v9589_v2  ;;  %v6698_v2 = vld [vmem:[%s10481_s0 + $0x68] sm:$0xff]  ;;  %v6707_v20 = vld [vmem:[%s10483_s24 + $0x30] sm:$0xff] }
0x1aa9   :  { %4092 = vadd.xlane.f32.xlu0 %v4091_v44  ;;  %v4100_v28 = vsel %vm194_vm0, %v9672_v33, 0.0 }
0x1aaa   :  { %v4094_v4 = vsel %vm194_vm0, %v9659_v57, 0.0  ;;  %v4097_v24 = vsel %vm194_vm0, %v9668_v30, 0.0 }
0x1aab   :  { %4095 = vadd.xlane.f32.xlu1 %v4094_v4 }
0x1b36   :  { %v4093_v58 = vpop.xlane.xlu0 %4092 }
0x1b37   :  { %v4103_v7 = vmul.f32 0.015625, %v4093_v58 }
0x1b38   :  { %v4096_v17 = vpop.xlane.xlu1 %4095 }
0x1b39   :  { %v4107_v18 = vsub.f32 %v9656_v6, %v4103_v7  ;;  %v4104_v0 = vmul.f32 0.015625, %v4096_v17 }
0x1b3b   :  { %v4108_v59 = vsub.f32 %v9659_v57, %v4104_v0  ;;  %v4111_v37 = vmul.f32 %v4107_v18, %v4107_v18 }
0x1b3d   :  { %v4115_v12 = vsel %vm194_vm0, %v4111_v37, 0.0  ;;  %v4112_v15 = vmul.f32 %v4108_v59, %v4108_v59 }
0x1b3e   :  { %4116 = vadd.xlane.f32.xlu0 %v4115_v12 }
0x1b3f   :  { %v4118_v23 = vsel %vm194_vm0, %v4112_v15, 0.0 }
0x1b40   :  { %4119 = vadd.xlane.f32.xlu1 %v4118_v23 }
0x1b42   :  { %4098 = vadd.xlane.f32.xlu0 %v4097_v24 }
0x1b44   :  { %4101 = vadd.xlane.f32.xlu1 %v4100_v28 }
0x1b55   :  { %4182 = vperm.xlu1 %7516, %v6698_v2  }
0x1b58   :  { %4177 = vperm.xlu0 %7515, %v6697_v5  }
0x1b59   :  { %4187 = vperm.xlu1 %7516, %v6699_v36  }
0x1b5c   :  { %4192 = vperm.xlu0 %7515, %v6700_v48  }
0x1bcb   :  { %v4117_v51 = vpop.xlane.xlu0 %4116 }
0x1bcc   :  { %v4127_v21 = vmul.f32 0.015625, %v4117_v51 }
0x1bcd   :  { %v4120_v34 = vpop.xlane.xlu1 %4119 }
0x1bce   :  { %v4131_v46 = vadd.f32 1e-06, %v4127_v21  ;;  %v4128_v39 = vmul.f32 0.015625, %v4120_v34 }
0x1bcf   :  { %v4099_v50 = vpop.xlane.xlu0 %4098 }
0x1bd0   :  { %8154 = vrsqrt.f32 %v4131_v46  ;;  %v4132_v22 = vadd.f32 1e-06, %v4128_v39  ;;  %v4105_v41 = vmul.f32 0.015625, %v4099_v50 }
0x1bd1   :  { %v4102_v13 = vpop.xlane.xlu1 %4101 }
0x1bd2   :  { %8156 = vrsqrt.f32 %v4132_v22  ;;  %v9699_v42 = vsub.f32 %v9668_v30, %v4105_v41  ;;  %v4106_v47 = vmul.f32 0.015625, %v4102_v13 }
0x1bd4   :  { %v9702_v55 = vsub.f32 %v9672_v33, %v4106_v47  ;;  %v4113_v35 = vmul.f32 %v9699_v42, %v9699_v42 }
0x1bd5   :  { %v9742_v14 = vpop.permute.xlu1 %4182 }
0x1bd6   :  { %v4121_v31 = vsel %vm194_vm0, %v4113_v35, 0.0  ;;  %v4114_v49 = vmul.f32 %v9702_v55, %v9702_v55 }
0x1bd7   :  { %4122 = vadd.xlane.f32.xlu1 %v4121_v31  ;;  %v9740_v40 = vpop.permute.xlu0 %4177 }
0x1bd8   :  { %v4124_v45 = vsel %vm194_vm0, %v4114_v49, 0.0 }
0x1bd9   :  { %4125 = vadd.xlane.f32.xlu0 %v4124_v45  ;;  %v9746_v3 = vpop.permute.xlu1 %4187 }
0x1bda   :  { %v8155_v10 = vpop.eup %8154 }
0x1bdb   :  { %v4139_v8 = vmul.f32 %v8155_v10, %v4107_v18  ;;  %v9744_v27 = vpop.permute.xlu0 %4192 }
0x1bdc   :  { %v8157_v56 = vpop.eup %8156 }
0x1bdd   :  { %v4140_v60 = vmul.f32 %v8157_v56, %v4108_v59  ;;  %v4149_v9 = vmul.f32 %v9713_v53, %v4139_v8 }
0x1bdf   :  { %v4150_v19 = vmul.f32 %v9713_v53, %v4140_v60  ;;  %v4159_v62 = vadd.f32 %v9719_v43, %v4149_v9 }
0x1be1   :  { %v4160_v29 = vadd.f32 %v9719_v43, %v4150_v19 }
0x1be3   :  { %v4163_v1 = vpack.c.bf16 %v4160_v29, %v4159_v62 }
0x1be5   :  { %7424 = vmatprep.subr.bf16.mxu1 %v4163_v1 }
0x1be6   :  { %7425 = vmatpush3.bf16.msra.mxu1 %v4163_v1 }
0x1be7   :  { %7430 = vmatprep.subr.bf16.mxu1 %v8207_v16 }
0x1be8   :  { %4311 = vperm.xlu1 %7516, %v6708_v32  }
0x1be9   :  { %7427 = vmatmul.mubr.msk.bf16.vlgmr.msra.gmra.mrb[76].mxu1 %vm365_vm1, %v9730_v25 }
0x1bea   :  { %7434 = vmatprep.mubr.msk.bf16.mxu1 %vm8208_vm2, %v8207_v16 }
0x1bef   :  { %4306 = vperm.xlu0 %7515, %v6707_v20  }
0x1c64   :  { %v4123_v44 = vpop.xlane.xlu1 %4122 }
0x1c65   :  { %v4129_v12 = vmul.f32 0.015625, %v4123_v44 }
0x1c66   :  { %v4126_v61 = vpop.xlane.xlu0 %4125 }
0x1c67   :  { %v4130_v18 = vmul.f32 0.015625, %v4126_v61  ;;  %v4133_v21 = vadd.f32 1e-06, %v4129_v12 }
0x1c69   :  { %v4134_v36 = vadd.f32 1e-06, %v4130_v18 }
0x1c6b   :  { %8158 = vrsqrt.f32 %v4134_v36 }
0x1c6c   :  { %8160 = vrsqrt.f32 %v4133_v21 }
0x1c75   :  { %v8159_v10 = vpop.eup %8158 }
0x1c76   :  { %v8161_v8 = vpop.eup %8160  ;;  %v4142_v19 = vmul.f32 %v8159_v10, %v9702_v55 }
0x1cbc   :  { %v7428_v54 = vpop.f32.mrb[76].mxu1 }
0x1cbd   :  { %v4254_v4 = vadd.f32 %v7428_v54, %v9746_v3  ;;  %v4245_v58 = vpop.f32.mrb[77].mxu1  ;;  %v4141_v54 = vmul.f32 %v8161_v8, %v9699_v42 }
0x1cbe   :  { %v4246_v7 = vadd.f32 %v4245_v58, %v9740_v40  ;;  %v7429_v17 = vpop.f32.mrb[78].mxu1 }
0x1cbf   :  { %v4266_v0 = vmul.f32 0.044715, %v4254_v4  ;;  %v4257_v59 = vadd.f32 %v7429_v17, %v9744_v27  ;;  %v4248_v37 = vpop.f32.mrb[79].mxu1  ;;  %v4262_v32 = vmul.f32 0.5, %v4254_v4  ;;  %v4151_v55 = vmul.f32 %v9713_v53, %v4141_v54 }
0x1cc0   :  { %v4264_v15 = vmul.f32 0.044715, %v4246_v7  ;;  %v4249_v23 = vadd.f32 %v4248_v37, %v9742_v14  ;;  %v4260_v44 = vmul.f32 0.5, %v4246_v7  ;;  %v4152_v37 = vmul.f32 %v9713_v53, %v4142_v19  ;;  %v9773_v53 = vpop.permute.xlu0 %4306 }
0x1cc1   :  { %v4270_v24 = vmul.f32 %v4266_v0, %v4254_v4  ;;  %v4267_v28 = vmul.f32 0.044715, %v4257_v59  ;;  %v4263_v20 = vmul.f32 0.5, %v4257_v59  ;;  %v4161_v42 = vadd.f32 %v9719_v43, %v4151_v55 }
0x1cc2   :  { %v4268_v2 = vmul.f32 %v4264_v15, %v4246_v7  ;;  %v4265_v5 = vmul.f32 0.044715, %v4249_v23  ;;  %v4261_v58 = vmul.f32 0.5, %v4249_v23 }
0x1cc3   :  { %v4274_v48 = vmul.f32 %v4270_v24, %v4254_v4  ;;  %v4271_v51 = vmul.f32 %v4267_v28, %v4257_v59 }
0x1cc4   :  { %v4272_v34 = vmul.f32 %v4268_v2, %v4246_v7  ;;  %v4269_v46 = vmul.f32 %v4265_v5, %v4249_v23  ;;  %v4162_v2 = vadd.f32 %v9719_v43, %v4152_v37  ;;  %v9776_v5 = vpop.permute.xlu1 %4311 }
0x1cc5   :  { %v4278_v39 = vadd.f32 %v4274_v48, %v4254_v4  ;;  %v4275_v50 = vmul.f32 %v4271_v51, %v4257_v59 }
0x1cc6   :  { %v4276_v22 = vadd.f32 %v4272_v34, %v4246_v7  ;;  %v4273_v41 = vmul.f32 %v4269_v46, %v4249_v23  ;;  %v4164_v4 = vpack.c.bf16 %v4162_v2, %v4161_v42  ;;  %v9762_v7 = vld [vmem:[%s10449_s7 + $0x18] sm:$0xff]  }
0x1cc7   :  { %v4282_v13 = vmul.f32 0.7978846, %v4278_v39  ;;  %v4279_v47 = vadd.f32 %v4275_v50, %v4257_v59 }
0x1cc8   :  { %v4280_v35 = vmul.f32 0.7978846, %v4276_v22  ;;  %v4277_v31 = vadd.f32 %v4273_v41, %v4249_v23 }
0x1cc9   :  { %8162 = vtanh.f32 %v4282_v13  ;;  %v4283_v49 = vmul.f32 0.7978846, %v4279_v47 }
0x1cca   :  { %8164 = vtanh.f32 %v4280_v35  ;;  %v4281_v45 = vmul.f32 0.7978846, %v4277_v31 }
0x1ccb   :  { %8166 = vtanh.f32 %v4283_v49 }
0x1ccc   :  { %8168 = vtanh.f32 %v4281_v45 }
0x1cd3   :  { %v8163_v56 = vpop.eup %8162 }
0x1cd4   :  { %v8165_v60 = vpop.eup %8164  ;;  %v4290_v9 = vadd.f32 1.0, %v8163_v56 }
0x1cd5   :  { %v8167_v62 = vpop.eup %8166  ;;  %v4288_v29 = vadd.f32 1.0, %v8165_v60 }
0x1cd6   :  { %v8169_v1 = vpop.eup %8168  ;;  %v4291_v61 = vadd.f32 1.0, %v8167_v62  ;;  %v4294_v18 = vmul.f32 %v4290_v9, %v4262_v32 }
0x1cd7   :  { %v4289_v17 = vadd.f32 1.0, %v8169_v1  ;;  %v4292_v12 = vmul.f32 %v4288_v29, %v4260_v44 }
0x1cd8   :  { %v4295_v0 = vmul.f32 %v4291_v61, %v4263_v20 }
0x1cd9   :  { %v4293_v15 = vmul.f32 %v4289_v17, %v4261_v58 }
0x1cda   :  { %v4300_v24 = vpack.c.bf16 %v4295_v0, %v4294_v18 }
0x1cdb   :  { %v4299_v28 = vpack.c.bf16 %v4293_v15, %v4292_v12 }
0x1cdd   :  { %7431 = vmatpush3.bf16.msra.mxu1 %v4299_v28 }
0x1cde   :  { %7432 = vmatprep.subr.bf16.mxu1 %v8207_v16 }
0x1ce1   :  { %7433 = vmatpush3.bf16.msra.mxu1 %v4300_v24 }
0x1ce2   :  { %7438 = vmatprep.subr.bf16.mxu1 %v4164_v4 }
0x1ce4   :  { %7435 = vmatmul.mubr.msk.bf16.vlgmr.msra.gmra.mrb[80].mxu1 %vm478_vm3, %v9762_v7 }
0x1ce5   :  { %7439 = vmatpush3.bf16.msra.mxu1 %v4164_v4  ;;  %7440 = vmatprep.mubr.msk.bf16.mxu1 %vm365_vm1, %v9694_v63 }
0x1ce6   :  { %7444 = vmatprep.subr.bf16.mxu1 %v8207_v16 }
0x1cec   :  { %7441 = vmatmul.mubr.msk.bf16.vlgmr.msra.gmra.mrb[84].mxu1 %vm365_vm1, %v9730_v25 }
0x1ced   :  { %7448 = vmatprep.mubr.msk.bf16.mxu1 %vm8208_vm2, %v8207_v16 }
0x1db7   :  { %v4356_v43 = vpop.f32.mrb[80].mxu1 }
0x1db8   :  { %v4357_v59 = vadd.f32 %v4356_v43, %v9773_v53  ;;  %v7436_v23 = vpop.f32.mrb[81].mxu1 }
0x1db9   :  { %v4359_v36 = vpop.f32.mrb[82].mxu1 }
0x1dba   :  { %v9779_v48 = vadd.f32 %v4357_v59, %v9656_v6  ;;  %v4360_v63 = vadd.f32 %v4359_v36, %v9776_v5  ;;  %v7437_v51 = vpop.f32.mrb[83].mxu1 }
0x1dbc   :  { %v9783_v25 = vadd.f32 %v4360_v63, %v9659_v57  ;;  %v4499_v21 = vsel %vm194_vm0, %v9779_v48, 0.0 }
0x1dbd   :  { %4500 = vadd.xlane.f32.xlu1 %v4499_v21 }
0x1dbe   :  { %v4502_v34 = vsel %vm194_vm0, %v9783_v25, 0.0 }
0x1dbf   :  { %4503 = vadd.xlane.f32.xlu0 %v4502_v34  ;;  %v7442_v46 = vpop.f32.mrb[84].mxu1 }
0x1dc0   :  { %v4406_v39 = vadd.f32 %v7442_v46, %v9746_v3  ;;  %v4397_v50 = vpop.f32.mrb[85].mxu1 }
0x1dc1   :  { %v4398_v6 = vadd.f32 %v4397_v50, %v9740_v40  ;;  %v7443_v22 = vpop.f32.mrb[86].mxu1 }
0x1dc2   :  { %v4418_v41 = vmul.f32 0.044715, %v4406_v39  ;;  %v4409_v13 = vadd.f32 %v7443_v22, %v9744_v27  ;;  %v4400_v57 = vpop.f32.mrb[87].mxu1  ;;  %v4414_v0 = vmul.f32 0.5, %v4406_v39 }
0x1dc3   :  { %v4416_v47 = vmul.f32 0.044715, %v4398_v6  ;;  %v4401_v35 = vadd.f32 %v4400_v57, %v9742_v14  ;;  %v4412_v15 = vmul.f32 0.5, %v4398_v6 }
0x1dc4   :  { %v4422_v31 = vmul.f32 %v4418_v41, %v4406_v39  ;;  %v4419_v49 = vmul.f32 0.044715, %v4409_v13  ;;  %v4415_v37 = vmul.f32 0.5, %v4409_v13 }
0x1dc5   :  { %v4420_v45 = vmul.f32 %v4416_v47, %v4398_v6  ;;  %v4417_v10 = vmul.f32 0.044715, %v4401_v35  ;;  %v4413_v24 = vmul.f32 0.5, %v4401_v35 }
0x1dc6   :  { %v4426_v8 = vmul.f32 %v4422_v31, %v4406_v39  ;;  %v4423_v56 = vmul.f32 %v4419_v49, %v4409_v13 }
0x1dc7   :  { %v4424_v60 = vmul.f32 %v4420_v45, %v4398_v6  ;;  %v4421_v9 = vmul.f32 %v4417_v10, %v4401_v35 }
0x1dc8   :  { %v4430_v3 = vadd.f32 %v4426_v8, %v4406_v39  ;;  %v4427_v19 = vmul.f32 %v4423_v56, %v4409_v13 }
0x1dc9   :  { %v4428_v62 = vadd.f32 %v4424_v60, %v4398_v6  ;;  %v4425_v40 = vmul.f32 %v4421_v9, %v4401_v35 }
0x1dca   :  { %v4434_v29 = vmul.f32 0.7978846, %v4430_v3  ;;  %v4431_v1 = vadd.f32 %v4427_v19, %v4409_v13 }
0x1dcb   :  { %v4432_v32 = vmul.f32 0.7978846, %v4428_v62  ;;  %v4429_v27 = vadd.f32 %v4425_v40, %v4401_v35 }
0x1dcc   :  { %8170 = vtanh.f32 %v4434_v29  ;;  %v4435_v20 = vmul.f32 0.7978846, %v4431_v1 }
0x1dcd   :  { %8172 = vtanh.f32 %v4432_v32  ;;  %v4433_v14 = vmul.f32 0.7978846, %v4429_v27  ;;  %v6716_v27 = vld [vmem:[%s10450_s9 + $0x3] ss:$0 sm:$0xff] }
0x1dce   :  { %8174 = vtanh.f32 %v4435_v20 }
0x1dcf   :  { %8176 = vtanh.f32 %v4433_v14 }
0x1dd6   :  { %v8171_v61 = vpop.eup %8170 }
0x1dd7   :  { %v8173_v54 = vpop.eup %8172  ;;  %v4442_v44 = vadd.f32 1.0, %v8171_v61 }
0x1dd8   :  { %v8175_v58 = vpop.eup %8174  ;;  %v4440_v17 = vadd.f32 1.0, %v8173_v54 }
0x1dd9   :  { %v8177_v18 = vpop.eup %8176  ;;  %v4443_v12 = vadd.f32 1.0, %v8175_v58  ;;  %v4446_v28 = vmul.f32 %v4442_v44, %v4414_v0  ;;  %v6717_v44 = vld [vmem:[%s10451_s10 + $0x3] ss:$0 sm:$0xff] }
0x1dda   :  { %v4441_v55 = vadd.f32 1.0, %v8177_v18  ;;  %v4444_v42 = vmul.f32 %v4440_v17, %v4412_v15  ;;  %v7806_v15 = vld [vmem:[%s10452_s11 + $0x70] sm:$0xff]  }
0x1ddb   :  { %v4447_v2 = vmul.f32 %v4443_v12, %v4415_v37  ;;  %v7804_v37 = vld [vmem:[%s10452_s11 + $0x60] sm:$0xff]   ;;  %v7805_v12 = vld [vmem:[%s10452_s11 + $0x68] sm:$0xff]  }
0x1ddc   :  { %v4445_v4 = vmul.f32 %v4441_v55, %v4413_v24  ;;  %v7807_v24 = vld [vmem:[%s10452_s11 + $0x78] sm:$0xff]  }
0x1ddd   :  { %v4449_v43 = vpack.c.bf16 %v4447_v2, %v4446_v28 }
0x1dde   :  { %v4448_v59 = vpack.c.bf16 %v4445_v4, %v4444_v42 }
0x1de0   :  { %7445 = vmatpush3.bf16.msra.mxu1 %v4448_v59 }
0x1de1   :  { %7446 = vmatprep.subr.bf16.mxu1 %v8207_v16 }
0x1de4   :  { %7447 = vmatpush3.bf16.msra.mxu1 %v4449_v43 }
0x1de5   :  { %7452 = vmatprep.subr.bf16.mxu1 %v7804_v37 }
0x1de7   :  { %7449 = vmatmul.mubr.msk.bf16.vlgmr.msra.gmra.mrb[88].mxu1 %vm478_vm3, %v9762_v7 }
0x1de8   :  { %7453 = vmatpush3.bf16.msra.mxu1 %v7804_v37 }
0x1de9   :  { %7454 = vmatprep.subr.bf16.mxu1 %v7805_v12 }
0x1dec   :  { %7455 = vmatpush3.bf16.msra.mxu1 %v7805_v12 }
0x1ded   :  { %7456 = vmatprep.subr.bf16.mxu1 %v7806_v15 }
0x1df0   :  { %7457 = vmatpush3.bf16.msra.mxu1 %v7806_v15 }
0x1df1   :  { %7458 = vmatprep.subr.bf16.mxu1 %v7807_v24 }
0x1df4   :  { %7459 = vmatpush3.bf16.msra.mxu1 %v7807_v24 }
0x1e4a   :  { %v4501_v23 = vpop.xlane.xlu1 %4500 }
0x1e4b   :  { %v4511_v63 = vmul.f32 0.015625, %v4501_v23 }
0x1e4c   :  { %v4504_v36 = vpop.xlane.xlu0 %4503 }
0x1e4d   :  { %v4512_v51 = vmul.f32 0.015625, %v4504_v36  ;;  %v4515_v34 = vsub.f32 %v9779_v48, %v4511_v63 }
0x1e4f   :  { %v4516_v6 = vsub.f32 %v9783_v25, %v4512_v51  ;;  %v4519_v57 = vmul.f32 %v4515_v34, %v4515_v34 }
0x1e51   :  { %v4520_v47 = vmul.f32 %v4516_v6, %v4516_v6  ;;  %v4523_v35 = vsel %vm194_vm0, %v4519_v57, 0.0  ;;  %v7813_v57 = vld [vmem:[%s10453_s13 + $0xe8] sm:$0xff]  }
0x1eba   :  { %v4484_v21 = vpop.f32.mrb[88].mxu1 }
0x1ebb   :  { %v4485_v46 = vadd.f32 %v4484_v21, %v9773_v53  ;;  %v7450_v39 = vpop.f32.mrb[89].mxu1 }
0x1ebc   :  { %v4487_v50 = vpop.f32.mrb[90].mxu1 }
0x1ebd   :  { %v9800_v22 = vadd.f32 %v4485_v46, %v9668_v30  ;;  %v4488_v16 = vadd.f32 %v4487_v50, %v9776_v5  ;;  %v7451_v41 = vpop.f32.mrb[91].mxu1  ;;  %v4526_v30 = vsel %vm194_vm0, %v4520_v47, 0.0  ;;  %v7808_v50 = vld [vmem:[%s10453_s13 + $0xc0] sm:$0xff]   ;;  %v7815_v47 = vld [vmem:[%s10453_s13 + $0xf8] sm:$0xff]  }
0x1ebe   :  { %7464 = vmatprep.subr.bf16.mxu1 %v7808_v50  ;;  %v7811_v41 = vld [vmem:[%s10453_s13 + $0xd8] sm:$0xff]  }
0x1ebf   :  { %v9804_v7 = vadd.f32 %v4488_v16, %v9672_v33  ;;  %v4505_v13 = vsel %vm194_vm0, %v9800_v22, 0.0  ;;  %v7810_v16 = vld [vmem:[%s10453_s13 + $0xd0] sm:$0xff]  }
0x1ec0   :  { %4506 = vadd.xlane.f32.xlu0 %v4505_v13  ;;  %v7812_v13 = vld [vmem:[%s10453_s13 + $0xe0] sm:$0xff]  }
0x1ec1   :  { %v4508_v53 = vsel %vm194_vm0, %v9804_v7, 0.0 }
0x1ec2   :  { %4509 = vadd.xlane.f32.xlu1 %v4508_v53  ;;  %v7814_v53 = vld [vmem:[%s10453_s13 + $0xf0] sm:$0xff]  }
0x1ec4   :  { %4524 = vadd.xlane.f32.xlu0 %v4523_v35  ;;  %v6727_v35 = vld [vmem:[%s10454_s12 + $0x3] ss:$0 sm:$0xff] }
0x1ec6   :  { %4527 = vadd.xlane.f32.xlu1 %v4526_v30 }
0x1f4d   :  { %v4507_v5 = vpop.xlane.xlu0 %4506 }
0x1f4e   :  { %v4513_v31 = vmul.f32 0.015625, %v4507_v5 }
0x1f4f   :  { %v4510_v33 = vpop.xlane.xlu1 %4509 }
0x1f50   :  { %v4517_v49 = vsub.f32 %v9800_v22, %v4513_v31  ;;  %v4514_v45 = vmul.f32 0.015625, %v4510_v33 }
0x1f51   :  { %v4525_v10 = vpop.xlane.xlu0 %4524 }
0x1f52   :  { %v4518_v8 = vsub.f32 %v9804_v7, %v4514_v45  ;;  %v4535_v56 = vmul.f32 0.015625, %v4525_v10  ;;  %v4521_v60 = vmul.f32 %v4517_v49, %v4517_v49 }
0x1f53   :  { %v4528_v9 = vpop.xlane.xlu1 %4527 }
0x1f54   :  { %v4539_v3 = vadd.f32 1e-06, %v4535_v56  ;;  %v4536_v19 = vmul.f32 0.015625, %v4528_v9  ;;  %v4529_v62 = vsel %vm194_vm0, %v4521_v60, 0.0  ;;  %v4522_v40 = vmul.f32 %v4518_v8, %v4518_v8 }
0x1f55   :  { %4530 = vadd.xlane.f32.xlu0 %v4529_v62 }
0x1f56   :  { %8178 = vrsqrt.f32 %v4539_v3  ;;  %v4540_v29 = vadd.f32 1e-06, %v4536_v19  ;;  %v4532_v1 = vsel %vm194_vm0, %v4522_v40, 0.0 }
0x1f57   :  { %4533 = vadd.xlane.f32.xlu1 %v4532_v1 }
0x1f58   :  { %8180 = vrsqrt.f32 %v4540_v29 }
0x1f60   :  { %v8179_v32 = vpop.eup %8178 }
0x1f61   :  { %v4547_v20 = vmul.f32 %v8179_v32, %v4515_v34 }
0x1f62   :  { %v8181_v14 = vpop.eup %8180 }
0x1f63   :  { %v4548_v61 = vmul.f32 %v8181_v14, %v4516_v6  ;;  %v4557_v54 = vmul.f32 %v6716_v27, %v4547_v20  ;;  %v7809_v6 = vld [vmem:[%s10453_s13 + $0xc8] sm:$0xff]  }
0x1f65   :  { %v4558_v58 = vmul.f32 %v6716_v27, %v4548_v61  ;;  %v4567_v17 = vadd.f32 %v6717_v44, %v4557_v54 }
0x1f67   :  { %v4568_v18 = vadd.f32 %v6717_v44, %v4558_v58 }
0x1f69   :  { %v4571_v0 = vpack.c.bf16 %v4568_v18, %v4567_v17 }
0x1f6b   :  { %7460 = vmatprep.mubr.msk.bf16.mxu1 %vm194_vm0, %v4571_v0 }
0x1fe2   :  { %v4531_v55 = vpop.xlane.xlu0 %4530 }
0x1fe3   :  { %v4537_v28 = vmul.f32 0.015625, %v4531_v55 }
0x1fe4   :  { %v4534_v2 = vpop.xlane.xlu1 %4533 }
0x1fe5   :  { %v4541_v42 = vadd.f32 1e-06, %v4537_v28  ;;  %v4538_v4 = vmul.f32 0.015625, %v4534_v2 }
0x1fe7   :  { %8182 = vrsqrt.f32 %v4541_v42  ;;  %v4542_v43 = vadd.f32 1e-06, %v4538_v4 }
0x1fe9   :  { %8184 = vrsqrt.f32 %v4542_v43 }
0x1ff1   :  { %v8183_v59 = vpop.eup %8182 }
0x1ff2   :  { %v4549_v23 = vmul.f32 %v8183_v59, %v4517_v49 }
0x1ff3   :  { %v8185_v36 = vpop.eup %8184 }
0x1ff4   :  { %v4559_v63 = vmul.f32 %v6716_v27, %v4549_v23  ;;  %v4550_v51 = vmul.f32 %v8185_v36, %v4518_v8 }
0x1ff6   :  { %v4560_v21 = vmul.f32 %v6716_v27, %v4550_v51  ;;  %v4569_v34 = vadd.f32 %v6717_v44, %v4559_v63 }
0x1ff8   :  { %v4570_v46 = vadd.f32 %v6717_v44, %v4560_v21 }
0x1ffa   :  { %v4572_v39 = vpack.c.bf16 %v4570_v46, %v4569_v34 }
0x1ffc   :  { %7461 = vmatmul.mubr.msk.bf16.vlgmr.msra.gmra.mrb[92].mxu1 %vm194_vm0, %v4572_v39  ;;  %v6751_v39 = vld [vmem:[%s10485_s14 + $0x3] ss:$0 sm:$0xff] }
0x1ffd   :  { %7465 = vmatpush3.bf16.msra.mxu1 %v7808_v50 }
0x1ffe   :  { %7466 = vmatprep.subr.bf16.mxu1 %v7809_v6 }
0x2001   :  { %7467 = vmatpush3.bf16.msra.mxu1 %v7809_v6 }
0x2002   :  { %7468 = vmatprep.subr.bf16.mxu1 %v7810_v16 }
0x2005   :  { %7469 = vmatpush3.bf16.msra.mxu1 %v7810_v16 }
0x2006   :  { %7470 = vmatprep.subr.bf16.mxu1 %v7811_v41 }
0x2009   :  { %7471 = vmatpush3.bf16.msra.mxu1 %v7811_v41 }
0x200a   :  { %7472 = vmatprep.subr.bf16.mxu1 %v7812_v13 }
0x200d   :  { %7473 = vmatpush3.bf16.msra.mxu1 %v7812_v13 }
0x200e   :  { %7474 = vmatprep.subr.bf16.mxu1 %v7813_v57 }
0x2011   :  { %7475 = vmatpush3.bf16.msra.mxu1 %v7813_v57 }
0x2012   :  { %7476 = vmatprep.subr.bf16.mxu1 %v7814_v53 }
0x2015   :  { %7477 = vmatpush3.bf16.msra.mxu1 %v7814_v53 }
0x2016   :  { %7478 = vmatprep.subr.bf16.mxu1 %v7815_v47 }
0x2019   :  { %7479 = vmatpush3.bf16.msra.mxu1 %v7815_v47 }
0x20cf   :  { %v7462_v30 = vpop.f32.mrb[92].mxu1 }
0x20d0   :  { %v4663_v5 = vadd.f32 %v7462_v30, %v6727_v35  ;;  %v4654_v31 = vpop.f32.mrb[93].mxu1 }
0x20d1   :  { %v4655_v33 = vadd.f32 %v6727_v35, %v4654_v31  ;;  %v7463_v49 = vpop.f32.mrb[94].mxu1 }
0x20d2   :  { %v4675_v45 = vmul.f32 0.044715, %v4663_v5  ;;  %v4666_v10 = vadd.f32 %v7463_v49, %v6727_v35  ;;  %v4657_v8 = vpop.f32.mrb[95].mxu1  ;;  %v4671_v2 = vmul.f32 0.5, %v4663_v5 }
0x20d3   :  { %v4673_v56 = vmul.f32 0.044715, %v4655_v33  ;;  %v4658_v60 = vadd.f32 %v6727_v35, %v4657_v8  ;;  %v4669_v43 = vmul.f32 0.5, %v4655_v33 }
0x20d4   :  { %v4679_v9 = vmul.f32 %v4675_v45, %v4663_v5  ;;  %v4676_v3 = vmul.f32 0.044715, %v4666_v10  ;;  %v4672_v42 = vmul.f32 0.5, %v4666_v10 }
0x20d5   :  { %v4677_v19 = vmul.f32 %v4673_v56, %v4655_v33  ;;  %v4674_v62 = vmul.f32 0.044715, %v4658_v60  ;;  %v4670_v59 = vmul.f32 0.5, %v4658_v60 }
0x20d6   :  { %v4683_v40 = vmul.f32 %v4679_v9, %v4663_v5  ;;  %v4680_v29 = vmul.f32 %v4676_v3, %v4666_v10 }
0x20d7   :  { %v4681_v1 = vmul.f32 %v4677_v19, %v4655_v33  ;;  %v4678_v32 = vmul.f32 %v4674_v62, %v4658_v60 }
0x20d8   :  { %v4687_v27 = vadd.f32 %v4683_v40, %v4663_v5  ;;  %v4684_v20 = vmul.f32 %v4680_v29, %v4666_v10  ;;  %v7821_v29 = vld [vmem:[%s10456_s17 + $0x414] ss:$8 sps:$4 sm:$0xff]  }
0x20d9   :  { %v4682_v14 = vmul.f32 %v4678_v32, %v4658_v60  ;;  %v4685_v61 = vadd.f32 %v4681_v1, %v4655_v33  ;;  %v7819_v1 = vld [vmem:[%s10456_s17 + $0x410] ss:$8 sps:$4 sm:$0xff]   ;;  %v7824_v32 = vld [vmem:[%s10456_s17 + $0x424] ss:$8 sps:$4 sm:$0xff]  }
0x20da   :  { %v4691_v54 = vmul.f32 0.7978846, %v4687_v27  ;;  %v4688_v44 = vadd.f32 %v4684_v20, %v4666_v10  ;;  %v7822_v27 = vld [vmem:[%s10456_s17 + $0x420] ss:$8 sps:$4 sm:$0xff]   ;;  %v7827_v20 = vld [vmem:[%s10456_s17 + $0x434] ss:$8 sps:$4 sm:$0xff]  }
0x20db   :  { %v4686_v58 = vadd.f32 %v4682_v14, %v4658_v60  ;;  %v4689_v17 = vmul.f32 0.7978846, %v4685_v61  ;;  %v7825_v14 = vld [vmem:[%s10456_s17 + $0x430] ss:$8 sps:$4 sm:$0xff]   ;;  %v7830_v61 = vld [vmem:[%s10456_s17 + $0x444] ss:$8 sps:$4 sm:$0xff]  }
0x20dc   :  { %8186 = vtanh.f32 %v4691_v54  ;;  %v4692_v18 = vmul.f32 0.7978846, %v4688_v44  ;;  %v7828_v54 = vld [vmem:[%s10456_s17 + $0x440] ss:$8 sps:$4 sm:$0xff]   ;;  %v7833_v44 = vld [vmem:[%s10456_s17 + $0x454] ss:$8 sps:$4 sm:$0xff]  }
0x20dd   :  { %v4690_v0 = vmul.f32 0.7978846, %v4686_v58  ;;  %8188 = vtanh.f32 %v4689_v17  ;;  %v7831_v58 = vld [vmem:[%s10456_s17 + $0x450] ss:$8 sps:$4 sm:$0xff]   ;;  %v7836_v17 = vld [vmem:[%s10456_s17 + $0x464] ss:$8 sps:$4 sm:$0xff]  }
0x20de   :  { %8190 = vtanh.f32 %v4692_v18  ;;  %v7834_v18 = vld [vmem:[%s10456_s17 + $0x460] ss:$8 sps:$4 sm:$0xff]  }
0x20df   :  { %8192 = vtanh.f32 %v4690_v0  ;;  %v7839_v0 = vld [vmem:[%s10456_s17 + $0x474] ss:$8 sps:$4 sm:$0xff]  }
0x20e6   :  { %v8187_v37 = vpop.eup %8186 }
0x20e7   :  { %v8189_v12 = vpop.eup %8188  ;;  %v4699_v15 = vadd.f32 1.0, %v8187_v37  ;;  %v7837_v37 = vld [vmem:[%s10456_s17 + $0x470] ss:$8 sps:$4 sm:$0xff]  }
0x20e8   :  { %v8191_v24 = vpop.eup %8190  ;;  %v4697_v55 = vadd.f32 1.0, %v8189_v12  ;;  %v7842_v12 = vld [vmem:[%s10456_s17 + $0x484] ss:$8 sps:$4 sm:$0xff]  }
0x20e9   :  { %v8193_v28 = vpop.eup %8192  ;;  %v4700_v4 = vadd.f32 1.0, %v8191_v24  ;;  %v4703_v36 = vmul.f32 %v4699_v15, %v4671_v2  ;;  %v7840_v15 = vld [vmem:[%s10456_s17 + $0x480] ss:$8 sps:$4 sm:$0xff]   ;;  %v7845_v24 = vld [vmem:[%s10456_s17 + $0x494] ss:$8 sps:$4 sm:$0xff]  }
0x20ea   :  { %v4698_v23 = vadd.f32 1.0, %v8193_v28  ;;  %v4701_v51 = vmul.f32 %v4697_v55, %v4669_v43  ;;  %v7843_v55 = vld [vmem:[%s10456_s17 + $0x490] ss:$8 sps:$4 sm:$0xff]  }
0x20eb   :  { %v4704_v63 = vmul.f32 %v4700_v4, %v4672_v42 }
0x20ec   :  { %v4702_v21 = vmul.f32 %v4698_v23, %v4670_v59  ;;  %v7846_v23 = vld [vmem:[%s10456_s17 + $0x4a0] ss:$8 sps:$4 sm:$0xff]  }
0x20ed   :  { %v4706_v34 = vpack.c.bf16 %v4704_v63, %v4703_v36  ;;  %v7848_v36 = vld [vmem:[%s10456_s17 + $0x4a4] ss:$8 sps:$4 sm:$0xff]  }
0x20ee   :  { %v4705_v46 = vpack.c.bf16 %v4702_v21, %v4701_v51  ;;  %v9959_v51 = vld [vmem:[%s10457_s15 + $0x1] ss:$0 sm:$0xff] }
0x20f0   :  { %7480 = vmatprep.mubr.bf16.mxu1 %v4705_v46  ;;  %v9965_v46 = vld [vmem:[%s10458_s16 + $0x1] ss:$0 sm:$0xff] }
0x20f1   :  { %7481 = vmatmul.mubr.bf16.vlgmr.msra.gmra.mrb[96].mxu1 %v4706_v34 }
0x21c4   :  { %v7482_v50 = vpop.f32.mrb[96].mxu1 }
0x21c5   :  { %v4823_v6 = vadd.f32 %v7482_v50, %v6751_v39  ;;  %v4814_v16 = vpop.f32.mrb[97].mxu1 }
0x21c6   :  { %v4815_v41 = vadd.f32 %v6751_v39, %v4814_v16  ;;  %v7483_v13 = vpop.f32.mrb[98].mxu1  ;;  %v7851_v16 = vld [vmem:[%s10456_s17 + $0x4b4] ss:$8 sps:$4 sm:$0xff]  }
0x21c7   :  { %v4831_v57 = vadd.f32 %v4823_v6, %v9800_v22  ;;  %v4826_v53 = vadd.f32 %v7483_v13, %v6751_v39  ;;  %v4817_v47 = vpop.f32.mrb[99].mxu1  ;;  %v7849_v6 = vld [vmem:[%s10456_s17 + $0x4b0] ss:$8 sps:$4 sm:$0xff]  }
0x21c8   :  { %v4829_v35 = vadd.f32 %v4815_v41, %v9779_v48  ;;  %v4818_v30 = vadd.f32 %v6751_v39, %v4817_v47 }
0x21c9   :  { %v4843_v5 = vsel %vm194_vm0, %v4831_v57, 0.0  ;;  %v9879_v60 = vadd.f32 %v4826_v53, %v9804_v7  ;;  %v7816_v7 = vld [vmem:[%s10456_s17 + $0x400] ss:$8 sps:$4 sm:$0xff]  }
0x21ca   :  { %4844 = vadd.xlane.f32.xlu1 %v4843_v5  ;;  %v4837_v31 = vsel %vm194_vm0, %v4829_v35, 0.0  ;;  %v9883_v3 = vadd.f32 %v4818_v30, %v9783_v25  ;;  %v7818_v25 = vld [vmem:[%s10456_s17 + $0x404] ss:$8 sps:$4 sm:$0xff]  }
0x21cb   :  { %4838 = vadd.xlane.f32.xlu0 %v4837_v31  ;;  %v4846_v62 = vsel %vm194_vm0, %v9879_v60, 0.0  ;;  %5941 = vmatprep.subr.bf16.mxu0 %v7818_v25  ;;  %v7854_v30 = vld [vmem:[%s10456_s17 + $0x4c4] ss:$8 sps:$4 sm:$0xff]   ;;  %v7858_v25 = vld [vmem:[%s10456_s17 + $0x4e0] ss:$8 sps:$4 sm:$0xff]  }
0x21cc   :  { %v4840_v40 = vsel %vm194_vm0, %v9883_v3, 0.0  ;;  %5942 = vmatpush1.bf16.msra.mxu0 %v7816_v7 }
0x21cd   :  { %5943 = vmatprep.subr.bf16.mxu0 %v7821_v29  ;;  %v7863_v29 = vld [vmem:[%s10456_s17 + $0x4f4] ss:$8 sps:$4 sm:$0xff]  }
0x21d0   :  { %5944 = vmatpush1.bf16.msra.mxu0 %v7819_v1 }
0x21d1   :  { %5945 = vmatprep.subr.bf16.mxu0 %v7824_v32 }
0x21d4   :  { %5946 = vmatpush1.bf16.msra.mxu0 %v7822_v27  ;;  %v7861_v27 = vld [vmem:[%s10456_s17 + $0x4f0] ss:$8 sps:$4 sm:$0xff]  }
0x21d5   :  { %5947 = vmatprep.subr.bf16.mxu0 %v7827_v20 }
0x21d8   :  { %5948 = vmatpush1.bf16.msra.mxu0 %v7825_v14 }
0x21d9   :  { %5949 = vmatprep.subr.bf16.mxu0 %v7830_v61  ;;  %v7866_v61 = vld [vmem:[%s10456_s17 + $0x504] ss:$8 sps:$4 sm:$0xff]  }
0x21dc   :  { %5950 = vmatpush1.bf16.msra.mxu0 %v7828_v54 }
0x21dd   :  { %5951 = vmatprep.subr.bf16.mxu0 %v7833_v44 }
0x21e0   :  { %5952 = vmatpush1.bf16.msra.mxu0 %v7831_v58 }
0x21e1   :  { %5953 = vmatprep.subr.bf16.mxu0 %v7836_v17 }
0x21e4   :  { %5954 = vmatpush1.bf16.msra.mxu0 %v7834_v18 }
0x21e5   :  { %5955 = vmatprep.subr.bf16.mxu0 %v7839_v0 }
0x21e8   :  { %5956 = vmatpush1.bf16.msra.mxu0 %v7837_v37 }
0x21e9   :  { %5957 = vmatprep.subr.bf16.mxu0 %v7842_v12 }
0x21ec   :  { %5958 = vmatpush1.bf16.msra.mxu0 %v7840_v15 }
0x21ed   :  { %5959 = vmatprep.subr.bf16.mxu0 %v7845_v24 }
0x21f0   :  { %5960 = vmatpush1.bf16.msra.mxu0 %v7843_v55 }
0x21f1   :  { %5961 = vmatprep.subr.bf16.mxu0 %v7848_v36 }
0x21f4   :  { %5962 = vmatpush1.bf16.msra.mxu0 %v7846_v23 }
0x21f5   :  { %5963 = vmatprep.subr.bf16.mxu0 %v7851_v16  ;;  %v7870_v16 = vld [vmem:[%s10456_s17 + $0x514] ss:$8 sps:$4 sm:$0xff]  }
0x21f8   :  { %5964 = vmatpush1.bf16.msra.mxu0 %v7849_v6 }
0x21f9   :  { %5965 = vmatprep.subr.bf16.mxu0 %v7854_v30  ;;  %v7879_v30 = vld [vmem:[%s10456_s17 + $0x544] ss:$8 sps:$4 sm:$0xff]  }
0x2257   :  { %v4845_v33 = vpop.xlane.xlu1 %4844 }
0x2258   :  { %v4851_v49 = vmul.f32 0.015625, %v4845_v33  ;;  %v4839_v45 = vpop.xlane.xlu0 %4838 }
0x2259   :  { %v4849_v10 = vmul.f32 0.015625, %v4839_v45 }
0x225a   :  { %v9870_v8 = vsub.f32 %v4831_v57, %v4851_v49 }
0x225b   :  { %v9872_v56 = vsub.f32 %v4829_v35, %v4849_v10  ;;  %v7852_v35 = vld [vmem:[%s10456_s17 + $0x4c0] ss:$8 sps:$4 sm:$0xff]  }
0x225c   :  { %v4859_v22 = vmul.f32 %v9870_v8, %v9870_v8  ;;  %5966 = vmatpush1.bf16.msra.mxu0 %v7852_v35  ;;  %v7874_v35 = vld [vmem:[%s10456_s17 + $0x530] ss:$8 sps:$4 sm:$0xff]  }
0x225d   :  { %v4857_v48 = vmul.f32 %v9872_v56, %v9872_v56 }
0x225e   :  { %v4867_v9 = vsel %vm194_vm0, %v4859_v22, 0.0 }
0x225f   :  { %4868 = vadd.xlane.f32.xlu1 %v4867_v9  ;;  %v4861_v19 = vsel %vm194_vm0, %v4857_v48, 0.0  ;;  %v7855_v48 = vld [vmem:[%s10456_s17 + $0x4d0] ss:$8 sps:$4 sm:$0xff]   ;;  %v7857_v9 = vld [vmem:[%s10456_s17 + $0x4d4] ss:$8 sps:$4 sm:$0xff]  }
0x2260   :  { %4862 = vadd.xlane.f32.xlu0 %v4861_v19  ;;  %5967 = vmatprep.subr.bf16.mxu0 %v7857_v9  ;;  %v7892_v9 = vld [vmem:[%s10456_s17 + $0x590] ss:$8 sps:$4 sm:$0xff]  }
0x2261   :  { %5968 = vmatpush1.bf16.msra.mxu0 %v7855_v48  ;;  %v7894_v48 = vld [vmem:[%s10456_s17 + $0x594] ss:$8 sps:$4 sm:$0xff]  }
0x2263   :  { %4847 = vadd.xlane.f32.xlu1 %v4846_v62 }
0x2264   :  { %4841 = vadd.xlane.f32.xlu0 %v4840_v40  ;;  %v7860_v40 = vld [vmem:[%s10456_s17 + $0x4e4] ss:$8 sps:$4 sm:$0xff]  }
0x2265   :  { %5969 = vmatprep.subr.bf16.mxu0 %v7860_v40  ;;  %v7900_v40 = vld [vmem:[%s10456_s17 + $0x5b4] ss:$8 sps:$4 sm:$0xff]  }
0x2266   :  { %5970 = vmatpush1.bf16.msra.mxu0 %v7858_v25 }
0x2267   :  { %5971 = vmatprep.subr.bf16.mxu0 %v7863_v29  ;;  %v7903_v29 = vld [vmem:[%s10456_s17 + $0x5c4] ss:$8 sps:$4 sm:$0xff]  }
0x226a   :  { %5972 = vmatpush1.bf16.msra.mxu0 %v7861_v27  ;;  %v7901_v27 = vld [vmem:[%s10456_s17 + $0x5c0] ss:$8 sps:$4 sm:$0xff]  }
0x226b   :  { %5982 = vmatprep.subr.bf16.mxu0 %v7866_v61 }
0x22ec   :  { %v4869_v28 = vpop.xlane.xlu1 %4868 }
0x22ed   :  { %v4875_v2 = vmul.f32 0.015625, %v4869_v28  ;;  %v4863_v42 = vpop.xlane.xlu0 %4862 }
0x22ee   :  { %v4873_v4 = vmul.f32 0.015625, %v4863_v42 }
0x22ef   :  { %v4879_v43 = vadd.f32 1e-06, %v4875_v2 }
0x22f0   :  { %v4877_v59 = vadd.f32 1e-06, %v4873_v4  ;;  %v4848_v54 = vpop.xlane.xlu1 %4847 }
0x22f1   :  { %8194 = vrsqrt.f32 %v4879_v43  ;;  %v4852_v44 = vmul.f32 0.015625, %v4848_v54  ;;  %v4842_v58 = vpop.xlane.xlu0 %4841 }
0x22f2   :  { %8196 = vrsqrt.f32 %v4877_v59  ;;  %v4850_v18 = vmul.f32 0.015625, %v4842_v58  ;;  %v7909_v58 = vld [vmem:[%s10456_s17 + $0x5e4] ss:$8 sps:$4 sm:$0xff]  }
0x22f3   :  { %v10026_v17 = vsub.f32 %v9879_v60, %v4852_v44  ;;  %v7904_v44 = vld [vmem:[%s10456_s17 + $0x5d0] ss:$8 sps:$4 sm:$0xff]  }
0x22f4   :  { %v10029_v0 = vsub.f32 %v9883_v3, %v4850_v18  ;;  %v7907_v18 = vld [vmem:[%s10456_s17 + $0x5e0] ss:$8 sps:$4 sm:$0xff]  }
0x22f5   :  { %v4860_v37 = vmul.f32 %v10026_v17, %v10026_v17 }
0x22f6   :  { %v4858_v15 = vmul.f32 %v10029_v0, %v10029_v0 }
0x22f7   :  { %v4870_v12 = vsel %vm194_vm0, %v4860_v37, 0.0  ;;  %v7912_v37 = vld [vmem:[%s10456_s17 + $0x5f4] ss:$8 sps:$4 sm:$0xff]  }
0x22f8   :  { %v4864_v24 = vsel %vm194_vm0, %v4858_v15, 0.0  ;;  %v7910_v15 = vld [vmem:[%s10456_s17 + $0x5f0] ss:$8 sps:$4 sm:$0xff]  }
0x22fb   :  { %v8195_v63 = vpop.eup %8194 }
0x22fc   :  { %v8197_v21 = vpop.eup %8196  ;;  %v4887_v34 = vmul.f32 %v8195_v63, %v9870_v8 }
0x22fd   :  { %v4885_v39 = vmul.f32 %v8197_v21, %v9872_v56 }
0x22fe   :  { %v4897_v50 = vmul.f32 %v9959_v51, %v4887_v34 }
0x22ff   :  { %v4895_v41 = vmul.f32 %v9959_v51, %v4885_v39  ;;  %v7864_v39 = vld [vmem:[%s10456_s17 + $0x500] ss:$8 sps:$4 sm:$0xff]  }
0x2300   :  { %v4907_v13 = vadd.f32 %v9965_v46, %v4897_v50 }
0x2301   :  { %v4905_v57 = vadd.f32 %v9965_v46, %v4895_v41 }
0x2302   :  { %v5015_v53 = vrot.slane %v4907_v13, %v8971_v26  ;;  %5007 = vst.msk [vmem:[#allocation2 + $0x1] sm:$0x1] %vm1807_vm4, %v4907_v13  ;;  %v5031_v47 = vcombine.high %v4907_v13, %v4907_v13  ;;  %v7868_v13 = vld [vmem:[%s10456_s17 + $0x510] ss:$8 sps:$4 sm:$0xff]  }
0x2303   :  { %v4917_v5 = vrot.slane %v4905_v57, %v8971_v26  ;;  %4909 = vst.msk [vmem:[#allocation2] sm:$0x1] %vm1807_vm4, %v4905_v57  ;;  %v4933_v31 = vcombine.high %v4905_v57, %v4905_v57  ;;  %v7873_v57 = vld [vmem:[%s10456_s17 + $0x524] ss:$8 sps:$4 sm:$0xff]  }
0x2304   :  { %v6772_v33 = vrot.slane %v5015_v53, 9  ;;  %v5022_v49 = vcombine.high %v5015_v53, %v5015_v53  ;;  %v5038_v45 = vrot.slane %v5031_v47, %v8971_v26  ;;  %v7871_v53 = vld [vmem:[%s10456_s17 + $0x520] ss:$8 sps:$4 sm:$0xff]   ;;  %v7876_v47 = vld [vmem:[%s10456_s17 + $0x534] ss:$8 sps:$4 sm:$0xff]  }
0x2305   :  { %v6764_v10 = vrot.slane %v4917_v5, 9  ;;  %v4924_v8 = vcombine.high %v4917_v5, %v4917_v5  ;;  %v4940_v56 = vrot.slane %v4933_v31, %v8971_v26  ;;  %v7877_v5 = vld [vmem:[%s10456_s17 + $0x540] ss:$8 sps:$4 sm:$0xff]   ;;  %v7882_v31 = vld [vmem:[%s10456_s17 + $0x554] ss:$8 sps:$4 sm:$0xff]  }
0x2306   :  { %5018 = vrot.lane.b32.xlu1 %v6772_v33, %s8210_s29  ;;  %5024 = vst.msk [vmem:[#allocation2 + $0x3] sm:$0x1] %vm1807_vm4, %v5022_v49  ;;  %5040 = vst.msk [vmem:[#allocation2 + $0x5] sm:$0x1] %vm1807_vm4, %v5038_v45  ;;  %v5047_v22 = vcombine.high %v5038_v45, %v5038_v45  ;;  %v6773_v7 = vrot.slane %v5022_v49, 9  ;;  %v6774_v20 = vrot.slane %v5038_v45, 9 }
0x2307   :  { %4920 = vrot.lane.b32.xlu0 %v6764_v10, %s8210_s29  ;;  %v6765_v19 = vrot.slane %v4924_v8, 9  ;;  %4926 = vst.msk [vmem:[#allocation2 + $0x2] sm:$0x1] %vm1807_vm4, %v4924_v8  ;;  %4942 = vst.msk [vmem:[#allocation2 + $0x4] sm:$0x1] %vm1807_vm4, %v4940_v56  ;;  %v4949_v62 = vcombine.high %v4940_v56, %v4940_v56  ;;  %v6766_v1 = vrot.slane %v4940_v56, 9 }
0x2308   :  { %5049 = vst.msk [vmem:[#allocation2 + $0x7] sm:$0x1] %vm1807_vm4, %v5047_v22  ;;  %v6775_v14 = vrot.slane %v5047_v22, 9  ;;  %v7880_v33 = vld [vmem:[%s10456_s17 + $0x550] ss:$8 sps:$4 sm:$0xff]  }
0x2309   :  { %4951 = vst.msk [vmem:[#allocation2 + $0x6] sm:$0x1] %vm1807_vm4, %v4949_v62  ;;  %v6767_v32 = vrot.slane %v4949_v62, 9  ;;  %v7885_v49 = vld [vmem:[%s10456_s17 + $0x564] ss:$8 sps:$4 sm:$0xff]  }
0x230a   :  { %4929 = vrot.lane.b32.xlu1 %v6765_v19, %s8210_s29  ;;  %v7883_v45 = vld [vmem:[%s10456_s17 + $0x560] ss:$8 sps:$4 sm:$0xff]   ;;  %v7888_v10 = vld [vmem:[%s10456_s17 + $0x574] ss:$8 sps:$4 sm:$0xff]   ;;  %v7886_v8 = vld [vmem:[%s10456_s17 + $0x570] ss:$8 sps:$4 sm:$0xff]  }
0x230b   :  { %5027 = vrot.lane.b32.xlu0 %v6773_v7, %s8210_s29  ;;  %v7891_v56 = vld [vmem:[%s10456_s17 + $0x584] ss:$8 sps:$4 sm:$0xff]   ;;  %v7889_v22 = vld [vmem:[%s10456_s17 + $0x580] ss:$8 sps:$4 sm:$0xff]   ;;  %v7898_v7 = vld [vmem:[%s10456_s17 + $0x5b0] ss:$8 sps:$4 sm:$0xff]  }
0x230c   :  { %v7897_v19 = vld [vmem:[%s10456_s17 + $0x5a4] ss:$8 sps:$4 sm:$0xff]   ;;  %v7895_v62 = vld [vmem:[%s10456_s17 + $0x5a0] ss:$8 sps:$4 sm:$0xff]  }
0x230e   :  { %4945 = vrot.lane.b32.xlu1 %v6766_v1, %s8210_s29 }
0x230f   :  { %4954 = vrot.lane.b32.xlu0 %v6767_v32, %s8210_s29 }
0x2312   :  { %5043 = vrot.lane.b32.xlu1 %v6774_v20, %s8210_s29 }
0x2313   :  { %5052 = vrot.lane.b32.xlu0 %v6775_v14, %s8210_s29  ;;  %v7906_v14 = vld [vmem:[%s10456_s17 + $0x5d4] ss:$8 sps:$4 sm:$0xff]  }
0x2332   :  { %4871 = vadd.xlane.f32.xlu0 %v4870_v12 }
0x2336   :  { %4865 = vadd.xlane.f32.xlu1 %v4864_v24 }
0x2378   :  { %v5019_v55 = vpop.permute.xlu1 %5018 }
0x2379   :  { %5021 = vst.msk [vmem:[#allocation2 + $0x1] sm:$0x1] %vm1822_vm5, %v5019_v55  ;;  %v4921_v60 = vpop.permute.xlu0 %4920  ;;  %v7915_v55 = vld [vmem:[%s10456_s17 + $0x604] ss:$8 sps:$4 sm:$0xff]  }
0x237a   :  { %4923 = vst.msk [vmem:[#allocation2] sm:$0x1] %vm1822_vm5, %v4921_v60 }
0x237c   :  { %v4930_v3 = vpop.permute.xlu1 %4929 }
0x237d   :  { %4932 = vst.msk [vmem:[#allocation2 + $0x2] sm:$0x1] %vm1822_vm5, %v4930_v3  ;;  %v5028_v28 = vpop.permute.xlu0 %5027 }
0x237e   :  { %5030 = vst.msk [vmem:[#allocation2 + $0x3] sm:$0x1] %vm1822_vm5, %v5028_v28  ;;  %v7913_v28 = vld [vmem:[%s10456_s17 + $0x600] ss:$8 sps:$4 sm:$0xff]  }
0x2380   :  { %v4946_v2 = vpop.permute.xlu1 %4945 }
0x2381   :  { %4948 = vst.msk [vmem:[#allocation2 + $0x4] sm:$0x1] %vm1822_vm5, %v4946_v2  ;;  %v4955_v42 = vpop.permute.xlu0 %4954 }
0x2382   :  { %4957 = vst.msk [vmem:[#allocation2 + $0x6] sm:$0x1] %vm1822_vm5, %v4955_v42 }
0x2384   :  { %v5044_v4 = vpop.permute.xlu1 %5043 }
0x2385   :  { %5046 = vst.msk [vmem:[#allocation2 + $0x5] sm:$0x1] %vm1822_vm5, %v5044_v4  ;;  %v5053_v43 = vpop.permute.xlu0 %5052  ;;  %v7918_v4 = vld [vmem:[%s10456_s17 + $0x614] ss:$8 sps:$4 sm:$0xff]  }
0x2386   :  { %5055 = vst.msk [vmem:[#allocation2 + $0x7] sm:$0x1] %vm1822_vm5, %v5053_v43 }
0x238d   :  { %v5105_v59 = vld [vmem:[#allocation2] sm:$0xff] }
0x238e   :  { %v5116_v23 = vrot.slane %v5105_v59, %v8971_v26  ;;  %v5109_v36 = vcombine.high %v5105_v59, %v5105_v59 }
0x2390   :  { %v5124_v63 = vcombine.high %v5116_v23, %v5116_v23  ;;  %v10047_v21 = vrot.slane %v5109_v36, %v8971_v26  ;;  %v5151_v6 = vpack.c.bf16 %v5116_v23, %v5116_v23 }
0x2392   :  { %v5152_v34 = vpack.c.bf16 %v5124_v63, %v5124_v63  ;;  %v5125_v50 = vcombine.high %v10047_v21, %v10047_v21  ;;  %v5153_v42 = vpack.c.bf16 %v10047_v21, %v10047_v21 }
0x2394   :  { %5973 = vmatprep.mubr.bf16.mxu0 %v5152_v34  ;;  %v5154_v41 = vpack.c.bf16 %v5125_v50, %v5125_v50 }
0x2395   :  { %5974 = vmatmul.mubr.bf16.vlgmr.msra.gmra.mrb[24].mxu0 %v5151_v6  ;;  %v7919_v6 = vld [vmem:[%s10456_s17 + $0x620] ss:$8 sps:$4 sm:$0xff]  }
0x2396   :  { %5983 = vmatpush1.bf16.msra.mxu0 %v7864_v39  ;;  %6014 = vmatprep.mubr.bf16.mxu0 %v5154_v41 }
0x2397   :  { %5984 = vmatprep.subr.bf16.mxu0 %v7870_v16 }
0x239a   :  { %5985 = vmatpush1.bf16.msra.mxu0 %v7868_v13 }
0x239b   :  { %5986 = vmatprep.subr.bf16.mxu0 %v7873_v57  ;;  %v7924_v57 = vld [vmem:[%s10456_s17 + $0x634] ss:$8 sps:$4 sm:$0xff]  }
0x239e   :  { %5987 = vmatpush1.bf16.msra.mxu0 %v7871_v53 }
0x239f   :  { %5988 = vmatprep.subr.bf16.mxu0 %v7876_v47 }
0x23a2   :  { %5989 = vmatpush1.bf16.msra.mxu0 %v7874_v35  ;;  %v7922_v35 = vld [vmem:[%s10456_s17 + $0x630] ss:$8 sps:$4 sm:$0xff]  }
0x23a3   :  { %5990 = vmatprep.subr.bf16.mxu0 %v7879_v30 }
0x23a6   :  { %5991 = vmatpush1.bf16.msra.mxu0 %v7877_v5  ;;  %v7927_v5 = vld [vmem:[%s10456_s17 + $0x644] ss:$8 sps:$4 sm:$0xff]  }
0x23a7   :  { %5992 = vmatprep.subr.bf16.mxu0 %v7882_v31 }
0x23aa   :  { %5993 = vmatpush1.bf16.msra.mxu0 %v7880_v33  ;;  %v7925_v33 = vld [vmem:[%s10456_s17 + $0x640] ss:$8 sps:$4 sm:$0xff]  }
0x23ab   :  { %5994 = vmatprep.subr.bf16.mxu0 %v7885_v49 }
0x23ae   :  { %5995 = vmatpush1.bf16.msra.mxu0 %v7883_v45  ;;  %v7930_v45 = vld [vmem:[%s10456_s17 + $0x654] ss:$8 sps:$4 sm:$0xff]  }
0x23af   :  { %5996 = vmatprep.subr.bf16.mxu0 %v7888_v10 }
0x23b2   :  { %5997 = vmatpush1.bf16.msra.mxu0 %v7886_v8  ;;  %v7928_v8 = vld [vmem:[%s10456_s17 + $0x650] ss:$8 sps:$4 sm:$0xff]  }
0x23b3   :  { %5998 = vmatprep.subr.bf16.mxu0 %v7891_v56 }
0x23b6   :  { %5999 = vmatpush1.bf16.msra.mxu0 %v7889_v22  ;;  %v7933_v22 = vld [vmem:[%s10456_s17 + $0x664] ss:$8 sps:$4 sm:$0xff]  }
0x23b7   :  { %6000 = vmatprep.subr.bf16.mxu0 %v7894_v48  ;;  %v7931_v48 = vld [vmem:[%s10456_s17 + $0x660] ss:$8 sps:$4 sm:$0xff]  }
0x23ba   :  { %6001 = vmatpush1.bf16.msra.mxu0 %v7892_v9  ;;  %v7936_v9 = vld [vmem:[%s10456_s17 + $0x674] ss:$8 sps:$4 sm:$0xff]  }
0x23bb   :  { %6002 = vmatprep.subr.bf16.mxu0 %v7897_v19  ;;  %v7934_v19 = vld [vmem:[%s10456_s17 + $0x670] ss:$8 sps:$4 sm:$0xff]  }
0x23be   :  { %6003 = vmatpush1.bf16.msra.mxu0 %v7895_v62  ;;  %v7939_v62 = vld [vmem:[%s10456_s17 + $0x684] ss:$8 sps:$4 sm:$0xff]  }
0x23bf   :  { %v4872_v25 = vpop.xlane.xlu0 %4871  ;;  %6004 = vmatprep.subr.bf16.mxu0 %v7900_v40  ;;  %v7937_v40 = vld [vmem:[%s10456_s17 + $0x680] ss:$8 sps:$4 sm:$0xff]  }
0x23c0   :  { %v4876_v1 = vmul.f32 0.015625, %v4872_v25  ;;  %v7940_v25 = vld [vmem:[%s10456_s17 + $0x690] ss:$8 sps:$4 sm:$0xff]  }
0x23c2   :  { %v4880_v32 = vadd.f32 1e-06, %v4876_v1  ;;  %6005 = vmatpush1.bf16.msra.mxu0 %v7898_v7  ;;  %v7942_v7 = vld [vmem:[%s10456_s17 + $0x694] ss:$8 sps:$4 sm:$0xff]   ;;  %v7943_v1 = vld [vmem:[%s10456_s17 + $0x6a0] ss:$8 sps:$4 sm:$0xff]  }
0x23c3   :  { %v4866_v20 = vpop.xlane.xlu1 %4865  ;;  %6006 = vmatprep.subr.bf16.mxu0 %v7903_v29  ;;  %v7945_v29 = vld [vmem:[%s10456_s17 + $0x6a4] ss:$8 sps:$4 sm:$0xff]  }
0x23c4   :  { %8198 = vrsqrt.f32 %v4880_v32  ;;  %v4874_v61 = vmul.f32 0.015625, %v4866_v20  ;;  %v7948_v32 = vld [vmem:[%s10456_s17 + $0x6b4] ss:$8 sps:$4 sm:$0xff]   ;;  %v7951_v20 = vld [vmem:[%s10456_s17 + $0x6c4] ss:$8 sps:$4 sm:$0xff]  }
0x23c6   :  { %v4878_v54 = vadd.f32 1e-06, %v4874_v61  ;;  %6007 = vmatpush1.bf16.msra.mxu0 %v7901_v27  ;;  %v7946_v27 = vld [vmem:[%s10456_s17 + $0x6b0] ss:$8 sps:$4 sm:$0xff]   ;;  %v7954_v61 = vld [vmem:[%s10456_s17 + $0x6d4] ss:$8 sps:$4 sm:$0xff]  }
0x23c7   :  { %6008 = vmatprep.subr.bf16.mxu0 %v7906_v14  ;;  %v7949_v14 = vld [vmem:[%s10456_s17 + $0x6c0] ss:$8 sps:$4 sm:$0xff]  }
0x23c8   :  { %8200 = vrsqrt.f32 %v4878_v54  ;;  %v7952_v54 = vld [vmem:[%s10456_s17 + $0x6d0] ss:$8 sps:$4 sm:$0xff]  }
0x23ca   :  { %6009 = vmatpush1.bf16.msra.mxu0 %v7904_v44  ;;  %v7957_v44 = vld [vmem:[%s10456_s17 + $0x6e4] ss:$8 sps:$4 sm:$0xff]  }
0x23cb   :  { %6010 = vmatprep.subr.bf16.mxu0 %v7909_v58  ;;  %v7955_v58 = vld [vmem:[%s10456_s17 + $0x6e0] ss:$8 sps:$4 sm:$0xff]  }
0x23ce   :  { %v8199_v12 = vpop.eup %8198  ;;  %6011 = vmatpush1.bf16.msra.mxu0 %v7907_v18  ;;  %v7960_v18 = vld [vmem:[%s10456_s17 + $0x6f4] ss:$8 sps:$4 sm:$0xff]  }
0x23cf   :  { %v4888_v24 = vmul.f32 %v8199_v12, %v10026_v17  ;;  %6012 = vmatprep.subr.bf16.mxu0 %v7912_v37  ;;  %v7958_v37 = vld [vmem:[%s10456_s17 + $0x6f0] ss:$8 sps:$4 sm:$0xff]   ;;  %v7963_v12 = vld [vmem:[%s10456_s17 + $0x704] ss:$8 sps:$4 sm:$0xff]  }
0x23d1   :  { %v4898_v60 = vmul.f32 %v9959_v51, %v4888_v24  ;;  %v8011_v24 = vld [vmem:[%s10459_s19 + $0x80] sm:$0xff]  }
0x23d2   :  { %v8201_v3 = vpop.eup %8200  ;;  %6013 = vmatpush1.bf16.msra.mxu0 %v7910_v15  ;;  %v8010_v15 = vld [vmem:[%s10459_s19 + $0xc0] sm:$0xff]  }
0x23d3   :  { %v4886_v2 = vmul.f32 %v8201_v3, %v10029_v0  ;;  %v4908_v17 = vadd.f32 %v9965_v46, %v4898_v60  ;;  %6023 = vmatprep.subr.bf16.mxu0 %v7915_v55  ;;  %v7916_v0 = vld [vmem:[%s10456_s17 + $0x610] ss:$8 sps:$4 sm:$0xff]   ;;  %v8012_v55 = vld [vmem:[%s10459_s19 + $0xc8] sm:$0xff]   ;;  %7222 = vmatprep.subr.bf16.mxu1 %v8010_v15 }
0x23d4   :  { %7223 = vmatpush3.bf16.msra.mxu1 %v8011_v24  ;;  %v8013_v60 = vld [vmem:[%s10459_s19 + $0x88] sm:$0xff]   ;;  %v8014_v3 = vld [vmem:[%s10459_s19 + $0xd0] sm:$0xff]  }
0x23d5   :  { %v4896_v43 = vmul.f32 %v9959_v51, %v4886_v2  ;;  %6015 = vmatmul.mubr.bf16.vlgmr.msra.gmra.mrb[24].mxu0 %v5153_v42  ;;  %v5064_v59 = vrot.slane %v4908_v17, %v8971_v26  ;;  %5056 = vst.msk [vmem:[#allocation2 + $0x9] sm:$0x1] %vm1807_vm4, %v4908_v17  ;;  %v5080_v23 = vcombine.high %v4908_v17, %v4908_v17  ;;  %v7921_v51 = vld [vmem:[%s10456_s17 + $0x624] ss:$8 sps:$4 sm:$0xff]   ;;  %v8016_v2 = vld [vmem:[%s10459_s19 + $0xd8] sm:$0xff]   ;;  %v8022_v15 = vld [vmem:[%s10459_s19 + $0xf0] sm:$0xff]  }
0x23d6   :  { %6024 = vmatpush1.bf16.msra.mxu0 %v7913_v28  ;;  %7224 = vmatprep.subr.bf16.mxu1 %v8012_v55  ;;  %v8015_v28 = vld [vmem:[%s10459_s19 + $0x90] sm:$0xff]   ;;  %v8017_v42 = vld [vmem:[%s10459_s19 + $0x98] sm:$0xff]   ;;  %v8018_v17 = vld [vmem:[%s10459_s19 + $0xe0] sm:$0xff]  }
0x23d7   :  { %v6776_v36 = vrot.slane %v5064_v59, 9  ;;  %v4906_v63 = vadd.f32 %v9965_v46, %v4896_v43  ;;  %v5071_v21 = vcombine.high %v5064_v59, %v5064_v59  ;;  %v5087_v34 = vrot.slane %v5080_v23, %v8971_v26  ;;  %6025 = vmatprep.subr.bf16.mxu0 %v7918_v4  ;;  %v8019_v4 = vld [vmem:[%s10459_s19 + $0xa0] sm:$0xff]   ;;  %v8020_v43 = vld [vmem:[%s10459_s19 + $0xe8] sm:$0xff]   ;;  %v8023_v24 = vld [vmem:[%s10459_s19 + $0xb0] sm:$0xff]  }
0x23d8   :  { %7225 = vmatpush3.bf16.msra.mxu1 %v8013_v60  ;;  %v8021_v59 = vld [vmem:[%s10459_s19 + $0xa8] sm:$0xff]   ;;  %v8024_v55 = vld [vmem:[%s10459_s19 + $0xf8] sm:$0xff]  }
0x23d9   :  { %5067 = vrot.lane.b32.xlu1 %v6776_v36, %s8210_s29  ;;  %v4966_v39 = vrot.slane %v4906_v63, %v8971_v26  ;;  %4958 = vst.msk [vmem:[#allocation2 + $0x8] sm:$0x1] %vm1807_vm4, %v4906_v63  ;;  %5073 = vst.msk [vmem:[#allocation2 + $0xb] sm:$0x1] %vm1807_vm4, %v5071_v21  ;;  %v4982_v50 = vcombine.high %v4906_v63, %v4906_v63  ;;  %v5096_v46 = vcombine.high %v5087_v34, %v5087_v34  ;;  %v8025_v60 = vld [vmem:[%s10459_s19 + $0xb8] sm:$0xff]  }
0x23da   :  { %5089 = vst.msk [vmem:[#allocation2 + $0xd] sm:$0x1] %vm1807_vm4, %v5087_v34  ;;  %6026 = vmatpush1.bf16.msra.mxu0 %v7916_v0  ;;  %v6777_v30 = vrot.slane %v5071_v21, 9  ;;  %v6778_v10 = vrot.slane %v5087_v34, 9  ;;  %7226 = vmatprep.subr.bf16.mxu1 %v8014_v3  ;;  %v6908_v3 = vld [vmem:[%s10460_s18 + $0x2] sm:$0x3] }
0x23db   :  { %v6768_v16 = vrot.slane %v4966_v39, 9  ;;  %v4973_v41 = vcombine.high %v4966_v39, %v4966_v39  ;;  %v4989_v13 = vrot.slane %v4982_v50, %v8971_v26  ;;  %6027 = vmatprep.subr.bf16.mxu0 %v7921_v51  ;;  %5098 = vst.msk [vmem:[#allocation2 + $0xf] sm:$0x1] %vm1807_vm4, %v5096_v46  ;;  %v6779_v56 = vrot.slane %v5096_v46, 9 }
0x23dc   :  { %7227 = vmatpush3.bf16.msra.mxu1 %v8015_v28  ;;  %v5294_v28 = vrot.slane %v6908_v3, %v2191_v52 }
0x23dd   :  { %4969 = vrot.lane.b32.xlu0 %v6768_v16, %s8210_s29  ;;  %v6769_v53 = vrot.slane %v4973_v41, 9  ;;  %4975 = vst.msk [vmem:[#allocation2 + $0xa] sm:$0x1] %vm1807_vm4, %v4973_v41  ;;  %4991 = vst.msk [vmem:[#allocation2 + $0xc] sm:$0x1] %vm1807_vm4, %v4989_v13  ;;  %v4998_v47 = vcombine.high %v4989_v13, %v4989_v13  ;;  %v6770_v31 = vrot.slane %v4989_v13, 9  ;;  %7228 = vmatprep.subr.bf16.mxu1 %v8016_v2 }
0x23de   :  { %6028 = vmatpush1.bf16.msra.mxu0 %v7919_v6  ;;  %v5298_v2 = vrot.slane %v6908_v3, %v2195_v11 }
0x23df   :  { %4978 = vrot.lane.b32.xlu1 %v6769_v53, %s8210_s29  ;;  %5000 = vst.msk [vmem:[#allocation2 + $0xe] sm:$0x1] %vm1807_vm4, %v4998_v47  ;;  %6029 = vmatprep.subr.bf16.mxu0 %v7924_v57  ;;  %v6771_v49 = vrot.slane %v4998_v47, 9  ;;  %v7961_v57 = vld [vmem:[%s10456_s17 + $0x700] ss:$8 sps:$4 sm:$0xff]  }
0x23e0   :  { %7229 = vmatpush3.bf16.msra.mxu1 %v8017_v42 }
0x23e1   :  { %5076 = vrot.lane.b32.xlu0 %v6777_v30, %s8210_s29  ;;  %7230 = vmatprep.subr.bf16.mxu1 %v8018_v17 }
0x23e2   :  { %6030 = vmatpush1.bf16.msra.mxu0 %v7922_v35  ;;  %v7967_v35 = vld [vmem:[%s10456_s17 + $0x714] ss:$8 sps:$4 sm:$0xff]  }
0x23e3   :  { %4994 = vrot.lane.b32.xlu1 %v6770_v31, %s8210_s29  ;;  %6031 = vmatprep.subr.bf16.mxu0 %v7927_v5  ;;  %v7970_v5 = vld [vmem:[%s10456_s17 + $0x724] ss:$8 sps:$4 sm:$0xff]   ;;  %v7968_v31 = vld [vmem:[%s10456_s17 + $0x720] ss:$8 sps:$4 sm:$0xff]  }
0x23e4   :  { %7231 = vmatpush3.bf16.msra.mxu1 %v8019_v4 }
0x23e5   :  { %5003 = vrot.lane.b32.xlu0 %v6771_v49, %s8210_s29  ;;  %7232 = vmatprep.subr.bf16.mxu1 %v8020_v43  ;;  %v7971_v49 = vld [vmem:[%s10456_s17 + $0x730] ss:$8 sps:$4 sm:$0xff]  }
0x23e6   :  { %6032 = vmatpush1.bf16.msra.mxu0 %v7925_v33  ;;  %v7973_v33 = vld [vmem:[%s10456_s17 + $0x734] ss:$8 sps:$4 sm:$0xff]  }
0x23e7   :  { %5092 = vrot.lane.b32.xlu1 %v6778_v10, %s8210_s29  ;;  %6033 = vmatprep.subr.bf16.mxu0 %v7930_v45  ;;  %v7976_v45 = vld [vmem:[%s10456_s17 + $0x744] ss:$8 sps:$4 sm:$0xff]   ;;  %v7974_v10 = vld [vmem:[%s10456_s17 + $0x740] ss:$8 sps:$4 sm:$0xff]  }
0x23e8   :  { %7233 = vmatpush3.bf16.msra.mxu1 %v8021_v59 }
0x23e9   :  { %5101 = vrot.lane.b32.xlu0 %v6779_v56, %s8210_s29  ;;  %v7977_v56 = vld [vmem:[%s10456_s17 + $0x750] ss:$8 sps:$4 sm:$0xff]   ;;  %7234 = vmatprep.subr.bf16.mxu1 %v8022_v15 }
0x23ea   :  { %6034 = vmatpush1.bf16.msra.mxu0 %v7928_v8  ;;  %v7979_v8 = vld [vmem:[%s10456_s17 + $0x754] ss:$8 sps:$4 sm:$0xff]  }
0x23eb   :  { %6035 = vmatprep.subr.bf16.mxu0 %v7933_v22  ;;  %v7982_v22 = vld [vmem:[%s10456_s17 + $0x764] ss:$8 sps:$4 sm:$0xff]  }
0x23ec   :  { %7235 = vmatpush3.bf16.msra.mxu1 %v8023_v24 }
0x23ed   :  { %7236 = vmatprep.subr.bf16.mxu1 %v8024_v55 }
0x23ee   :  { %6036 = vmatpush1.bf16.msra.mxu0 %v7931_v48  ;;  %v7980_v48 = vld [vmem:[%s10456_s17 + $0x760] ss:$8 sps:$4 sm:$0xff]  }
0x23ef   :  { %6037 = vmatprep.subr.bf16.mxu0 %v7936_v9  ;;  %v7985_v9 = vld [vmem:[%s10456_s17 + $0x774] ss:$8 sps:$4 sm:$0xff]  }
0x23f0   :  { %7237 = vmatpush3.bf16.msra.mxu1 %v8025_v60 }
0x23f2   :  { %6038 = vmatpush1.bf16.msra.mxu0 %v7934_v19  ;;  %v7983_v19 = vld [vmem:[%s10456_s17 + $0x770] ss:$8 sps:$4 sm:$0xff]  }
0x23f3   :  { %6039 = vmatprep.subr.bf16.mxu0 %v7939_v62  ;;  %v7988_v62 = vld [vmem:[%s10456_s17 + $0x784] ss:$8 sps:$4 sm:$0xff]  }
0x23f6   :  { %6040 = vmatpush1.bf16.msra.mxu0 %v7937_v40  ;;  %v7986_v40 = vld [vmem:[%s10456_s17 + $0x780] ss:$8 sps:$4 sm:$0xff]  }
0x23f7   :  { %6041 = vmatprep.subr.bf16.mxu0 %v7942_v7  ;;  %v7991_v7 = vld [vmem:[%s10456_s17 + $0x794] ss:$8 sps:$4 sm:$0xff]  }
0x23fa   :  { %6042 = vmatpush1.bf16.msra.mxu0 %v7940_v25  ;;  %v7989_v25 = vld [vmem:[%s10456_s17 + $0x790] ss:$8 sps:$4 sm:$0xff]  }
0x23fb   :  { %6043 = vmatprep.subr.bf16.mxu0 %v7945_v29  ;;  %v7994_v29 = vld [vmem:[%s10456_s17 + $0x7a4] ss:$8 sps:$4 sm:$0xff]  }
0x23fe   :  { %6044 = vmatpush1.bf16.msra.mxu0 %v7943_v1  ;;  %v7992_v1 = vld [vmem:[%s10456_s17 + $0x7a0] ss:$8 sps:$4 sm:$0xff]  }
0x23ff   :  { %6045 = vmatprep.subr.bf16.mxu0 %v7948_v32  ;;  %v7997_v32 = vld [vmem:[%s10456_s17 + $0x7b4] ss:$8 sps:$4 sm:$0xff]  }
0x2402   :  { %6046 = vmatpush1.bf16.msra.mxu0 %v7946_v27  ;;  %v7995_v27 = vld [vmem:[%s10456_s17 + $0x7b0] ss:$8 sps:$4 sm:$0xff]  }
0x2403   :  { %6047 = vmatprep.subr.bf16.mxu0 %v7951_v20  ;;  %v8000_v20 = vld [vmem:[%s10456_s17 + $0x7c4] ss:$8 sps:$4 sm:$0xff]  }
0x2406   :  { %6048 = vmatpush1.bf16.msra.mxu0 %v7949_v14  ;;  %v7998_v14 = vld [vmem:[%s10456_s17 + $0x7c0] ss:$8 sps:$4 sm:$0xff]  }
0x2407   :  { %6049 = vmatprep.subr.bf16.mxu0 %v7954_v61  ;;  %v8003_v61 = vld [vmem:[%s10456_s17 + $0x7d4] ss:$8 sps:$4 sm:$0xff]  }
0x240a   :  { %6050 = vmatpush1.bf16.msra.mxu0 %v7952_v54  ;;  %v8001_v54 = vld [vmem:[%s10456_s17 + $0x7d0] ss:$8 sps:$4 sm:$0xff]  }
0x240b   :  { %6051 = vmatprep.subr.bf16.mxu0 %v7957_v44  ;;  %v8006_v44 = vld [vmem:[%s10456_s17 + $0x7e4] ss:$8 sps:$4 sm:$0xff]  }
0x240e   :  { %6052 = vmatpush1.bf16.msra.mxu0 %v7955_v58  ;;  %v8004_v58 = vld [vmem:[%s10456_s17 + $0x7e0] ss:$8 sps:$4 sm:$0xff]  }
0x240f   :  { %6053 = vmatprep.subr.bf16.mxu0 %v7960_v18  ;;  %v8009_v18 = vld [vmem:[%s10456_s17 + $0x7f4] ss:$8 sps:$4 sm:$0xff]  }
0x2412   :  { %6054 = vmatpush1.bf16.msra.mxu0 %v7958_v37  ;;  %v8007_v37 = vld [vmem:[%s10456_s17 + $0x7f0] ss:$8 sps:$4 sm:$0xff]  }
0x2413   :  { %6064 = vmatprep.subr.bf16.mxu0 %v7963_v12 }
0x244b   :  { %v5068_v23 = vpop.permute.xlu1 %5067 }
0x244c   :  { %5070 = vst.msk [vmem:[#allocation2 + $0x9] sm:$0x1] %vm1822_vm5, %v5068_v23 }
0x244f   :  { %v4970_v0 = vpop.permute.xlu0 %4969 }
0x2450   :  { %4972 = vst.msk [vmem:[#allocation2 + $0x8] sm:$0x1] %vm1822_vm5, %v4970_v0 }
0x2451   :  { %v4979_v36 = vpop.permute.xlu1 %4978 }
0x2452   :  { %4981 = vst.msk [vmem:[#allocation2 + $0xa] sm:$0x1] %vm1822_vm5, %v4979_v36 }
0x2453   :  { %v5077_v63 = vpop.permute.xlu0 %5076 }
0x2454   :  { %5079 = vst.msk [vmem:[#allocation2 + $0xb] sm:$0x1] %vm1822_vm5, %v5077_v63 }
0x2455   :  { %v4995_v21 = vpop.permute.xlu1 %4994 }
0x2456   :  { %4997 = vst.msk [vmem:[#allocation2 + $0xc] sm:$0x1] %vm1822_vm5, %v4995_v21 }
0x2457   :  { %v5004_v34 = vpop.permute.xlu0 %5003 }
0x2458   :  { %5006 = vst.msk [vmem:[#allocation2 + $0xe] sm:$0x1] %vm1822_vm5, %v5004_v34 }
0x2459   :  { %v5093_v51 = vpop.permute.xlu1 %5092 }
0x245a   :  { %5095 = vst.msk [vmem:[#allocation2 + $0xd] sm:$0x1] %vm1822_vm5, %v5093_v51 }
0x245b   :  { %v5102_v39 = vpop.permute.xlu0 %5101 }
0x245c   :  { %5104 = vst.msk [vmem:[#allocation2 + $0xf] sm:$0x1] %vm1822_vm5, %v5102_v39 }
0x2463   :  { %v5106_v50 = vld [vmem:[#allocation2 + $0x8] sm:$0xff] }
0x2464   :  { %v5133_v46 = vrot.slane %v5106_v50, %v8971_v26  ;;  %v5126_v6 = vcombine.high %v5106_v50, %v5106_v50 }
0x2466   :  { %v5141_v16 = vcombine.high %v5133_v46, %v5133_v46  ;;  %v10317_v41 = vrot.slane %v5126_v6, %v8971_v26  ;;  %v5155_v47 = vpack.c.bf16 %v5133_v46, %v5133_v46  ;;  %v7965_v26 = vld [vmem:[%s10456_s17 + $0x710] ss:$8 sps:$4 sm:$0xff]  }
0x2468   :  { %v5156_v13 = vpack.c.bf16 %v5141_v16, %v5141_v16  ;;  %v5142_v53 = vcombine.high %v10317_v41, %v10317_v41  ;;  %v5157_v12 = vpack.c.bf16 %v10317_v41, %v10317_v41 }
0x246a   :  { %6055 = vmatprep.mubr.bf16.mxu0 %v5156_v13  ;;  %v5158_v30 = vpack.c.bf16 %v5142_v53, %v5142_v53 }
0x246b   :  { %6056 = vmatmul.mubr.bf16.vlgmr.msra.gmra.mrb[24].mxu0 %v5155_v47 }
0x246c   :  { %6065 = vmatpush1.bf16.msra.mxu0 %v7961_v57  ;;  %6096 = vmatprep.mubr.bf16.mxu0 %v5158_v30 }
0x246d   :  { %6066 = vmatprep.subr.bf16.mxu0 %v7967_v35 }
0x2470   :  { %6067 = vmatpush1.bf16.msra.mxu0 %v7965_v26 }
0x2471   :  { %6068 = vmatprep.subr.bf16.mxu0 %v7970_v5 }
0x2474   :  { %6069 = vmatpush1.bf16.msra.mxu0 %v7968_v31 }
0x2475   :  { %6070 = vmatprep.subr.bf16.mxu0 %v7973_v33 }
0x2478   :  { %6071 = vmatpush1.bf16.msra.mxu0 %v7971_v49 }
0x2479   :  { %6072 = vmatprep.subr.bf16.mxu0 %v7976_v45 }
0x247c   :  { %6073 = vmatpush1.bf16.msra.mxu0 %v7974_v10 }
0x247d   :  { %6074 = vmatprep.subr.bf16.mxu0 %v7979_v8 }
0x2480   :  { %6075 = vmatpush1.bf16.msra.mxu0 %v7977_v56 }
0x2481   :  { %6076 = vmatprep.subr.bf16.mxu0 %v7982_v22 }
0x2484   :  { %6077 = vmatpush1.bf16.msra.mxu0 %v7980_v48 }
0x2485   :  { %6078 = vmatprep.subr.bf16.mxu0 %v7985_v9 }
0x2488   :  { %6079 = vmatpush1.bf16.msra.mxu0 %v7983_v19 }
0x2489   :  { %6080 = vmatprep.subr.bf16.mxu0 %v7988_v62 }
0x248c   :  { %6081 = vmatpush1.bf16.msra.mxu0 %v7986_v40 }
0x248d   :  { %6082 = vmatprep.subr.bf16.mxu0 %v7991_v7 }
0x2490   :  { %6083 = vmatpush1.bf16.msra.mxu0 %v7989_v25 }
0x2491   :  { %6084 = vmatprep.subr.bf16.mxu0 %v7994_v29 }
0x2494   :  { %6085 = vmatpush1.bf16.msra.mxu0 %v7992_v1 }
0x2495   :  { %6086 = vmatprep.subr.bf16.mxu0 %v7997_v32 }
0x2498   :  { %6087 = vmatpush1.bf16.msra.mxu0 %v7995_v27 }
0x2499   :  { %6088 = vmatprep.subr.bf16.mxu0 %v8000_v20 }
0x249c   :  { %6089 = vmatpush1.bf16.msra.mxu0 %v7998_v14 }
0x249d   :  { %6090 = vmatprep.subr.bf16.mxu0 %v8003_v61 }
0x24a0   :  { %6091 = vmatpush1.bf16.msra.mxu0 %v8001_v54 }
0x24a1   :  { %6092 = vmatprep.subr.bf16.mxu0 %v8006_v44 }
0x24a4   :  { %6093 = vmatpush1.bf16.msra.mxu0 %v8004_v58 }
0x24a5   :  { %6094 = vmatprep.subr.bf16.mxu0 %v8009_v18 }
0x24a8   :  { %6095 = vmatpush1.bf16.msra.mxu0 %v8007_v37 }
0x24ab   :  { %6097 = vmatmul.mubr.bf16.vlgmr.msra.gmra.mrb[24].mxu0 %v5157_v12 }
0x257e   :  { %v6098_v42 = vpop.f32.mrb[24].mxu0 }
0x257f   :  { %v7488_v17 = vadd.f32 %v6098_v42, %v5294_v28  ;;  %v6100_v4 = vpop.f32.mrb[25].mxu0 }
0x2580   :  { %v7489_v43 = vadd.f32 %v6100_v4, %v5298_v2  ;;  %v6102_v59 = vpop.f32.mrb[26].mxu0 }
0x2581   :  { %vm6105_vm8 = vcmp.ge.f32.partialorder %v7488_v17, 0.0  ;;  %v6107_v23 = vmul.f32 0.1, %v7488_v17  ;;  %v6103_v0 = vpop.f32.mrb[27].mxu0 }
0x2582   :  { %vm6106_vm9 = vcmp.ge.f32.partialorder %v7489_v43, 0.0  ;;  %v6108_v36 = vmul.f32 0.1, %v7489_v43 }
0x2583   :  { %v6109_v63 = vsel %vm6105_vm8, %v7488_v17, %v6107_v23 }
0x2584   :  { %v6110_v21 = vsel %vm6106_vm9, %v7489_v43, %v6108_v36  ;;  %v6111_v51 = vpack.c.bf16 %v6109_v63, %v6109_v63 }
0x2585   :  { %v6112_v34 = vpack.c.bf16 %v6110_v21, %v6110_v21 }
0x2587   :  { %6282 = vmatprep.mubr.bf16.mxu1 %v6112_v34 }
0x2588   :  { %6283 = vmatmul.mubr.bf16.vlgmr.msra.gmra.mrb[100].mxu1 %v6111_v51 }
0x265b   :  { %v7238_v52 = vpop.f32.mrb[100].mxu1 }
0x265c   :  { %v7239_v11 = vpop.f32.mrb[101].mxu1 }
0x265d   :  { %v7240_v39 = vadd.f32 %v7239_v11, %v7238_v52  ;;  %v7241_v50 = vpop.f32.mrb[102].mxu1 }
0x265e   :  { %v7242_v46 = vpop.f32.mrb[103].mxu1 }
0x265f   :  { %v6285_v6 = vadd.f32 %v7240_v39, %v7070_v38 }
0x2661   :  { %7087 = vst [vmem:[%s10462_s21 + $0x2] sm:$0x3] %v6285_v6 }

</bundles_post_ra>
